<compile_context>
chip_gen: v6e
topology: v6e:2x2x1
jax: 0.10.0
libtpu: 0.0.40
codegen_flags: <defaults>
</compile_context>

<pallas_src>
import math
import functools

import jax
import jax.numpy as jnp
from jax import lax
from jax.experimental import pallas as pl
from jax.experimental.pallas import tpu as pltpu

# ---- module hyper-parameters (defaults of MambaBlock) ----
D_MODEL = 32
EXPAND = 2
D_INNER = D_MODEL * EXPAND                 # 64
D_CONV = 16
D_STATE = 32
DT_RANK = max(1, math.ceil(D_MODEL / 16))  # 'auto' -> 2
DT_MIN, DT_MAX, DT_INIT_FLOOR = 0.001, 0.1, 1e-4

BATCH = 32
SEQ = 8


# ----------------------------- Pallas kernel -----------------------------
def mamba_block_kernel(x_ref, win_ref, convw_ref, wxp_ref, vecs_ref, at2_ref,
                       wout_ref, out_ref, dscr, duscr, bscr, cscr, yscr,
                       *, b_tile, seq):
    L = seq
    M = b_tile * L
    n_pairs = b_tile // 2
    DI2 = 2 * D_INNER

    vecs = vecs_ref[...]                       # (4, d_inner): [conv_b, dt_bias, D, 0]
    conv_b = vecs[0:1, :]
    dt_b = vecs[1:2, :]
    d_skip = vecs[2:3, :]

    # ---- fused in_proj (no bias): one (M, d_model) x (d_model, 2*d_inner) matmul ----
    x = x_ref[...]                                                     # (M, d_model)
    xz = jnp.dot(x, win_ref[...], preferred_element_type=jnp.float32)  # (M, 128)
    xf = xz[:, :D_INNER]                                               # (M, d_inner)
    z = xz[:, D_INNER:]                                                # (M, d_inner)

    # ---- causal depthwise conv1d (left pad, first L outputs), in-register ----
    # Pad L zero rows (sublane aligned) instead of d_conv-1; only the last
    # min(d_conv, L) taps can ever touch real data.
    xf3 = xf.reshape(b_tile, L, D_INNER)
    convw = convw_ref[...]                                             # (d_conv, d_inner)
    xpad = jnp.concatenate(
        [jnp.zeros((b_tile, L, D_INNER), jnp.float32), xf3], axis=1)   # (bt, 2L, d_inner)
    conv = jnp.broadcast_to(conv_b[None], (b_tile, L, D_INNER))
    n_taps = min(D_CONV, L)
    for s in range(n_taps):                    # s = steps into the past
        k = D_CONV - 1 - s
        wk = convw[k:k + 1, :]                                         # (1, d_inner)
        conv = conv + xpad[:, L - s:2 * L - s, :] * wk
    xc = (conv * jax.nn.sigmoid(conv)).reshape(M, D_INNER)             # SiLU; dropout = id

    # ---- fused x_proj with dt_proj folded in: [W_delta_eff | B | C] ----
    dbc = jnp.dot(xc, wxp_ref[...], preferred_element_type=jnp.float32)  # (M, 128)
    delta = jax.nn.softplus(dbc[:, :D_INNER] + dt_b)                     # (M, d_inner)
    Bm = dbc[:, D_INNER:D_INNER + D_STATE]                               # (M, d_state)
    Cm = dbc[:, D_INNER + D_STATE:]                                      # (M, d_state)
    du = delta * xc

    # ---- pack pairs of batch rows onto the lane axis (64 -> 128 lanes) ----
    delta4 = delta.reshape(n_pairs, 2, L, D_INNER)
    du4 = du.reshape(n_pairs, 2, L, D_INNER)
    dscr[...] = jnp.concatenate([delta4[:, 0], delta4[:, 1]], axis=-1)   # (np, L, 128)
    duscr[...] = jnp.concatenate([du4[:, 0], du4[:, 1]], axis=-1)        # (np, L, 128)
    bscr[...] = Bm.reshape(n_pairs, 2 * L, D_STATE)                      # (np, 2L, 32)
    cscr[...] = Cm.reshape(n_pairs, 2 * L, D_STATE)                      # (np, 2L, 32)

    a2 = at2_ref[...]                                                    # (d_state, 128)
    half_mask = lax.broadcasted_iota(jnp.int32, (1, DI2), 1) < D_INNER   # even-row lanes

    # ---- selective scan: pl.loop over pairs bounds the live working set ----
    @pl.loop(0, n_pairs)
    def _pair(p):
        d_chunk = dscr[p]               # (L, 128)
        u_chunk = duscr[p]              # (L, 128)
        b_chunk = bscr[p]               # (2L, 32): rows [0:L] even batch, [L:2L] odd
        c_chunk = cscr[p]               # (2L, 32)
        b_cols = b_chunk[:, :, None]    # (2L, 32, 1): one small relayout per pair

        h = jnp.zeros((D_STATE, DI2), jnp.float32)
        ys = []
        for t in range(L):              # t-loop fully unrolled (static)
            d_row = d_chunk[t:t + 1, :]                                  # (1, 128)
            u_row = u_chunk[t:t + 1, :]                                  # (1, 128)
            dA = jnp.exp(d_row * a2)                                     # (32, 128)
            b_bc = jnp.where(half_mask,
                             jnp.broadcast_to(b_cols[t], (D_STATE, DI2)),
                             jnp.broadcast_to(b_cols[L + t], (D_STATE, DI2)))
            h = dA * h + u_row * b_bc
            c_pair = jnp.concatenate(
                [c_chunk[t:t + 1, :], c_chunk[L + t:L + t + 1, :]], axis=0)   # (2, 32)
            y_both = jnp.dot(c_pair, h, preferred_element_type=jnp.float32)   # (2, 128)
            ys.append(jnp.where(half_mask, y_both[0:1, :], y_both[1:2, :]))   # (1, 128)
        yscr[p] = jnp.concatenate(ys, axis=0)                            # (L, 128)

    # ---- un-pair, skip connection, gate with SiLU(z), out_proj ----
    yv = yscr[...]                                                       # (np, L, 128)
    y = jnp.stack([yv[:, :, :D_INNER], yv[:, :, D_INNER:]], axis=1)      # (np, 2, L, 64)
    y = y.reshape(M, D_INNER)
    y = y + d_skip * xc
    zact = z * jax.nn.sigmoid(z)
    out = jnp.dot(y * zact, wout_ref[...], preferred_element_type=jnp.float32)
    out_ref[...] = out.astype(out_ref.dtype)


# ----------------------------- wrapper -----------------------------
def _pick_b_tile(batch):
    """Single-TC chips (v5e/v6e): one grid step. Dual-TC (v7x): keep 2 parallel steps."""
    try:
        kind = jax.devices()[0].device_kind.lower()
    except Exception:
        kind = ""
    if ("v7" in kind or "tpu7" in kind) and batch % 2 == 0 and (batch // 2) % 2 == 0:
        return batch // 2
    return batch


def mamba_block_forward(x, kp, *, b_tile=None):
    B, L, d_model = x.shape
    assert d_model == D_MODEL
    if b_tile is None:
        b_tile = _pick_b_tile(B)
    assert B % b_tile == 0, "batch must be divisible by the batch tile"
    assert b_tile % 2 == 0, "batch tile must be even (lane pairing)"
    M = b_tile * L
    assert M % 8 == 0
    n_pairs = b_tile // 2
    x2 = x.reshape(B * L, D_MODEL)

    def wspec(shape):
        zeros = (0,) * len(shape)
        return pl.BlockSpec(shape, lambda i: zeros)

    kernel = functools.partial(mamba_block_kernel, b_tile=b_tile, seq=L)

    out2 = pl.pallas_call(
        kernel,
        out_shape=jax.ShapeDtypeStruct((B * L, D_MODEL), jnp.float32),
        grid_spec=pltpu.PrefetchScalarGridSpec(
            num_scalar_prefetch=0,
            grid=(B // b_tile,),
            in_specs=[
                pl.BlockSpec((M, D_MODEL), lambda i: (i, 0)),   # x, batch-tiled rows
                wspec((D_MODEL, 2 * D_INNER)),                  # in_proj packed (x | z)
                wspec((D_CONV, D_INNER)),                       # conv weight (K, d_inner)
                wspec((D_INNER, D_INNER + 2 * D_STATE)),        # x_proj packed (dt-fold|B|C)
                wspec((4, D_INNER)),                            # [conv_b, dt_bias, D, 0]
                wspec((D_STATE, 2 * D_INNER)),                  # (-exp(A_log)).T tiled x2
                wspec((D_INNER, D_MODEL)),                      # out_proj weight
            ],
            out_specs=pl.BlockSpec((M, D_MODEL), lambda i: (i, 0)),
            scratch_shapes=[
                pltpu.VMEM((n_pairs, L, 2 * D_INNER), jnp.float32),   # paired delta
                pltpu.VMEM((n_pairs, L, 2 * D_INNER), jnp.float32),   # paired delta*x
                pltpu.VMEM((n_pairs, 2 * L, D_STATE), jnp.float32),   # B per pair
                pltpu.VMEM((n_pairs, 2 * L, D_STATE), jnp.float32),   # C per pair
                pltpu.VMEM((n_pairs, L, 2 * D_INNER), jnp.float32),   # scan output y
            ],
        ),
        compiler_params=pltpu.CompilerParams(
            dimension_semantics=("parallel",)),
    )(x2, kp["win"], kp["convw"], kp["wxp"], kp["vecs"], kp["at2"], kp["wout"])
    return out2.reshape(B, L, D_MODEL)


# ----------------------------- deterministic param init -----------------------------
def init_params(key):
    ks = jax.random.split(key, 8)

    def unif(k, shape, bound):
        return jax.random.uniform(k, shape, jnp.float32, -bound, bound)

    w_in = unif(ks[0], (2 * D_INNER, D_MODEL), 1.0 / math.sqrt(D_MODEL))      # in_proj_fwd
    conv_w = unif(ks[1], (D_INNER, 1, D_CONV), 1.0 / math.sqrt(D_CONV))       # conv1d_fwd.w
    conv_b = unif(ks[2], (D_INNER,), 1.0 / math.sqrt(D_CONV))                 # conv1d_fwd.b
    w_xproj = unif(ks[3], (DT_RANK + 2 * D_STATE, D_INNER), 1.0 / math.sqrt(D_INNER))
    dt_init_std = DT_RANK ** (-0.5)                                           # dt_scale = 1
    w_dt = unif(ks[4], (D_INNER, DT_RANK), dt_init_std)                       # dt_proj_fwd.w
    u = jax.random.uniform(ks[5], (D_INNER,), jnp.float32)
    dt = jnp.exp(u * (math.log(DT_MAX) - math.log(DT_MIN)) + math.log(DT_MIN))
    dt = jnp.maximum(dt, DT_INIT_FLOOR)
    b_dt = dt + jnp.log(-jnp.expm1(-dt))                                      # dt_proj_fwd.b
    A_log = jnp.log(jnp.tile(jnp.arange(1, D_STATE + 1, dtype=jnp.float32), (D_INNER, 1)))
    D_param = jnp.ones((D_INNER,), jnp.float32)
    w_out = unif(ks[6], (D_MODEL, D_INNER), 1.0 / math.sqrt(D_INNER))         # out_proj

    torch_like = dict(w_in=w_in, conv_w=conv_w, conv_b=conv_b, w_xproj=w_xproj,
                      w_dt=w_dt, b_dt=b_dt, A_log=A_log, D=D_param, w_out=w_out)

    # ---- packed / pre-transposed kernel params ----
    # dt_proj folded into x_proj: delta_pre = xc @ (w_dt @ w_xproj_delta).T
    w_delta_eff = (w_dt @ w_xproj[:DT_RANK, :]).T                      # (d_inner, d_inner)
    wxp = jnp.concatenate(
        [w_delta_eff,
         w_xproj[DT_RANK:DT_RANK + D_STATE, :].T,
         w_xproj[DT_RANK + D_STATE:, :].T], axis=1)                    # (d_inner, 128)

    at = (-jnp.exp(A_log)).T                                           # (d_state, d_inner)
    vecs = jnp.concatenate(
        [conv_b[None, :], b_dt[None, :], D_param[None, :],
         jnp.zeros((1, D_INNER), jnp.float32)], axis=0)                # (4, d_inner)

    kernel_params = dict(
        win=w_in.T,                            # (d_model, 2*d_inner), cols = [x | z]
        convw=conv_w[:, 0, :].T,               # (d_conv, d_inner)
        wxp=wxp,                               # (d_inner, 128)
        vecs=vecs,                             # packed row-vector params
        at2=jnp.concatenate([at, at], axis=1),  # (d_state, 128), tiled for lane pairing
        wout=w_out.T,                          # (d_inner, d_model)
    )
    return torch_like, kernel_params


# ----------------------------- pure-JAX reference -----------------------------
def reference_forward(x, p):
    B, L, _ = x.shape
    xz = x @ p["w_in"].T
    xf, z = xz[..., :D_INNER], xz[..., D_INNER:]
    xpad = jnp.pad(xf, ((0, 0), (D_CONV - 1, 0), (0, 0)))
    conv = jnp.zeros_like(xf)
    for k in range(D_CONV):
        conv = conv + xpad[:, k:k + L, :] * p["conv_w"][:, 0, k][None, None, :]
    conv = conv + p["conv_b"][None, None, :]
    xc = jax.nn.silu(conv)
    dbc = xc @ p["w_xproj"].T
    dlow = dbc[..., :DT_RANK]
    Bm = dbc[..., DT_RANK:DT_RANK + D_STATE]
    Cm = dbc[..., DT_RANK + D_STATE:]
    delta = jax.nn.softplus(dlow @ p["w_dt"].T + p["b_dt"])
    A = -jnp.exp(p["A_log"])
    dA = jnp.exp(delta[..., None] * A)
    bx = (delta * xc)[..., None] * Bm[:, :, None, :]
    h = jnp.zeros((B, D_INNER, D_STATE), jnp.float32)
    ys = []
    for t in range(L):
        h = dA[:, t] * h + bx[:, t]
        ys.append(jnp.einsum("bdn,bn->bd", h, Cm[:, t]))
    y = jnp.stack(ys, axis=1)
    y = y + p["D"] * xc
    return (y * jax.nn.silu(z)) @ p["w_out"].T


# ----------------------------- main -----------------------------
if __name__ == "__main__":
    key = jax.random.PRNGKey(0)
    k_x, k_p = jax.random.split(key)
    x = jax.random.normal(k_x, (BATCH, SEQ, D_MODEL), jnp.float32)

    torch_like, kernel_params = init_params(k_p)

    out = jax.block_until_ready(mamba_block_forward(x, kernel_params))
    ref = jax.block_until_ready(reference_forward(x, torch_like))

    assert out.shape == (BATCH, SEQ, D_MODEL)
    err = jnp.max(jnp.abs(out - ref))
    assert jnp.allclose(out, ref, rtol=1e-3, atol=1e-3), f"max abs err {err}"
    print("KERNEL_OK")
</pallas_src>

<mosaic_0001>
module attributes {stable_mosaic.version = 11 : i64} {
  func.func @mamba_block_kernel(%arg0: i32, %arg1: memref<256x32xf32, #tpu.memory_space<vmem>>, %arg2: memref<32x128xf32, #tpu.memory_space<vmem>>, %arg3: memref<16x64xf32, #tpu.memory_space<vmem>>, %arg4: memref<64x128xf32, #tpu.memory_space<vmem>>, %arg5: memref<4x64xf32, #tpu.memory_space<vmem>>, %arg6: memref<32x128xf32, #tpu.memory_space<vmem>>, %arg7: memref<64x32xf32, #tpu.memory_space<vmem>>, %arg8: memref<256x32xf32, #tpu.memory_space<vmem>>, %arg9: memref<16x8x128xf32, #tpu.memory_space<vmem>>, %arg10: memref<16x8x128xf32, #tpu.memory_space<vmem>>, %arg11: memref<16x16x32xf32, #tpu.memory_space<vmem>>, %arg12: memref<16x16x32xf32, #tpu.memory_space<vmem>>, %arg13: memref<16x8x128xf32, #tpu.memory_space<vmem>>) attributes {dimension_semantics = [#tpu.dimension_semantics<parallel>], iteration_bounds = array<i64: 1>, scalar_prefetch = 0 : i64, scratch_operands = 5 : i64, tpu.core_type = #tpu.core_type<tc>, window_params = [{transform_indices = @transform_0, window_bounds = array<i64: 256, 32>}, {pipeline_mode = #tpu.pipeline_mode<synchronous>, transform_indices = @transform_1, window_bounds = array<i64: 32, 128>}, {pipeline_mode = #tpu.pipeline_mode<synchronous>, transform_indices = @transform_2, window_bounds = array<i64: 16, 64>}, {pipeline_mode = #tpu.pipeline_mode<synchronous>, transform_indices = @transform_3, window_bounds = array<i64: 64, 128>}, {pipeline_mode = #tpu.pipeline_mode<synchronous>, transform_indices = @transform_4, window_bounds = array<i64: 4, 64>}, {pipeline_mode = #tpu.pipeline_mode<synchronous>, transform_indices = @transform_5, window_bounds = array<i64: 32, 128>}, {pipeline_mode = #tpu.pipeline_mode<synchronous>, transform_indices = @transform_6, window_bounds = array<i64: 64, 32>}, {transform_indices = @transform_7, window_bounds = array<i64: 256, 32>}]} {
    %c0 = arith.constant 0 : index
    %c0_0 = arith.constant 0 : index
    %0 = vector.load %arg5[%c0, %c0_0] : memref<4x64xf32, #tpu.memory_space<vmem>>, vector<4x64xf32>
    %1 = vector.extract_strided_slice %0 {offsets = [0, 0], sizes = [1, 64], strides = [1, 1]} : vector<4x64xf32> to vector<1x64xf32>
    %2 = vector.extract_strided_slice %0 {offsets = [1, 0], sizes = [1, 64], strides = [1, 1]} : vector<4x64xf32> to vector<1x64xf32>
    %3 = vector.extract_strided_slice %0 {offsets = [2, 0], sizes = [1, 64], strides = [1, 1]} : vector<4x64xf32> to vector<1x64xf32>
    %c0_1 = arith.constant 0 : index
    %c0_2 = arith.constant 0 : index
    %4 = vector.load %arg1[%c0_1, %c0_2] : memref<256x32xf32, #tpu.memory_space<vmem>>, vector<256x32xf32>
    %c0_3 = arith.constant 0 : index
    %c0_4 = arith.constant 0 : index
    %5 = vector.load %arg2[%c0_3, %c0_4] : memref<32x128xf32, #tpu.memory_space<vmem>>, vector<32x128xf32>
    %cst = arith.constant dense<0.000000e+00> : vector<256x128xf32>
    %6 = tpu.matmul %4, %5, %cst {dimension_numbers = #tpu.dot_dimension_numbers<[1], [0], [0], [1], [0, 0, 1, 1], [], []>} : vector<256x32xf32>, vector<32x128xf32>, vector<256x128xf32> -> vector<256x128xf32>
    %7 = vector.extract_strided_slice %6 {offsets = [0, 0], sizes = [256, 64], strides = [1, 1]} : vector<256x128xf32> to vector<256x64xf32>
    %8 = vector.extract_strided_slice %6 {offsets = [0, 64], sizes = [256, 64], strides = [1, 1]} : vector<256x128xf32> to vector<256x64xf32>
    %9 = vector.shape_cast %7 : vector<256x64xf32> to vector<32x8x64xf32>
    %c0_5 = arith.constant 0 : index
    %c0_6 = arith.constant 0 : index
    %10 = vector.load %arg3[%c0_5, %c0_6] : memref<16x64xf32, #tpu.memory_space<vmem>>, vector<16x64xf32>
    %cst_7 = arith.constant 0.000000e+00 : f32
    %11 = vector.broadcast %cst_7 : f32 to vector<32x8x64xf32>
    %12 = tpu.concatenate %11, %9 in 1 : vector<32x8x64xf32>, vector<32x8x64xf32> -> vector<32x16x64xf32>
    %13 = vector.shape_cast %1 : vector<1x64xf32> to vector<1x1x64xf32>
    %14 = vector.shape_cast %13 : vector<1x1x64xf32> to vector<1x1x64xf32>
    %15 = vector.broadcast %14 : vector<1x1x64xf32> to vector<32x8x64xf32>
    %16 = vector.extract_strided_slice %10 {offsets = [15, 0], sizes = [1, 64], strides = [1, 1]} : vector<16x64xf32> to vector<1x64xf32>
    %17 = vector.extract_strided_slice %12 {offsets = [0, 8, 0], sizes = [32, 8, 64], strides = [1, 1, 1]} : vector<32x16x64xf32> to vector<32x8x64xf32>
    %18 = vector.shape_cast %16 : vector<1x64xf32> to vector<1x1x64xf32>
    %19 = vector.broadcast %18 : vector<1x1x64xf32> to vector<32x8x64xf32>
    %20 = arith.mulf %17, %19 : vector<32x8x64xf32>
    %21 = arith.addf %15, %20 : vector<32x8x64xf32>
    %22 = vector.extract_strided_slice %10 {offsets = [14, 0], sizes = [1, 64], strides = [1, 1]} : vector<16x64xf32> to vector<1x64xf32>
    %23 = vector.extract_strided_slice %12 {offsets = [0, 7, 0], sizes = [32, 8, 64], strides = [1, 1, 1]} : vector<32x16x64xf32> to vector<32x8x64xf32>
    %24 = vector.shape_cast %22 : vector<1x64xf32> to vector<1x1x64xf32>
    %25 = vector.broadcast %24 : vector<1x1x64xf32> to vector<32x8x64xf32>
    %26 = arith.mulf %23, %25 : vector<32x8x64xf32>
    %27 = arith.addf %21, %26 : vector<32x8x64xf32>
    %28 = vector.extract_strided_slice %10 {offsets = [13, 0], sizes = [1, 64], strides = [1, 1]} : vector<16x64xf32> to vector<1x64xf32>
    %29 = vector.extract_strided_slice %12 {offsets = [0, 6, 0], sizes = [32, 8, 64], strides = [1, 1, 1]} : vector<32x16x64xf32> to vector<32x8x64xf32>
    %30 = vector.shape_cast %28 : vector<1x64xf32> to vector<1x1x64xf32>
    %31 = vector.broadcast %30 : vector<1x1x64xf32> to vector<32x8x64xf32>
    %32 = arith.mulf %29, %31 : vector<32x8x64xf32>
    %33 = arith.addf %27, %32 : vector<32x8x64xf32>
    %34 = vector.extract_strided_slice %10 {offsets = [12, 0], sizes = [1, 64], strides = [1, 1]} : vector<16x64xf32> to vector<1x64xf32>
    %35 = vector.extract_strided_slice %12 {offsets = [0, 5, 0], sizes = [32, 8, 64], strides = [1, 1, 1]} : vector<32x16x64xf32> to vector<32x8x64xf32>
    %36 = vector.shape_cast %34 : vector<1x64xf32> to vector<1x1x64xf32>
    %37 = vector.broadcast %36 : vector<1x1x64xf32> to vector<32x8x64xf32>
    %38 = arith.mulf %35, %37 : vector<32x8x64xf32>
    %39 = arith.addf %33, %38 : vector<32x8x64xf32>
    %40 = vector.extract_strided_slice %10 {offsets = [11, 0], sizes = [1, 64], strides = [1, 1]} : vector<16x64xf32> to vector<1x64xf32>
    %41 = vector.extract_strided_slice %12 {offsets = [0, 4, 0], sizes = [32, 8, 64], strides = [1, 1, 1]} : vector<32x16x64xf32> to vector<32x8x64xf32>
    %42 = vector.shape_cast %40 : vector<1x64xf32> to vector<1x1x64xf32>
    %43 = vector.broadcast %42 : vector<1x1x64xf32> to vector<32x8x64xf32>
    %44 = arith.mulf %41, %43 : vector<32x8x64xf32>
    %45 = arith.addf %39, %44 : vector<32x8x64xf32>
    %46 = vector.extract_strided_slice %10 {offsets = [10, 0], sizes = [1, 64], strides = [1, 1]} : vector<16x64xf32> to vector<1x64xf32>
    %47 = vector.extract_strided_slice %12 {offsets = [0, 3, 0], sizes = [32, 8, 64], strides = [1, 1, 1]} : vector<32x16x64xf32> to vector<32x8x64xf32>
    %48 = vector.shape_cast %46 : vector<1x64xf32> to vector<1x1x64xf32>
    %49 = vector.broadcast %48 : vector<1x1x64xf32> to vector<32x8x64xf32>
    %50 = arith.mulf %47, %49 : vector<32x8x64xf32>
    %51 = arith.addf %45, %50 : vector<32x8x64xf32>
    %52 = vector.extract_strided_slice %10 {offsets = [9, 0], sizes = [1, 64], strides = [1, 1]} : vector<16x64xf32> to vector<1x64xf32>
    %53 = vector.extract_strided_slice %12 {offsets = [0, 2, 0], sizes = [32, 8, 64], strides = [1, 1, 1]} : vector<32x16x64xf32> to vector<32x8x64xf32>
    %54 = vector.shape_cast %52 : vector<1x64xf32> to vector<1x1x64xf32>
    %55 = vector.broadcast %54 : vector<1x1x64xf32> to vector<32x8x64xf32>
    %56 = arith.mulf %53, %55 : vector<32x8x64xf32>
    %57 = arith.addf %51, %56 : vector<32x8x64xf32>
    %58 = vector.extract_strided_slice %10 {offsets = [8, 0], sizes = [1, 64], strides = [1, 1]} : vector<16x64xf32> to vector<1x64xf32>
    %59 = vector.extract_strided_slice %12 {offsets = [0, 1, 0], sizes = [32, 8, 64], strides = [1, 1, 1]} : vector<32x16x64xf32> to vector<32x8x64xf32>
    %60 = vector.shape_cast %58 : vector<1x64xf32> to vector<1x1x64xf32>
    %61 = vector.broadcast %60 : vector<1x1x64xf32> to vector<32x8x64xf32>
    %62 = arith.mulf %59, %61 : vector<32x8x64xf32>
    %63 = arith.addf %57, %62 : vector<32x8x64xf32>
    %64 = arith.negf %63 : vector<32x8x64xf32>
    %65 = math.exp %64 : vector<32x8x64xf32>
    %cst_8 = arith.constant 1.000000e+00 : f32
    %66 = vector.broadcast %cst_8 : f32 to vector<32x8x64xf32>
    %67 = arith.addf %66, %65 : vector<32x8x64xf32>
    %68 = arith.divf %66, %67 : vector<32x8x64xf32>
    %69 = arith.mulf %63, %68 : vector<32x8x64xf32>
    %70 = vector.shape_cast %69 : vector<32x8x64xf32> to vector<256x64xf32>
    %c0_9 = arith.constant 0 : index
    %c0_10 = arith.constant 0 : index
    %71 = vector.load %arg4[%c0_9, %c0_10] : memref<64x128xf32, #tpu.memory_space<vmem>>, vector<64x128xf32>
    %cst_11 = arith.constant dense<0.000000e+00> : vector<256x128xf32>
    %72 = tpu.matmul %70, %71, %cst_11 {dimension_numbers = #tpu.dot_dimension_numbers<[1], [0], [0], [1], [0, 0, 1, 1], [], []>} : vector<256x64xf32>, vector<64x128xf32>, vector<256x128xf32> -> vector<256x128xf32>
    %73 = vector.extract_strided_slice %72 {offsets = [0, 0], sizes = [256, 64], strides = [1, 1]} : vector<256x128xf32> to vector<256x64xf32>
    %74 = vector.broadcast %2 : vector<1x64xf32> to vector<256x64xf32>
    %75 = arith.addf %73, %74 : vector<256x64xf32>
    %cst_12 = arith.constant 0.000000e+00 : f32
    %76 = vector.broadcast %cst_12 : f32 to vector<256x64xf32>
    %77 = arith.maximumf %75, %76 : vector<256x64xf32>
    %78 = vector.broadcast %cst_12 : f32 to vector<256x64xf32>
    %79 = arith.subf %75, %78 : vector<256x64xf32>
    %80 = arith.cmpf one, %79, %79 : vector<256x64xf32>
    %81 = vector.broadcast %cst_12 : f32 to vector<256x64xf32>
    %82 = arith.addf %75, %81 : vector<256x64xf32>
    %83 = math.absf %79 : vector<256x64xf32>
    %cst_13 = arith.constant 0.000000e+00 : f32
    %84 = vector.broadcast %cst_13 : f32 to vector<256x64xf32>
    %85 = arith.subf %84, %83 : vector<256x64xf32>
    %86 = math.exp %85 : vector<256x64xf32>
    %87 = math.log1p %86 : vector<256x64xf32>
    %88 = arith.addf %77, %87 : vector<256x64xf32>
    %89 = arith.select %80, %82, %88 : vector<256x64xi1>, vector<256x64xf32>
    %90 = vector.extract_strided_slice %72 {offsets = [0, 64], sizes = [256, 32], strides = [1, 1]} : vector<256x128xf32> to vector<256x32xf32>
    %91 = vector.extract_strided_slice %72 {offsets = [0, 96], sizes = [256, 32], strides = [1, 1]} : vector<256x128xf32> to vector<256x32xf32>
    %92 = arith.mulf %89, %70 : vector<256x64xf32>
    %93 = vector.shape_cast %89 : vector<256x64xf32> to vector<16x2x8x64xf32>
    %94 = vector.shape_cast %92 : vector<256x64xf32> to vector<16x2x8x64xf32>
    %95 = vector.extract_strided_slice %93 {offsets = [0, 0, 0, 0], sizes = [16, 1, 8, 64], strides = [1, 1, 1, 1]} : vector<16x2x8x64xf32> to vector<16x1x8x64xf32>
    %96 = vector.shape_cast %95 : vector<16x1x8x64xf32> to vector<16x8x64xf32>
    %97 = vector.extract_strided_slice %93 {offsets = [0, 1, 0, 0], sizes = [16, 1, 8, 64], strides = [1, 1, 1, 1]} : vector<16x2x8x64xf32> to vector<16x1x8x64xf32>
    %98 = vector.shape_cast %97 : vector<16x1x8x64xf32> to vector<16x8x64xf32>
    %99 = tpu.concatenate %96, %98 in 2 : vector<16x8x64xf32>, vector<16x8x64xf32> -> vector<16x8x128xf32>
    %c0_14 = arith.constant 0 : index
    %c0_15 = arith.constant 0 : index
    %c0_16 = arith.constant 0 : index
    %100 = vector.load %arg9[%c0_14, %c0_15, %c0_16] : memref<16x8x128xf32, #tpu.memory_space<vmem>>, vector<16x8x128xf32>
    tpu.vector_store %arg9[%c0_14, %c0_15, %c0_16], %99 {strides = array<i32>} : memref<16x8x128xf32, #tpu.memory_space<vmem>>, vector<16x8x128xf32>,
    %101 = vector.extract_strided_slice %94 {offsets = [0, 0, 0, 0], sizes = [16, 1, 8, 64], strides = [1, 1, 1, 1]} : vector<16x2x8x64xf32> to vector<16x1x8x64xf32>
    %102 = vector.shape_cast %101 : vector<16x1x8x64xf32> to vector<16x8x64xf32>
    %103 = vector.extract_strided_slice %94 {offsets = [0, 1, 0, 0], sizes = [16, 1, 8, 64], strides = [1, 1, 1, 1]} : vector<16x2x8x64xf32> to vector<16x1x8x64xf32>
    %104 = vector.shape_cast %103 : vector<16x1x8x64xf32> to vector<16x8x64xf32>
    %105 = tpu.concatenate %102, %104 in 2 : vector<16x8x64xf32>, vector<16x8x64xf32> -> vector<16x8x128xf32>
    %c0_17 = arith.constant 0 : index
    %c0_18 = arith.constant 0 : index
    %c0_19 = arith.constant 0 : index
    %106 = vector.load %arg10[%c0_17, %c0_18, %c0_19] : memref<16x8x128xf32, #tpu.memory_space<vmem>>, vector<16x8x128xf32>
    tpu.vector_store %arg10[%c0_17, %c0_18, %c0_19], %105 {strides = array<i32>} : memref<16x8x128xf32, #tpu.memory_space<vmem>>, vector<16x8x128xf32>,
    %107 = vector.shape_cast %90 : vector<256x32xf32> to vector<16x16x32xf32>
    %c0_20 = arith.constant 0 : index
    %c0_21 = arith.constant 0 : index
    %c0_22 = arith.constant 0 : index
    %108 = vector.load %arg11[%c0_20, %c0_21, %c0_22] : memref<16x16x32xf32, #tpu.memory_space<vmem>>, vector<16x16x32xf32>
    tpu.vector_store %arg11[%c0_20, %c0_21, %c0_22], %107 {strides = array<i32>} : memref<16x16x32xf32, #tpu.memory_space<vmem>>, vector<16x16x32xf32>,
    %109 = vector.shape_cast %91 : vector<256x32xf32> to vector<16x16x32xf32>
    %c0_23 = arith.constant 0 : index
    %c0_24 = arith.constant 0 : index
    %c0_25 = arith.constant 0 : index
    %110 = vector.load %arg12[%c0_23, %c0_24, %c0_25] : memref<16x16x32xf32, #tpu.memory_space<vmem>>, vector<16x16x32xf32>
    tpu.vector_store %arg12[%c0_23, %c0_24, %c0_25], %109 {strides = array<i32>} : memref<16x16x32xf32, #tpu.memory_space<vmem>>, vector<16x16x32xf32>,
    %c0_26 = arith.constant 0 : index
    %c0_27 = arith.constant 0 : index
    %111 = vector.load %arg6[%c0_26, %c0_27] : memref<32x128xf32, #tpu.memory_space<vmem>>, vector<32x128xf32>
    %112 = tpu.iota {dimensions = array<i32: 1>} : vector<1x128xi32>
    %c64_i32 = arith.constant 64 : i32
    %113 = vector.broadcast %c64_i32 : i32 to vector<1x128xi32>
    %114 = arith.cmpi slt, %112, %113 : vector<1x128xi32>
    %c0_i32 = arith.constant 0 : i32
    %c16_i32 = arith.constant 16 : i32
    %115 = arith.addi %c0_i32, %c16_i32 : i32
    %c1_i32 = arith.constant 1 : i32
    scf.for %arg14 = %c0_i32 to %115 step %c1_i32  : i32 {
      %c1_i32_38 = arith.constant 1 : i32
      %136 = arith.muli %arg14, %c1_i32_38 : i32
      %c0_i32_39 = arith.constant 0 : i32
      %137 = arith.addi %c0_i32_39, %136 : i32
      %138 = arith.index_cast %137 : i32 to index
      %c0_40 = arith.constant 0 : index
      %c0_41 = arith.constant 0 : index
      %139 = vector.load %arg9[%138, %c0_40, %c0_41] : memref<16x8x128xf32, #tpu.memory_space<vmem>>, vector<1x8x128xf32>
      %140 = vector.shape_cast %139 : vector<1x8x128xf32> to vector<8x128xf32>
      %141 = arith.index_cast %137 : i32 to index
      %c0_42 = arith.constant 0 : index
      %c0_43 = arith.constant 0 : index
      %142 = vector.load %arg10[%141, %c0_42, %c0_43] : memref<16x8x128xf32, #tpu.memory_space<vmem>>, vector<1x8x128xf32>
      %143 = vector.shape_cast %142 : vector<1x8x128xf32> to vector<8x128xf32>
      %144 = arith.index_cast %137 : i32 to index
      %c0_44 = arith.constant 0 : index
      %c0_45 = arith.constant 0 : index
      %145 = vector.load %arg11[%144, %c0_44, %c0_45] : memref<16x16x32xf32, #tpu.memory_space<vmem>>, vector<1x16x32xf32>
      %146 = vector.shape_cast %145 : vector<1x16x32xf32> to vector<16x32xf32>
      %147 = arith.index_cast %137 : i32 to index
      %c0_46 = arith.constant 0 : index
      %c0_47 = arith.constant 0 : index
      %148 = vector.load %arg12[%147, %c0_46, %c0_47] : memref<16x16x32xf32, #tpu.memory_space<vmem>>, vector<1x16x32xf32>
      %149 = vector.shape_cast %148 : vector<1x16x32xf32> to vector<16x32xf32>
      %150 = vector.shape_cast %146 : vector<16x32xf32> to vector<16x32x1xf32>
      %cst_48 = arith.constant 0.000000e+00 : f32
      %151 = vector.broadcast %cst_48 : f32 to vector<32x128xf32>
      %152 = vector.extract_strided_slice %140 {offsets = [0, 0], sizes = [1, 128], strides = [1, 1]} : vector<8x128xf32> to vector<1x128xf32>
      %153 = vector.extract_strided_slice %143 {offsets = [0, 0], sizes = [1, 128], strides = [1, 1]} : vector<8x128xf32> to vector<1x128xf32>
      %154 = vector.broadcast %152 : vector<1x128xf32> to vector<32x128xf32>
      %155 = arith.mulf %154, %111 : vector<32x128xf32>
      %156 = math.exp %155 : vector<32x128xf32>
      %157 = vector.extract_strided_slice %150 {offsets = [0, 0, 0], sizes = [1, 32, 1], strides = [1, 1, 1]} : vector<16x32x1xf32> to vector<1x32x1xf32>
      %158 = vector.shape_cast %157 : vector<1x32x1xf32> to vector<32x1xf32>
      %159 = vector.shape_cast %158 : vector<32x1xf32> to vector<32x1xf32>
      %160 = vector.broadcast %159 : vector<32x1xf32> to vector<32x128xf32>
      %161 = vector.extract_strided_slice %150 {offsets = [8, 0, 0], sizes = [1, 32, 1], strides = [1, 1, 1]} : vector<16x32x1xf32> to vector<1x32x1xf32>
      %162 = vector.shape_cast %161 : vector<1x32x1xf32> to vector<32x1xf32>
      %163 = vector.shape_cast %162 : vector<32x1xf32> to vector<32x1xf32>
      %164 = vector.broadcast %163 : vector<32x1xf32> to vector<32x128xf32>
      %165 = vector.shape_cast %114 : vector<1x128xi1> to vector<1x128xi1>
      %166 = vector.broadcast %165 : vector<1x128xi1> to vector<32x128xi1>
      %167 = arith.select %166, %160, %164 : vector<32x128xi1>, vector<32x128xf32>
      %168 = arith.mulf %156, %151 : vector<32x128xf32>
      %169 = vector.broadcast %153 : vector<1x128xf32> to vector<32x128xf32>
      %170 = arith.mulf %169, %167 : vector<32x128xf32>
      %171 = arith.addf %168, %170 : vector<32x128xf32>
      %172 = vector.extract_strided_slice %149 {offsets = [0, 0], sizes = [1, 32], strides = [1, 1]} : vector<16x32xf32> to vector<1x32xf32>
      %173 = vector.extract_strided_slice %149 {offsets = [8, 0], sizes = [1, 32], strides = [1, 1]} : vector<16x32xf32> to vector<1x32xf32>
      %174 = tpu.concatenate %172, %173 in 0 : vector<1x32xf32>, vector<1x32xf32> -> vector<2x32xf32>
      %cst_49 = arith.constant dense<0.000000e+00> : vector<2x128xf32>
      %175 = tpu.matmul %174, %171, %cst_49 {dimension_numbers = #tpu.dot_dimension_numbers<[1], [0], [0], [1], [0, 0, 1, 1], [], []>} : vector<2x32xf32>, vector<32x128xf32>, vector<2x128xf32> -> vector<2x128xf32>
      %176 = vector.extract_strided_slice %175 {offsets = [0, 0], sizes = [1, 128], strides = [1, 1]} : vector<2x128xf32> to vector<1x128xf32>
      %177 = vector.extract_strided_slice %175 {offsets = [1, 0], sizes = [1, 128], strides = [1, 1]} : vector<2x128xf32> to vector<1x128xf32>
      %178 = arith.select %114, %176, %177 : vector<1x128xi1>, vector<1x128xf32>
      %179 = vector.extract_strided_slice %140 {offsets = [1, 0], sizes = [1, 128], strides = [1, 1]} : vector<8x128xf32> to vector<1x128xf32>
      %180 = vector.extract_strided_slice %143 {offsets = [1, 0], sizes = [1, 128], strides = [1, 1]} : vector<8x128xf32> to vector<1x128xf32>
      %181 = vector.broadcast %179 : vector<1x128xf32> to vector<32x128xf32>
      %182 = arith.mulf %181, %111 : vector<32x128xf32>
      %183 = math.exp %182 : vector<32x128xf32>
      %184 = vector.extract_strided_slice %150 {offsets = [1, 0, 0], sizes = [1, 32, 1], strides = [1, 1, 1]} : vector<16x32x1xf32> to vector<1x32x1xf32>
      %185 = vector.shape_cast %184 : vector<1x32x1xf32> to vector<32x1xf32>
      %186 = vector.shape_cast %185 : vector<32x1xf32> to vector<32x1xf32>
      %187 = vector.broadcast %186 : vector<32x1xf32> to vector<32x128xf32>
      %188 = vector.extract_strided_slice %150 {offsets = [9, 0, 0], sizes = [1, 32, 1], strides = [1, 1, 1]} : vector<16x32x1xf32> to vector<1x32x1xf32>
      %189 = vector.shape_cast %188 : vector<1x32x1xf32> to vector<32x1xf32>
      %190 = vector.shape_cast %189 : vector<32x1xf32> to vector<32x1xf32>
      %191 = vector.broadcast %190 : vector<32x1xf32> to vector<32x128xf32>
      %192 = vector.shape_cast %114 : vector<1x128xi1> to vector<1x128xi1>
      %193 = vector.broadcast %192 : vector<1x128xi1> to vector<32x128xi1>
      %194 = arith.select %193, %187, %191 : vector<32x128xi1>, vector<32x128xf32>
      %195 = arith.mulf %183, %171 : vector<32x128xf32>
      %196 = vector.broadcast %180 : vector<1x128xf32> to vector<32x128xf32>
      %197 = arith.mulf %196, %194 : vector<32x128xf32>
      %198 = arith.addf %195, %197 : vector<32x128xf32>
      %199 = vector.extract_strided_slice %149 {offsets = [1, 0], sizes = [1, 32], strides = [1, 1]} : vector<16x32xf32> to vector<1x32xf32>
      %200 = vector.extract_strided_slice %149 {offsets = [9, 0], sizes = [1, 32], strides = [1, 1]} : vector<16x32xf32> to vector<1x32xf32>
      %201 = tpu.concatenate %199, %200 in 0 : vector<1x32xf32>, vector<1x32xf32> -> vector<2x32xf32>
      %cst_50 = arith.constant dense<0.000000e+00> : vector<2x128xf32>
      %202 = tpu.matmul %201, %198, %cst_50 {dimension_numbers = #tpu.dot_dimension_numbers<[1], [0], [0], [1], [0, 0, 1, 1], [], []>} : vector<2x32xf32>, vector<32x128xf32>, vector<2x128xf32> -> vector<2x128xf32>
      %203 = vector.extract_strided_slice %202 {offsets = [0, 0], sizes = [1, 128], strides = [1, 1]} : vector<2x128xf32> to vector<1x128xf32>
      %204 = vector.extract_strided_slice %202 {offsets = [1, 0], sizes = [1, 128], strides = [1, 1]} : vector<2x128xf32> to vector<1x128xf32>
      %205 = arith.select %114, %203, %204 : vector<1x128xi1>, vector<1x128xf32>
      %206 = vector.extract_strided_slice %140 {offsets = [2, 0], sizes = [1, 128], strides = [1, 1]} : vector<8x128xf32> to vector<1x128xf32>
      %207 = vector.extract_strided_slice %143 {offsets = [2, 0], sizes = [1, 128], strides = [1, 1]} : vector<8x128xf32> to vector<1x128xf32>
      %208 = vector.broadcast %206 : vector<1x128xf32> to vector<32x128xf32>
      %209 = arith.mulf %208, %111 : vector<32x128xf32>
      %210 = math.exp %209 : vector<32x128xf32>
      %211 = vector.extract_strided_slice %150 {offsets = [2, 0, 0], sizes = [1, 32, 1], strides = [1, 1, 1]} : vector<16x32x1xf32> to vector<1x32x1xf32>
      %212 = vector.shape_cast %211 : vector<1x32x1xf32> to vector<32x1xf32>
      %213 = vector.shape_cast %212 : vector<32x1xf32> to vector<32x1xf32>
      %214 = vector.broadcast %213 : vector<32x1xf32> to vector<32x128xf32>
      %215 = vector.extract_strided_slice %150 {offsets = [10, 0, 0], sizes = [1, 32, 1], strides = [1, 1, 1]} : vector<16x32x1xf32> to vector<1x32x1xf32>
      %216 = vector.shape_cast %215 : vector<1x32x1xf32> to vector<32x1xf32>
      %217 = vector.shape_cast %216 : vector<32x1xf32> to vector<32x1xf32>
      %218 = vector.broadcast %217 : vector<32x1xf32> to vector<32x128xf32>
      %219 = vector.shape_cast %114 : vector<1x128xi1> to vector<1x128xi1>
      %220 = vector.broadcast %219 : vector<1x128xi1> to vector<32x128xi1>
      %221 = arith.select %220, %214, %218 : vector<32x128xi1>, vector<32x128xf32>
      %222 = arith.mulf %210, %198 : vector<32x128xf32>
      %223 = vector.broadcast %207 : vector<1x128xf32> to vector<32x128xf32>
      %224 = arith.mulf %223, %221 : vector<32x128xf32>
      %225 = arith.addf %222, %224 : vector<32x128xf32>
      %226 = vector.extract_strided_slice %149 {offsets = [2, 0], sizes = [1, 32], strides = [1, 1]} : vector<16x32xf32> to vector<1x32xf32>
      %227 = vector.extract_strided_slice %149 {offsets = [10, 0], sizes = [1, 32], strides = [1, 1]} : vector<16x32xf32> to vector<1x32xf32>
      %228 = tpu.concatenate %226, %227 in 0 : vector<1x32xf32>, vector<1x32xf32> -> vector<2x32xf32>
      %cst_51 = arith.constant dense<0.000000e+00> : vector<2x128xf32>
      %229 = tpu.matmul %228, %225, %cst_51 {dimension_numbers = #tpu.dot_dimension_numbers<[1], [0], [0], [1], [0, 0, 1, 1], [], []>} : vector<2x32xf32>, vector<32x128xf32>, vector<2x128xf32> -> vector<2x128xf32>
      %230 = vector.extract_strided_slice %229 {offsets = [0, 0], sizes = [1, 128], strides = [1, 1]} : vector<2x128xf32> to vector<1x128xf32>
      %231 = vector.extract_strided_slice %229 {offsets = [1, 0], sizes = [1, 128], strides = [1, 1]} : vector<2x128xf32> to vector<1x128xf32>
      %232 = arith.select %114, %230, %231 : vector<1x128xi1>, vector<1x128xf32>
      %233 = vector.extract_strided_slice %140 {offsets = [3, 0], sizes = [1, 128], strides = [1, 1]} : vector<8x128xf32> to vector<1x128xf32>
      %234 = vector.extract_strided_slice %143 {offsets = [3, 0], sizes = [1, 128], strides = [1, 1]} : vector<8x128xf32> to vector<1x128xf32>
      %235 = vector.broadcast %233 : vector<1x128xf32> to vector<32x128xf32>
      %236 = arith.mulf %235, %111 : vector<32x128xf32>
      %237 = math.exp %236 : vector<32x128xf32>
      %238 = vector.extract_strided_slice %150 {offsets = [3, 0, 0], sizes = [1, 32, 1], strides = [1, 1, 1]} : vector<16x32x1xf32> to vector<1x32x1xf32>
      %239 = vector.shape_cast %238 : vector<1x32x1xf32> to vector<32x1xf32>
      %240 = vector.shape_cast %239 : vector<32x1xf32> to vector<32x1xf32>
      %241 = vector.broadcast %240 : vector<32x1xf32> to vector<32x128xf32>
      %242 = vector.extract_strided_slice %150 {offsets = [11, 0, 0], sizes = [1, 32, 1], strides = [1, 1, 1]} : vector<16x32x1xf32> to vector<1x32x1xf32>
      %243 = vector.shape_cast %242 : vector<1x32x1xf32> to vector<32x1xf32>
      %244 = vector.shape_cast %243 : vector<32x1xf32> to vector<32x1xf32>
      %245 = vector.broadcast %244 : vector<32x1xf32> to vector<32x128xf32>
      %246 = vector.shape_cast %114 : vector<1x128xi1> to vector<1x128xi1>
      %247 = vector.broadcast %246 : vector<1x128xi1> to vector<32x128xi1>
      %248 = arith.select %247, %241, %245 : vector<32x128xi1>, vector<32x128xf32>
      %249 = arith.mulf %237, %225 : vector<32x128xf32>
      %250 = vector.broadcast %234 : vector<1x128xf32> to vector<32x128xf32>
      %251 = arith.mulf %250, %248 : vector<32x128xf32>
      %252 = arith.addf %249, %251 : vector<32x128xf32>
      %253 = vector.extract_strided_slice %149 {offsets = [3, 0], sizes = [1, 32], strides = [1, 1]} : vector<16x32xf32> to vector<1x32xf32>
      %254 = vector.extract_strided_slice %149 {offsets = [11, 0], sizes = [1, 32], strides = [1, 1]} : vector<16x32xf32> to vector<1x32xf32>
      %255 = tpu.concatenate %253, %254 in 0 : vector<1x32xf32>, vector<1x32xf32> -> vector<2x32xf32>
      %cst_52 = arith.constant dense<0.000000e+00> : vector<2x128xf32>
      %256 = tpu.matmul %255, %252, %cst_52 {dimension_numbers = #tpu.dot_dimension_numbers<[1], [0], [0], [1], [0, 0, 1, 1], [], []>} : vector<2x32xf32>, vector<32x128xf32>, vector<2x128xf32> -> vector<2x128xf32>
      %257 = vector.extract_strided_slice %256 {offsets = [0, 0], sizes = [1, 128], strides = [1, 1]} : vector<2x128xf32> to vector<1x128xf32>
      %258 = vector.extract_strided_slice %256 {offsets = [1, 0], sizes = [1, 128], strides = [1, 1]} : vector<2x128xf32> to vector<1x128xf32>
      %259 = arith.select %114, %257, %258 : vector<1x128xi1>, vector<1x128xf32>
      %260 = vector.extract_strided_slice %140 {offsets = [4, 0], sizes = [1, 128], strides = [1, 1]} : vector<8x128xf32> to vector<1x128xf32>
      %261 = vector.extract_strided_slice %143 {offsets = [4, 0], sizes = [1, 128], strides = [1, 1]} : vector<8x128xf32> to vector<1x128xf32>
      %262 = vector.broadcast %260 : vector<1x128xf32> to vector<32x128xf32>
      %263 = arith.mulf %262, %111 : vector<32x128xf32>
      %264 = math.exp %263 : vector<32x128xf32>
      %265 = vector.extract_strided_slice %150 {offsets = [4, 0, 0], sizes = [1, 32, 1], strides = [1, 1, 1]} : vector<16x32x1xf32> to vector<1x32x1xf32>
      %266 = vector.shape_cast %265 : vector<1x32x1xf32> to vector<32x1xf32>
      %267 = vector.shape_cast %266 : vector<32x1xf32> to vector<32x1xf32>
      %268 = vector.broadcast %267 : vector<32x1xf32> to vector<32x128xf32>
      %269 = vector.extract_strided_slice %150 {offsets = [12, 0, 0], sizes = [1, 32, 1], strides = [1, 1, 1]} : vector<16x32x1xf32> to vector<1x32x1xf32>
      %270 = vector.shape_cast %269 : vector<1x32x1xf32> to vector<32x1xf32>
      %271 = vector.shape_cast %270 : vector<32x1xf32> to vector<32x1xf32>
      %272 = vector.broadcast %271 : vector<32x1xf32> to vector<32x128xf32>
      %273 = vector.shape_cast %114 : vector<1x128xi1> to vector<1x128xi1>
      %274 = vector.broadcast %273 : vector<1x128xi1> to vector<32x128xi1>
      %275 = arith.select %274, %268, %272 : vector<32x128xi1>, vector<32x128xf32>
      %276 = arith.mulf %264, %252 : vector<32x128xf32>
      %277 = vector.broadcast %261 : vector<1x128xf32> to vector<32x128xf32>
      %278 = arith.mulf %277, %275 : vector<32x128xf32>
      %279 = arith.addf %276, %278 : vector<32x128xf32>
      %280 = vector.extract_strided_slice %149 {offsets = [4, 0], sizes = [1, 32], strides = [1, 1]} : vector<16x32xf32> to vector<1x32xf32>
      %281 = vector.extract_strided_slice %149 {offsets = [12, 0], sizes = [1, 32], strides = [1, 1]} : vector<16x32xf32> to vector<1x32xf32>
      %282 = tpu.concatenate %280, %281 in 0 : vector<1x32xf32>, vector<1x32xf32> -> vector<2x32xf32>
      %cst_53 = arith.constant dense<0.000000e+00> : vector<2x128xf32>
      %283 = tpu.matmul %282, %279, %cst_53 {dimension_numbers = #tpu.dot_dimension_numbers<[1], [0], [0], [1], [0, 0, 1, 1], [], []>} : vector<2x32xf32>, vector<32x128xf32>, vector<2x128xf32> -> vector<2x128xf32>
      %284 = vector.extract_strided_slice %283 {offsets = [0, 0], sizes = [1, 128], strides = [1, 1]} : vector<2x128xf32> to vector<1x128xf32>
      %285 = vector.extract_strided_slice %283 {offsets = [1, 0], sizes = [1, 128], strides = [1, 1]} : vector<2x128xf32> to vector<1x128xf32>
      %286 = arith.select %114, %284, %285 : vector<1x128xi1>, vector<1x128xf32>
      %287 = vector.extract_strided_slice %140 {offsets = [5, 0], sizes = [1, 128], strides = [1, 1]} : vector<8x128xf32> to vector<1x128xf32>
      %288 = vector.extract_strided_slice %143 {offsets = [5, 0], sizes = [1, 128], strides = [1, 1]} : vector<8x128xf32> to vector<1x128xf32>
      %289 = vector.broadcast %287 : vector<1x128xf32> to vector<32x128xf32>
      %290 = arith.mulf %289, %111 : vector<32x128xf32>
      %291 = math.exp %290 : vector<32x128xf32>
      %292 = vector.extract_strided_slice %150 {offsets = [5, 0, 0], sizes = [1, 32, 1], strides = [1, 1, 1]} : vector<16x32x1xf32> to vector<1x32x1xf32>
      %293 = vector.shape_cast %292 : vector<1x32x1xf32> to vector<32x1xf32>
      %294 = vector.shape_cast %293 : vector<32x1xf32> to vector<32x1xf32>
      %295 = vector.broadcast %294 : vector<32x1xf32> to vector<32x128xf32>
      %296 = vector.extract_strided_slice %150 {offsets = [13, 0, 0], sizes = [1, 32, 1], strides = [1, 1, 1]} : vector<16x32x1xf32> to vector<1x32x1xf32>
      %297 = vector.shape_cast %296 : vector<1x32x1xf32> to vector<32x1xf32>
      %298 = vector.shape_cast %297 : vector<32x1xf32> to vector<32x1xf32>
      %299 = vector.broadcast %298 : vector<32x1xf32> to vector<32x128xf32>
      %300 = vector.shape_cast %114 : vector<1x128xi1> to vector<1x128xi1>
      %301 = vector.broadcast %300 : vector<1x128xi1> to vector<32x128xi1>
      %302 = arith.select %301, %295, %299 : vector<32x128xi1>, vector<32x128xf32>
      %303 = arith.mulf %291, %279 : vector<32x128xf32>
      %304 = vector.broadcast %288 : vector<1x128xf32> to vector<32x128xf32>
      %305 = arith.mulf %304, %302 : vector<32x128xf32>
      %306 = arith.addf %303, %305 : vector<32x128xf32>
      %307 = vector.extract_strided_slice %149 {offsets = [5, 0], sizes = [1, 32], strides = [1, 1]} : vector<16x32xf32> to vector<1x32xf32>
      %308 = vector.extract_strided_slice %149 {offsets = [13, 0], sizes = [1, 32], strides = [1, 1]} : vector<16x32xf32> to vector<1x32xf32>
      %309 = tpu.concatenate %307, %308 in 0 : vector<1x32xf32>, vector<1x32xf32> -> vector<2x32xf32>
      %cst_54 = arith.constant dense<0.000000e+00> : vector<2x128xf32>
      %310 = tpu.matmul %309, %306, %cst_54 {dimension_numbers = #tpu.dot_dimension_numbers<[1], [0], [0], [1], [0, 0, 1, 1], [], []>} : vector<2x32xf32>, vector<32x128xf32>, vector<2x128xf32> -> vector<2x128xf32>
      %311 = vector.extract_strided_slice %310 {offsets = [0, 0], sizes = [1, 128], strides = [1, 1]} : vector<2x128xf32> to vector<1x128xf32>
      %312 = vector.extract_strided_slice %310 {offsets = [1, 0], sizes = [1, 128], strides = [1, 1]} : vector<2x128xf32> to vector<1x128xf32>
      %313 = arith.select %114, %311, %312 : vector<1x128xi1>, vector<1x128xf32>
      %314 = vector.extract_strided_slice %140 {offsets = [6, 0], sizes = [1, 128], strides = [1, 1]} : vector<8x128xf32> to vector<1x128xf32>
      %315 = vector.extract_strided_slice %143 {offsets = [6, 0], sizes = [1, 128], strides = [1, 1]} : vector<8x128xf32> to vector<1x128xf32>
      %316 = vector.broadcast %314 : vector<1x128xf32> to vector<32x128xf32>
      %317 = arith.mulf %316, %111 : vector<32x128xf32>
      %318 = math.exp %317 : vector<32x128xf32>
      %319 = vector.extract_strided_slice %150 {offsets = [6, 0, 0], sizes = [1, 32, 1], strides = [1, 1, 1]} : vector<16x32x1xf32> to vector<1x32x1xf32>
      %320 = vector.shape_cast %319 : vector<1x32x1xf32> to vector<32x1xf32>
      %321 = vector.shape_cast %320 : vector<32x1xf32> to vector<32x1xf32>
      %322 = vector.broadcast %321 : vector<32x1xf32> to vector<32x128xf32>
      %323 = vector.extract_strided_slice %150 {offsets = [14, 0, 0], sizes = [1, 32, 1], strides = [1, 1, 1]} : vector<16x32x1xf32> to vector<1x32x1xf32>
      %324 = vector.shape_cast %323 : vector<1x32x1xf32> to vector<32x1xf32>
      %325 = vector.shape_cast %324 : vector<32x1xf32> to vector<32x1xf32>
      %326 = vector.broadcast %325 : vector<32x1xf32> to vector<32x128xf32>
      %327 = vector.shape_cast %114 : vector<1x128xi1> to vector<1x128xi1>
      %328 = vector.broadcast %327 : vector<1x128xi1> to vector<32x128xi1>
      %329 = arith.select %328, %322, %326 : vector<32x128xi1>, vector<32x128xf32>
      %330 = arith.mulf %318, %306 : vector<32x128xf32>
      %331 = vector.broadcast %315 : vector<1x128xf32> to vector<32x128xf32>
      %332 = arith.mulf %331, %329 : vector<32x128xf32>
      %333 = arith.addf %330, %332 : vector<32x128xf32>
      %334 = vector.extract_strided_slice %149 {offsets = [6, 0], sizes = [1, 32], strides = [1, 1]} : vector<16x32xf32> to vector<1x32xf32>
      %335 = vector.extract_strided_slice %149 {offsets = [14, 0], sizes = [1, 32], strides = [1, 1]} : vector<16x32xf32> to vector<1x32xf32>
      %336 = tpu.concatenate %334, %335 in 0 : vector<1x32xf32>, vector<1x32xf32> -> vector<2x32xf32>
      %cst_55 = arith.constant dense<0.000000e+00> : vector<2x128xf32>
      %337 = tpu.matmul %336, %333, %cst_55 {dimension_numbers = #tpu.dot_dimension_numbers<[1], [0], [0], [1], [0, 0, 1, 1], [], []>} : vector<2x32xf32>, vector<32x128xf32>, vector<2x128xf32> -> vector<2x128xf32>
      %338 = vector.extract_strided_slice %337 {offsets = [0, 0], sizes = [1, 128], strides = [1, 1]} : vector<2x128xf32> to vector<1x128xf32>
      %339 = vector.extract_strided_slice %337 {offsets = [1, 0], sizes = [1, 128], strides = [1, 1]} : vector<2x128xf32> to vector<1x128xf32>
      %340 = arith.select %114, %338, %339 : vector<1x128xi1>, vector<1x128xf32>
      %341 = vector.extract_strided_slice %140 {offsets = [7, 0], sizes = [1, 128], strides = [1, 1]} : vector<8x128xf32> to vector<1x128xf32>
      %342 = vector.extract_strided_slice %143 {offsets = [7, 0], sizes = [1, 128], strides = [1, 1]} : vector<8x128xf32> to vector<1x128xf32>
      %343 = vector.broadcast %341 : vector<1x128xf32> to vector<32x128xf32>
      %344 = arith.mulf %343, %111 : vector<32x128xf32>
      %345 = math.exp %344 : vector<32x128xf32>
      %346 = vector.extract_strided_slice %150 {offsets = [7, 0, 0], sizes = [1, 32, 1], strides = [1, 1, 1]} : vector<16x32x1xf32> to vector<1x32x1xf32>
      %347 = vector.shape_cast %346 : vector<1x32x1xf32> to vector<32x1xf32>
      %348 = vector.shape_cast %347 : vector<32x1xf32> to vector<32x1xf32>
      %349 = vector.broadcast %348 : vector<32x1xf32> to vector<32x128xf32>
      %350 = vector.extract_strided_slice %150 {offsets = [15, 0, 0], sizes = [1, 32, 1], strides = [1, 1, 1]} : vector<16x32x1xf32> to vector<1x32x1xf32>
      %351 = vector.shape_cast %350 : vector<1x32x1xf32> to vector<32x1xf32>
      %352 = vector.shape_cast %351 : vector<32x1xf32> to vector<32x1xf32>
      %353 = vector.broadcast %352 : vector<32x1xf32> to vector<32x128xf32>
      %354 = vector.shape_cast %114 : vector<1x128xi1> to vector<1x128xi1>
      %355 = vector.broadcast %354 : vector<1x128xi1> to vector<32x128xi1>
      %356 = arith.select %355, %349, %353 : vector<32x128xi1>, vector<32x128xf32>
      %357 = arith.mulf %345, %333 : vector<32x128xf32>
      %358 = vector.broadcast %342 : vector<1x128xf32> to vector<32x128xf32>
      %359 = arith.mulf %358, %356 : vector<32x128xf32>
      %360 = arith.addf %357, %359 : vector<32x128xf32>
      %361 = vector.extract_strided_slice %149 {offsets = [7, 0], sizes = [1, 32], strides = [1, 1]} : vector<16x32xf32> to vector<1x32xf32>
      %362 = vector.extract_strided_slice %149 {offsets = [15, 0], sizes = [1, 32], strides = [1, 1]} : vector<16x32xf32> to vector<1x32xf32>
      %363 = tpu.concatenate %361, %362 in 0 : vector<1x32xf32>, vector<1x32xf32> -> vector<2x32xf32>
      %cst_56 = arith.constant dense<0.000000e+00> : vector<2x128xf32>
      %364 = tpu.matmul %363, %360, %cst_56 {dimension_numbers = #tpu.dot_dimension_numbers<[1], [0], [0], [1], [0, 0, 1, 1], [], []>} : vector<2x32xf32>, vector<32x128xf32>, vector<2x128xf32> -> vector<2x128xf32>
      %365 = vector.extract_strided_slice %364 {offsets = [0, 0], sizes = [1, 128], strides = [1, 1]} : vector<2x128xf32> to vector<1x128xf32>
      %366 = vector.extract_strided_slice %364 {offsets = [1, 0], sizes = [1, 128], strides = [1, 1]} : vector<2x128xf32> to vector<1x128xf32>
      %367 = arith.select %114, %365, %366 : vector<1x128xi1>, vector<1x128xf32>
      %368 = tpu.concatenate %178, %205, %232, %259, %286, %313, %340, %367 in 0 : vector<1x128xf32>, vector<1x128xf32>, vector<1x128xf32>, vector<1x128xf32>, vector<1x128xf32>, vector<1x128xf32>, vector<1x128xf32>, vector<1x128xf32> -> vector<8x128xf32>
      %369 = arith.index_cast %137 : i32 to index
      %c0_57 = arith.constant 0 : index
      %c0_58 = arith.constant 0 : index
      %370 = vector.load %arg13[%369, %c0_57, %c0_58] : memref<16x8x128xf32, #tpu.memory_space<vmem>>, vector<1x8x128xf32>
      %371 = vector.shape_cast %370 : vector<1x8x128xf32> to vector<8x128xf32>
      %372 = vector.shape_cast %368 : vector<8x128xf32> to vector<1x8x128xf32>
      tpu.vector_store %arg13[%369, %c0_57, %c0_58], %372 {strides = array<i32>} : memref<16x8x128xf32, #tpu.memory_space<vmem>>, vector<1x8x128xf32>,
    }
    %c16_i32_28 = arith.constant 16 : i32
    %c0_29 = arith.constant 0 : index
    %c0_30 = arith.constant 0 : index
    %c0_31 = arith.constant 0 : index
    %116 = vector.load %arg13[%c0_29, %c0_30, %c0_31] : memref<16x8x128xf32, #tpu.memory_space<vmem>>, vector<16x8x128xf32>
    %117 = vector.extract_strided_slice %116 {offsets = [0, 0, 0], sizes = [16, 8, 64], strides = [1, 1, 1]} : vector<16x8x128xf32> to vector<16x8x64xf32>
    %118 = vector.extract_strided_slice %116 {offsets = [0, 0, 64], sizes = [16, 8, 64], strides = [1, 1, 1]} : vector<16x8x128xf32> to vector<16x8x64xf32>
    %119 = vector.shape_cast %117 : vector<16x8x64xf32> to vector<16x1x8x64xf32>
    %120 = vector.shape_cast %118 : vector<16x8x64xf32> to vector<16x1x8x64xf32>
    %121 = tpu.concatenate %119, %120 in 1 : vector<16x1x8x64xf32>, vector<16x1x8x64xf32> -> vector<16x2x8x64xf32>
    %122 = vector.shape_cast %121 : vector<16x2x8x64xf32> to vector<256x64xf32>
    %123 = vector.broadcast %3 : vector<1x64xf32> to vector<256x64xf32>
    %124 = arith.mulf %123, %70 : vector<256x64xf32>
    %125 = arith.addf %122, %124 : vector<256x64xf32>
    %126 = arith.negf %8 : vector<256x64xf32>
    %127 = math.exp %126 : vector<256x64xf32>
    %cst_32 = arith.constant 1.000000e+00 : f32
    %128 = vector.broadcast %cst_32 : f32 to vector<256x64xf32>
    %129 = arith.addf %128, %127 : vector<256x64xf32>
    %130 = arith.divf %128, %129 : vector<256x64xf32>
    %131 = arith.mulf %8, %130 : vector<256x64xf32>
    %132 = arith.mulf %125, %131 : vector<256x64xf32>
    %c0_33 = arith.constant 0 : index
    %c0_34 = arith.constant 0 : index
    %133 = vector.load %arg7[%c0_33, %c0_34] : memref<64x32xf32, #tpu.memory_space<vmem>>, vector<64x32xf32>
    %cst_35 = arith.constant dense<0.000000e+00> : vector<256x32xf32>
    %134 = tpu.matmul %132, %133, %cst_35 {dimension_numbers = #tpu.dot_dimension_numbers<[1], [0], [0], [1], [0, 0, 1, 1], [], []>} : vector<256x64xf32>, vector<64x32xf32>, vector<256x32xf32> -> vector<256x32xf32>
    %c0_36 = arith.constant 0 : index
    %c0_37 = arith.constant 0 : index
    %135 = vector.load %arg8[%c0_36, %c0_37] : memref<256x32xf32, #tpu.memory_space<vmem>>, vector<256x32xf32>
    tpu.vector_store %arg8[%c0_36, %c0_37], %134 {strides = array<i32>} : memref<256x32xf32, #tpu.memory_space<vmem>>, vector<256x32xf32>,
    return
  }
  func.func @transform_0(%arg0: i32) -> (i32, i32) {
    %c0_i32 = arith.constant 0 : i32
    %c0_i32_0 = arith.constant 0 : i32
    return %arg0, %c0_i32 : i32, i32
  }
  func.func @transform_1(%arg0: i32) -> (i32, i32) {
    %c0_i32 = arith.constant 0 : i32
    %c0_i32_0 = arith.constant 0 : i32
    %c0_i32_1 = arith.constant 0 : i32
    return %c0_i32, %c0_i32_0 : i32, i32
  }
  func.func @transform_2(%arg0: i32) -> (i32, i32) {
    %c0_i32 = arith.constant 0 : i32
    %c0_i32_0 = arith.constant 0 : i32
    %c0_i32_1 = arith.constant 0 : i32
    return %c0_i32, %c0_i32_0 : i32, i32
  }
  func.func @transform_3(%arg0: i32) -> (i32, i32) {
    %c0_i32 = arith.constant 0 : i32
    %c0_i32_0 = arith.constant 0 : i32
    %c0_i32_1 = arith.constant 0 : i32
    return %c0_i32, %c0_i32_0 : i32, i32
  }
  func.func @transform_4(%arg0: i32) -> (i32, i32) {
    %c0_i32 = arith.constant 0 : i32
    %c0_i32_0 = arith.constant 0 : i32
    %c0_i32_1 = arith.constant 0 : i32
    return %c0_i32, %c0_i32_0 : i32, i32
  }
  func.func @transform_5(%arg0: i32) -> (i32, i32) {
    %c0_i32 = arith.constant 0 : i32
    %c0_i32_0 = arith.constant 0 : i32
    %c0_i32_1 = arith.constant 0 : i32
    return %c0_i32, %c0_i32_0 : i32, i32
  }
  func.func @transform_6(%arg0: i32) -> (i32, i32) {
    %c0_i32 = arith.constant 0 : i32
    %c0_i32_0 = arith.constant 0 : i32
    %c0_i32_1 = arith.constant 0 : i32
    return %c0_i32, %c0_i32_0 : i32, i32
  }
  func.func @transform_7(%arg0: i32) -> (i32, i32) {
    %c0_i32 = arith.constant 0 : i32
    %c0_i32_0 = arith.constant 0 : i32
    return %arg0, %c0_i32 : i32, i32
  }
}

</mosaic_0001>

<bundles_post_ra>
// kernel: tpu_custom_call.1
= control target key start
LH: loop header
LB: loop body
LE: loop exit
PB: predicated region body
PF: predicated region fallthrough
CT: control target
= control target key end

     0   :  { %vm63_vm0 = vcmask 261120   ;;  %v386_v44 = vlaneseq  ;;  %vm528_vm2 = vcmask 1040384   ;;  %vm728_vm3 = vcmask 1041408   ;;  %s6850_s17 = smov 64   ;;  %s6851_s18 = smov 32   ;;  %s10931_s1 = inlined_call_operand.vmem [shape: f32[32,128], index: 1, kind: input, shape index: {}]   ;;  %s10932_s6 = inlined_call_operand.vmem [shape: f32[64,32], index: 6, kind: input, shape index: {}]   ;;  %s10933_s7 = inlined_call_operand.vmem [shape: f32[256,32], index: 7, kind: output, shape index: {}]   ;;  %s10934_s0 = inlined_call_operand.vmem [shape: f32[256,32], index: 0, kind: input, shape index: {}]   ;;  %s10935_s3 = inlined_call_operand.vmem [shape: f32[64,128], index: 3, kind: input, shape index: {}]   ;;  %s10936_s2 = inlined_call_operand.vmem [shape: f32[16,64], index: 2, kind: input, shape index: {}]   ;;  %s10937_s4 = inlined_call_operand.vmem [shape: f32[4,64], index: 4, kind: input, shape index: {}]   ;;  %s10938_s5 = inlined_call_operand.vmem [shape: f32[32,128], index: 5, kind: input, shape index: {}]  }
   0x1   :  { %v62_v0 = vld [vmem:[%s10931_s1 + $0x18] sm:$0xff]  ;;  %v61_v1 = vld [vmem:[%s10931_s1 + $0x10] sm:$0xff]  ;;  %v27_v2 = vld [vmem:[%s10934_s0] sm:$0xff]  ;;  %vm928_vm4 = vcmask 1042432   ;;  %vm1128_vm5 = vcmask 1043456   ;;  %vm1328_vm6 = vcmask 1044480  }
   0x2   :  { %6077 = vmatprep.subr.mxu0 %v62_v0  ;;  %v60_v3 = vld [vmem:[%s10931_s1 + $0x8] sm:$0xff]  ;;  %6085 = vmatprep.mubr.msk.f32.mxu0 %vm63_vm0, %v27_v2  ;;  %v59_v4 = vld [vmem:[%s10931_s1] sm:$0xff]  ;;  %v29_v6 = vld [vmem:[%s10934_s0 + $0x10] sm:$0xff]  ;;  %v387_v45 = vshrl.u32 %v386_v44, 7  ;;  %vm1528_vm7 = vcmask 1045504   ;;  %vm1728_vm8 = vcmask 1046528  }
   0x3   :  { %6078 = vmatpush3.msra.mxu0 %v62_v0  ;;  %v28_v5 = vld [vmem:[%s10934_s0 + $0x8] sm:$0xff]  ;;  %v30_v7 = vld [vmem:[%s10934_s0 + $0x18] sm:$0xff]  ;;  %v31_v8 = vld [vmem:[%s10934_s0 + $0x20] sm:$0xff]  ;;  %vm2090_vm9 = vcmask 523264  }
   0x4   :  { %6079 = vmatprep.subr.mxu0 %v61_v1  ;;  %v2089_v9 = vld [vmem:[%s10935_s3 + $0x38] sm:$0xff]  ;;  %v32_v10 = vld [vmem:[%s10934_s0 + $0x28] sm:$0xff]  ;;  %v33_v11 = vld [vmem:[%s10934_s0 + $0x30] sm:$0xff]  ;;  %v7058_v46 = vsub.s32 6, %v387_v45  ;;  %v7060_v47 = vsub.s32 5, %v387_v45  ;;  %v7065_v49 = vsub.s32 4, %v387_v45 }
   0x5   :  { %6080 = vmatpush3.msra.mxu0 %v61_v1  ;;  %6349 = vmatprep.subr.mxu1 %v2089_v9  ;;  %v34_v12 = vld [vmem:[%s10934_s0 + $0x38] sm:$0xff]  ;;  %v35_v13 = vld [vmem:[%s10934_s0 + $0x40] sm:$0xff]  ;;  %v36_v14 = vld [vmem:[%s10934_s0 + $0x48] sm:$0xff]  ;;  %v7067_v50 = vsub.s32 3, %v387_v45  ;;  %v7069_v51 = vsub.s32 0, %v387_v45  ;;  %v7071_v52 = vsub.s32 2, %v387_v45 }
   0x6   :  { %6081 = vmatprep.subr.mxu0 %v60_v3  ;;  %6357 = vmatpush3.msra.mxu1 %v2089_v9  ;;  %v37_v15 = vld [vmem:[%s10934_s0 + $0x50] sm:$0xff]  ;;  %v38_v16 = vld [vmem:[%s10934_s0 + $0x58] sm:$0xff]  ;;  %v39_v17 = vld [vmem:[%s10934_s0 + $0x60] sm:$0xff]  ;;  %11164 = vst [vmem:[#allocation7_spill] sm:$0xff] %v7058_v46  ;;  %v7073_v53 = vsub.s32 1, %v387_v45  ;;  %v7096_v61 = vsub.s32 7, %v387_v45 }
   0x7   :  { %6082 = vmatpush3.msra.mxu0 %v60_v3  ;;  %v40_v18 = vld [vmem:[%s10934_s0 + $0x68] sm:$0xff]  ;;  %v41_v19 = vld [vmem:[%s10934_s0 + $0x70] sm:$0xff]  ;;  %v42_v20 = vld [vmem:[%s10934_s0 + $0x78] sm:$0xff]  ;;  %11165 = vst [vmem:[#allocation8_spill] sm:$0xff] %v7060_v47  ;;  %v7107_v3 = vand.u32 127, %v386_v44 }
   0x8   :  { %6083 = vmatprep.subr.mxu0 %v59_v4  ;;  %v43_v21 = vld [vmem:[%s10934_s0 + $0x80] sm:$0xff]  ;;  %v44_v22 = vld [vmem:[%s10934_s0 + $0x88] sm:$0xff]  ;;  %v45_v23 = vld [vmem:[%s10934_s0 + $0x90] sm:$0xff]  ;;  %11166 = vst [vmem:[#allocation9_spill] sm:$0xff] %v7065_v49 }
   0x9   :  { %6084 = vmatpush3.msra.mxu0 %v59_v4  ;;  %v46_v24 = vld [vmem:[%s10934_s0 + $0x98] sm:$0xff]  ;;  %v47_v25 = vld [vmem:[%s10934_s0 + $0xa0] sm:$0xff]  ;;  %v48_v26 = vld [vmem:[%s10934_s0 + $0xa8] sm:$0xff]  ;;  %11167 = vst [vmem:[#allocation10_spill] sm:$0xff] %v7067_v50  ;;  %vm3542_vm1 = vcmp.lt.s32.totalorder %v7107_v3, 64 }
   0xa   :  { %6086 = vmatmul.mubr.msk.f32.vlgmr.msra.gmra.mxu0 %vm63_vm0, %v28_v5  ;;  %6133 = vmatprep.subr.mxu0 %v2089_v9  ;;  %v49_v27 = vld [vmem:[%s10934_s0 + $0xb0] sm:$0xff]  ;;  %v50_v28 = vld [vmem:[%s10934_s0 + $0xb8] sm:$0xff]  ;;  %v51_v29 = vld [vmem:[%s10934_s0 + $0xc0] sm:$0xff]  ;;  %11168 = vst [vmem:[#allocation11_spill] sm:$0xff] %v7069_v51 }
   0xb   :  { %6088 = vmatprep.mubr.msk.f32.mxu0 %vm63_vm0, %v29_v6  ;;  %6134 = vmatpush3.msra.mxu0 %v2089_v9  ;;  %v52_v30 = vld [vmem:[%s10934_s0 + $0xc8] sm:$0xff]  ;;  %v53_v31 = vld [vmem:[%s10934_s0 + $0xd0] sm:$0xff]  ;;  %v54_v32 = vld [vmem:[%s10934_s0 + $0xd8] sm:$0xff]  ;;  %11169 = vst [vmem:[#allocation12_spill] sm:$0xff] %v7071_v52 }
   0xc   :  { %v55_v33 = vld [vmem:[%s10934_s0 + $0xe0] sm:$0xff]  ;;  %v56_v34 = vld [vmem:[%s10934_s0 + $0xe8] sm:$0xff]  ;;  %v57_v35 = vld [vmem:[%s10934_s0 + $0xf0] sm:$0xff]  ;;  %11170 = vst [vmem:[#allocation13_spill] sm:$0xff] %v7073_v53 }
   0xd   :  { %v58_v36 = vld [vmem:[%s10934_s0 + $0xf8] sm:$0xff]  ;;  %v2088_v37 = vld [vmem:[%s10935_s3 + $0x30] sm:$0xff]  ;;  %v2087_v38 = vld [vmem:[%s10935_s3 + $0x28] sm:$0xff]  ;;  %11171 = vst [vmem:[#allocation14_spill] sm:$0xff] %v7096_v61 }
   0xe   :  { %6089 = vmatmul.mubr.msk.f32.gmra.mxu0 %vm63_vm0, %v30_v7  ;;  %6135 = vmatprep.subr.mxu0 %v2088_v37  ;;  %v2086_v39 = vld [vmem:[%s10935_s3 + $0x20] sm:$0xff]  ;;  %v2085_v40 = vld [vmem:[%s10935_s3 + $0x18] sm:$0xff]  ;;  %v2084_v41 = vld [vmem:[%s10935_s3 + $0x10] sm:$0xff]  ;;  %11173 = vst [vmem:[#allocation16_spill] sm:$0xff] %v7107_v3 }
   0xf   :  { %6091 = vmatprep.mubr.msk.f32.mxu0 %vm63_vm0, %v31_v8  ;;  %6350 = vmatprep.subr.mxu1 %v2088_v37  ;;  %v2083_v42 = vld [vmem:[%s10935_s3 + $0x8] sm:$0xff]  ;;  %v2082_v43 = vld [vmem:[%s10935_s3] sm:$0xff] }
  0x10   :  { %6136 = vmatpush3.msra.mxu0 %v2088_v37  ;;  %6358 = vmatpush3.msra.mxu1 %v2088_v37  ;;  %v385_v48 = vld [vmem:[%s10936_s2 + $0x8] sm:$0xff]  ;;  %v7103_v0 = vld [vmem:[%s10937_s4] sm:$0xf] }
  0x11   :  { %6137 = vmatprep.subr.mxu0 %v2087_v38  ;;  %6351 = vmatprep.subr.mxu1 %v2087_v38  ;;  %v7076_v54 = vrot.slane %v385_v48, %v7058_v46  ;;  %v7079_v55 = vrot.slane %v385_v48, %v7060_v47  ;;  %v7082_v56 = vrot.slane %v385_v48, %v7065_v49 }
  0x12   :  { %6092 = vmatmul.mubr.msk.f32.gmra.mxu0 %vm63_vm0, %v32_v10  ;;  %6359 = vmatpush3.msra.mxu1 %v2087_v38  ;;  %v7085_v57 = vrot.slane %v385_v48, %v7067_v50  ;;  %v7088_v58 = vrot.slane %v385_v48, %v7071_v52  ;;  %v7091_v59 = vrot.slane %v385_v48, %v7073_v53 }
  0x13   :  { %6094 = vmatprep.mubr.msk.f32.mxu0 %vm63_vm0, %v33_v11  ;;  %6138 = vmatpush3.msra.mxu0 %v2087_v38  ;;  %v7094_v60 = vrot.slane %v385_v48, %v7069_v51  ;;  %v462_v62 = vmul.f32 0.0, %v7076_v54  ;;  %v662_v63 = vmul.f32 0.0, %v7079_v55  ;;  %11172 = vst [vmem:[#allocation15_spill] sm:$0xff] %v7103_v0  ;;  %v862_v1 = vmul.f32 0.0, %v7082_v56 }
  0x14   :  { %6139 = vmatprep.subr.mxu0 %v2086_v39  ;;  %6352 = vmatprep.subr.mxu1 %v2086_v39  ;;  %v1062_v2 = vmul.f32 0.0, %v7085_v57  ;;  %v1262_v4 = vmul.f32 0.0, %v7088_v58  ;;  %v1462_v5 = vmul.f32 0.0, %v7091_v59  ;;  %v7113_v7 = vrot.slane %v385_v48, %v7096_v61 }
  0x15   :  { %6140 = vmatpush3.msra.mxu0 %v2086_v39  ;;  %6360 = vmatpush3.msra.mxu1 %v2086_v39  ;;  %v1662_v6 = vmul.f32 0.0, %v7094_v60  ;;  %v7118_v8 = vrot.slane %v7103_v0, %v7069_v51  ;;  %v7120_v9 = vrot.slane %v462_v62, 7  ;;  %v7122_v10 = vrot.slane %v662_v63, 6 }
  0x16   :  { %6095 = vmatmul.mubr.msk.f32.gmra.mxu0 %vm63_vm0, %v34_v12  ;;  %6141 = vmatprep.subr.mxu0 %v2085_v40  ;;  %v7124_v11 = vrot.slane %v862_v1, 5  ;;  %v7126_v12 = vrot.slane %v1062_v2, 4 }
  0x17   :  { %6097 = vmatprep.mubr.msk.f32.mxu0 %vm63_vm0, %v35_v13  ;;  %6353 = vmatprep.subr.mxu1 %v2085_v40 }
  0x18   :  { %6142 = vmatpush3.msra.mxu0 %v2085_v40  ;;  %6361 = vmatpush3.msra.mxu1 %v2085_v40 }
  0x19   :  { %6143 = vmatprep.subr.mxu0 %v2084_v41  ;;  %6354 = vmatprep.subr.mxu1 %v2084_v41 }
  0x1a   :  { %6098 = vmatmul.mubr.msk.f32.gmra.mxu0 %vm63_vm0, %v36_v14  ;;  %6362 = vmatpush3.msra.mxu1 %v2084_v41  ;;  %v7130_v14 = vrot.slane %v1262_v4, 3 }
  0x1b   :  { %6100 = vmatprep.mubr.msk.f32.mxu0 %vm63_vm0, %v37_v15  ;;  %6144 = vmatpush3.msra.mxu0 %v2084_v41  ;;  %v7132_v15 = vrot.slane %v1462_v5, 2 }
  0x1c   :  { %6145 = vmatprep.subr.mxu0 %v2083_v42  ;;  %6355 = vmatprep.subr.mxu1 %v2083_v42 }
  0x1d   :  { %6146 = vmatpush3.msra.mxu0 %v2083_v42  ;;  %6363 = vmatpush3.msra.mxu1 %v2083_v42 }
  0x1e   :  { %6101 = vmatmul.mubr.msk.f32.gmra.mxu0 %vm63_vm0, %v38_v16  ;;  %6147 = vmatprep.subr.mxu0 %v2082_v43  ;;  %v7134_v16 = vrot.slane %v1662_v6, 1 }
  0x1f   :  { %6103 = vmatprep.mubr.msk.f32.mxu0 %vm63_vm0, %v39_v17  ;;  %6356 = vmatprep.subr.mxu1 %v2082_v43 }
  0x20   :  { %6148 = vmatpush3.msra.mxu0 %v2082_v43  ;;  %6364 = vmatpush3.msra.mxu1 %v2082_v43 }
  0x22   :  { %6104 = vmatmul.mubr.msk.f32.gmra.mxu0 %vm63_vm0, %v40_v18 }
  0x23   :  { %6106 = vmatprep.mubr.msk.f32.mxu0 %vm63_vm0, %v41_v19 }
  0x26   :  { %6107 = vmatmul.mubr.msk.f32.gmra.mxu0 %vm63_vm0, %v42_v20 }
  0x27   :  { %6109 = vmatprep.mubr.msk.f32.mxu0 %vm63_vm0, %v43_v21 }
  0x2a   :  { %6110 = vmatmul.mubr.msk.f32.gmra.mxu0 %vm63_vm0, %v44_v22 }
  0x2b   :  { %6112 = vmatprep.mubr.msk.f32.mxu0 %vm63_vm0, %v45_v23 }
  0x2e   :  { %6113 = vmatmul.mubr.msk.f32.gmra.mxu0 %vm63_vm0, %v46_v24 }
  0x2f   :  { %6115 = vmatprep.mubr.msk.f32.mxu0 %vm63_vm0, %v47_v25 }
  0x32   :  { %6116 = vmatmul.mubr.msk.f32.gmra.mxu0 %vm63_vm0, %v48_v26 }
  0x33   :  { %6118 = vmatprep.mubr.msk.f32.mxu0 %vm63_vm0, %v49_v27 }
  0x36   :  { %6119 = vmatmul.mubr.msk.f32.gmra.mxu0 %vm63_vm0, %v50_v28 }
  0x37   :  { %6121 = vmatprep.mubr.msk.f32.mxu0 %vm63_vm0, %v51_v29 }
  0x3a   :  { %6122 = vmatmul.mubr.msk.f32.gmra.mxu0 %vm63_vm0, %v52_v30 }
  0x3b   :  { %6124 = vmatprep.mubr.msk.f32.mxu0 %vm63_vm0, %v53_v31 }
  0x3e   :  { %6125 = vmatmul.mubr.msk.f32.gmra.mxu0 %vm63_vm0, %v54_v32 }
  0x3f   :  { %6127 = vmatprep.mubr.msk.f32.mxu0 %vm63_vm0, %v55_v33 }
  0x42   :  { %6128 = vmatmul.mubr.msk.f32.gmra.mxu0 %vm63_vm0, %v56_v34 }
  0x43   :  { %6130 = vmatprep.mubr.msk.f32.mxu0 %vm63_vm0, %v57_v35 }
  0x46   :  { %6131 = vmatmul.mubr.msk.f32.gmra.mxu0 %vm63_vm0, %v58_v36 }
  0xca   :  { %v7128_v13 = vpop.f32.mrf.mxu0 }
  0xcb   :  { %11174 = vst [vmem:[#allocation17_spill] sm:$0xff] %v7128_v13  ;;  %v395_v17 = vmul.f32 %v7128_v13, %v7113_v7  ;;  %v464_v18 = vmul.f32 %v7128_v13, %v7076_v54  ;;  %v664_v19 = vmul.f32 %v7128_v13, %v7079_v55  ;;  %v864_v20 = vmul.f32 %v7128_v13, %v7082_v56 }
  0xcc   :  { %v1064_v21 = vmul.f32 %v7128_v13, %v7085_v57  ;;  %v7148_v22 = vmul.f32 %v7128_v13, %v7088_v58  ;;  %v7152_v23 = vmul.f32 %v7128_v13, %v7091_v59  ;;  %v7156_v24 = vmul.f32 %v7128_v13, %v7094_v60  ;;  %v7158_v25 = vpop.f32.mrf.mxu0 }
  0xcd   :  { %11175 = vst [vmem:[#allocation18_spill] sm:$0xff] %v7158_v25  ;;  %v427_v26 = vadd.f32 %v395_v17, %v7118_v8  ;;  %v532_v27 = vrot.slane %v464_v18, 7  ;;  %v732_v28 = vrot.slane %v664_v19, 6  ;;  %v932_v29 = vrot.slane %v864_v20, 5 }
  0xce   :  { %v1132_v30 = vrot.slane %v1064_v21, 4  ;;  %v7164_v34 = vpop.f32.mrf.mxu0  ;;  %v394_v38 = vmul.f32 %v7113_v7, %v7158_v25  ;;  %v7180_v41 = vmul.f32 %v7076_v54, %v7158_v25  ;;  %v7184_v42 = vmul.f32 %v7079_v55, %v7158_v25 }
  0xcf   :  { %11176 = vst [vmem:[#allocation19_spill] sm:$0xff] %v7164_v34  ;;  %v533_v35 = vsel %vm528_vm2, %v7120_v9, %v532_v27  ;;  %v733_v36 = vsel %vm728_vm3, %v7122_v10, %v732_v28  ;;  %v933_v37 = vsel %vm928_vm4, %v7124_v11, %v932_v29  ;;  %v7193_v45 = vmul.f32 %v7082_v56, %v7158_v25 }
  0xd0   :  { %v627_v39 = vadd.f32 %v533_v35, %v427_v26  ;;  %v7176_v40 = vsel %vm1128_vm5, %v7126_v12, %v1132_v30  ;;  %v7186_v43 = vpop.f32.mrf.mxu0  ;;  %v7189_v44 = vadd.f32 %v394_v38, %v7118_v8  ;;  %v7197_v48 = vmul.f32 %v7085_v57, %v7158_v25 }
  0xd1   :  { %11177 = vst [vmem:[#allocation20_spill] sm:$0xff] %v7186_v43  ;;  %v397_v62 = vmul.f32 %v7164_v34, %v7113_v7  ;;  %v7205_v4 = vmul.f32 %v7164_v34, %v7076_v54  ;;  %v7216_v19 = vmul.f32 %v7164_v34, %v7079_v55  ;;  %v7223_v26 = vmul.f32 %v7164_v34, %v7082_v56 }
  0xd2   :  { %v827_v63 = vadd.f32 %v733_v36, %v627_v39  ;;  %v7207_v5 = vpop.f32.mrf.mxu0  ;;  %v7227_v27 = vmul.f32 %v7164_v34, %v7085_v57  ;;  %v7234_v30 = vmul.f32 %v7076_v54, %v7186_v43 }
  0xd3   :  { %11178 = vst [vmem:[#allocation21_spill] sm:$0xff] %v7207_v5  ;;  %v7212_v18 = vadd.f32 %v397_v62, %v7118_v8  ;;  %v399_v35 = vmul.f32 %v7207_v5, %v7113_v7  ;;  %v7240_v36 = vmul.f32 %v7207_v5, %v7076_v54  ;;  %v7246_v39 = vmul.f32 %v7207_v5, %v7079_v55 }
  0xd4   :  { %v7218_v20 = vadd.f32 %v933_v37, %v827_v63  ;;  %v7229_v28 = vpop.f32.mrf.mxu0  ;;  %v7250_v62 = vmul.f32 %v7207_v5, %v7082_v56  ;;  %v7261_v38 = vmul.f32 %v7207_v5, %v7085_v57 }
  0xd5   :  { %11179 = vst [vmem:[#allocation22_spill] sm:$0xff] %v7229_v28  ;;  %v7256_v21 = vadd.f32 %v399_v35, %v7118_v8  ;;  %v398_v31 = vmul.f32 %v7113_v7, %v7229_v28  ;;  %v7269_v17 = vmul.f32 %v7076_v54, %v7229_v28  ;;  %v7276_v33 = vmul.f32 %v7079_v55, %v7229_v28 }
  0xd6   :  { %v7252_v63 = vpop.f32.mrf.mxu0  ;;  %v7280_v37 = vmul.f32 %v7082_v56, %v7229_v28  ;;  %v7284_v32 = vmul.f32 %v7085_v57, %v7229_v28 }
  0xd7   :  { %11180 = vst [vmem:[#allocation23_spill] sm:$0xff] %v7252_v63  ;;  %v7287_v6 = vadd.f32 %v398_v31, %v7118_v8  ;;  %v401_v35 = vmul.f32 %v7252_v63, %v7113_v7  ;;  %v7294_v1 = vmul.f32 %v7252_v63, %v7076_v54  ;;  %v7303_v31 = vmul.f32 %v7252_v63, %v7079_v55 }
  0xd8   :  { %v7271_v29 = vpop.f32.mrf.mxu0  ;;  %v7311_v47 = vmul.f32 %v7252_v63, %v7082_v56  ;;  %v7315_v13 = vmul.f32 %v7252_v63, %v7085_v57 }
  0xd9   :  { %11181 = vst [vmem:[#allocation24_spill] sm:$0xff] %v7271_v29  ;;  %11182 = vst [vmem:[#allocation25_spill] sm:$0xff] %v7294_v1  ;;  %v7306_v2 = vadd.f32 %v401_v35, %v7118_v8  ;;  %v400_v49 = vmul.f32 %v7113_v7, %v7271_v29  ;;  %v7324_v35 = vmul.f32 %v7076_v54, %v7271_v29 }
  0xda   :  { %v7296_v0 = vpop.f32.mrf.mxu0  ;;  %11184 = vst [vmem:[#allocation27_spill] sm:$0xff] %v7303_v31  ;;  %11186 = vst [vmem:[#allocation29_spill] sm:$0xff] %v7311_v47  ;;  %v7328_v46 = vmul.f32 %v7079_v55, %v7271_v29  ;;  %v7334_v51 = vmul.f32 %v7082_v56, %v7271_v29  ;;  %v7338_v61 = vmul.f32 %v7085_v57, %v7271_v29 }
  0xdb   :  { %11183 = vst [vmem:[#allocation26_spill] sm:$0xff] %v7296_v0  ;;  %11185 = vst [vmem:[#allocation28_spill] sm:$0xff] %v7306_v2  ;;  %v7343_v63 = vadd.f32 %v400_v49, %v7118_v8  ;;  %v403_v52 = vmul.f32 %v7296_v0, %v7113_v7  ;;  %v7353_v47 = vmul.f32 %v7296_v0, %v7076_v54 }
  0xdc   :  { %11187 = vst [vmem:[#allocation30_spill] sm:$0xff] %v7315_v13  ;;  %v7317_v3 = vpop.f32.mrf.mxu0  ;;  %11189 = vst [vmem:[#allocation32_spill] sm:$0xff] %v7324_v35  ;;  %v7357_v1 = vmul.f32 %v7296_v0, %v7079_v55  ;;  %v7366_v2 = vmul.f32 %v7296_v0, %v7082_v56  ;;  %v7370_v13 = vmul.f32 %v7296_v0, %v7085_v57 }
  0xdd   :  { %11188 = vst [vmem:[#allocation31_spill] sm:$0xff] %v7317_v3  ;;  %11190 = vst [vmem:[#allocation33_spill] sm:$0xff] %v7328_v46  ;;  %v7362_v31 = vadd.f32 %v403_v52, %v7118_v8  ;;  %v402_v50 = vmul.f32 %v7113_v7, %v7317_v3  ;;  %v7382_v52 = vmul.f32 %v7079_v55, %v7317_v3 }
  0xde   :  { %11191 = vst [vmem:[#allocation34_spill] sm:$0xff] %v7334_v51  ;;  %11192 = vst [vmem:[#allocation35_spill] sm:$0xff] %v7338_v61  ;;  %v7340_v53 = vpop.f32.mrf.mxu0  ;;  %v7378_v51 = vmul.f32 %v7076_v54, %v7317_v3  ;;  %v7393_v61 = vmul.f32 %v7082_v56, %v7317_v3 }
  0xdf   :  { %11193 = vst [vmem:[#allocation36_spill] sm:$0xff] %v7340_v53  ;;  %11194 = vst [vmem:[#allocation37_spill] sm:$0xff] %v7343_v63  ;;  %v7389_v63 = vadd.f32 %v402_v50, %v7118_v8  ;;  %v405_v0 = vmul.f32 %v7340_v53, %v7113_v7  ;;  %v7408_v46 = vmul.f32 %v7340_v53, %v7076_v54 }
  0xe0   :  { %11195 = vst [vmem:[#allocation38_spill] sm:$0xff] %v7353_v47  ;;  %11196 = vst [vmem:[#allocation39_spill] sm:$0xff] %v7357_v1  ;;  %v7359_v49 = vpop.f32.mrf.mxu0  ;;  %v7399_v47 = vmul.f32 %v7085_v57, %v7317_v3  ;;  %v7412_v29 = vmul.f32 %v7340_v53, %v7079_v55  ;;  %v7416_v1 = vmul.f32 %v7340_v53, %v7082_v56 }
  0xe1   :  { %11197 = vst [vmem:[#allocation40_spill] sm:$0xff] %v7359_v49  ;;  %11198 = vst [vmem:[#allocation41_spill] sm:$0xff] %v7362_v31  ;;  %v7420_v3 = vadd.f32 %v405_v0, %v7118_v8  ;;  %v7424_v50 = vmul.f32 %v7340_v53, %v7085_v57 }
  0xe2   :  { %11199 = vst [vmem:[#allocation42_spill] sm:$0xff] %v7366_v2  ;;  %11200 = vst [vmem:[#allocation43_spill] sm:$0xff] %v7370_v13  ;;  %v7384_v31 = vpop.f32.mrf.mxu0  ;;  %v7435_v13 = vmul.f32 %v7076_v54, %v7359_v49 }
  0xe3   :  { %11201 = vst [vmem:[#allocation44_spill] sm:$0xff] %v7378_v51  ;;  %11202 = vst [vmem:[#allocation45_spill] sm:$0xff] %v7382_v52  ;;  %v7460_v0 = vmul.f32 %v7384_v31, %v7076_v54  ;;  %v7470_v35 = vmul.f32 %v7384_v31, %v7082_v56 }
  0xe4   :  { %11203 = vst [vmem:[#allocation46_spill] sm:$0xff] %v7384_v31  ;;  %11204 = vst [vmem:[#allocation47_spill] sm:$0xff] %v7389_v63  ;;  %v7403_v2 = vpop.f32.mrf.mxu0  ;;  %v7447_v63 = vmul.f32 %v7082_v56, %v7359_v49 }
  0xe5   :  { %11205 = vst [vmem:[#allocation48_spill] sm:$0xff] %v7393_v61  ;;  %11206 = vst [vmem:[#allocation49_spill] sm:$0xff] %v7399_v47  ;;  %v404_v61 = vmul.f32 %v7113_v7, %v7359_v49  ;;  %v7489_v5 = vmul.f32 %v7076_v54, %v7403_v2  ;;  %v7496_v47 = vmul.f32 %v7079_v55, %v7403_v2 }
  0xe6   :  { %11207 = vst [vmem:[#allocation50_spill] sm:$0xff] %v7403_v2  ;;  %11208 = vst [vmem:[#allocation51_spill] sm:$0xff] %v7408_v46  ;;  %v7428_v52 = vpop.f32.mrf.mxu0  ;;  %v7466_v46 = vmul.f32 %v7384_v31, %v7079_v55 }
  0xe7   :  { %11209 = vst [vmem:[#allocation52_spill] sm:$0xff] %v7412_v29  ;;  %11210 = vst [vmem:[#allocation53_spill] sm:$0xff] %v7416_v1  ;;  %v7439_v53 = vadd.f32 %v404_v61, %v7118_v8  ;;  %v7454_v1 = vmul.f32 %v7085_v57, %v7359_v49  ;;  %v407_v61 = vmul.f32 %v7384_v31, %v7113_v7 }
  0xe8   :  { %11211 = vst [vmem:[#allocation54_spill] sm:$0xff] %v7420_v3  ;;  %11212 = vst [vmem:[#allocation55_spill] sm:$0xff] %v7424_v50  ;;  %v7443_v3 = vmul.f32 %v7079_v55, %v7359_v49  ;;  %v7449_v51 = vpop.f32.mrf.mxu0  ;;  %v7481_v29 = vmul.f32 %v7384_v31, %v7085_v57  ;;  %v7500_v50 = vmul.f32 %v7082_v56, %v7403_v2 }
  0xe9   :  { %11213 = vst [vmem:[#allocation56_spill] sm:$0xff] %v7428_v52  ;;  %11214 = vst [vmem:[#allocation57_spill] sm:$0xff] %v7435_v13  ;;  %v7476_v13 = vadd.f32 %v407_v61, %v7118_v8  ;;  %v409_v61 = vmul.f32 %v7428_v52, %v7113_v7 }
  0xea   :  { %11215 = vst [vmem:[#allocation58_spill] sm:$0xff] %v7439_v53  ;;  %11216 = vst [vmem:[#allocation59_spill] sm:$0xff] %v7443_v3  ;;  %v7472_v49 = vpop.f32.mrf.mxu0  ;;  %v406_v3 = vmul.f32 %v7113_v7, %v7403_v2 }
  0xeb   :  { %11217 = vst [vmem:[#allocation60_spill] sm:$0xff] %v7447_v63  ;;  %11218 = vst [vmem:[#allocation61_spill] sm:$0xff] %v7449_v51  ;;  %v7504_v63 = vmul.f32 %v7085_v57, %v7403_v2  ;;  %v7558_v2 = vmul.f32 %v7085_v57, %v7449_v51 }
  0xec   :  { %11219 = vst [vmem:[#allocation62_spill] sm:$0xff] %v7454_v1  ;;  %11220 = vst [vmem:[#allocation63_spill] sm:$0xff] %v7460_v0  ;;  %v7491_v53 = vpop.f32.mrf.mxu0  ;;  %v7507_v31 = vadd.f32 %v406_v3, %v7118_v8  ;;  %v7523_v3 = vmul.f32 %v7428_v52, %v7079_v55  ;;  %v7586_v1 = vmul.f32 %v7472_v49, %v7082_v56 }
  0xed   :  { %11221 = vst [vmem:[#allocation64_spill] sm:$0xff] %v7466_v46  ;;  %11222 = vst [vmem:[#allocation65_spill] sm:$0xff] %v7470_v35  ;;  %v7526_v35 = vadd.f32 %v409_v61, %v7118_v8  ;;  %v7544_v61 = vmul.f32 %v7076_v54, %v7449_v51 }
  0xee   :  { %11223 = vst [vmem:[#allocation66_spill] sm:$0xff] %v7472_v49  ;;  %11224 = vst [vmem:[#allocation67_spill] sm:$0xff] %v7476_v13  ;;  %v7516_v46 = vpop.f32.mrf.mxu0  ;;  %v7535_v13 = vmul.f32 %v7428_v52, %v7085_v57 }
  0xef   :  { %11225 = vst [vmem:[#allocation68_spill] sm:$0xff] %v7481_v29  ;;  %11226 = vst [vmem:[#allocation69_spill] sm:$0xff] %v7489_v5  ;;  %v7514_v29 = vmul.f32 %v7428_v52, %v7076_v54  ;;  %v7531_v5 = vmul.f32 %v7428_v52, %v7082_v56  ;;  %v411_v52 = vmul.f32 %v7472_v49, %v7113_v7 }
  0xf0   :  { %11227 = vst [vmem:[#allocation70_spill] sm:$0xff] %v7491_v53  ;;  %11228 = vst [vmem:[#allocation71_spill] sm:$0xff] %v7496_v47  ;;  %v7537_v0 = vpop.f32.mrf.mxu0 }
  0xf1   :  { %11229 = vst [vmem:[#allocation72_spill] sm:$0xff] %v7500_v50  ;;  %11230 = vst [vmem:[#allocation73_spill] sm:$0xff] %v7504_v63  ;;  %v408_v63 = vmul.f32 %v7113_v7, %v7449_v51  ;;  %v7582_v47 = vadd.f32 %v411_v52, %v7118_v8  ;;  %v7602_v52 = vmul.f32 %v7079_v55, %v7491_v53 }
  0xf2   :  { %11231 = vst [vmem:[#allocation74_spill] sm:$0xff] %v7507_v31  ;;  %11232 = vst [vmem:[#allocation75_spill] sm:$0xff] %v7514_v29  ;;  %v7548_v31 = vmul.f32 %v7079_v55, %v7449_v51  ;;  %v7554_v29 = vmul.f32 %v7082_v56, %v7449_v51  ;;  %v7577_v51 = vmul.f32 %v7472_v49, %v7079_v55 }
  0xf3   :  { %11233 = vst [vmem:[#allocation76_spill] sm:$0xff] %v7516_v46  ;;  %11234 = vst [vmem:[#allocation77_spill] sm:$0xff] %v7523_v3  ;;  %v7560_v3 = vpop.f32.mrf.mxu0  ;;  %v7563_v50 = vadd.f32 %v408_v63, %v7118_v8 }
  0xf4   :  { %11235 = vst [vmem:[#allocation78_spill] sm:$0xff] %v7526_v35  ;;  %11236 = vst [vmem:[#allocation79_spill] sm:$0xff] %v7531_v5  ;;  %v7573_v5 = vmul.f32 %v7472_v49, %v7076_v54  ;;  %v410_v35 = vmul.f32 %v7113_v7, %v7491_v53 }
  0xf5   :  { %11237 = vst [vmem:[#allocation80_spill] sm:$0xff] %v7535_v13  ;;  %11238 = vst [vmem:[#allocation81_spill] sm:$0xff] %v7537_v0  ;;  %v7579_v63 = vpop.f32.mrf.mxu0  ;;  %v7590_v13 = vmul.f32 %v7472_v49, %v7085_v57  ;;  %v413_v49 = vmul.f32 %v7516_v46, %v7113_v7 }
  0xf6   :  { %11239 = vst [vmem:[#allocation82_spill] sm:$0xff] %v7544_v61  ;;  %11240 = vst [vmem:[#allocation83_spill] sm:$0xff] %v7548_v31  ;;  %v7607_v31 = vadd.f32 %v410_v35, %v7118_v8  ;;  %v7619_v61 = vmul.f32 %v7085_v57, %v7491_v53  ;;  %v7642_v35 = vmul.f32 %v7516_v46, %v7085_v57 }
  0xf7   :  { %11241 = vst [vmem:[#allocation84_spill] sm:$0xff] %v7554_v29  ;;  %11242 = vst [vmem:[#allocation85_spill] sm:$0xff] %v7558_v2  ;;  %v7611_v2 = vmul.f32 %v7082_v56, %v7491_v53  ;;  %v7613_v29 = vpop.f32.mrf.mxu0 }
  0xf8   :  { %11243 = vst [vmem:[#allocation86_spill] sm:$0xff] %v7560_v3  ;;  %11244 = vst [vmem:[#allocation87_spill] sm:$0xff] %v7563_v50  ;;  %v7598_v50 = vmul.f32 %v7076_v54, %v7491_v53  ;;  %v412_v53 = vmul.f32 %v7113_v7, %v7537_v0 }
  0xf9   :  { %11245 = vst [vmem:[#allocation88_spill] sm:$0xff] %v7573_v5  ;;  %11246 = vst [vmem:[#allocation89_spill] sm:$0xff] %v7577_v51  ;;  %v7634_v5 = vmul.f32 %v7516_v46, %v7082_v56  ;;  %v7653_v51 = vpop.f32.mrf.mxu0 }
  0xfa   :  { %11247 = vst [vmem:[#allocation90_spill] sm:$0xff] %v7579_v63  ;;  %11248 = vst [vmem:[#allocation91_spill] sm:$0xff] %v7582_v47  ;;  %v7626_v47 = vmul.f32 %v7516_v46, %v7076_v54 }
  0xfb   :  { %11249 = vst [vmem:[#allocation92_spill] sm:$0xff] %v7586_v1  ;;  %11250 = vst [vmem:[#allocation93_spill] sm:$0xff] %v7590_v13  ;;  %v7630_v13 = vmul.f32 %v7516_v46, %v7079_v55  ;;  %v7638_v1 = vadd.f32 %v413_v49, %v7118_v8  ;;  %v7657_v46 = vadd.f32 %v412_v53, %v7118_v8 }
  0xfc   :  { %11251 = vst [vmem:[#allocation94_spill] sm:$0xff] %v7598_v50  ;;  %11252 = vst [vmem:[#allocation95_spill] sm:$0xff] %v7602_v52  ;;  %v7651_v50 = vmul.f32 %v7076_v54, %v7537_v0  ;;  %v7665_v52 = vmul.f32 %v7082_v56, %v7537_v0  ;;  %v415_v49 = vmul.f32 %v7560_v3, %v7113_v7 }
  0xfd   :  { %11253 = vst [vmem:[#allocation96_spill] sm:$0xff] %v7607_v31  ;;  %11254 = vst [vmem:[#allocation97_spill] sm:$0xff] %v7611_v2  ;;  %v7670_v2 = vmul.f32 %v7085_v57, %v7537_v0  ;;  %v7676_v53 = vmul.f32 %v7560_v3, %v7076_v54  ;;  %v7686_v31 = vmul.f32 %v7560_v3, %v7082_v56 }
  0xfe   :  { %11255 = vst [vmem:[#allocation98_spill] sm:$0xff] %v7613_v29  ;;  %11256 = vst [vmem:[#allocation99_spill] sm:$0xff] %v7626_v47  ;;  %v7705_v47 = vmul.f32 %v7076_v54, %v7579_v63 }
  0xff   :  { %11257 = vst [vmem:[#allocation100_spill] sm:$0xff] %v7630_v13  ;;  %11258 = vst [vmem:[#allocation101_spill] sm:$0xff] %v7634_v5  ;;  %v7682_v13 = vmul.f32 %v7560_v3, %v7079_v55  ;;  %v7697_v5 = vpop.f32.mrf.mxu0 }
 0x100   :  { %11259 = vst [vmem:[#allocation102_spill] sm:$0xff] %v7638_v1  ;;  %11260 = vst [vmem:[#allocation103_spill] sm:$0xff] %v7642_v35  ;;  %v7661_v1 = vmul.f32 %v7079_v55, %v7537_v0  ;;  %v7690_v0 = vadd.f32 %v415_v49, %v7118_v8  ;;  %v7695_v35 = vmul.f32 %v7560_v3, %v7085_v57 }
 0x101   :  { %11261 = vst [vmem:[#allocation104_spill] sm:$0xff] %v7651_v50  ;;  %11262 = vst [vmem:[#allocation105_spill] sm:$0xff] %v7653_v51  ;;  %v414_v50 = vmul.f32 %v7113_v7, %v7579_v63  ;;  %v7714_v3 = vmul.f32 %v7082_v56, %v7579_v63  ;;  %v417_v49 = vmul.f32 %v7613_v29, %v7113_v7 }
 0x102   :  { %11263 = vst [vmem:[#allocation106_spill] sm:$0xff] %v7657_v46  ;;  %11264 = vst [vmem:[#allocation107_spill] sm:$0xff] %v7661_v1  ;;  %v7710_v46 = vmul.f32 %v7079_v55, %v7579_v63  ;;  %v7718_v1 = vmul.f32 %v7085_v57, %v7579_v63  ;;  %v7735_v63 = vmul.f32 %v7613_v29, %v7079_v55 }
 0x103   :  { %11265 = vst [vmem:[#allocation108_spill] sm:$0xff] %v7665_v52  ;;  %11266 = vst [vmem:[#allocation109_spill] sm:$0xff] %v7676_v53  ;;  %v7721_v52 = vadd.f32 %v414_v50, %v7118_v8  ;;  %v7737_v50 = vpop.f32.mrf.mxu0  ;;  %v7770_v53 = vmul.f32 %v7085_v57, %v7653_v51 }
 0x104   :  { %11267 = vst [vmem:[#allocation110_spill] sm:$0xff] %v7682_v13  ;;  %11268 = vst [vmem:[#allocation111_spill] sm:$0xff] %v7686_v31  ;;  %v7740_v31 = vadd.f32 %v417_v49, %v7118_v8  ;;  %v416_v13 = vmul.f32 %v7113_v7, %v7653_v51  ;;  %v7760_v49 = vmul.f32 %v7079_v55, %v7653_v51 }
 0x105   :  { %11269 = vst [vmem:[#allocation112_spill] sm:$0xff] %v7690_v0  ;;  %11270 = vst [vmem:[#allocation113_spill] sm:$0xff] %v7695_v35  ;;  %v7728_v35 = vmul.f32 %v7613_v29, %v7076_v54  ;;  %v7749_v0 = vmul.f32 %v7613_v29, %v7085_v57 }
 0x106   :  { %11271 = vst [vmem:[#allocation114_spill] sm:$0xff] %v7697_v5  ;;  %11272 = vst [vmem:[#allocation115_spill] sm:$0xff] %v7705_v47  ;;  %v7745_v47 = vmul.f32 %v7613_v29, %v7082_v56  ;;  %v7766_v29 = vmul.f32 %v7082_v56, %v7653_v51 }
 0x107   :  { %11273 = vst [vmem:[#allocation116_spill] sm:$0xff] %v7714_v3  ;;  %11274 = vst [vmem:[#allocation117_spill] sm:$0xff] %v7718_v1  ;;  %v7756_v1 = vmul.f32 %v7076_v54, %v7653_v51  ;;  %v7785_v51 = vmul.f32 %v7697_v5, %v7076_v54  ;;  %v7796_v3 = vmul.f32 %v7697_v5, %v7082_v56 }
 0x108   :  { %11275 = vst [vmem:[#allocation118_spill] sm:$0xff] %v7721_v52  ;;  %11276 = vst [vmem:[#allocation119_spill] sm:$0xff] %v7728_v35  ;;  %v419_v52 = vmul.f32 %v7697_v5, %v7113_v7 }
 0x109   :  { %11277 = vst [vmem:[#allocation120_spill] sm:$0xff] %v7735_v63  ;;  %11278 = vst [vmem:[#allocation121_spill] sm:$0xff] %v7737_v50  ;;  %v7773_v63 = vadd.f32 %v416_v13, %v7118_v8  ;;  %v7789_v13 = vmul.f32 %v7697_v5, %v7079_v55 }
 0x10a   :  { %11279 = vst [vmem:[#allocation122_spill] sm:$0xff] %v7740_v31  ;;  %11280 = vst [vmem:[#allocation123_spill] sm:$0xff] %v7745_v47  ;;  %v7779_v47 = vpop.f32.mrf.mxu0  ;;  %v7792_v35 = vadd.f32 %v419_v52, %v7118_v8  ;;  %v7800_v31 = vmul.f32 %v7697_v5, %v7085_v57  ;;  %v7812_v52 = vmul.f32 %v7079_v55, %v7737_v50 }
 0x10b   :  { %11281 = vst [vmem:[#allocation124_spill] sm:$0xff] %v7749_v0  ;;  %11282 = vst [vmem:[#allocation125_spill] sm:$0xff] %v7756_v1  ;;  %v418_v0 = vmul.f32 %v7113_v7, %v7737_v50  ;;  %v7829_v1 = vmul.f32 %v7085_v57, %v7737_v50  ;;  %v421_v5 = vmul.f32 %v7779_v47, %v7113_v7 }
 0x10c   :  { %11283 = vst [vmem:[#allocation126_spill] sm:$0xff] %v7760_v49  ;;  %11284 = vst [vmem:[#allocation127_spill] sm:$0xff] %v7766_v29  ;;  %v7823_v29 = vpop.f32.mrf.mxu0 }
 0x10d   :  { %11285 = vst [vmem:[#allocation128_spill] sm:$0xff] %v7770_v53  ;;  %11286 = vst [vmem:[#allocation129_spill] sm:$0xff] %v7773_v63  ;;  %v7808_v63 = vmul.f32 %v7076_v54, %v7737_v50  ;;  %v7817_v49 = vadd.f32 %v418_v0, %v7118_v8  ;;  %v7821_v53 = vmul.f32 %v7082_v56, %v7737_v50 }
 0x10e   :  { %11287 = vst [vmem:[#allocation130_spill] sm:$0xff] %v7779_v47  ;;  %11288 = vst [vmem:[#allocation131_spill] sm:$0xff] %v7785_v51  ;;  %v7844_v51 = vmul.f32 %v7779_v47, %v7082_v56  ;;  %v7852_v0 = vmul.f32 %v7779_v47, %v7085_v57  ;;  %v420_v50 = vmul.f32 %v7113_v7, %v7823_v29 }
 0x10f   :  { %11289 = vst [vmem:[#allocation132_spill] sm:$0xff] %v7789_v13  ;;  %11290 = vst [vmem:[#allocation133_spill] sm:$0xff] %v7792_v35  ;;  %v7836_v35 = vmul.f32 %v7779_v47, %v7076_v54  ;;  %v7840_v13 = vmul.f32 %v7779_v47, %v7079_v55  ;;  %v7869_v47 = vmul.f32 %v7079_v55, %v7823_v29 }
 0x110   :  { %11291 = vst [vmem:[#allocation134_spill] sm:$0xff] %v7796_v3  ;;  %11292 = vst [vmem:[#allocation135_spill] sm:$0xff] %v7800_v31  ;;  %v7848_v3 = vadd.f32 %v421_v5, %v7118_v8  ;;  %v7865_v31 = vadd.f32 %v420_v50, %v7118_v8 }
 0x111   :  { %11293 = vst [vmem:[#allocation136_spill] sm:$0xff] %v7808_v63  ;;  %11294 = vst [vmem:[#allocation137_spill] sm:$0xff] %v7812_v52  ;;  %v7861_v63 = vmul.f32 %v7076_v54, %v7823_v29  ;;  %v7875_v52 = vpop.f32.mrf.mxu0 }
 0x112   :  { %11295 = vst [vmem:[#allocation138_spill] sm:$0xff] %v7817_v49  ;;  %11296 = vst [vmem:[#allocation139_spill] sm:$0xff] %v7821_v53  ;;  %v7873_v53 = vmul.f32 %v7082_v56, %v7823_v29  ;;  %v423_v50 = vmul.f32 %v7875_v52, %v7113_v7  ;;  %v7886_v5 = vmul.f32 %v7875_v52, %v7076_v54 }
 0x113   :  { %11297 = vst [vmem:[#allocation140_spill] sm:$0xff] %v7823_v29  ;;  %11298 = vst [vmem:[#allocation141_spill] sm:$0xff] %v7836_v35  ;;  %v7896_v49 = vmul.f32 %v7875_v52, %v7082_v56  ;;  %v11314_v35 = vrot.slane %v7184_v42, 6  ;;  %v1463_v42 = vmul.f32 %v7091_v59, %v7158_v25 }
 0x114   :  { %11299 = vst [vmem:[#allocation142_spill] sm:$0xff] %v7840_v13  ;;  %11300 = vst [vmem:[#allocation143_spill] sm:$0xff] %v7844_v51  ;;  %v7880_v51 = vmul.f32 %v7085_v57, %v7823_v29  ;;  %v7900_v29 = vadd.f32 %v423_v50, %v7118_v8 }
 0x115   :  { %11301 = vst [vmem:[#allocation144_spill] sm:$0xff] %v7848_v3  ;;  %11302 = vst [vmem:[#allocation145_spill] sm:$0xff] %v7852_v0  ;;  %v7892_v3 = vmul.f32 %v7875_v52, %v7079_v55  ;;  %v7905_v0 = vmul.f32 %v7875_v52, %v7085_v57  ;;  %v731_v50 = vsel %vm728_vm3, %v7122_v10, %v11314_v35 }
 0x116   :  { %11303 = vst [vmem:[#allocation146_spill] sm:$0xff] %v7861_v63  ;;  %11304 = vst [vmem:[#allocation147_spill] sm:$0xff] %v7865_v31  ;;  %v1663_v35 = vmul.f32 %v7094_v60, %v7158_v25 }
 0x117   :  { %11305 = vst [vmem:[#allocation148_spill] sm:$0xff] %v7869_v47  ;;  %11306 = vst [vmem:[#allocation149_spill] sm:$0xff] %v7873_v53  ;;  %v11313_v47 = vrot.slane %v7180_v41, 7  ;;  %v11316_v53 = vrot.slane %v7197_v48, 4  ;;  %v11318_v48 = vrot.slane %v7148_v22, 3 }
 0x118   :  { %11307 = vst [vmem:[#allocation150_spill] sm:$0xff] %v7875_v52  ;;  %11308 = vst [vmem:[#allocation151_spill] sm:$0xff] %v7886_v5  ;;  %v11315_v52 = vrot.slane %v7193_v45, 5  ;;  %v7935_v45 = vpop.f32.mrf.mxu0 }
 0x119   :  { %11309 = vst [vmem:[#allocation152_spill] sm:$0xff] %v7892_v3  ;;  %11310 = vst [vmem:[#allocation153_spill] sm:$0xff] %v7896_v49  ;;  %v531_v63 = vsel %vm528_vm2, %v7120_v9, %v11313_v47  ;;  %v1131_v41 = vsel %vm1128_vm5, %v7126_v12, %v11316_v53  ;;  %v1263_v47 = vmul.f32 %v7088_v58, %v7158_v25 }
 0x11a   :  { %11311 = vst [vmem:[#allocation154_spill] sm:$0xff] %v7900_v29  ;;  %11312 = vst [vmem:[#allocation155_spill] sm:$0xff] %v7905_v0  ;;  %v626_v29 = vadd.f32 %v531_v63, %v7189_v44  ;;  %v931_v13 = vsel %vm928_vm4, %v7124_v11, %v11315_v52  ;;  %v1227_v44 = vadd.f32 %v7176_v40, %v7218_v20  ;;  %v11319_v52 = vrot.slane %v7152_v23, 2 }
 0x11b   :  { %11317 = vst [vmem:[#allocation156_spill] sm:$0xff] %v7935_v45  ;;  %v1333_v53 = vsel %vm1328_vm6, %v7130_v14, %v11318_v48  ;;  %v11320_v0 = vrot.slane %v7156_v24, 1  ;;  %v1330_v49 = vrot.slane %v1263_v47, 3  ;;  %v1530_v40 = vrot.slane %v1463_v42, 2  ;;  %v7970_v48 = vpop.f32.mrf.mxu0 }
 0x11c   :  { %v826_v63 = vadd.f32 %v731_v50, %v626_v29  ;;  %v1533_v31 = vsel %vm1528_vm7, %v7132_v15, %v11319_v52  ;;  %v1730_v20 = vrot.slane %v1663_v35, 1  ;;  %v1427_v3 = vadd.f32 %v1333_v53, %v1227_v44  ;;  %11321 = vst [vmem:[#allocation157_spill] sm:$0xff] %v7970_v48 }
 0x11d   :  { %v1733_v25 = vsel %vm1728_vm8, %v7134_v16, %v11320_v0  ;;  %v422_v22 = vmul.f32 %v7113_v7, %v7935_v45  ;;  %v7953_v50 = vmul.f32 %v7076_v54, %v7935_v45  ;;  %v7957_v23 = vmul.f32 %v7079_v55, %v7935_v45 }
 0x11e   :  { %v1026_v29 = vadd.f32 %v931_v13, %v826_v63  ;;  %v1331_v24 = vsel %vm1328_vm6, %v7130_v14, %v1330_v49  ;;  %v1531_v0 = vsel %vm1528_vm7, %v7132_v15, %v1530_v40  ;;  %v1731_v13 = vsel %vm1728_vm8, %v7134_v16, %v1730_v20 }
 0x11f   :  { %v1627_v47 = vadd.f32 %v1533_v31, %v1427_v3  ;;  %v7966_v35 = vadd.f32 %v422_v22, %v7118_v8  ;;  %v7976_v49 = vmul.f32 %v7082_v56, %v7935_v45  ;;  %v7980_v52 = vmul.f32 %v7085_v57, %v7935_v45 }
 0x120   :  { %v1226_v42 = vadd.f32 %v1131_v41, %v1026_v29  ;;  %v425_v31 = vmul.f32 %v7970_v48, %v7113_v7  ;;  %v7986_v41 = vmul.f32 %v7970_v48, %v7076_v54  ;;  %v7994_v40 = vmul.f32 %v7970_v48, %v7082_v56 }
 0x121   :  { %v7972_v53 = vadd.f32 %v1733_v25, %v1627_v47  ;;  %11322 = vst [vmem:[#allocation158_spill] sm:$0xff] %v7980_v52  ;;  %v7990_v25 = vmul.f32 %v7970_v48, %v7079_v55  ;;  %v8007_v5 = vmul.f32 %v7970_v48, %v7085_v57  ;;  %v396_v29 = vmul.f32 %v7113_v7, %v7186_v43 }
 0x122   :  { %v1426_v3 = vadd.f32 %v1331_v24, %v1226_v42  ;;  %11323 = vst [vmem:[#allocation159_spill] sm:$0xff] %v7986_v41  ;;  %11325 = vst [vmem:[#allocation161_spill] sm:$0xff] %v7994_v40  ;;  %v8000_v24 = vadd.f32 %v425_v31, %v7118_v8  ;;  %v11328_v22 = vrot.slane %v7234_v30, 7  ;;  %v1065_v44 = vmul.f32 %v7085_v57, %v7186_v43 }
 0x123   :  { %11324 = vst [vmem:[#allocation160_spill] sm:$0xff] %v7990_v25  ;;  %v5784_v20 = vmul.f32 -1.442695, %v7972_v53  ;;  %11327 = vst [vmem:[#allocation163_spill] sm:$0xff] %v8007_v5  ;;  %v428_v42 = vadd.f32 %v396_v29, %v7118_v8  ;;  %v1265_v30 = vmul.f32 %v7088_v58, %v7186_v43  ;;  %v1665_v45 = vmul.f32 %v7094_v60, %v7186_v43 }
 0x124   :  { %11326 = vst [vmem:[#allocation162_spill] sm:$0xff] %v8000_v24  ;;  %v1626_v47 = vadd.f32 %v1531_v0, %v1426_v3  ;;  %v535_v31 = vsel %vm528_vm2, %v7120_v9, %v11328_v22  ;;  %v665_v3 = vmul.f32 %v7079_v55, %v7186_v43  ;;  %v1134_v40 = vrot.slane %v1065_v44, 4 }
 0x125   :  { %6393 = vpow2.f32 %v5784_v20  ;;  %v865_v20 = vmul.f32 %v7082_v56, %v7186_v43  ;;  %v628_v25 = vadd.f32 %v535_v31, %v428_v42  ;;  %v1334_v24 = vrot.slane %v1265_v30, 3 }
 0x126   :  { %v8015_v0 = vadd.f32 %v1731_v13, %v1626_v47  ;;  %v1465_v13 = vmul.f32 %v7091_v59, %v7186_v43  ;;  %v734_v47 = vrot.slane %v665_v3, 6  ;;  %v1135_v5 = vsel %vm1128_vm5, %v7126_v12, %v1134_v40  ;;  %v8042_v3 = vpop.f32.mrf.mxu0 }
 0x127   :  { %v934_v48 = vrot.slane %v865_v20, 5  ;;  %v1335_v44 = vsel %vm1328_vm6, %v7130_v14, %v1334_v24  ;;  %v1734_v31 = vrot.slane %v1665_v45, 1  ;;  %11329 = vst [vmem:[#allocation164_spill] sm:$0xff] %v8042_v3  ;;  %v11330_v20 = vrot.slane %v7205_v4, 7 }
 0x128   :  { %v5783_v22 = vmul.f32 -1.442695, %v8015_v0  ;;  %v1534_v41 = vrot.slane %v1465_v13, 2  ;;  %v735_v29 = vsel %vm728_vm3, %v7122_v10, %v734_v47  ;;  %v1666_v47 = vmul.f32 %v7164_v34, %v7094_v60 }
 0x129   :  { %v935_v63 = vsel %vm928_vm4, %v7124_v11, %v934_v48  ;;  %v828_v52 = vadd.f32 %v735_v29, %v628_v25  ;;  %v537_v30 = vsel %vm528_vm2, %v7120_v9, %v11330_v20  ;;  %v11331_v48 = vrot.slane %v7216_v19, 6 }
 0x12a   :  { %6395 = vpow2.f32 %v5783_v22  ;;  %v1535_v42 = vsel %vm1528_vm7, %v7132_v15, %v1534_v41  ;;  %v11332_v25 = vrot.slane %v7223_v26, 5  ;;  %v11333_v41 = vrot.slane %v7227_v27, 4 }
 0x12b   :  { %v737_v40 = vsel %vm728_vm3, %v7122_v10, %v11331_v48  ;;  %v1028_v13 = vadd.f32 %v935_v63, %v828_v52  ;;  %v1735_v4 = vsel %vm1728_vm8, %v7134_v16, %v1734_v31  ;;  %v629_v22 = vadd.f32 %v537_v30, %v7212_v18 }
 0x12c   :  { %v937_v24 = vsel %vm928_vm4, %v7124_v11, %v11332_v25  ;;  %v1137_v45 = vsel %vm1128_vm5, %v7126_v12, %v11333_v41  ;;  %v1266_v19 = vmul.f32 %v7164_v34, %v7088_v58  ;;  %v1466_v26 = vmul.f32 %v7164_v34, %v7091_v59 }
 0x12d   :  { %v424_v27 = vmul.f32 %v7113_v7, %v8042_v3  ;;  %v8073_v63 = vmul.f32 %v7076_v54, %v8042_v3  ;;  %v1228_v52 = vadd.f32 %v1135_v5, %v1028_v13  ;;  %v829_v29 = vadd.f32 %v737_v40, %v629_v22 }
 0x12e   :  { %v1336_v31 = vrot.slane %v1266_v19, 3  ;;  %v8077_v18 = vmul.f32 %v7079_v55, %v8042_v3  ;;  %v1536_v20 = vrot.slane %v1466_v26, 2  ;;  %v1736_v30 = vrot.slane %v1666_v47, 1 }
 0x12f   :  { %v8080_v48 = vadd.f32 %v424_v27, %v7118_v8  ;;  %v1428_v41 = vadd.f32 %v1335_v44, %v1228_v52  ;;  %v1029_v7 = vadd.f32 %v937_v24, %v829_v29  ;;  %v8092_v8 = vmul.f32 %v7082_v56, %v8042_v3 }
 0x130   :  { %v1337_v54 = vsel %vm1328_vm6, %v7130_v14, %v1336_v31  ;;  %v1537_v13 = vsel %vm1528_vm7, %v7132_v15, %v1536_v20  ;;  %v1737_v55 = vsel %vm1728_vm8, %v7134_v16, %v1736_v30  ;;  %v8096_v44 = vmul.f32 %v7085_v57, %v8042_v3 }
 0x131   :  { %v1628_v22 = vadd.f32 %v1535_v42, %v1428_v41  ;;  %v1229_v19 = vadd.f32 %v1137_v45, %v1029_v7  ;;  %v11334_v26 = vrot.slane %v7269_v17, 7  ;;  %v11335_v56 = vrot.slane %v7276_v33, 6 }
 0x132   :  { %v6394_v40 = vpop.eup %6393  ;;  %v11336_v17 = vrot.slane %v7280_v37, 5  ;;  %v11337_v30 = vrot.slane %v7284_v32, 4  ;;  %v1267_v33 = vmul.f32 %v7088_v58, %v7229_v28  ;;  %v1467_v41 = vmul.f32 %v7091_v59, %v7229_v28 }
 0x133   :  { %v1955_v24 = vadd.f32 1.0, %v6394_v40  ;;  %v539_v47 = vsel %vm528_vm2, %v7120_v9, %v11334_v26  ;;  %v739_v57 = vsel %vm728_vm3, %v7122_v10, %v11335_v56  ;;  %v8109_v31 = vadd.f32 %v1735_v4, %v1628_v22 }
 0x134   :  { %v630_v29 = vadd.f32 %v539_v47, %v7287_v6  ;;  %v1429_v42 = vadd.f32 %v1337_v54, %v1229_v19  ;;  %v939_v45 = vsel %vm928_vm4, %v7124_v11, %v11336_v17  ;;  %v1139_v6 = vsel %vm1128_vm5, %v7126_v12, %v11337_v30 }
 0x135   :  { %6397 = vrcp.f32 %v1955_v24  ;;  %v5785_v7 = vmul.f32 -1.442695, %v8109_v31  ;;  %v1667_v37 = vmul.f32 %v7094_v60, %v7229_v28  ;;  %v11338_v40 = vrot.slane %v7240_v36, 7 }
 0x136   :  { %v830_v20 = vadd.f32 %v739_v57, %v630_v29  ;;  %v1629_v54 = vadd.f32 %v1537_v13, %v1429_v42  ;;  %v1338_v19 = vrot.slane %v1267_v33, 3  ;;  %v1538_v26 = vrot.slane %v1467_v41, 2 }
 0x137   :  { %v6396_v4 = vpop.eup %6395  ;;  %v541_v32 = vsel %vm528_vm2, %v7120_v9, %v11338_v40  ;;  %6399 = vpow2.f32 %v5785_v7  ;;  %v1738_v29 = vrot.slane %v1667_v37, 1  ;;  %v11341_v33 = vrot.slane %v7261_v38, 4 }
 0x138   :  { %v1954_v24 = vadd.f32 1.0, %v6396_v4  ;;  %v1030_v22 = vadd.f32 %v939_v45, %v830_v20  ;;  %v8130_v47 = vadd.f32 %v1737_v55, %v1629_v54  ;;  %v631_v56 = vadd.f32 %v541_v32, %v7256_v21  ;;  %v11342_v4 = vld [vmem:[#allocation21_spill] sm:$0xff]  ;;  %v11343_v54 = vld [vmem:[#allocation32_spill] sm:$0xff] }
 0x139   :  { %v1339_v57 = vsel %vm1328_vm6, %v7130_v14, %v1338_v19  ;;  %v1539_v36 = vsel %vm1528_vm7, %v7132_v15, %v1538_v26  ;;  %v1739_v17 = vsel %vm1728_vm8, %v7134_v16, %v1738_v29  ;;  %v11339_v45 = vrot.slane %v7246_v39, 6 }
 0x13a   :  { %6401 = vrcp.f32 %v1954_v24  ;;  %v1230_v13 = vadd.f32 %v1139_v6, %v1030_v22  ;;  %v5786_v42 = vmul.f32 -1.442695, %v8130_v47  ;;  %v11340_v21 = vrot.slane %v7250_v62, 5  ;;  %v11345_v22 = vld [vmem:[#allocation37_spill] sm:$0xff] }
 0x13b   :  { %v741_v55 = vsel %vm728_vm3, %v7122_v10, %v11339_v45  ;;  %v1141_v41 = vsel %vm1128_vm5, %v7126_v12, %v11341_v33  ;;  %v1268_v7 = vmul.f32 %v11342_v4, %v7088_v58  ;;  %v1468_v39 = vmul.f32 %v11342_v4, %v7091_v59 }
 0x13c   :  { %v941_v20 = vsel %vm928_vm4, %v7124_v11, %v11340_v21  ;;  %v1430_v30 = vadd.f32 %v1339_v57, %v1230_v13  ;;  %v831_v6 = vadd.f32 %v741_v55, %v631_v56  ;;  %6403 = vpow2.f32 %v5786_v42  ;;  %v11346_v56 = vld [vmem:[#allocation33_spill] sm:$0xff]  ;;  %v11348_v42 = vld [vmem:[#allocation34_spill] sm:$0xff] }
 0x13d   :  { %v1668_v62 = vmul.f32 %v11342_v4, %v7094_v60  ;;  %v11344_v37 = vrot.slane %v11343_v54, 7  ;;  %v1340_v24 = vrot.slane %v1268_v7, 3  ;;  %v1540_v26 = vrot.slane %v1468_v39, 2  ;;  %v11350_v4 = vld [vmem:[#allocation35_spill] sm:$0xff] }
 0x13e   :  { %v1630_v32 = vadd.f32 %v1539_v36, %v1430_v30  ;;  %v1031_v38 = vadd.f32 %v941_v20, %v831_v6  ;;  %v11347_v13 = vrot.slane %v11346_v56, 6  ;;  %v11349_v45 = vrot.slane %v11348_v42, 5 }
 0x13f   :  { %v543_v40 = vsel %vm528_vm2, %v7120_v9, %v11344_v37  ;;  %v1740_v29 = vrot.slane %v1668_v62, 1  ;;  %v1341_v20 = vsel %vm1328_vm6, %v7130_v14, %v1340_v24  ;;  %v1541_v6 = vsel %vm1528_vm7, %v7132_v15, %v1540_v26  ;;  %v11352_v62 = vld [vmem:[#allocation24_spill] sm:$0xff] }
 0x140   :  { %v632_v19 = vadd.f32 %v543_v40, %v11345_v22  ;;  %v743_v57 = vsel %vm728_vm3, %v7122_v10, %v11347_v13  ;;  %v943_v55 = vsel %vm928_vm4, %v7124_v11, %v11349_v45  ;;  %v8171_v21 = vadd.f32 %v1739_v17, %v1630_v32 }
 0x141   :  { %v1231_v36 = vadd.f32 %v1141_v41, %v1031_v38  ;;  %v1741_v33 = vsel %vm1728_vm8, %v7134_v16, %v1740_v29  ;;  %v11351_v7 = vrot.slane %v11350_v4, 4  ;;  %v1269_v17 = vmul.f32 %v7088_v58, %v11352_v62 }
 0x142   :  { %v832_v30 = vadd.f32 %v743_v57, %v632_v19  ;;  %v6398_v54 = vpop.eup %6397  ;;  %v5787_v41 = vmul.f32 -1.442695, %v8171_v21  ;;  %v1469_v32 = vmul.f32 %v7091_v59, %v11352_v62  ;;  %v1669_v22 = vmul.f32 %v7094_v60, %v11352_v62  ;;  %v11354_v19 = vld [vmem:[#allocation25_spill] sm:$0xff] }
 0x143   :  { %v1143_v39 = vsel %vm1128_vm5, %v7126_v12, %v11351_v7  ;;  %v1431_v37 = vadd.f32 %v1341_v20, %v1231_v36  ;;  %v8189_v38 = vmul.f32 %v6398_v54, %v7972_v53  ;;  %v1342_v24 = vrot.slane %v1269_v17, 3  ;;  %v11357_v36 = vld [vmem:[#allocation27_spill] sm:$0xff] }
 0x144   :  { %v1032_v40 = vadd.f32 %v943_v55, %v832_v30  ;;  %v11355_v26 = vrot.slane %v11354_v19, 7  ;;  %6405 = vpow2.f32 %v5787_v41  ;;  %v1542_v57 = vrot.slane %v1469_v32, 2  ;;  %v11356_v55 = vld [vmem:[#allocation28_spill] sm:$0xff]  ;;  %v6400_v4 = vpop.eup %6399 }
 0x145   :  { %11353 = vst [vmem:[#allocation32_spill] sm:$0xff] %v8189_v38  ;;  %v1631_v56 = vadd.f32 %v1541_v6, %v1431_v37  ;;  %v1343_v42 = vsel %vm1328_vm6, %v7130_v14, %v1342_v24  ;;  %v1742_v45 = vrot.slane %v1669_v22, 1  ;;  %v11358_v20 = vrot.slane %v11357_v36, 6  ;;  %v11361_v24 = vld [vmem:[#allocation30_spill] sm:$0xff]  ;;  %v11364_v36 = vld [vmem:[#allocation44_spill] sm:$0xff] }
 0x146   :  { %v545_v29 = vsel %vm528_vm2, %v7120_v9, %v11355_v26  ;;  %v1232_v13 = vadd.f32 %v1143_v39, %v1032_v40  ;;  %v1543_v6 = vsel %vm1528_vm7, %v7132_v15, %v1542_v57  ;;  %v11359_v39 = vld [vmem:[#allocation29_spill] sm:$0xff]  ;;  %v1956_v37 = vadd.f32 1.0, %v6400_v4 }
 0x147   :  { %v633_v53 = vadd.f32 %v545_v29, %v11356_v55  ;;  %v745_v30 = vsel %vm728_vm3, %v7122_v10, %v11358_v20  ;;  %v8204_v7 = vadd.f32 %v1741_v33, %v1631_v56  ;;  %v11360_v17 = vrot.slane %v11359_v39, 5  ;;  %v6402_v41 = vpop.eup %6401  ;;  %v11363_v56 = vld [vmem:[#allocation23_spill] sm:$0xff] }
 0x148   :  { %v1432_v62 = vadd.f32 %v1343_v42, %v1232_v13  ;;  %v1743_v40 = vsel %vm1728_vm8, %v7134_v16, %v1742_v45  ;;  %v11362_v22 = vrot.slane %v11361_v24, 4  ;;  %v8219_v19 = vmul.f32 %v6402_v41, %v8015_v0  ;;  %v11366_v41 = vld [vmem:[#allocation47_spill] sm:$0xff] }
 0x149   :  { %v945_v54 = vsel %vm928_vm4, %v7124_v11, %v11360_v17  ;;  %v833_v32 = vadd.f32 %v745_v30, %v633_v53  ;;  %v5788_v26 = vmul.f32 -1.442695, %v8204_v7  ;;  %v1270_v13 = vmul.f32 %v11363_v56, %v7088_v58  ;;  %v6404_v55 = vpop.eup %6403 }
 0x14a   :  { %v1145_v33 = vsel %vm1128_vm5, %v7126_v12, %v11362_v22  ;;  %v1632_v29 = vadd.f32 %v1543_v6, %v1432_v62  ;;  %6407 = vrcp.f32 %v1956_v37  ;;  %v1470_v42 = vmul.f32 %v11363_v56, %v7091_v59  ;;  %6149 = vmatprep.mubr.msk.f32.mxu0 %vm2090_vm9, %v8219_v19 }
 0x14b   :  { %v1033_v57 = vadd.f32 %v945_v54, %v833_v32  ;;  %v1670_v45 = vmul.f32 %v11363_v56, %v7094_v60  ;;  %6409 = vpow2.f32 %v5788_v26  ;;  %v1344_v53 = vrot.slane %v1270_v13, 3  ;;  %6150 = vmatmul.mubr.msk.f32.vlgmr.msra.gmra.mxu0 %vm2090_vm9, %v8189_v38  ;;  %v11369_v56 = vld [vmem:[#allocation48_spill] sm:$0xff] }
 0x14c   :  { %v8230_v0 = vadd.f32 %v1743_v40, %v1632_v29  ;;  %v11365_v20 = vrot.slane %v11364_v36, 7  ;;  %v1957_v4 = vadd.f32 1.0, %v6404_v55  ;;  %v1544_v6 = vrot.slane %v1470_v42, 2  ;;  %v11367_v40 = vld [vmem:[#allocation45_spill] sm:$0xff]  ;;  %v11373_v36 = vld [vmem:[#allocation31_spill] sm:$0xff] }
 0x14d   :  { %v1233_v62 = vadd.f32 %v1145_v33, %v1033_v57  ;;  %v1744_v39 = vrot.slane %v1670_v45, 1  ;;  %v1345_v54 = vsel %vm1328_vm6, %v7130_v14, %v1344_v53  ;;  %v11368_v32 = vrot.slane %v11367_v40, 6  ;;  %v11371_v42 = vld [vmem:[#allocation49_spill] sm:$0xff]  ;;  %v11378_v40 = vld [vmem:[#allocation42_spill] sm:$0xff] }
 0x14e   :  { %v547_v30 = vsel %vm528_vm2, %v7120_v9, %v11365_v20  ;;  %v5789_v17 = vmul.f32 -1.442695, %v8230_v0  ;;  %6411 = vrcp.f32 %v1957_v4  ;;  %v1545_v26 = vsel %vm1528_vm7, %v7132_v15, %v1544_v6  ;;  %v11374_v6 = vld [vmem:[#allocation38_spill] sm:$0xff] }
 0x14f   :  { %v634_v37 = vadd.f32 %v547_v30, %v11366_v41  ;;  %v747_v24 = vsel %vm728_vm3, %v7122_v10, %v11368_v32  ;;  %v1433_v22 = vadd.f32 %v1345_v54, %v1233_v62  ;;  %v1745_v33 = vsel %vm1728_vm8, %v7134_v16, %v1744_v39  ;;  %v11376_v54 = vld [vmem:[#allocation39_spill] sm:$0xff] }
 0x150   :  { %6413 = vpow2.f32 %v5789_v17  ;;  %v11370_v13 = vrot.slane %v11369_v56, 5  ;;  %v11372_v45 = vrot.slane %v11371_v42, 4  ;;  %v1271_v20 = vmul.f32 %v7088_v58, %v11373_v36 }
 0x151   :  { %v834_v29 = vadd.f32 %v747_v24, %v634_v37  ;;  %v1633_v53 = vadd.f32 %v1545_v26, %v1433_v22  ;;  %v1471_v30 = vmul.f32 %v7091_v59, %v11373_v36  ;;  %v1671_v4 = vmul.f32 %v7094_v60, %v11373_v36  ;;  %v6406_v22 = vpop.eup %6405 }
 0x152   :  { %v947_v57 = vsel %vm928_vm4, %v7124_v11, %v11370_v13  ;;  %v1147_v55 = vsel %vm1128_vm5, %v7126_v12, %v11372_v45  ;;  %v11375_v39 = vrot.slane %v11374_v6, 7  ;;  %v11377_v41 = vrot.slane %v11376_v54, 6  ;;  %v11380_v45 = vld [vmem:[#allocation41_spill] sm:$0xff]  ;;  %v11381_v6 = vld [vmem:[#allocation43_spill] sm:$0xff] }
 0x153   :  { %v1034_v62 = vadd.f32 %v947_v57, %v834_v29  ;;  %v11379_v32 = vrot.slane %v11378_v40, 5  ;;  %v8276_v26 = vadd.f32 %v1745_v33, %v1633_v53  ;;  %v1346_v56 = vrot.slane %v1271_v20, 3 }
 0x154   :  { %v549_v17 = vsel %vm528_vm2, %v7120_v9, %v11375_v39  ;;  %v749_v37 = vsel %vm728_vm3, %v7122_v10, %v11377_v41  ;;  %v1546_v29 = vrot.slane %v1471_v30, 2  ;;  %v1746_v13 = vrot.slane %v1671_v4, 1  ;;  %v11383_v30 = vld [vmem:[#allocation26_spill] sm:$0xff] }
 0x155   :  { %v949_v24 = vsel %vm928_vm4, %v7124_v11, %v11379_v32  ;;  %v1958_v57 = vadd.f32 1.0, %v6406_v22  ;;  %v1234_v42 = vadd.f32 %v1147_v55, %v1034_v62  ;;  %v635_v36 = vadd.f32 %v549_v17, %v11380_v45  ;;  %v11384_v32 = vld [vmem:[#allocation57_spill] sm:$0xff] }
 0x156   :  { %v11382_v39 = vrot.slane %v11381_v6, 4  ;;  %v5790_v41 = vmul.f32 -1.442695, %v8276_v26  ;;  %v1347_v40 = vsel %vm1328_vm6, %v7130_v14, %v1346_v56  ;;  %v1547_v33 = vsel %vm1528_vm7, %v7132_v15, %v1546_v29 }
 0x157   :  { %v1747_v53 = vsel %vm1728_vm8, %v7134_v16, %v1746_v13  ;;  %6415 = vrcp.f32 %v1958_v57  ;;  %v1434_v55 = vadd.f32 %v1347_v40, %v1234_v42  ;;  %v835_v20 = vadd.f32 %v749_v37, %v635_v36  ;;  %v6408_v29 = vpop.eup %6407  ;;  %v11386_v37 = vld [vmem:[#allocation58_spill] sm:$0xff]  ;;  %v11388_v40 = vld [vmem:[#allocation59_spill] sm:$0xff] }
 0x158   :  { %v1149_v54 = vsel %vm1128_vm5, %v7126_v12, %v11382_v39  ;;  %v1272_v4 = vmul.f32 %v11383_v30, %v7088_v58  ;;  %6417 = vpow2.f32 %v5790_v41  ;;  %v1472_v62 = vmul.f32 %v11383_v30, %v7091_v59  ;;  %v6410_v36 = vpop.eup %6409 }
 0x159   :  { %v1672_v17 = vmul.f32 %v11383_v30, %v7094_v60  ;;  %v11385_v22 = vrot.slane %v11384_v32, 7  ;;  %v1634_v13 = vadd.f32 %v1547_v33, %v1434_v55  ;;  %v1035_v57 = vadd.f32 %v949_v24, %v835_v20  ;;  %v11390_v20 = vld [vmem:[#allocation60_spill] sm:$0xff] }
 0x15a   :  { %v1348_v42 = vrot.slane %v1272_v4, 3  ;;  %v8302_v6 = vmul.f32 %v6408_v29, %v8109_v31  ;;  %v1548_v39 = vrot.slane %v1472_v62, 2  ;;  %v11389_v52 = vrot.slane %v11388_v40, 6 }
 0x15b   :  { %v551_v56 = vsel %vm528_vm2, %v7120_v9, %v11385_v22  ;;  %v1748_v41 = vrot.slane %v1672_v17, 1  ;;  %v1959_v32 = vadd.f32 1.0, %v6410_v36  ;;  %v8308_v27 = vadd.f32 %v1747_v53, %v1634_v13  ;;  %v6412_v53 = vpop.eup %6411  ;;  %v11392_v17 = vld [vmem:[#allocation62_spill] sm:$0xff] }
 0x15c   :  { %v636_v45 = vadd.f32 %v551_v56, %v11386_v37  ;;  %11387 = vst [vmem:[#allocation37_spill] sm:$0xff] %v8302_v6  ;;  %v751_v30 = vsel %vm728_vm3, %v7122_v10, %v11389_v52  ;;  %v1235_v22 = vadd.f32 %v1149_v54, %v1035_v57  ;;  %v1349_v24 = vsel %vm1328_vm6, %v7130_v14, %v1348_v42  ;;  %v11395_v37 = vld [vmem:[#allocation40_spill] sm:$0xff] }
 0x15d   :  { %6152 = vmatprep.mubr.msk.f32.mxu1 %vm2090_vm9, %v8302_v6  ;;  %v1549_v31 = vsel %vm1528_vm7, %v7132_v15, %v1548_v39  ;;  %v1749_v33 = vsel %vm1728_vm8, %v7134_v16, %v1748_v41  ;;  %v11391_v4 = vrot.slane %v11390_v20, 5  ;;  %6419 = vrcp.f32 %v1959_v32  ;;  %v6414_v13 = vpop.eup %6413 }
 0x15e   :  { %v836_v55 = vadd.f32 %v751_v30, %v636_v45  ;;  %v5791_v54 = vmul.f32 -1.442695, %v8308_v27  ;;  %v1435_v62 = vadd.f32 %v1349_v24, %v1235_v22  ;;  %v11393_v56 = vrot.slane %v11392_v17, 4  ;;  %v11396_v22 = vld [vmem:[#allocation51_spill] sm:$0xff] }
 0x15f   :  { %v951_v52 = vsel %vm928_vm4, %v7124_v11, %v11391_v4  ;;  %v8328_v57 = vmul.f32 %v6412_v53, %v8130_v47  ;;  %v1273_v45 = vmul.f32 %v7088_v58, %v11395_v37  ;;  %v1473_v36 = vmul.f32 %v7091_v59, %v11395_v37 }
 0x160   :  { %v1151_v29 = vsel %vm1128_vm5, %v7126_v12, %v11393_v56  ;;  %v1036_v42 = vadd.f32 %v951_v52, %v836_v55  ;;  %v1960_v39 = vadd.f32 1.0, %v6414_v13  ;;  %6421 = vpow2.f32 %v5791_v54  ;;  %v11398_v52 = vld [vmem:[#allocation54_spill] sm:$0xff] }
 0x161   :  { %11394 = vst [vmem:[#allocation33_spill] sm:$0xff] %v8328_v57  ;;  %v1635_v41 = vadd.f32 %v1549_v31, %v1435_v62  ;;  %v1673_v40 = vmul.f32 %v7094_v60, %v11395_v37  ;;  %6153 = vmatmul.mubr.msk.f32.vlgmr.msra.gmra.mxu1 %vm2090_vm9, %v8328_v57  ;;  %v1350_v32 = vrot.slane %v1273_v45, 3  ;;  %v1550_v47 = vrot.slane %v1473_v36, 2  ;;  %v11399_v62 = vld [vmem:[#allocation52_spill] sm:$0xff] }
 0x162   :  { %v1236_v30 = vadd.f32 %v1151_v29, %v1036_v42  ;;  %v11397_v24 = vrot.slane %v11396_v22, 7  ;;  %6423 = vrcp.f32 %v1960_v39  ;;  %v11400_v17 = vrot.slane %v11399_v62, 6  ;;  %v11401_v29 = vld [vmem:[#allocation53_spill] sm:$0xff] }
 0x163   :  { %v8342_v20 = vadd.f32 %v1749_v33, %v1635_v41  ;;  %v1750_v4 = vrot.slane %v1673_v40, 1  ;;  %v1351_v53 = vsel %vm1328_vm6, %v7130_v14, %v1350_v32  ;;  %v1551_v54 = vsel %vm1528_vm7, %v7132_v15, %v1550_v47  ;;  %v11403_v41 = vld [vmem:[#allocation55_spill] sm:$0xff]  ;;  %v11405_v47 = vld [vmem:[#allocation36_spill] sm:$0xff] }
 0x164   :  { %v553_v55 = vsel %vm528_vm2, %v7120_v9, %v11397_v24  ;;  %v753_v56 = vsel %vm728_vm3, %v7122_v10, %v11400_v17  ;;  %v11402_v13 = vrot.slane %v11401_v29, 5  ;;  %v1436_v37 = vadd.f32 %v1351_v53, %v1236_v30  ;;  %v6416_v39 = vpop.eup %6415 }
 0x165   :  { %v637_v31 = vadd.f32 %v553_v55, %v11398_v52  ;;  %v5792_v42 = vmul.f32 -1.442695, %v8342_v20  ;;  %v1751_v45 = vsel %vm1728_vm8, %v7134_v16, %v1750_v4  ;;  %v11404_v40 = vrot.slane %v11403_v41, 4  ;;  %v6418_v30 = vpop.eup %6417  ;;  %v11407_v41 = vld [vmem:[#allocation69_spill] sm:$0xff] }
 0x166   :  { %v953_v33 = vsel %vm928_vm4, %v7124_v11, %v11402_v13  ;;  %v1274_v22 = vmul.f32 %v11405_v47, %v7088_v58  ;;  %v1474_v24 = vmul.f32 %v11405_v47, %v7091_v59  ;;  %v1674_v55 = vmul.f32 %v11405_v47, %v7094_v60 }
 0x167   :  { %v837_v36 = vadd.f32 %v753_v56, %v637_v31  ;;  %v1153_v32 = vsel %vm1128_vm5, %v7126_v12, %v11404_v40  ;;  %v8371_v52 = vmul.f32 %v6416_v39, %v8171_v21  ;;  %6425 = vpow2.f32 %v5792_v42  ;;  %v11409_v21 = vld [vmem:[#allocation71_spill] sm:$0xff] }
 0x168   :  { %v1636_v4 = vadd.f32 %v1551_v54, %v1436_v37  ;;  %v1961_v53 = vadd.f32 1.0, %v6418_v30  ;;  %v1352_v62 = vrot.slane %v1274_v22, 3  ;;  %v1552_v17 = vrot.slane %v1474_v24, 2  ;;  %v11412_v24 = vld [vmem:[#allocation72_spill] sm:$0xff] }
 0x169   :  { %11406 = vst [vmem:[#allocation34_spill] sm:$0xff] %v8371_v52  ;;  %v1037_v31 = vadd.f32 %v953_v33, %v837_v36  ;;  %v1752_v56 = vrot.slane %v1674_v55, 1  ;;  %6155 = vmatprep.mubr.msk.f32.mxu1 %vm2090_vm9, %v8371_v52  ;;  %v11408_v40 = vrot.slane %v11407_v41, 7  ;;  %v11410_v39 = vrot.slane %v11409_v21, 6 }
 0x16a   :  { %v8375_v29 = vadd.f32 %v1751_v45, %v1636_v4  ;;  %6427 = vrcp.f32 %v1961_v53  ;;  %v1353_v33 = vsel %vm1328_vm6, %v7130_v14, %v1352_v62  ;;  %v1553_v42 = vsel %vm1528_vm7, %v7132_v15, %v1552_v17  ;;  %v6420_v4 = vpop.eup %6419  ;;  %v11416_v17 = vld [vmem:[#allocation50_spill] sm:$0xff] }
 0x16b   :  { %v1237_v13 = vadd.f32 %v1153_v32, %v1037_v31  ;;  %v555_v47 = vsel %vm528_vm2, %v7120_v9, %v11408_v40  ;;  %v755_v54 = vsel %vm728_vm3, %v7122_v10, %v11410_v39  ;;  %v1753_v37 = vsel %vm1728_vm8, %v7134_v16, %v1752_v56  ;;  %v11411_v32 = vld [vmem:[#allocation74_spill] sm:$0xff]  ;;  %v11414_v31 = vld [vmem:[#allocation73_spill] sm:$0xff] }
 0x16c   :  { %v5793_v45 = vmul.f32 -1.442695, %v8375_v29  ;;  %v638_v22 = vadd.f32 %v555_v47, %v11411_v32  ;;  %v11413_v55 = vrot.slane %v11412_v24, 5  ;;  %v11415_v53 = vrot.slane %v11414_v31, 4 }
 0x16d   :  { %v1437_v36 = vadd.f32 %v1353_v33, %v1237_v13  ;;  %v1275_v41 = vmul.f32 %v7088_v58, %v11416_v17  ;;  %v1475_v56 = vmul.f32 %v7091_v59, %v11416_v17  ;;  %v1675_v13 = vmul.f32 %v7094_v60, %v11416_v17  ;;  %v6422_v39 = vpop.eup %6421 }
 0x16e   :  { %v955_v30 = vsel %vm928_vm4, %v7124_v11, %v11413_v55  ;;  %v1155_v62 = vsel %vm1128_vm5, %v7126_v12, %v11415_v53  ;;  %v8408_v40 = vmul.f32 %v6420_v4, %v8204_v7  ;;  %6429 = vpow2.f32 %v5793_v45  ;;  %v11418_v55 = vld [vmem:[#allocation63_spill] sm:$0xff] }
 0x16f   :  { %v1637_v47 = vadd.f32 %v1553_v42, %v1437_v36  ;;  %v838_v21 = vadd.f32 %v755_v54, %v638_v22  ;;  %v1354_v33 = vrot.slane %v1275_v41, 3  ;;  %v1554_v32 = vrot.slane %v1475_v56, 2  ;;  %v11420_v4 = vld [vmem:[#allocation67_spill] sm:$0xff]  ;;  %v6424_v42 = vpop.eup %6423  ;;  %v11421_v41 = vld [vmem:[#allocation64_spill] sm:$0xff] }
 0x170   :  { %11417 = vst [vmem:[#allocation35_spill] sm:$0xff] %v8408_v40  ;;  %v1754_v24 = vrot.slane %v1675_v13, 1  ;;  %v11419_v31 = vrot.slane %v11418_v55, 7  ;;  %6156 = vmatmul.mubr.msk.f32.gmra.mxu1 %vm2090_vm9, %v8408_v40  ;;  %v1962_v5 = vadd.f32 1.0, %v6422_v39  ;;  %v11422_v56 = vrot.slane %v11421_v41, 6  ;;  %v11424_v39 = vld [vmem:[#allocation65_spill] sm:$0xff] }
 0x171   :  { %v8416_v17 = vadd.f32 %v1753_v37, %v1637_v47  ;;  %v1038_v7 = vadd.f32 %v955_v30, %v838_v21  ;;  %v1355_v54 = vsel %vm1328_vm6, %v7130_v14, %v1354_v33  ;;  %v1555_v36 = vsel %vm1528_vm7, %v7132_v15, %v1554_v32  ;;  %v11426_v55 = vld [vmem:[#allocation68_spill] sm:$0xff]  ;;  %v11429_v41 = vld [vmem:[#allocation82_spill] sm:$0xff] }
 0x172   :  { %v557_v53 = vsel %vm528_vm2, %v7120_v9, %v11419_v31  ;;  %v1755_v22 = vsel %vm1728_vm8, %v7134_v16, %v1754_v24  ;;  %v757_v13 = vsel %vm728_vm3, %v7122_v10, %v11422_v56  ;;  %v8430_v37 = vmul.f32 %v6424_v42, %v8230_v0 }
 0x173   :  { %v639_v45 = vadd.f32 %v557_v53, %v11420_v4  ;;  %6431 = vrcp.f32 %v1962_v5  ;;  %v5794_v30 = vmul.f32 -1.442695, %v8416_v17  ;;  %v1238_v47 = vadd.f32 %v1155_v62, %v1038_v7  ;;  %v11428_v53 = vld [vmem:[#allocation46_spill] sm:$0xff] }
 0x174   :  { %11423 = vst [vmem:[#allocation25_spill] sm:$0xff] %v8430_v37  ;;  %v11425_v33 = vrot.slane %v11424_v39, 5  ;;  %v11427_v24 = vrot.slane %v11426_v55, 4  ;;  %v1276_v4 = vmul.f32 %v11428_v53, %v7088_v58  ;;  %6158 = vmatprep.mubr.msk.f32.mxu1 %vm2090_vm9, %v8430_v37  ;;  %v1476_v0 = vmul.f32 %v11428_v53, %v7091_v59  ;;  %v6426_v7 = vpop.eup %6425  ;;  %v11431_v39 = vld [vmem:[#allocation83_spill] sm:$0xff] }
 0x175   :  { %v839_v21 = vadd.f32 %v757_v13, %v639_v45  ;;  %6433 = vpow2.f32 %v5794_v30  ;;  %v1438_v5 = vadd.f32 %v1355_v54, %v1238_v47  ;;  %v1676_v62 = vmul.f32 %v11428_v53, %v7094_v60 }
 0x176   :  { %v957_v32 = vsel %vm928_vm4, %v7124_v11, %v11425_v33  ;;  %v1157_v31 = vsel %vm1128_vm5, %v7126_v12, %v11427_v24  ;;  %v1356_v42 = vrot.slane %v1276_v4, 3  ;;  %v11430_v56 = vrot.slane %v11429_v41, 7  ;;  %v11434_v4 = vld [vmem:[#allocation84_spill] sm:$0xff] }
 0x177   :  { %v1039_v45 = vadd.f32 %v957_v32, %v839_v21  ;;  %v11432_v33 = vrot.slane %v11431_v39, 6  ;;  %v1963_v54 = vadd.f32 1.0, %v6426_v7  ;;  %v1638_v47 = vadd.f32 %v1555_v36, %v1438_v5  ;;  %v11433_v21 = vld [vmem:[#allocation87_spill] sm:$0xff]  ;;  %v6428_v28 = vpop.eup %6427  ;;  %v11437_v7 = vld [vmem:[#allocation85_spill] sm:$0xff] }
 0x178   :  { %v559_v13 = vsel %vm528_vm2, %v7120_v9, %v11430_v56  ;;  %v1556_v55 = vrot.slane %v1476_v0, 2  ;;  %v1756_v24 = vrot.slane %v1676_v62, 1  ;;  %v1357_v53 = vsel %vm1328_vm6, %v7130_v14, %v1356_v42 }
 0x179   :  { %v759_v30 = vsel %vm728_vm3, %v7122_v10, %v11432_v33  ;;  %v1239_v25 = vadd.f32 %v1157_v31, %v1039_v45  ;;  %v640_v32 = vadd.f32 %v559_v13, %v11433_v21  ;;  %v11435_v41 = vrot.slane %v11434_v4, 5 }
 0x17a   :  { %6435 = vrcp.f32 %v1963_v54  ;;  %v8464_v39 = vadd.f32 %v1755_v22, %v1638_v47  ;;  %v1557_v36 = vsel %vm1528_vm7, %v7132_v15, %v1556_v55  ;;  %v1757_v31 = vsel %vm1728_vm8, %v7134_v16, %v1756_v24  ;;  %v11439_v22 = vld [vmem:[#allocation61_spill] sm:$0xff] }
 0x17b   :  { %v959_v56 = vsel %vm928_vm4, %v7124_v11, %v11435_v41  ;;  %v8471_v5 = vmul.f32 %v6428_v28, %v8276_v26  ;;  %v1439_v0 = vadd.f32 %v1357_v53, %v1239_v25  ;;  %v840_v62 = vadd.f32 %v759_v30, %v640_v32  ;;  %v6430_v28 = vpop.eup %6429  ;;  %v11440_v30 = vld [vmem:[#allocation75_spill] sm:$0xff]  ;;  %v11442_v53 = vld [vmem:[#allocation77_spill] sm:$0xff] }
 0x17c   :  { %v11438_v45 = vrot.slane %v11437_v7, 4  ;;  %v5795_v13 = vmul.f32 -1.442695, %v8464_v39  ;;  %v1277_v33 = vmul.f32 %v7088_v58, %v11439_v22  ;;  %v1477_v54 = vmul.f32 %v7091_v59, %v11439_v22 }
 0x17d   :  { %11436 = vst [vmem:[#allocation28_spill] sm:$0xff] %v8471_v5  ;;  %v1677_v47 = vmul.f32 %v7094_v60, %v11439_v22  ;;  %6159 = vmatmul.mubr.msk.f32.gmra.mxu1 %vm2090_vm9, %v8471_v5  ;;  %v1639_v25 = vadd.f32 %v1557_v36, %v1439_v0  ;;  %v1040_v26 = vadd.f32 %v959_v56, %v840_v62  ;;  %v11441_v55 = vrot.slane %v11440_v30, 7  ;;  %v11444_v36 = vld [vmem:[#allocation78_spill] sm:$0xff]  ;;  %v11445_v30 = vld [vmem:[#allocation79_spill] sm:$0xff] }
 0x17e   :  { %v1159_v42 = vsel %vm1128_vm5, %v7126_v12, %v11438_v45  ;;  %v11443_v21 = vrot.slane %v11442_v53, 6  ;;  %v1964_v4 = vadd.f32 1.0, %v6430_v28  ;;  %6437 = vpow2.f32 %v5795_v13  ;;  %v11450_v53 = vld [vmem:[#allocation56_spill] sm:$0xff] }
 0x17f   :  { %v561_v24 = vsel %vm528_vm2, %v7120_v9, %v11441_v55  ;;  %v1358_v41 = vrot.slane %v1277_v33, 3  ;;  %v1558_v7 = vrot.slane %v1477_v54, 2  ;;  %v8494_v45 = vadd.f32 %v1757_v31, %v1639_v25  ;;  %v11448_v25 = vld [vmem:[#allocation80_spill] sm:$0xff] }
 0x180   :  { %v761_v32 = vsel %vm728_vm3, %v7122_v10, %v11443_v21  ;;  %v1240_v22 = vadd.f32 %v1159_v42, %v1040_v26  ;;  %v1758_v34 = vrot.slane %v1677_v47, 1  ;;  %v641_v56 = vadd.f32 %v561_v24, %v11444_v36  ;;  %v6432_v33 = vpop.eup %6431 }
 0x181   :  { %6439 = vrcp.f32 %v1964_v4  ;;  %v1359_v0 = vsel %vm1328_vm6, %v7130_v14, %v1358_v41  ;;  %v1559_v62 = vsel %vm1528_vm7, %v7132_v15, %v1558_v7  ;;  %v11446_v55 = vrot.slane %v11445_v30, 5 }
 0x182   :  { %v5796_v31 = vmul.f32 -1.442695, %v8494_v45  ;;  %v1440_v54 = vadd.f32 %v1359_v0, %v1240_v22  ;;  %v1759_v42 = vsel %vm1728_vm8, %v7134_v16, %v1758_v34  ;;  %v841_v47 = vadd.f32 %v761_v32, %v641_v56  ;;  %v6434_v41 = vpop.eup %6433  ;;  %v11451_v56 = vld [vmem:[#allocation94_spill] sm:$0xff] }
 0x183   :  { %v961_v13 = vsel %vm928_vm4, %v7124_v11, %v11446_v55  ;;  %v8509_v28 = vmul.f32 %v6432_v33, %v8308_v27  ;;  %v11449_v26 = vrot.slane %v11448_v25, 4  ;;  %v1278_v21 = vmul.f32 %v11450_v53, %v7088_v58  ;;  %v11454_v25 = vld [vmem:[#allocation95_spill] sm:$0xff] }
 0x184   :  { %v1478_v4 = vmul.f32 %v11450_v53, %v7091_v59  ;;  %6441 = vpow2.f32 %v5796_v31  ;;  %v1640_v7 = vadd.f32 %v1559_v62, %v1440_v54  ;;  %v1041_v22 = vadd.f32 %v961_v13, %v841_v47  ;;  %v11453_v62 = vld [vmem:[#allocation96_spill] sm:$0xff] }
 0x185   :  { %11447 = vst [vmem:[#allocation27_spill] sm:$0xff] %v8509_v28  ;;  %v1161_v24 = vsel %vm1128_vm5, %v7126_v12, %v11449_v26  ;;  %v1678_v34 = vmul.f32 %v11450_v53, %v7094_v60  ;;  %6161 = vmatprep.mubr.msk.f32.mxu1 %vm2090_vm9, %v8509_v28  ;;  %v1965_v27 = vadd.f32 1.0, %v6434_v41  ;;  %v1360_v32 = vrot.slane %v1278_v21, 3 }
 0x186   :  { %v1560_v36 = vrot.slane %v1478_v4, 2  ;;  %v11452_v0 = vrot.slane %v11451_v56, 7  ;;  %v8527_v55 = vadd.f32 %v1759_v42, %v1640_v7  ;;  %v1241_v33 = vadd.f32 %v1161_v24, %v1041_v22  ;;  %v11457_v22 = vld [vmem:[#allocation97_spill] sm:$0xff]  ;;  %v11460_v56 = vld [vmem:[#allocation70_spill] sm:$0xff] }
 0x187   :  { %v1760_v31 = vrot.slane %v1678_v34, 1  ;;  %6443 = vrcp.f32 %v1965_v27  ;;  %v1361_v54 = vsel %vm1328_vm6, %v7130_v14, %v1360_v32  ;;  %v11455_v26 = vrot.slane %v11454_v25, 6  ;;  %v6436_v21 = vpop.eup %6435  ;;  %v11463_v25 = vld [vmem:[#allocation89_spill] sm:$0xff] }
 0x188   :  { %v563_v30 = vsel %vm528_vm2, %v7120_v9, %v11452_v0  ;;  %v1561_v47 = vsel %vm1528_vm7, %v7132_v15, %v1560_v36  ;;  %v5797_v42 = vmul.f32 -1.442695, %v8527_v55  ;;  %v1441_v4 = vadd.f32 %v1361_v54, %v1241_v33 }
 0x189   :  { %v642_v13 = vadd.f32 %v563_v30, %v11453_v62  ;;  %v763_v53 = vsel %vm728_vm3, %v7122_v10, %v11455_v26  ;;  %v1761_v24 = vsel %vm1728_vm8, %v7134_v16, %v1760_v31  ;;  %v8542_v7 = vmul.f32 %v6436_v21, %v8342_v20 }
 0x18a   :  { %v11458_v34 = vrot.slane %v11457_v22, 5  ;;  %v11459_v32 = vrot.slane %v7619_v61, 4  ;;  %v1279_v0 = vmul.f32 %v7088_v58, %v11460_v56  ;;  %6445 = vpow2.f32 %v5797_v42  ;;  %v11461_v61 = vld [vmem:[#allocation88_spill] sm:$0xff] }
 0x18b   :  { %v842_v41 = vadd.f32 %v763_v53, %v642_v13  ;;  %11456 = vst [vmem:[#allocation29_spill] sm:$0xff] %v8542_v7  ;;  %v1641_v30 = vadd.f32 %v1561_v47, %v1441_v4  ;;  %v1479_v20 = vmul.f32 %v7091_v59, %v11460_v56  ;;  %6162 = vmatmul.mubr.msk.f32.gmra.mxu1 %vm2090_vm9, %v8542_v7  ;;  %v11462_v13 = vrot.slane %v11461_v61, 7  ;;  %v6438_v53 = vpop.eup %6437 }
 0x18c   :  { %v963_v27 = vsel %vm928_vm4, %v7124_v11, %v11458_v34  ;;  %v1163_v36 = vsel %vm1128_vm5, %v7126_v12, %v11459_v32  ;;  %v1362_v31 = vrot.slane %v1279_v0, 3  ;;  %v1679_v62 = vmul.f32 %v7094_v60, %v11460_v56  ;;  %v11466_v56 = vld [vmem:[#allocation92_spill] sm:$0xff] }
 0x18d   :  { %v1042_v33 = vadd.f32 %v963_v27, %v842_v41  ;;  %v565_v54 = vsel %vm528_vm2, %v7120_v9, %v11462_v13  ;;  %v11464_v26 = vrot.slane %v11463_v25, 6  ;;  %v8568_v21 = vadd.f32 %v1761_v24, %v1641_v30  ;;  %v11465_v41 = vld [vmem:[#allocation91_spill] sm:$0xff] }
 0x18e   :  { %v1562_v4 = vrot.slane %v1479_v20, 2  ;;  %v643_v22 = vadd.f32 %v565_v54, %v11465_v41  ;;  %v1966_v34 = vadd.f32 1.0, %v6438_v53  ;;  %v1363_v27 = vsel %vm1328_vm6, %v7130_v14, %v1362_v31  ;;  %v6440_v13 = vpop.eup %6439  ;;  %v11469_v20 = vld [vmem:[#allocation93_spill] sm:$0xff] }
 0x18f   :  { %v765_v47 = vsel %vm728_vm3, %v7122_v10, %v11464_v26  ;;  %v1242_v42 = vadd.f32 %v1163_v36, %v1042_v33  ;;  %v1762_v32 = vrot.slane %v1679_v62, 1  ;;  %v11467_v0 = vrot.slane %v11466_v56, 5 }
 0x190   :  { %v5798_v25 = vmul.f32 -1.442695, %v8568_v21  ;;  %v1563_v24 = vsel %vm1528_vm7, %v7132_v15, %v1562_v4  ;;  %v843_v36 = vadd.f32 %v765_v47, %v643_v22  ;;  %v8581_v30 = vmul.f32 %v6440_v13, %v8375_v29  ;;  %v11472_v22 = vld [vmem:[#allocation104_spill] sm:$0xff] }
 0x191   :  { %v965_v61 = vsel %vm928_vm4, %v7124_v11, %v11467_v0  ;;  %v1442_v26 = vadd.f32 %v1363_v27, %v1242_v42  ;;  %6447 = vrcp.f32 %v1966_v34  ;;  %v1763_v33 = vsel %vm1728_vm8, %v7134_v16, %v1762_v32  ;;  %v11471_v42 = vld [vmem:[#allocation66_spill] sm:$0xff]  ;;  %v6442_v4 = vpop.eup %6441  ;;  %v11474_v32 = vld [vmem:[#allocation107_spill] sm:$0xff] }
 0x192   :  { %11468 = vst [vmem:[#allocation30_spill] sm:$0xff] %v8581_v30  ;;  %v11470_v31 = vrot.slane %v11469_v20, 4  ;;  %6449 = vpow2.f32 %v5798_v25  ;;  %v1043_v53 = vadd.f32 %v965_v61, %v843_v36  ;;  %v1280_v41 = vmul.f32 %v11471_v42, %v7088_v58  ;;  %6164 = vmatprep.mubr.msk.f32.mxu1 %vm2090_vm9, %v8581_v30  ;;  %v11476_v20 = vld [vmem:[#allocation106_spill] sm:$0xff] }
 0x193   :  { %v1642_v54 = vadd.f32 %v1563_v24, %v1442_v26  ;;  %v1480_v29 = vmul.f32 %v11471_v42, %v7091_v59  ;;  %v1680_v47 = vmul.f32 %v11471_v42, %v7094_v60  ;;  %v11473_v34 = vrot.slane %v11472_v22, 7  ;;  %v11477_v42 = vld [vmem:[#allocation108_spill] sm:$0xff] }
 0x194   :  { %v1165_v62 = vsel %vm1128_vm5, %v7126_v12, %v11470_v31  ;;  %v11475_v56 = vrot.slane %v11474_v32, 6  ;;  %v1967_v61 = vadd.f32 1.0, %v6442_v4  ;;  %v1364_v26 = vrot.slane %v1280_v41, 3 }
 0x195   :  { %v567_v27 = vsel %vm528_vm2, %v7120_v9, %v11473_v34  ;;  %v8605_v13 = vadd.f32 %v1763_v33, %v1642_v54  ;;  %v1243_v25 = vadd.f32 %v1165_v62, %v1043_v53  ;;  %v1564_v24 = vrot.slane %v1480_v29, 2  ;;  %v6444_v34 = vpop.eup %6443 }
 0x196   :  { %v767_v0 = vsel %vm728_vm3, %v7122_v10, %v11475_v56  ;;  %v1764_v36 = vrot.slane %v1680_v47, 1  ;;  %v644_v31 = vadd.f32 %v567_v27, %v11476_v20  ;;  %v11478_v43 = vrot.slane %v11477_v42, 5  ;;  %v11480_v47 = vld [vmem:[#allocation81_spill] sm:$0xff] }
 0x197   :  { %6451 = vrcp.f32 %v1967_v61  ;;  %v5799_v32 = vmul.f32 -1.442695, %v8605_v13  ;;  %v1365_v4 = vsel %vm1328_vm6, %v7130_v14, %v1364_v26  ;;  %v11479_v33 = vrot.slane %v7670_v2, 4  ;;  %v6446_v56 = vpop.eup %6445 }
 0x198   :  { %v967_v22 = vsel %vm928_vm4, %v7124_v11, %v11478_v43  ;;  %v8620_v54 = vmul.f32 %v6444_v34, %v8416_v17  ;;  %v1443_v53 = vadd.f32 %v1365_v4, %v1243_v25  ;;  %v1565_v41 = vsel %vm1528_vm7, %v7132_v15, %v1564_v24  ;;  %v11481_v25 = vld [vmem:[#allocation99_spill] sm:$0xff] }
 0x199   :  { %v1167_v62 = vsel %vm1128_vm5, %v7126_v12, %v11479_v33  ;;  %v1765_v43 = vsel %vm1728_vm8, %v7134_v16, %v1764_v36  ;;  %6453 = vpow2.f32 %v5799_v32  ;;  %v844_v29 = vadd.f32 %v767_v0, %v644_v31  ;;  %v11483_v0 = vld [vmem:[#allocation100_spill] sm:$0xff] }
 0x19a   :  { %v1281_v27 = vmul.f32 %v7088_v58, %v11480_v47  ;;  %v1481_v2 = vmul.f32 %v7091_v59, %v11480_v47  ;;  %6165 = vmatmul.mubr.msk.f32.gmra.mxu1 %vm2090_vm9, %v8620_v54  ;;  %v1643_v17 = vadd.f32 %v1565_v41, %v1443_v53  ;;  %v1681_v61 = vmul.f32 %v7094_v60, %v11480_v47  ;;  %v11485_v53 = vld [vmem:[#allocation102_spill] sm:$0xff]  ;;  %v11486_v47 = vld [vmem:[#allocation101_spill] sm:$0xff] }
 0x19b   :  { %v11482_v26 = vrot.slane %v11481_v25, 7  ;;  %v11484_v36 = vrot.slane %v11483_v0, 6  ;;  %v1968_v31 = vadd.f32 1.0, %v6446_v56  ;;  %v1044_v42 = vadd.f32 %v967_v22, %v844_v29 }
 0x19c   :  { %v1366_v34 = vrot.slane %v1281_v27, 3  ;;  %v1566_v32 = vrot.slane %v1481_v2, 2  ;;  %v8642_v4 = vadd.f32 %v1765_v43, %v1643_v17  ;;  %v1766_v33 = vrot.slane %v1681_v61, 1  ;;  %v11488_v2 = vld [vmem:[#allocation103_spill] sm:$0xff] }
 0x19d   :  { %v569_v24 = vsel %vm528_vm2, %v7120_v9, %v11482_v26  ;;  %v769_v20 = vsel %vm728_vm3, %v7122_v10, %v11484_v36  ;;  %v11487_v30 = vrot.slane %v11486_v47, 5  ;;  %6455 = vrcp.f32 %v1968_v31 }
 0x19e   :  { %v645_v41 = vadd.f32 %v569_v24, %v11485_v53  ;;  %v1244_v26 = vadd.f32 %v1167_v62, %v1044_v42  ;;  %v1367_v0 = vsel %vm1328_vm6, %v7130_v14, %v1366_v34  ;;  %v1567_v22 = vsel %vm1528_vm7, %v7132_v15, %v1566_v32  ;;  %v11490_v62 = vld [vmem:[#allocation76_spill] sm:$0xff]  ;;  %v11492_v32 = vld [vmem:[#allocation115_spill] sm:$0xff] }
 0x19f   :  { %v969_v25 = vsel %vm928_vm4, %v7124_v11, %v11487_v30  ;;  %v5800_v29 = vmul.f32 -1.442695, %v8642_v4  ;;  %v1767_v43 = vsel %vm1728_vm8, %v7134_v16, %v1766_v33  ;;  %v11489_v56 = vrot.slane %v11488_v2, 4  ;;  %v6448_v30 = vpop.eup %6447 }
 0x1a0   :  { %v845_v27 = vadd.f32 %v769_v20, %v645_v41  ;;  %v1444_v61 = vadd.f32 %v1367_v0, %v1244_v26  ;;  %v1282_v24 = vmul.f32 %v11490_v62, %v7088_v58  ;;  %v1482_v36 = vmul.f32 %v11490_v62, %v7091_v59  ;;  %v6450_v42 = vpop.eup %6449 }
 0x1a1   :  { %v1169_v17 = vsel %vm1128_vm5, %v7126_v12, %v11489_v56  ;;  %v1682_v31 = vmul.f32 %v11490_v62, %v7094_v60  ;;  %v8667_v34 = vmul.f32 %v6448_v30, %v8464_v39  ;;  %6457 = vpow2.f32 %v5800_v29  ;;  %v11494_v62 = vld [vmem:[#allocation118_spill] sm:$0xff] }
 0x1a2   :  { %v1045_v20 = vadd.f32 %v969_v25, %v845_v27  ;;  %v11493_v33 = vrot.slane %v11492_v32, 7  ;;  %v1969_v41 = vadd.f32 1.0, %v6450_v42  ;;  %v1644_v47 = vadd.f32 %v1567_v22, %v1444_v61 }
 0x1a3   :  { %11491 = vst [vmem:[#allocation44_spill] sm:$0xff] %v8667_v34  ;;  %v1368_v26 = vrot.slane %v1282_v24, 3  ;;  %v1568_v0 = vrot.slane %v1482_v36, 2  ;;  %6167 = vmatprep.mubr.msk.f32.mxu1 %vm2090_vm9, %v8667_v34  ;;  %v1768_v56 = vrot.slane %v1682_v31, 1  ;;  %v11495_v39 = vrot.slane %v7710_v46, 6  ;;  %v11496_v36 = vld [vmem:[#allocation116_spill] sm:$0xff] }
 0x1a4   :  { %v571_v53 = vsel %vm528_vm2, %v7120_v9, %v11493_v33  ;;  %v1245_v2 = vadd.f32 %v1169_v17, %v1045_v20  ;;  %6459 = vrcp.f32 %v1969_v41  ;;  %v8680_v29 = vadd.f32 %v1767_v43, %v1644_v47  ;;  %v6452_v30 = vpop.eup %6451  ;;  %v11498_v20 = vld [vmem:[#allocation117_spill] sm:$0xff] }
 0x1a5   :  { %v646_v28 = vadd.f32 %v571_v53, %v11494_v62  ;;  %v771_v25 = vsel %vm728_vm3, %v7122_v10, %v11495_v39  ;;  %v1369_v22 = vsel %vm1328_vm6, %v7130_v14, %v1368_v26  ;;  %v1569_v27 = vsel %vm1528_vm7, %v7132_v15, %v1568_v0  ;;  %v11500_v53 = vld [vmem:[#allocation90_spill] sm:$0xff]  ;;  %v11501_v62 = vld [vmem:[#allocation109_spill] sm:$0xff] }
 0x1a6   :  { %v1445_v61 = vadd.f32 %v1369_v22, %v1245_v2  ;;  %v1769_v17 = vsel %vm1728_vm8, %v7134_v16, %v1768_v56  ;;  %v11497_v46 = vrot.slane %v11496_v36, 5  ;;  %v8693_v43 = vmul.f32 %v6452_v30, %v8494_v45  ;;  %v6454_v47 = vpop.eup %6453  ;;  %v11503_v36 = vld [vmem:[#allocation112_spill] sm:$0xff] }
 0x1a7   :  { %v846_v24 = vadd.f32 %v771_v25, %v646_v28  ;;  %v5801_v42 = vmul.f32 -1.442695, %v8680_v29  ;;  %v11499_v32 = vrot.slane %v11498_v20, 4  ;;  %v1283_v41 = vmul.f32 %v7088_v58, %v11500_v53 }
 0x1a8   :  { %v971_v31 = vsel %vm928_vm4, %v7124_v11, %v11497_v46  ;;  %v1645_v28 = vadd.f32 %v1569_v27, %v1445_v61  ;;  %v1483_v0 = vmul.f32 %v7091_v59, %v11500_v53  ;;  %v1683_v45 = vmul.f32 %v7094_v60, %v11500_v53  ;;  %6168 = vmatmul.mubr.msk.f32.gmra.mxu1 %vm2090_vm9, %v8693_v43 }
 0x1a9   :  { %v1171_v33 = vsel %vm1128_vm5, %v7126_v12, %v11499_v32  ;;  %v1046_v26 = vadd.f32 %v971_v31, %v846_v24  ;;  %v1970_v2 = vadd.f32 1.0, %v6454_v47  ;;  %6461 = vpow2.f32 %v5801_v42  ;;  %v11504_v31 = vld [vmem:[#allocation110_spill] sm:$0xff] }
 0x1aa   :  { %v1370_v56 = vrot.slane %v1283_v41, 3  ;;  %v11502_v39 = vrot.slane %v11501_v62, 7  ;;  %v8712_v22 = vadd.f32 %v1769_v17, %v1645_v28  ;;  %v1570_v30 = vrot.slane %v1483_v0, 2  ;;  %v6456_v32 = vpop.eup %6455 }
 0x1ab   :  { %v1246_v27 = vadd.f32 %v1171_v33, %v1046_v26  ;;  %v1770_v61 = vrot.slane %v1683_v45, 1  ;;  %6463 = vrcp.f32 %v1970_v2  ;;  %v11505_v20 = vrot.slane %v11504_v31, 6  ;;  %v11507_v26 = vld [vmem:[#allocation111_spill] sm:$0xff]  ;;  %v11509_v2 = vld [vmem:[#allocation113_spill] sm:$0xff] }
 0x1ac   :  { %v573_v25 = vsel %vm528_vm2, %v7120_v9, %v11502_v39  ;;  %v1371_v24 = vsel %vm1328_vm6, %v7130_v14, %v1370_v56  ;;  %v5802_v53 = vmul.f32 -1.442695, %v8712_v22  ;;  %v1571_v17 = vsel %vm1528_vm7, %v7132_v15, %v1570_v30 }
 0x1ad   :  { %v647_v46 = vadd.f32 %v573_v25, %v11503_v36  ;;  %v773_v42 = vsel %vm728_vm3, %v7122_v10, %v11505_v20  ;;  %v1446_v41 = vadd.f32 %v1371_v24, %v1246_v27  ;;  %v1771_v33 = vsel %vm1728_vm8, %v7134_v16, %v1770_v61  ;;  %v11511_v25 = vld [vmem:[#allocation86_spill] sm:$0xff]  ;;  %v11512_v36 = vld [vmem:[#allocation125_spill] sm:$0xff] }
 0x1ae   :  { %v8727_v47 = vmul.f32 %v6456_v32, %v8527_v55  ;;  %v11508_v0 = vrot.slane %v11507_v26, 5  ;;  %v11510_v56 = vrot.slane %v11509_v2, 4  ;;  %6465 = vpow2.f32 %v5802_v53  ;;  %v6458_v30 = vpop.eup %6457  ;;  %v11514_v20 = vld [vmem:[#allocation126_spill] sm:$0xff] }
 0x1af   :  { %v847_v28 = vadd.f32 %v773_v42, %v647_v46  ;;  %v1646_v39 = vadd.f32 %v1571_v17, %v1446_v41  ;;  %v1284_v27 = vmul.f32 %v11511_v25, %v7088_v58  ;;  %v1484_v55 = vmul.f32 %v11511_v25, %v7091_v59 }
 0x1b0   :  { %11506 = vst [vmem:[#allocation47_spill] sm:$0xff] %v8727_v47  ;;  %v973_v45 = vsel %vm928_vm4, %v7124_v11, %v11508_v0  ;;  %v1173_v62 = vsel %vm1128_vm5, %v7126_v12, %v11510_v56  ;;  %6170 = vmatprep.mubr.msk.f32.mxu1 %vm2090_vm9, %v8727_v47  ;;  %v1684_v24 = vmul.f32 %v11511_v25, %v7094_v60  ;;  %v11513_v46 = vrot.slane %v11512_v36, 7  ;;  %v11517_v56 = vld [vmem:[#allocation127_spill] sm:$0xff] }
 0x1b1   :  { %v1047_v61 = vadd.f32 %v973_v45, %v847_v28  ;;  %v11515_v42 = vrot.slane %v11514_v20, 6  ;;  %v1971_v53 = vadd.f32 1.0, %v6458_v30  ;;  %v8753_v41 = vadd.f32 %v1771_v33, %v1646_v39  ;;  %v11516_v45 = vld [vmem:[#allocation129_spill] sm:$0xff] }
 0x1b2   :  { %v575_v31 = vsel %vm528_vm2, %v7120_v9, %v11513_v46  ;;  %v1372_v17 = vrot.slane %v1284_v27, 3  ;;  %v1572_v26 = vrot.slane %v1484_v55, 2  ;;  %v1772_v28 = vrot.slane %v1684_v24, 1  ;;  %v6460_v46 = vpop.eup %6459 }
 0x1b3   :  { %v775_v32 = vsel %vm728_vm3, %v7122_v10, %v11515_v42  ;;  %v1247_v0 = vadd.f32 %v1173_v62, %v1047_v61  ;;  %v648_v2 = vadd.f32 %v575_v31, %v11516_v45  ;;  %v11518_v25 = vrot.slane %v11517_v56, 5  ;;  %v11519_v61 = vld [vmem:[#allocation128_spill] sm:$0xff]  ;;  %v11521_v42 = vld [vmem:[#allocation105_spill] sm:$0xff] }
 0x1b4   :  { %6467 = vrcp.f32 %v1971_v53  ;;  %v5803_v20 = vmul.f32 -1.442695, %v8753_v41  ;;  %v1373_v30 = vsel %vm1328_vm6, %v7130_v14, %v1372_v17  ;;  %v1573_v33 = vsel %vm1528_vm7, %v7132_v15, %v1572_v26 }
 0x1b5   :  { %v975_v36 = vsel %vm928_vm4, %v7124_v11, %v11518_v25  ;;  %v8766_v62 = vmul.f32 %v6460_v46, %v8568_v21  ;;  %v1447_v39 = vadd.f32 %v1373_v30, %v1247_v0  ;;  %v1773_v27 = vsel %vm1728_vm8, %v7134_v16, %v1772_v28  ;;  %v11522_v0 = vld [vmem:[#allocation119_spill] sm:$0xff]  ;;  %v11524_v46 = vld [vmem:[#allocation122_spill] sm:$0xff]  ;;  %v11525_v30 = vld [vmem:[#allocation120_spill] sm:$0xff] }
 0x1b6   :  { %v848_v55 = vadd.f32 %v775_v32, %v648_v2  ;;  %6469 = vpow2.f32 %v5803_v20  ;;  %v11520_v24 = vrot.slane %v11519_v61, 4  ;;  %v1285_v53 = vmul.f32 %v7088_v58, %v11521_v42  ;;  %v6462_v2 = vpop.eup %6461 }
 0x1b7   :  { %v1485_v17 = vmul.f32 %v7091_v59, %v11521_v42  ;;  %6171 = vmatmul.mubr.msk.f32.gmra.mxu1 %vm2090_vm9, %v8766_v62  ;;  %v1647_v21 = vadd.f32 %v1573_v33, %v1447_v39  ;;  %v1685_v32 = vmul.f32 %v7094_v60, %v11521_v42  ;;  %v11523_v28 = vrot.slane %v11522_v0, 7 }
 0x1b8   :  { %v1175_v31 = vsel %vm1128_vm5, %v7126_v12, %v11520_v24  ;;  %v1048_v26 = vadd.f32 %v975_v36, %v848_v55  ;;  %v1374_v56 = vrot.slane %v1285_v53, 3  ;;  %v11526_v61 = vrot.slane %v11525_v30, 6  ;;  %v6464_v42 = vpop.eup %6463 }
 0x1b9   :  { %v577_v45 = vsel %vm528_vm2, %v7120_v9, %v11523_v28  ;;  %v1574_v25 = vrot.slane %v1485_v17, 2  ;;  %v1972_v33 = vadd.f32 1.0, %v6462_v2  ;;  %v8791_v36 = vadd.f32 %v1773_v27, %v1647_v21  ;;  %v11527_v28 = vld [vmem:[#allocation123_spill] sm:$0xff] }
 0x1ba   :  { %v649_v20 = vadd.f32 %v577_v45, %v11524_v46  ;;  %v777_v24 = vsel %vm728_vm3, %v7122_v10, %v11526_v61  ;;  %v1248_v39 = vadd.f32 %v1175_v31, %v1048_v26  ;;  %v1774_v55 = vrot.slane %v1685_v32, 1  ;;  %v11530_v32 = vld [vmem:[#allocation124_spill] sm:$0xff] }
 0x1bb   :  { %v1375_v0 = vsel %vm1328_vm6, %v7130_v14, %v1374_v56  ;;  %v1575_v53 = vsel %vm1528_vm7, %v7132_v15, %v1574_v25  ;;  %v11528_v45 = vrot.slane %v11527_v28, 5  ;;  %v8802_v30 = vmul.f32 %v6464_v42, %v8605_v13  ;;  %v11532_v25 = vld [vmem:[#allocation98_spill] sm:$0xff]  ;;  %v6466_v61 = vpop.eup %6465 }
 0x1bc   :  { %v849_v17 = vadd.f32 %v777_v24, %v649_v20  ;;  %6471 = vrcp.f32 %v1972_v33  ;;  %v5804_v27 = vmul.f32 -1.442695, %v8791_v36  ;;  %v1448_v31 = vadd.f32 %v1375_v0, %v1248_v39  ;;  %v11533_v0 = vld [vmem:[#allocation136_spill] sm:$0xff] }
 0x1bd   :  { %v977_v46 = vsel %vm928_vm4, %v7124_v11, %v11528_v45  ;;  %11529 = vst [vmem:[#allocation45_spill] sm:$0xff] %v8802_v30  ;;  %v1775_v21 = vsel %vm1728_vm8, %v7134_v16, %v1774_v55  ;;  %v11531_v2 = vrot.slane %v11530_v32, 4  ;;  %v1286_v20 = vmul.f32 %v11532_v25, %v7088_v58  ;;  %6173 = vmatprep.mubr.msk.f32.mxu1 %vm2090_vm9, %v8802_v30  ;;  %v11545_v30 = vld [vmem:[#allocation132_spill] sm:$0xff] }
 0x1be   :  { %v1049_v26 = vadd.f32 %v977_v46, %v849_v17  ;;  %6473 = vpow2.f32 %v5804_v27  ;;  %v1648_v13 = vadd.f32 %v1575_v53, %v1448_v31  ;;  %v1486_v24 = vmul.f32 %v11532_v25, %v7091_v59  ;;  %v11535_v27 = vld [vmem:[#allocation138_spill] sm:$0xff] }
 0x1bf   :  { %v1177_v56 = vsel %vm1128_vm5, %v7126_v12, %v11531_v2  ;;  %v1686_v33 = vmul.f32 %v11532_v25, %v7094_v60  ;;  %v1973_v39 = vadd.f32 1.0, %v6466_v61  ;;  %v1376_v42 = vrot.slane %v1286_v20, 3  ;;  %v11536_v2 = vld [vmem:[#allocation137_spill] sm:$0xff] }
 0x1c0   :  { %v1249_v55 = vadd.f32 %v1177_v56, %v1049_v26  ;;  %v11534_v17 = vrot.slane %v11533_v0, 7  ;;  %v8823_v45 = vadd.f32 %v1775_v21, %v1648_v13  ;;  %v1576_v46 = vrot.slane %v1486_v24, 2  ;;  %v11538_v56 = vld [vmem:[#allocation139_spill] sm:$0xff] }
 0x1c1   :  { %v1776_v32 = vrot.slane %v1686_v33, 1  ;;  %6475 = vrcp.f32 %v1973_v39  ;;  %v1377_v31 = vsel %vm1328_vm6, %v7130_v14, %v1376_v42  ;;  %v11537_v25 = vrot.slane %v11536_v2, 6  ;;  %v6468_v21 = vpop.eup %6467 }
 0x1c2   :  { %v579_v28 = vsel %vm528_vm2, %v7120_v9, %v11534_v17  ;;  %v11539_v20 = vrot.slane %v11538_v56, 5  ;;  %v5805_v13 = vmul.f32 -1.442695, %v8823_v45  ;;  %v1449_v24 = vadd.f32 %v1377_v31, %v1249_v55  ;;  %v11542_v31 = vld [vmem:[#allocation131_spill] sm:$0xff] }
 0x1c3   :  { %v650_v53 = vadd.f32 %v579_v28, %v11535_v27  ;;  %v779_v26 = vsel %vm728_vm3, %v7122_v10, %v11537_v25  ;;  %v1577_v33 = vsel %vm1528_vm7, %v7132_v15, %v1576_v46  ;;  %v1777_v39 = vsel %vm1728_vm8, %v7134_v16, %v1776_v32  ;;  %v11541_v27 = vld [vmem:[#allocation121_spill] sm:$0xff]  ;;  %v6470_v25 = vpop.eup %6469 }
 0x1c4   :  { %v979_v61 = vsel %vm928_vm4, %v7124_v11, %v11539_v20  ;;  %v8842_v42 = vmul.f32 %v6468_v21, %v8642_v4  ;;  %v11540_v17 = vrot.slane %v7829_v1, 4  ;;  %v1287_v2 = vmul.f32 %v7088_v58, %v11541_v27 }
 0x1c5   :  { %v850_v0 = vadd.f32 %v779_v26, %v650_v53  ;;  %6477 = vpow2.f32 %v5805_v13  ;;  %v1649_v55 = vadd.f32 %v1577_v33, %v1449_v24  ;;  %v1487_v46 = vmul.f32 %v7091_v59, %v11541_v27  ;;  %v11544_v24 = vld [vmem:[#allocation133_spill] sm:$0xff] }
 0x1c6   :  { %v1179_v28 = vsel %vm1128_vm5, %v7126_v12, %v11540_v17  ;;  %v1687_v32 = vmul.f32 %v7094_v60, %v11541_v27  ;;  %6174 = vmatmul.mubr.msk.f32.gmra.mxu1 %vm2090_vm9, %v8842_v42  ;;  %v1974_v4 = vadd.f32 1.0, %v6470_v25  ;;  %v1378_v53 = vrot.slane %v1287_v2, 3 }
 0x1c7   :  { %v1050_v1 = vadd.f32 %v979_v61, %v850_v0  ;;  %v11543_v26 = vrot.slane %v11542_v31, 7  ;;  %v8860_v20 = vadd.f32 %v1777_v39, %v1649_v55  ;;  %v1578_v21 = vrot.slane %v1487_v46, 2 }
 0x1c8   :  { %v1778_v13 = vrot.slane %v1687_v32, 1  ;;  %6479 = vrcp.f32 %v1974_v4  ;;  %v1379_v27 = vsel %vm1328_vm6, %v7130_v14, %v1378_v53  ;;  %v11546_v25 = vrot.slane %v11545_v30, 6  ;;  %v11549_v30 = vld [vmem:[#allocation135_spill] sm:$0xff] }
 0x1c9   :  { %v581_v56 = vsel %vm528_vm2, %v7120_v9, %v11543_v26  ;;  %v1250_v17 = vadd.f32 %v1179_v28, %v1050_v1  ;;  %v5806_v0 = vmul.f32 -1.442695, %v8860_v20  ;;  %v1579_v39 = vsel %vm1528_vm7, %v7132_v15, %v1578_v21  ;;  %v6472_v46 = vpop.eup %6471  ;;  %v11547_v28 = vld [vmem:[#allocation134_spill] sm:$0xff] }
 0x1ca   :  { %v651_v33 = vadd.f32 %v581_v56, %v11544_v24  ;;  %v781_v61 = vsel %vm728_vm3, %v7122_v10, %v11546_v25  ;;  %v1779_v2 = vsel %vm1728_vm8, %v7134_v16, %v1778_v13  ;;  %v11548_v4 = vrot.slane %v11547_v28, 5  ;;  %v11551_v26 = vld [vmem:[#allocation114_spill] sm:$0xff] }
 0x1cb   :  { %v1450_v32 = vadd.f32 %v1379_v27, %v1250_v17  ;;  %v11550_v53 = vrot.slane %v11549_v30, 4  ;;  %v1288_v56 = vmul.f32 %v11551_v26, %v7088_v58  ;;  %v8885_v21 = vmul.f32 %v6472_v46, %v8680_v29  ;;  %v11555_v46 = vld [vmem:[#allocation147_spill] sm:$0xff] }
 0x1cc   :  { %v851_v55 = vadd.f32 %v781_v61, %v651_v33  ;;  %v981_v1 = vsel %vm928_vm4, %v7124_v11, %v11548_v4  ;;  %6481 = vpow2.f32 %v5806_v0  ;;  %v1488_v24 = vmul.f32 %v11551_v26, %v7091_v59  ;;  %v6474_v33 = vpop.eup %6473  ;;  %v11553_v61 = vld [vmem:[#allocation146_spill] sm:$0xff] }
 0x1cd   :  { %v1181_v31 = vsel %vm1128_vm5, %v7126_v12, %v11550_v53  ;;  %11552 = vst [vmem:[#allocation48_spill] sm:$0xff] %v8885_v21  ;;  %v1650_v17 = vadd.f32 %v1579_v39, %v1450_v32  ;;  %v1380_v27 = vrot.slane %v1288_v56, 3  ;;  %v1688_v25 = vmul.f32 %v11551_v26, %v7094_v60  ;;  %6176 = vmatprep.mubr.msk.f32.mxu1 %vm2090_vm9, %v8885_v21  ;;  %v11556_v53 = vld [vmem:[#allocation148_spill] sm:$0xff] }
 0x1ce   :  { %v1051_v13 = vadd.f32 %v981_v1, %v851_v55  ;;  %v11554_v28 = vrot.slane %v11553_v61, 7  ;;  %v1975_v29 = vadd.f32 1.0, %v6474_v33  ;;  %v1580_v55 = vrot.slane %v1488_v24, 2  ;;  %v6476_v61 = vpop.eup %6475 }
 0x1cf   :  { %v8898_v30 = vadd.f32 %v1779_v2, %v1650_v17  ;;  %v1381_v39 = vsel %vm1328_vm6, %v7130_v14, %v1380_v27  ;;  %v1780_v32 = vrot.slane %v1688_v25, 1  ;;  %v11557_v26 = vrot.slane %v11556_v53, 6  ;;  %v11558_v17 = vld [vmem:[#allocation149_spill] sm:$0xff] }
 0x1d0   :  { %v583_v4 = vsel %vm528_vm2, %v7120_v9, %v11554_v28  ;;  %v1251_v0 = vadd.f32 %v1181_v31, %v1051_v13  ;;  %6483 = vrcp.f32 %v1975_v29  ;;  %v1581_v31 = vsel %vm1528_vm7, %v7132_v15, %v1580_v55  ;;  %v11562_v53 = vld [vmem:[#allocation141_spill] sm:$0xff] }
 0x1d1   :  { %v652_v1 = vadd.f32 %v583_v4, %v11555_v46  ;;  %v783_v56 = vsel %vm728_vm3, %v7122_v10, %v11557_v26  ;;  %v8909_v24 = vmul.f32 %v6476_v61, %v8712_v22  ;;  %v5807_v2 = vmul.f32 -1.442695, %v8898_v30  ;;  %v11561_v46 = vld [vmem:[#allocation140_spill] sm:$0xff] }
 0x1d2   :  { %v1451_v28 = vadd.f32 %v1381_v39, %v1251_v0  ;;  %v1781_v33 = vsel %vm1728_vm8, %v7134_v16, %v1780_v32  ;;  %v11559_v27 = vrot.slane %v11558_v17, 5  ;;  %v11560_v0 = vrot.slane %v7880_v51, 4 }
 0x1d3   :  { %v852_v13 = vadd.f32 %v783_v56, %v652_v1  ;;  %v1289_v22 = vmul.f32 %v7088_v58, %v11561_v46  ;;  %v6478_v1 = vpop.eup %6477  ;;  %6177 = vmatmul.mubr.msk.f32.gmra.mxu1 %vm2090_vm9, %v8909_v24  ;;  %6485 = vpow2.f32 %v5807_v2  ;;  %v1489_v39 = vmul.f32 %v7091_v59, %v11561_v46 }
 0x1d4   :  { %v983_v25 = vsel %vm928_vm4, %v7124_v11, %v11559_v27  ;;  %v1651_v4 = vadd.f32 %v1581_v31, %v1451_v28  ;;  %v1183_v55 = vsel %vm1128_vm5, %v7126_v12, %v11560_v0  ;;  %v1689_v32 = vmul.f32 %v7094_v60, %v11561_v46  ;;  %v11564_v27 = vld [vmem:[#allocation144_spill] sm:$0xff] }
 0x1d5   :  { %v1052_v29 = vadd.f32 %v983_v25, %v852_v13  ;;  %v11563_v26 = vrot.slane %v11562_v53, 7  ;;  %v1976_v56 = vadd.f32 1.0, %v6478_v1  ;;  %v1382_v31 = vrot.slane %v1289_v22, 3  ;;  %v11565_v25 = vld [vmem:[#allocation142_spill] sm:$0xff]  ;;  %v6480_v46 = vpop.eup %6479 }
 0x1d6   :  { %v8934_v61 = vadd.f32 %v1781_v33, %v1651_v4  ;;  %v1582_v13 = vrot.slane %v1489_v39, 2  ;;  %v1782_v17 = vrot.slane %v1689_v32, 1  ;;  %v11566_v0 = vrot.slane %v11565_v25, 6  ;;  %v11567_v33 = vld [vmem:[#allocation143_spill] sm:$0xff] }
 0x1d7   :  { %v585_v51 = vsel %vm528_vm2, %v7120_v9, %v11563_v26  ;;  %v1252_v28 = vadd.f32 %v1183_v55, %v1052_v29  ;;  %6487 = vrcp.f32 %v1976_v56  ;;  %v1383_v1 = vsel %vm1328_vm6, %v7130_v14, %v1382_v31 }
 0x1d8   :  { %v653_v2 = vadd.f32 %v585_v51, %v11564_v27  ;;  %v785_v21 = vsel %vm728_vm3, %v7122_v10, %v11566_v0  ;;  %v5808_v53 = vmul.f32 -1.442695, %v8934_v61  ;;  %v11568_v4 = vrot.slane %v11567_v33, 5  ;;  %v11570_v51 = vld [vmem:[#allocation145_spill] sm:$0xff]  ;;  %v11572_v27 = vld [vmem:[#allocation130_spill] sm:$0xff] }
 0x1d9   :  { %v8949_v55 = vmul.f32 %v6480_v46, %v8753_v41  ;;  %v1452_v22 = vadd.f32 %v1383_v1, %v1252_v28  ;;  %v1583_v39 = vsel %vm1528_vm7, %v7132_v15, %v1582_v13  ;;  %v1783_v32 = vsel %vm1728_vm8, %v7134_v16, %v1782_v17  ;;  %v6482_v0 = vpop.eup %6481 }
 0x1da   :  { %v985_v29 = vsel %vm928_vm4, %v7124_v11, %v11568_v4  ;;  %6489 = vpow2.f32 %v5808_v53  ;;  %v853_v26 = vadd.f32 %v785_v21, %v653_v2  ;;  %v11571_v56 = vrot.slane %v11570_v51, 4 }
 0x1db   :  { %11569 = vst [vmem:[#allocation49_spill] sm:$0xff] %v8949_v55  ;;  %v1290_v25 = vmul.f32 %v11572_v27, %v7088_v58  ;;  %6179 = vmatprep.mubr.msk.f32.mxu1 %vm2090_vm9, %v8949_v55  ;;  %v1652_v41 = vadd.f32 %v1583_v39, %v1452_v22  ;;  %v1490_v28 = vmul.f32 %v11572_v27, %v7091_v59  ;;  %v11573_v21 = vrot.slane %v7953_v50, 7 }
 0x1dc   :  { %v1185_v31 = vsel %vm1128_vm5, %v7126_v12, %v11571_v56  ;;  %v1690_v13 = vmul.f32 %v11572_v27, %v7094_v60  ;;  %v1977_v2 = vadd.f32 1.0, %v6482_v0  ;;  %v1053_v46 = vadd.f32 %v985_v29, %v853_v26 }
 0x1dd   :  { %v587_v17 = vsel %vm528_vm2, %v7120_v9, %v11573_v21  ;;  %v1384_v53 = vrot.slane %v1290_v25, 3  ;;  %v8972_v33 = vadd.f32 %v1783_v32, %v1652_v41  ;;  %v1584_v4 = vrot.slane %v1490_v28, 2  ;;  %v6484_v0 = vpop.eup %6483  ;;  %v11576_v28 = vld [vmem:[#allocation158_spill] sm:$0xff] }
 0x1de   :  { %v654_v1 = vadd.f32 %v587_v17, %v7966_v35  ;;  %v1784_v22 = vrot.slane %v1690_v13, 1  ;;  %v11574_v39 = vrot.slane %v7957_v23, 6  ;;  %6491 = vrcp.f32 %v1977_v2  ;;  %v11578_v17 = vld [vmem:[#allocation156_spill] sm:$0xff] }
 0x1df   :  { %v1253_v56 = vadd.f32 %v1185_v31, %v1053_v46  ;;  %v1385_v50 = vsel %vm1328_vm6, %v7130_v14, %v1384_v53  ;;  %v5809_v29 = vmul.f32 -1.442695, %v8972_v33  ;;  %v1585_v35 = vsel %vm1528_vm7, %v7132_v15, %v1584_v4  ;;  %v11579_v4 = vld [vmem:[#allocation151_spill] sm:$0xff] }
 0x1e0   :  { %v787_v51 = vsel %vm728_vm3, %v7122_v10, %v11574_v39  ;;  %v1785_v32 = vsel %vm1728_vm8, %v7134_v16, %v1784_v22  ;;  %v11575_v23 = vrot.slane %v7976_v49, 5  ;;  %v8990_v31 = vmul.f32 %v6484_v0, %v8791_v36  ;;  %v6486_v53 = vpop.eup %6485 }
 0x1e1   :  { %v854_v27 = vadd.f32 %v787_v51, %v654_v1  ;;  %v1453_v25 = vadd.f32 %v1385_v50, %v1253_v56  ;;  %v11577_v13 = vrot.slane %v11576_v28, 4  ;;  %6493 = vpow2.f32 %v5809_v29  ;;  %v11581_v51 = vld [vmem:[#allocation152_spill] sm:$0xff]  ;;  %v11583_v28 = vld [vmem:[#allocation154_spill] sm:$0xff] }
 0x1e2   :  { %v987_v26 = vsel %vm928_vm4, %v7124_v11, %v11575_v23  ;;  %v1291_v2 = vmul.f32 %v7088_v58, %v11578_v17  ;;  %v1491_v49 = vmul.f32 %v7091_v59, %v11578_v17  ;;  %v1691_v46 = vmul.f32 %v7094_v60, %v11578_v17  ;;  %6180 = vmatmul.mubr.msk.f32.gmra.mxu1 %vm2090_vm9, %v8990_v31 }
 0x1e3   :  { %v1054_v41 = vadd.f32 %v987_v26, %v854_v27  ;;  %v1187_v21 = vsel %vm1128_vm5, %v7126_v12, %v11577_v13  ;;  %v1653_v36 = vadd.f32 %v1585_v35, %v1453_v25  ;;  %v11580_v22 = vrot.slane %v11579_v4, 7  ;;  %v11584_v35 = vld [vmem:[#allocation153_spill] sm:$0xff] }
 0x1e4   :  { %v11582_v56 = vrot.slane %v11581_v51, 6  ;;  %v1978_v27 = vadd.f32 1.0, %v6486_v53  ;;  %v1386_v0 = vrot.slane %v1291_v2, 3  ;;  %v1586_v29 = vrot.slane %v1491_v49, 2 }
 0x1e5   :  { %v1254_v1 = vadd.f32 %v1187_v21, %v1054_v41  ;;  %v589_v39 = vsel %vm528_vm2, %v7120_v9, %v11580_v22  ;;  %v1786_v23 = vrot.slane %v1691_v46, 1  ;;  %v9012_v26 = vadd.f32 %v1785_v32, %v1653_v36  ;;  %v11586_v21 = vld [vmem:[#allocation155_spill] sm:$0xff]  ;;  %v6488_v22 = vpop.eup %6487 }
 0x1e6   :  { %v789_v50 = vsel %vm728_vm3, %v7122_v10, %v11582_v56  ;;  %v655_v13 = vadd.f32 %v589_v39, %v11583_v28  ;;  %v11585_v25 = vrot.slane %v11584_v35, 5  ;;  %v11587_v17 = vrot.slane %v11586_v21, 4  ;;  %v11589_v56 = vld [vmem:[#allocation150_spill] sm:$0xff] }
 0x1e7   :  { %6495 = vrcp.f32 %v1978_v27  ;;  %v1387_v2 = vsel %vm1328_vm6, %v7130_v14, %v1386_v0  ;;  %v1587_v32 = vsel %vm1528_vm7, %v7132_v15, %v1586_v29  ;;  %v1787_v49 = vsel %vm1728_vm8, %v7134_v16, %v1786_v23  ;;  %v6490_v51 = vpop.eup %6489 }
 0x1e8   :  { %v989_v41 = vsel %vm928_vm4, %v7124_v11, %v11585_v25  ;;  %v1189_v4 = vsel %vm1128_vm5, %v7126_v12, %v11587_v17  ;;  %v9030_v46 = vmul.f32 %v6488_v22, %v8823_v45  ;;  %v5810_v53 = vmul.f32 -1.442695, %v9012_v26 }
 0x1e9   :  { %v1454_v36 = vadd.f32 %v1387_v2, %v1254_v1  ;;  %v855_v39 = vadd.f32 %v789_v50, %v655_v13  ;;  %v1292_v27 = vmul.f32 %v11589_v56, %v7088_v58  ;;  %v1492_v0 = vmul.f32 %v11589_v56, %v7091_v59 }
 0x1ea   :  { %11588 = vst [vmem:[#allocation38_spill] sm:$0xff] %v9030_v46  ;;  %v1692_v29 = vmul.f32 %v11589_v56, %v7094_v60  ;;  %v11590_v28 = vrot.slane %v8073_v63, 7  ;;  %6182 = vmatprep.mubr.msk.f32.mxu1 %vm2090_vm9, %v9030_v46  ;;  %v1979_v1 = vadd.f32 1.0, %v6490_v51  ;;  %6497 = vpow2.f32 %v5810_v53 }
 0x1eb   :  { %v1654_v50 = vadd.f32 %v1587_v32, %v1454_v36  ;;  %v1055_v23 = vadd.f32 %v989_v41, %v855_v39  ;;  %v1388_v13 = vrot.slane %v1292_v27, 3  ;;  %v1588_v35 = vrot.slane %v1492_v0, 2  ;;  %v6492_v56 = vpop.eup %6491 }
 0x1ec   :  { %v591_v45 = vsel %vm528_vm2, %v7120_v9, %v11590_v28  ;;  %v1788_v25 = vrot.slane %v1692_v29, 1  ;;  %6499 = vrcp.f32 %v1979_v1  ;;  %v11591_v63 = vrot.slane %v8077_v18, 6  ;;  %v11594_v1 = vld [vmem:[#allocation159_spill] sm:$0xff] }
 0x1ed   :  { %v656_v21 = vadd.f32 %v591_v45, %v8080_v48  ;;  %v9046_v17 = vadd.f32 %v1787_v49, %v1654_v50  ;;  %v1255_v22 = vadd.f32 %v1189_v4, %v1055_v23  ;;  %v1389_v53 = vsel %vm1328_vm6, %v7130_v14, %v1388_v13 }
 0x1ee   :  { %v791_v2 = vsel %vm728_vm3, %v7122_v10, %v11591_v63  ;;  %v1589_v41 = vsel %vm1528_vm7, %v7132_v15, %v1588_v35  ;;  %v1789_v32 = vsel %vm1728_vm8, %v7134_v16, %v1788_v25  ;;  %v9059_v49 = vmul.f32 %v6492_v56, %v8860_v20  ;;  %v6494_v28 = vpop.eup %6493  ;;  %v11596_v63 = vld [vmem:[#allocation162_spill] sm:$0xff]  ;;  %v11597_v56 = vld [vmem:[#allocation160_spill] sm:$0xff] }
 0x1ef   :  { %v856_v48 = vadd.f32 %v791_v2, %v656_v21  ;;  %v5811_v4 = vmul.f32 -1.442695, %v9046_v17  ;;  %v1455_v18 = vadd.f32 %v1389_v53, %v1255_v22  ;;  %v11592_v36 = vrot.slane %v8092_v8, 5 }
 0x1f0   :  { %v11593_v27 = vrot.slane %v8096_v44, 4  ;;  %v1293_v29 = vmul.f32 %v7088_v58, %v8042_v3  ;;  %v1493_v20 = vmul.f32 %v7091_v59, %v8042_v3  ;;  %6183 = vmatmul.mubr.msk.f32.gmra.mxu1 %vm2090_vm9, %v9059_v49  ;;  %v1693_v45 = vmul.f32 %v7094_v60, %v8042_v3 }
 0x1f1   :  { %v991_v39 = vsel %vm928_vm4, %v7124_v11, %v11592_v36  ;;  %6501 = vpow2.f32 %v5811_v4  ;;  %v1655_v8 = vadd.f32 %v1589_v41, %v1455_v18  ;;  %v11595_v44 = vrot.slane %v11594_v1, 7  ;;  %v11599_v4 = vld [vmem:[#allocation161_spill] sm:$0xff] }
 0x1f2   :  { %v1056_v51 = vadd.f32 %v991_v39, %v856_v48  ;;  %v1191_v0 = vsel %vm1128_vm5, %v7126_v12, %v11593_v27  ;;  %v1980_v23 = vadd.f32 1.0, %v6494_v28  ;;  %v1390_v35 = vrot.slane %v1293_v29, 3  ;;  %v11602_v29 = vld [vmem:[#allocation163_spill] sm:$0xff] }
 0x1f3   :  { %v593_v50 = vsel %vm528_vm2, %v7120_v9, %v11595_v44  ;;  %v1590_v25 = vrot.slane %v1493_v20, 2  ;;  %v9082_v21 = vadd.f32 %v1789_v32, %v1655_v8  ;;  %v1790_v22 = vrot.slane %v1693_v45, 1  ;;  %v11604_v8 = vld [vmem:[#allocation157_spill] sm:$0xff] }
 0x1f4   :  { %v1256_v13 = vadd.f32 %v1191_v0, %v1056_v51  ;;  %v657_v2 = vadd.f32 %v593_v50, %v11596_v63  ;;  %v11598_v53 = vrot.slane %v11597_v56, 6  ;;  %6503 = vrcp.f32 %v1980_v23  ;;  %v6496_v36 = vpop.eup %6495 }
 0x1f5   :  { %v1391_v48 = vsel %vm1328_vm6, %v7130_v14, %v1390_v35  ;;  %v1591_v9 = vsel %vm1528_vm7, %v7132_v15, %v1590_v25  ;;  %v11600_v18 = vrot.slane %v11599_v4, 5  ;;  %v5812_v39 = vmul.f32 -1.442695, %v9082_v21 }
 0x1f6   :  { %v793_v41 = vsel %vm728_vm3, %v7122_v10, %v11598_v53  ;;  %v1456_v51 = vadd.f32 %v1391_v48, %v1256_v13  ;;  %v1791_v27 = vsel %vm1728_vm8, %v7134_v16, %v1790_v22  ;;  %v9101_v0 = vmul.f32 %v6496_v36, %v8898_v30 }
 0x1f7   :  { %v993_v32 = vsel %vm928_vm4, %v7124_v11, %v11600_v18  ;;  %v857_v10 = vadd.f32 %v793_v41, %v657_v2  ;;  %v11603_v20 = vrot.slane %v11602_v29, 4  ;;  %v1294_v45 = vmul.f32 %v11604_v8, %v7088_v58  ;;  %v6498_v23 = vpop.eup %6497 }
 0x1f8   :  { %11601 = vst [vmem:[#allocation39_spill] sm:$0xff] %v9101_v0  ;;  %v1494_v11 = vmul.f32 %v11604_v8, %v7091_v59  ;;  %6505 = vpow2.f32 %v5812_v39  ;;  %v1656_v1 = vadd.f32 %v1591_v9, %v1456_v51  ;;  %v1694_v50 = vmul.f32 %v11604_v8, %v7094_v60  ;;  %6185 = vmatprep.mubr.msk.f32.mxu1 %vm2090_vm9, %v9101_v0 }
 0x1f9   :  { %v1193_v28 = vsel %vm1128_vm5, %v7126_v12, %v11603_v20  ;;  %v1057_v44 = vadd.f32 %v993_v32, %v857_v10  ;;  %v1392_v30 = vrot.slane %v1294_v45, 3  ;;  %v1981_v35 = vadd.f32 1.0, %v6498_v23  ;;  %v6500_v58 = vpop.eup %6499 }
 0x1fa   :  { %v1592_v13 = vrot.slane %v1494_v11, 2  ;;  %v1856_v12 = vadd.f32 %v1791_v27, %v1656_v1  ;;  %v1792_v22 = vrot.slane %v1694_v50, 1  ;;  %v9120_v2 = vmul.f32 %v6500_v58, %v8934_v61  ;;  %v6649_v58 = vld [vmem:[%s10937_s4] sm:$0xf] }
 0x1fb   :  { %v1257_v25 = vadd.f32 %v1193_v28, %v1057_v44  ;;  %v1393_v59 = vsel %vm1328_vm6, %v7130_v14, %v1392_v30  ;;  %6507 = vrcp.f32 %v1981_v35 }
 0x1fc   :  { %v1593_v63 = vsel %vm1528_vm7, %v7132_v15, %v1592_v13  ;;  %v5813_v60 = vmul.f32 -1.442695, %v1856_v12  ;;  %v1793_v53 = vsel %vm1728_vm8, %v7134_v16, %v1792_v22  ;;  %6186 = vmatmul.mubr.msk.f32.gmra.mxu1 %vm2090_vm9, %v9120_v2 }
 0x1fd   :  { %v1457_v56 = vadd.f32 %v1393_v59, %v1257_v25  ;;  %v11608_v59 = vld [vmem:[#allocation13_spill] sm:$0xff] }
 0x1fe   :  { %6509 = vpow2.f32 %v5813_v60  ;;  %v6502_v48 = vpop.eup %6501 }
 0x1ff   :  { %v1657_v41 = vadd.f32 %v1593_v63, %v1457_v56  ;;  %v1982_v9 = vadd.f32 1.0, %v6502_v48  ;;  %v9212_v63 = vrot.slane %v6649_v58, %v11608_v59 }
 0x201   :  { %v1857_v14 = vadd.f32 %v1793_v53, %v1657_v41  ;;  %v6504_v4 = vpop.eup %6503  ;;  %6511 = vrcp.f32 %v1982_v9 }
 0x202   :  { %v9127_v61 = vmul.f32 %v6504_v4, %v8972_v33 }
 0x203   :  { %v5814_v15 = vmul.f32 -1.442695, %v1857_v14 }
 0x204   :  { %11605 = vst [vmem:[#allocation42_spill] sm:$0xff] %v9127_v61  ;;  %6188 = vmatprep.mubr.msk.f32.mxu1 %vm2090_vm9, %v9127_v61 }
 0x205   :  { %6513 = vpow2.f32 %v5814_v15  ;;  %v6506_v18 = vpop.eup %6505 }
 0x206   :  { %v1983_v16 = vadd.f32 1.0, %v6506_v18 }
 0x208   :  { %6515 = vrcp.f32 %v1983_v16  ;;  %v6508_v32 = vpop.eup %6507 }
 0x209   :  { %v9132_v36 = vmul.f32 %v6508_v32, %v9012_v26 }
 0x20b   :  { %v6510_v39 = vpop.eup %6509  ;;  %6189 = vmatmul.mubr.msk.f32.gmra.mxu1 %vm2090_vm9, %v9132_v36  ;;  %v6151_v11 = vpop.f32.mrf.mxu0 }
 0x20c   :  { %v1984_v51 = vadd.f32 1.0, %v6510_v39  ;;  %3282 = vrot.lane.b32.xlu1 %v6151_v11, %s6850_s17  ;;  %v9217_v60 = vadd.f32 %v6151_v11, %v9212_v63 }
 0x20e   :  { %6517 = vrcp.f32 %v1984_v51  ;;  %v6512_v27 = vpop.eup %6511  ;;  %v2545_v53 = vand.u32 2147483647, %v9217_v60  ;;  %vm2481_vm11 = vcmp.ne.f32.partialorder %v9217_v60, %v9217_v60 }
 0x20f   :  { %v9137_v33 = vmul.f32 %v6512_v27, %v9046_v17 }
 0x210   :  { %3410 = vrot.lane.b32.xlu1 %v6151_v11, %s6851_s18  ;;  %v2577_v48 = vsub.f32 0.0, %v2545_v53 }
 0x211   :  { %11606 = vst [vmem:[#allocation41_spill] sm:$0xff] %v9137_v33  ;;  %6191 = vmatprep.mubr.msk.f32.mxu1 %vm2090_vm9, %v9137_v33 }
 0x212   :  { %v6514_v10 = vpop.eup %6513  ;;  %v2610_v9 = vmul.f32 1.442695, %v2577_v48 }
 0x213   :  { %v1985_v29 = vadd.f32 1.0, %v6514_v10 }
 0x215   :  { %6519 = vrcp.f32 %v1985_v29  ;;  %v6516_v20 = vpop.eup %6515 }
 0x216   :  { %v9142_v26 = vmul.f32 %v6516_v20, %v9082_v21  ;;  %v9155_v21 = vpop.f32.mrf.mxu0  ;;  %6521 = vpow2.f32 %v2610_v9 }
 0x217   :  { %3280 = vrot.lane.b32.xlu0 %v9155_v21, %s6850_s17 }
 0x218   :  { %6192 = vmatmul.mubr.msk.f32.gmra.mxu1 %vm2090_vm9, %v9142_v26 }
 0x21b   :  { %v6518_v28 = vpop.eup %6517  ;;  %3408 = vrot.lane.b32.xlu0 %v9155_v21, %s6851_s18 }
 0x21c   :  { %v9146_v8 = vmul.f32 %v6518_v28, %v1856_v12 }
 0x21e   :  { %11607 = vst [vmem:[#allocation43_spill] sm:$0xff] %v9146_v8  ;;  %6194 = vmatprep.mubr.msk.f32.mxu1 %vm2090_vm9, %v9146_v8 }
 0x221   :  { %v6154_v1 = vpop.f32.mrf.mxu1 }
 0x222   :  { %v6520_v17 = vpop.eup %6519  ;;  %3286 = vrot.lane.b32.xlu1 %v6154_v1, %s6850_s17  ;;  %v9235_v4 = vadd.f32 %v6154_v1, %v9212_v63 }
 0x223   :  { %v9150_v45 = vmul.f32 %v6520_v17, %v1857_v14  ;;  %v9163_v44 = vpop.f32.mrf.mxu1  ;;  %v6522_v10 = vpop.eup %6521 }
 0x224   :  { %3284 = vrot.lane.b32.xlu0 %v9163_v44, %s6850_s17  ;;  %v2547_v18 = vand.u32 2147483647, %v9235_v4  ;;  %v2681_v28 = vadd.f32 1.0, %v6522_v10  ;;  %vm2483_vm13 = vcmp.ne.f32.partialorder %v9235_v4, %v9235_v4 }
 0x225   :  { %6195 = vmatmul.mubr.msk.f32.gmra.mxu1 %vm2090_vm9, %v9150_v45 }
 0x226   :  { %3414 = vrot.lane.b32.xlu1 %v6154_v1, %s6851_s18  ;;  %v2579_v16 = vsub.f32 0.0, %v2547_v18 }
 0x228   :  { %3412 = vrot.lane.b32.xlu0 %v9163_v44, %s6851_s18  ;;  %v2614_v39 = vmul.f32 1.442695, %v2579_v16  ;;  %v2684_v16 = vmul.f32 -0.5, %v6522_v10 }
 0x22a   :  { %6523 = vpow2.f32 %v2614_v39 }
 0x22b   :  { %6525 = vlog2.f32 %v2681_v28 }
 0x230   :  { %v6157_v50 = vpop.f32.mrf.mxu1 }
 0x231   :  { %3290 = vrot.lane.b32.xlu1 %v6157_v50, %s6850_s17  ;;  %v9249_v32 = vadd.f32 %v6157_v50, %v9212_v63 }
 0x232   :  { %v9171_v23 = vpop.f32.mrf.mxu1 }
 0x233   :  { %3288 = vrot.lane.b32.xlu0 %v9171_v23, %s6850_s17  ;;  %v2549_v51 = vand.u32 2147483647, %v9249_v32  ;;  %vm2485_vm15 = vcmp.ne.f32.partialorder %v9249_v32, %v9249_v32 }
 0x235   :  { %3418 = vrot.lane.b32.xlu1 %v6157_v50, %s6851_s18  ;;  %v2581_v20 = vsub.f32 0.0, %v2549_v51 }
 0x237   :  { %3416 = vrot.lane.b32.xlu0 %v9171_v23, %s6851_s18  ;;  %v2618_v17 = vmul.f32 1.442695, %v2581_v20  ;;  %v9279_v9 = vpop.eup %6523 }
 0x238   :  { %v2699_v51 = vadd.f32 1.0, %v9279_v9  ;;  %v6526_v20 = vpop.eup %6525 }
 0x239   :  { %6527 = vpow2.f32 %v2618_v17  ;;  %v2685_v17 = vadd.f32 1.0, %v2684_v16 }
 0x23a   :  { %6529 = vlog2.f32 %v2699_v51 }
 0x23d   :  { %v6160_v30 = vpop.f32.mrf.mxu1 }
 0x23e   :  { %3294 = vrot.lane.b32.xlu1 %v6160_v30, %s6850_s17  ;;  %v9265_v11 = vadd.f32 %v6160_v30, %v9212_v63 }
 0x23f   :  { %v9179_v13 = vpop.f32.mrf.mxu1 }
 0x240   :  { %3292 = vrot.lane.b32.xlu0 %v9179_v13, %s6850_s17  ;;  %v2551_v59 = vand.u32 2147483647, %v9265_v11 }
 0x242   :  { %3422 = vrot.lane.b32.xlu1 %v6160_v30, %s6851_s18  ;;  %v2583_v18 = vsub.f32 0.0, %v2551_v59  ;;  %v2683_v59 = vmul.f32 0.6931472, %v6526_v20 }
 0x244   :  { %3420 = vrot.lane.b32.xlu0 %v9179_v13, %s6851_s18  ;;  %v2622_v28 = vmul.f32 1.442695, %v2583_v18 }
 0x246   :  { %6531 = vpow2.f32 %v2622_v28  ;;  %v2449_v28 = vmax.f32 %v9217_v60, 0.0 }
 0x24b   :  { %v9186_v35 = vpop.f32.mrf.mxu1 }
 0x24c   :  { %3298 = vrot.lane.b32.xlu1 %v9186_v35, %s6850_s17  ;;  %v9288_v39 = vadd.f32 %v9186_v35, %v9212_v63 }
 0x24d   :  { %v9190_v12 = vpop.f32.mrf.mxu1 }
 0x24e   :  { %3296 = vrot.lane.b32.xlu0 %v9190_v12, %s6850_s17 }
 0x250   :  { %3426 = vrot.lane.b32.xlu1 %v9186_v35, %s6851_s18  ;;  %v2686_v35 = vmul.f32 %v6522_v10, %v2685_v17 }
 0x252   :  { %3424 = vrot.lane.b32.xlu0 %v9190_v12, %s6851_s18 }
 0x25a   :  { %v9198_v25 = vpop.f32.mrf.mxu1 }
 0x25b   :  { %3302 = vrot.lane.b32.xlu1 %v9198_v25, %s6850_s17  ;;  %v9302_v18 = vadd.f32 %v9198_v25, %v9212_v63 }
 0x25c   :  { %v9202_v22 = vpop.f32.mrf.mxu1 }
 0x25d   :  { %3300 = vrot.lane.b32.xlu0 %v9202_v22, %s6850_s17 }
 0x25f   :  { %3430 = vrot.lane.b32.xlu1 %v9198_v25, %s6851_s18 }
 0x261   :  { %3428 = vrot.lane.b32.xlu0 %v9202_v22, %s6851_s18 }
 0x268   :  { %v9219_v56 = vpop.f32.mrf.mxu1 }
 0x269   :  { %3306 = vrot.lane.b32.xlu1 %v9219_v56, %s6850_s17 }
 0x26a   :  { %v9224_v41 = vpop.f32.mrf.mxu1 }
 0x26b   :  { %3304 = vrot.lane.b32.xlu0 %v9224_v41, %s6850_s17 }
 0x26d   :  { %3434 = vrot.lane.b32.xlu1 %v9219_v56, %s6851_s18 }
 0x26f   :  { %3432 = vrot.lane.b32.xlu0 %v9224_v41, %s6851_s18 }
 0x277   :  { %v9232_v14 = vpop.f32.mrf.mxu1 }
 0x278   :  { %3310 = vrot.lane.b32.xlu1 %v9232_v14, %s6850_s17 }
 0x279   :  { %v9239_v15 = vpop.f32.mrf.mxu1 }
 0x27a   :  { %3308 = vrot.lane.b32.xlu0 %v9239_v15, %s6850_s17 }
 0x27c   :  { %3438 = vrot.lane.b32.xlu1 %v9232_v14, %s6851_s18 }
 0x27e   :  { %3436 = vrot.lane.b32.xlu0 %v9239_v15, %s6851_s18  ;;  %v3283_v1 = vpop.permute.xlu1 %3282 }
 0x27f   :  { %3377 = vst.msk [vmem:[#allocation4 + $0x8] sm:$0xff] %vm63_vm0, %v3283_v1  ;;  %v2687_v1 = vand.u32 2147483647, %v6522_v10 }
 0x281   :  { %vm2688_vm10 = vcmp.lt.f32.partialorder %v2687_v1, 0.0004427343  ;;  %v2555_v1 = vand.u32 2147483647, %v9302_v18 }
 0x282   :  { %v3411_v48 = vpop.permute.xlu1 %3410  ;;  %v2689_v16 = vsel %vm2688_vm10, %v2686_v35, %v2683_v59  ;;  %v9318_v59 = vadd.f32 %v9219_v56, %v9212_v63  ;;  %v2702_v35 = vmul.f32 -0.5, %v9279_v9 }
 0x283   :  { %3505 = vst.msk [vmem:[#allocation5 + $0x8] sm:$0xff] %vm63_vm0, %v3411_v48  ;;  %v9292_v48 = vpop.eup %6527  ;;  %v2961_v17 = vadd.f32 %v2689_v16, %v2449_v28  ;;  %v9328_v28 = vadd.f32 %v9232_v14, %v9212_v63 }
 0x284   :  { %v2717_v51 = vadd.f32 1.0, %v9292_v48 }
 0x285   :  { %v2559_v33 = vand.u32 2147483647, %v9328_v28 }
 0x286   :  { %v9252_v27 = vpop.f32.mrf.mxu1  ;;  %6533 = vlog2.f32 %v2717_v51  ;;  %v6530_v51 = vpop.eup %6529 }
 0x287   :  { %3314 = vrot.lane.b32.xlu1 %v9252_v27, %s6850_s17  ;;  %v9340_v14 = vadd.f32 %v9252_v27, %v9212_v63 }
 0x288   :  { %v9256_v29 = vpop.f32.mrf.mxu1 }
 0x289   :  { %3312 = vrot.lane.b32.xlu0 %v9256_v29, %s6850_s17  ;;  %v3281_v58 = vpop.permute.xlu0 %3280 }
 0x28a   :  { %3376 = vst.msk [vmem:[#allocation4] sm:$0xff] %vm63_vm0, %v3281_v58  ;;  %v2553_v58 = vand.u32 2147483647, %v9288_v39 }
 0x28b   :  { %3442 = vrot.lane.b32.xlu1 %v9252_v27, %s6851_s18 }
 0x28c   :  { %v2585_v8 = vsub.f32 0.0, %v2553_v58 }
 0x28d   :  { %3440 = vrot.lane.b32.xlu0 %v9256_v29, %s6851_s18  ;;  %v3409_v30 = vpop.permute.xlu0 %3408 }
 0x28e   :  { %3504 = vst.msk [vmem:[#allocation5] sm:$0xff] %vm63_vm0, %v3409_v30  ;;  %v2626_v25 = vmul.f32 1.442695, %v2585_v8  ;;  %v2993_v8 = vsel %vm2481_vm11, %v9217_v60, %v2961_v17  ;;  %v2703_v17 = vadd.f32 1.0, %v2702_v35  ;;  %vm2487_vm11 = vcmp.ne.f32.partialorder %v9265_v11, %v9265_v11 }
 0x28f   :  { %v3025_v60 = vmul.f32 %v2993_v8, %v8189_v38 }
 0x290   :  { %6535 = vpow2.f32 %v2626_v25  ;;  %v2705_v25 = vand.u32 2147483647, %v9279_v9  ;;  %v2704_v35 = vmul.f32 %v9279_v9, %v2703_v17  ;;  %v2451_v17 = vmax.f32 %v9235_v4, 0.0 }
 0x292   :  { %vm9349_vm12 = vcmp.lt.f32.partialorder %v2705_v25, 0.0004427343 }
 0x293   :  { %v9268_v50 = vpop.f32.mrf.mxu1 }
 0x294   :  { %3318 = vrot.lane.b32.xlu1 %v9268_v50, %s6850_s17  ;;  %v3287_v20 = vpop.permute.xlu1 %3286 }
 0x295   :  { %v9274_v53 = vpop.f32.mrf.mxu1  ;;  %3379 = vst.msk [vmem:[#allocation4 + $0x18] sm:$0xff] %vm63_vm0, %v3287_v20  ;;  %v2587_v20 = vsub.f32 0.0, %v2555_v1 }
 0x296   :  { %3316 = vrot.lane.b32.xlu0 %v9274_v53, %s6850_s17  ;;  %v3285_v10 = vpop.permute.xlu0 %3284 }
 0x297   :  { %3378 = vst.msk [vmem:[#allocation4 + $0x10] sm:$0xff] %vm63_vm0, %v3285_v10  ;;  %v9330_v10 = vpop.eup %6531  ;;  %v2630_v1 = vmul.f32 1.442695, %v2587_v20 }
 0x298   :  { %3446 = vrot.lane.b32.xlu1 %v9268_v50, %s6851_s18  ;;  %v3415_v58 = vpop.permute.xlu1 %3414  ;;  %v2735_v61 = vadd.f32 1.0, %v9330_v10  ;;  %v6534_v9 = vpop.eup %6533 }
 0x299   :  { %3507 = vst.msk [vmem:[#allocation5 + $0x18] sm:$0xff] %vm63_vm0, %v3415_v58  ;;  %v2557_v58 = vand.u32 2147483647, %v9318_v59  ;;  %6537 = vpow2.f32 %v2630_v1  ;;  %v9362_v1 = vadd.f32 %v9268_v50, %v9212_v63 }
 0x29a   :  { %3444 = vrot.lane.b32.xlu0 %v9274_v53, %s6851_s18  ;;  %v3413_v16 = vpop.permute.xlu0 %3412  ;;  %6539 = vlog2.f32 %v2735_v61 }
 0x29b   :  { %3506 = vst.msk [vmem:[#allocation5 + $0x10] sm:$0xff] %vm63_vm0, %v3413_v16  ;;  %v2701_v16 = vmul.f32 0.6931472, %v6530_v51  ;;  %v2589_v46 = vsub.f32 0.0, %v2557_v58  ;;  %v2563_v50 = vand.u32 2147483647, %v9362_v1 }
 0x29d   :  { %v2707_v58 = vsel %vm9349_vm12, %v2704_v35, %v2701_v16  ;;  %v2634_v38 = vmul.f32 1.442695, %v2589_v46  ;;  %v2723_v16 = vand.u32 2147483647, %v9292_v48  ;;  %v9369_v61 = vpop.eup %6535 }
 0x29e   :  { %v2963_v51 = vadd.f32 %v2707_v58, %v2451_v17  ;;  %v2753_v17 = vadd.f32 1.0, %v9369_v61 }
 0x29f   :  { %6541 = vpow2.f32 %v2634_v38  ;;  %vm2724_vm14 = vcmp.lt.f32.partialorder %v2723_v16, 0.0004427343  ;;  %v2738_v16 = vmul.f32 -0.5, %v9330_v10 }
 0x2a2   :  { %v9294_v30 = vpop.f32.mrf.mxu1 }
 0x2a3   :  { %3322 = vrot.lane.b32.xlu1 %v9294_v30, %s6850_s17  ;;  %v3291_v0 = vpop.permute.xlu1 %3290 }
 0x2a4   :  { %v9298_v3 = vpop.f32.mrf.mxu1  ;;  %3381 = vst.msk [vmem:[#allocation4 + $0x28] sm:$0xff] %vm63_vm0, %v3291_v0  ;;  %v2561_v0 = vand.u32 2147483647, %v9340_v14 }
 0x2a5   :  { %3320 = vrot.lane.b32.xlu0 %v9298_v3, %s6850_s17  ;;  %v3289_v27 = vpop.permute.xlu0 %3288 }
 0x2a6   :  { %3380 = vst.msk [vmem:[#allocation4 + $0x20] sm:$0xff] %vm63_vm0, %v3289_v27  ;;  %v2593_v27 = vsub.f32 0.0, %v2561_v0 }
 0x2a7   :  { %3450 = vrot.lane.b32.xlu1 %v9294_v30, %s6851_s18  ;;  %v3419_v25 = vpop.permute.xlu1 %3418 }
 0x2a8   :  { %3509 = vst.msk [vmem:[#allocation5 + $0x28] sm:$0xff] %vm63_vm0, %v3419_v25  ;;  %v2642_v38 = vmul.f32 1.442695, %v2593_v27 }
 0x2a9   :  { %3448 = vrot.lane.b32.xlu0 %v9298_v3, %s6851_s18  ;;  %v3417_v35 = vpop.permute.xlu0 %3416 }
 0x2aa   :  { %3508 = vst.msk [vmem:[#allocation5 + $0x20] sm:$0xff] %vm63_vm0, %v3417_v35  ;;  %v2595_v35 = vsub.f32 0.0, %v2563_v50 }
 0x2ad   :  { %3072 = vrot.lane.b32.xlu0 %v2993_v8, %s6850_s17  ;;  %v2720_v8 = vmul.f32 -0.5, %v9292_v48 }
 0x2af   :  { %v2721_v55 = vadd.f32 1.0, %v2720_v8  ;;  %v9376_v8 = vadd.f32 %v9294_v30, %v9212_v63  ;;  %v2453_v30 = vmax.f32 %v9249_v32, 0.0 }
 0x2b0   :  { %v6184_v56 = vpop.f32.mrf.mxu1  ;;  %v3295_v0 = vpop.permute.xlu1 %3294 }
 0x2b1   :  { %3326 = vrot.lane.b32.xlu1 %v6184_v56, %s6850_s17  ;;  %3168 = vrot.lane.b32.xlu0 %v3025_v60, %s6850_s17  ;;  %v2591_v60 = vsub.f32 0.0, %v2559_v33  ;;  %v2719_v33 = vmul.f32 0.6931472, %v6534_v9  ;;  %v2722_v58 = vmul.f32 %v9292_v48, %v2721_v55  ;;  %v2995_v9 = vsel %vm2483_vm13, %v9235_v4, %v2963_v51  ;;  %3383 = vst.msk [vmem:[#allocation4 + $0x38] sm:$0xff] %vm63_vm0, %v3295_v0 }
 0x2b2   :  { %v9347_v20 = vpop.f32.mrf.mxu1  ;;  %v9384_v25 = vadd.f32 %v6184_v56, %v9212_v63  ;;  %v2565_v55 = vand.u32 2147483647, %v9376_v8  ;;  %v3293_v4 = vpop.permute.xlu0 %3292  ;;  %vm2489_vm13 = vcmp.ne.f32.partialorder %v9288_v39, %v9288_v39 }
 0x2b3   :  { %11609 = vst [vmem:[#allocation57_spill] sm:$0xff] %v9347_v20  ;;  %v2638_v46 = vmul.f32 1.442695, %v2591_v60  ;;  %v2725_v60 = vsel %vm2724_vm14, %v2722_v58, %v2719_v33  ;;  %3382 = vst.msk [vmem:[#allocation4 + $0x30] sm:$0xff] %vm63_vm0, %v3293_v4  ;;  %v2646_v58 = vmul.f32 1.442695, %v2595_v35 }
 0x2b4   :  { %v2965_v51 = vadd.f32 %v2725_v60, %v2453_v30  ;;  %v3423_v33 = vpop.permute.xlu1 %3422  ;;  %v2567_v27 = vand.u32 2147483647, %v9384_v25  ;;  %v2597_v60 = vsub.f32 0.0, %v2565_v55  ;;  %v2739_v30 = vadd.f32 1.0, %v2738_v16 }
 0x2b5   :  { %3454 = vrot.lane.b32.xlu1 %v6184_v56, %s6851_s18  ;;  %3324 = vrot.lane.b32.xlu0 %v9347_v20, %s6850_s17  ;;  %6543 = vpow2.f32 %v2638_v46  ;;  %v3027_v56 = vmul.f32 %v2995_v9, %v8328_v57  ;;  %v9397_v46 = vpop.eup %6537  ;;  %3511 = vst.msk [vmem:[#allocation5 + $0x38] sm:$0xff] %vm63_vm0, %v3423_v33 }
 0x2b6   :  { %6545 = vlog2.f32 %v2753_v17  ;;  %v6540_v50 = vpop.eup %6539  ;;  %v2997_v17 = vsel %vm2485_vm15, %v9249_v32, %v2965_v51  ;;  %v2771_v35 = vadd.f32 1.0, %v9397_v46  ;;  %v2650_v4 = vmul.f32 1.442695, %v2597_v60 }
 0x2b7   :  { %6547 = vpow2.f32 %v2642_v38  ;;  %v2741_v38 = vand.u32 2147483647, %v9330_v10  ;;  %v2737_v55 = vmul.f32 0.6931472, %v6540_v50  ;;  %v3029_v33 = vmul.f32 %v2997_v17, %v8408_v40  ;;  %v9416_v32 = vpop.eup %6541 }
 0x2b8   :  { %6549 = vpow2.f32 %v2646_v58  ;;  %v2740_v16 = vmul.f32 %v9330_v10, %v2739_v30  ;;  %v2789_v30 = vadd.f32 1.0, %v9416_v32  ;;  %v2792_v52 = vmul.f32 -0.5, %v9416_v32 }
 0x2b9   :  { %3452 = vrot.lane.b32.xlu0 %v9347_v20, %s6851_s18  ;;  %vm9423_vm10 = vcmp.lt.f32.partialorder %v2741_v38, 0.0004427343  ;;  %6551 = vlog2.f32 %v2771_v35  ;;  %v2455_v35 = vmax.f32 %v9265_v11, 0.0 }
 0x2ba   :  { %v2743_v58 = vsel %vm9423_vm10, %v2740_v16, %v2737_v55  ;;  %6553 = vpow2.f32 %v2650_v4  ;;  %vm2491_vm10 = vcmp.ne.f32.partialorder %v9302_v18, %v9302_v18 }
 0x2bc   :  { %v6187_v47 = vpop.f32.mrf.mxu1 }
 0x2bd   :  { %3330 = vrot.lane.b32.xlu1 %v6187_v47, %s6850_s17  ;;  %3074 = vrot.lane.b32.xlu0 %v2995_v9, %s6850_s17  ;;  %v9402_v0 = vadd.f32 %v6187_v47, %v9212_v63  ;;  %v3421_v9 = vpop.permute.xlu0 %3420 }
 0x2be   :  { %v9390_v48 = vpop.f32.mrf.mxu1  ;;  %3510 = vst.msk [vmem:[#allocation5 + $0x30] sm:$0xff] %vm63_vm0, %v3421_v9  ;;  %v3299_v60 = vpop.permute.xlu1 %3298 }
 0x2bf   :  { %11612 = vst [vmem:[#allocation58_spill] sm:$0xff] %v9390_v48  ;;  %3385 = vst.msk [vmem:[#allocation4 + $0x48] sm:$0xff] %vm63_vm0, %v3299_v60 }
 0x2c1   :  { %3458 = vrot.lane.b32.xlu1 %v6187_v47, %s6851_s18  ;;  %3328 = vrot.lane.b32.xlu0 %v9390_v48, %s6850_s17  ;;  %v2599_v47 = vsub.f32 0.0, %v2567_v27  ;;  %v3297_v55 = vpop.permute.xlu0 %3296 }
 0x2c2   :  { %3384 = vst.msk [vmem:[#allocation4 + $0x40] sm:$0xff] %vm63_vm0, %v3297_v55  ;;  %v3427_v16 = vpop.permute.xlu1 %3426 }
 0x2c3   :  { %v2654_v50 = vmul.f32 1.442695, %v2599_v47  ;;  %v2756_v47 = vmul.f32 -0.5, %v9369_v61  ;;  %3513 = vst.msk [vmem:[#allocation5 + $0x48] sm:$0xff] %vm63_vm0, %v3427_v16 }
 0x2c5   :  { %3170 = vrot.lane.b32.xlu1 %v3027_v56, %s6850_s17  ;;  %3456 = vrot.lane.b32.xlu0 %v9390_v48, %s6851_s18  ;;  %v2569_v56 = vand.u32 2147483647, %v9402_v0  ;;  %6555 = vpow2.f32 %v2654_v50  ;;  %v2757_v34 = vadd.f32 1.0, %v2756_v47  ;;  %v3425_v37 = vpop.permute.xlu0 %3424  ;;  %v2759_v50 = vand.u32 2147483647, %v9369_v61 }
 0x2c6   :  { %6557 = vlog2.f32 %v2789_v30  ;;  %3512 = vst.msk [vmem:[#allocation5 + $0x40] sm:$0xff] %vm63_vm0, %v3425_v37  ;;  %v2774_v30 = vmul.f32 -0.5, %v9397_v46  ;;  %v2777_v37 = vand.u32 2147483647, %v9397_v46 }
 0x2c7   :  { %v2601_v40 = vsub.f32 0.0, %v2569_v56  ;;  %v2967_v56 = vadd.f32 %v2743_v58, %v2455_v35  ;;  %v2758_v55 = vmul.f32 %v9369_v61, %v2757_v34  ;;  %vm9463_vm12 = vcmp.lt.f32.partialorder %v2759_v50, 0.0004427343 }
 0x2c8   :  { %v2775_v61 = vadd.f32 1.0, %v2774_v30  ;;  %vm9498_vm14 = vcmp.lt.f32.partialorder %v2777_v37, 0.0004427343 }
 0x2c9   :  { %3076 = vrot.lane.b32.xlu1 %v2997_v17, %s6850_s17  ;;  %3172 = vrot.lane.b32.xlu0 %v3029_v33, %s6850_s17  ;;  %v9429_v17 = vpop.eup %6543  ;;  %v2658_v60 = vmul.f32 1.442695, %v2601_v40  ;;  %v2999_v40 = vsel %vm2487_vm11, %v9265_v11, %v2967_v56 }
 0x2ca   :  { %v6546_v4 = vpop.eup %6545  ;;  %v2807_v33 = vadd.f32 1.0, %v9429_v17 }
 0x2cb   :  { %v6190_v51 = vpop.f32.mrf.mxu1  ;;  %v9443_v27 = vpop.eup %6547  ;;  %v2755_v58 = vmul.f32 0.6931472, %v6546_v4 }
 0x2cc   :  { %v9420_v9 = vadd.f32 %v6190_v51, %v9212_v63  ;;  %6559 = vlog2.f32 %v2807_v33  ;;  %v9457_v35 = vpop.eup %6549 }
 0x2cd   :  { %3334 = vrot.lane.b32.xlu1 %v6190_v51, %s6850_s17  ;;  %v9435_v38 = vpop.f32.mrf.mxu1  ;;  %6561 = vpow2.f32 %v2658_v60  ;;  %v6552_v11 = vpop.eup %6551  ;;  %v2761_v56 = vsel %vm9463_vm12, %v2758_v55, %v2755_v58  ;;  %v2843_v60 = vadd.f32 1.0, %v9457_v35  ;;  %vm2493_vm12 = vcmp.ne.f32.partialorder %v9318_v59, %v9318_v59 }
 0x2ce   :  { %v2571_v10 = vand.u32 2147483647, %v9420_v9  ;;  %11615 = vst [vmem:[#allocation59_spill] sm:$0xff] %v9435_v38  ;;  %3332 = vrot.lane.b32.xlu0 %v9435_v38, %s6850_s17  ;;  %v3303_v33 = vpop.permute.xlu1 %3302  ;;  %v9478_v50 = vpop.eup %6553 }
 0x2cf   :  { %3387 = vst.msk [vmem:[#allocation4 + $0x58] sm:$0xff] %vm63_vm0, %v3303_v33  ;;  %v3301_v58 = vpop.permute.xlu0 %3300 }
 0x2d0   :  { %v2603_v57 = vsub.f32 0.0, %v2571_v10  ;;  %3386 = vst.msk [vmem:[#allocation4 + $0x50] sm:$0xff] %vm63_vm0, %v3301_v58 }
 0x2d1   :  { %3462 = vrot.lane.b32.xlu1 %v6190_v51, %s6851_s18  ;;  %v2825_v51 = vadd.f32 1.0, %v9443_v27 }
 0x2d2   :  { %3460 = vrot.lane.b32.xlu0 %v9435_v38, %s6851_s18  ;;  %v2662_v10 = vmul.f32 1.442695, %v2603_v57  ;;  %v2457_v57 = vmax.f32 %v9288_v39, 0.0  ;;  %v9485_v38 = vadd.f32 %v9212_v63, %v9155_v21  ;;  %v3431_v30 = vpop.permute.xlu1 %3430  ;;  %v9487_v33 = vpop.eup %6555  ;;  %v3031_v21 = vmul.f32 %v2999_v40, %v8471_v5 }
 0x2d3   :  { %6563 = vlog2.f32 %v2825_v51  ;;  %3515 = vst.msk [vmem:[#allocation5 + $0x58] sm:$0xff] %vm63_vm0, %v3431_v30  ;;  %v3429_v58 = vpop.permute.xlu0 %3428  ;;  %v2879_v37 = vadd.f32 1.0, %v9487_v33 }
 0x2d4   :  { %6565 = vpow2.f32 %v2662_v10  ;;  %v2969_v51 = vadd.f32 %v2761_v56, %v2457_v57  ;;  %v2773_v10 = vmul.f32 0.6931472, %v6552_v11  ;;  %v2776_v57 = vmul.f32 %v9397_v46, %v2775_v61  ;;  %v6558_v56 = vpop.eup %6557  ;;  %3514 = vst.msk [vmem:[#allocation5 + $0x50] sm:$0xff] %vm63_vm0, %v3429_v58 }
 0x2d5   :  { %3078 = vrot.lane.b32.xlu1 %v2999_v40, %s6850_s17  ;;  %6567 = vlog2.f32 %v2843_v60  ;;  %v2861_v11 = vadd.f32 1.0, %v9478_v50  ;;  %v2793_v60 = vadd.f32 1.0, %v2792_v52  ;;  %v2459_v40 = vmax.f32 %v9302_v18, 0.0 }
 0x2d6   :  { %v3001_v46 = vsel %vm2489_vm13, %v9288_v39, %v2969_v51  ;;  %v2779_v61 = vsel %vm9498_vm14, %v2776_v57, %v2773_v10  ;;  %v2544_v51 = vand.u32 2147483647, %v9485_v38  ;;  %vm2495_vm14 = vcmp.ne.f32.partialorder %v9328_v28, %v9328_v28 }
 0x2d7   :  { %v3033_v10 = vmul.f32 %v3001_v46, %v8542_v7  ;;  %v2971_v57 = vadd.f32 %v2779_v61, %v2459_v40  ;;  %v2794_v5 = vmul.f32 %v9416_v32, %v2793_v60 }
 0x2d8   :  { %v6193_v47 = vpop.f32.mrf.mxu1  ;;  %v2576_v40 = vsub.f32 0.0, %v2544_v51 }
 0x2d9   :  { %v9461_v16 = vadd.f32 %v6193_v47, %v9212_v63  ;;  %3338 = vrot.lane.b32.xlu1 %v6193_v47, %s6850_s17  ;;  %v6560_v30 = vpop.eup %6559 }
 0x2da   :  { %v9467_v4 = vpop.f32.mrf.mxu1  ;;  %v9512_v39 = vpop.eup %6561 }
 0x2db   :  { %11618 = vst [vmem:[#allocation60_spill] sm:$0xff] %v9467_v4  ;;  %v2573_v34 = vand.u32 2147483647, %v9461_v16  ;;  %3336 = vrot.lane.b32.xlu0 %v9467_v4, %s6850_s17  ;;  %v2897_v61 = vadd.f32 1.0, %v9512_v39 }
 0x2dd   :  { %v2605_v55 = vsub.f32 0.0, %v2573_v34  ;;  %3466 = vrot.lane.b32.xlu1 %v6193_v47, %s6851_s18  ;;  %v2810_v47 = vmul.f32 -0.5, %v9429_v17 }
 0x2df   :  { %v2666_v48 = vmul.f32 1.442695, %v2605_v55  ;;  %3464 = vrot.lane.b32.xlu0 %v9467_v4, %s6851_s18  ;;  %v2795_v55 = vand.u32 2147483647, %v9416_v32  ;;  %v2811_v34 = vadd.f32 1.0, %v2810_v47  ;;  %v3307_v47 = vpop.permute.xlu1 %3306 }
 0x2e0   :  { %v6564_v6 = vpop.eup %6563  ;;  %3389 = vst.msk [vmem:[#allocation4 + $0x68] sm:$0xff] %vm63_vm0, %v3307_v47  ;;  %v2608_v47 = vmul.f32 1.442695, %v2576_v40 }
 0x2e1   :  { %6569 = vpow2.f32 %v2666_v48  ;;  %3174 = vrot.lane.b32.xlu1 %v3031_v21, %s6850_s17  ;;  %v2791_v48 = vmul.f32 0.6931472, %v6558_v56  ;;  %v2813_v21 = vand.u32 2147483647, %v9429_v17  ;;  %v2809_v56 = vmul.f32 0.6931472, %v6560_v30  ;;  %v9538_v60 = vpop.eup %6565 }
 0x2e2   :  { %6571 = vlog2.f32 %v2861_v11  ;;  %v2828_v11 = vmul.f32 -0.5, %v9443_v27  ;;  %vm9525_vm15 = vcmp.lt.f32.partialorder %v2795_v55, 0.0004427343  ;;  %v3003_v55 = vsel %vm2491_vm10, %v9302_v18, %v2971_v57 }
 0x2e3   :  { %3080 = vrot.lane.b32.xlu0 %v3001_v46, %s6850_s17  ;;  %6573 = vlog2.f32 %v2879_v37  ;;  %v2797_v32 = vsel %vm9525_vm15, %v2794_v5, %v2791_v48  ;;  %v2812_v37 = vmul.f32 %v9429_v17, %v2811_v34  ;;  %v2461_v30 = vmax.f32 %v9318_v59, 0.0  ;;  %v3305_v48 = vpop.permute.xlu0 %3304 }
 0x2e4   :  { %vm9544_vm11 = vcmp.lt.f32.partialorder %v2813_v21, 0.0004427343  ;;  %v2846_v5 = vmul.f32 -0.5, %v9457_v35  ;;  %v2829_v4 = vadd.f32 1.0, %v2828_v11  ;;  %v2831_v17 = vand.u32 2147483647, %v9443_v27  ;;  %v3435_v21 = vpop.permute.xlu1 %3434 }
 0x2e5   :  { %v9515_v52 = vpop.f32.mrf.mxu1  ;;  %v2815_v18 = vsel %vm9544_vm11, %v2812_v37, %v2809_v56  ;;  %v2973_v51 = vadd.f32 %v2797_v32, %v2461_v30  ;;  %3388 = vst.msk [vmem:[#allocation4 + $0x60] sm:$0xff] %vm63_vm0, %v3305_v48  ;;  %v2827_v34 = vmul.f32 0.6931472, %v6564_v6  ;;  %v2915_v11 = vadd.f32 1.0, %v9538_v60  ;;  %3517 = vst.msk [vmem:[#allocation5 + $0x68] sm:$0xff] %vm63_vm0, %v3435_v21 }
 0x2e6   :  { %v9520_v58 = vadd.f32 %v9515_v52, %v9212_v63  ;;  %3342 = vrot.lane.b32.xlu1 %v9515_v52, %s6850_s17  ;;  %6575 = vlog2.f32 %v2897_v61  ;;  %v3035_v56 = vmul.f32 %v3003_v55, %v8620_v54  ;;  %v2463_v32 = vmax.f32 %v9328_v28, 0.0 }
 0x2e7   :  { %3176 = vrot.lane.b32.xlu0 %v3033_v10, %s6850_s17  ;;  %v9549_v20 = vpop.f32.mrf.mxu1  ;;  %v2830_v37 = vmul.f32 %v9443_v27, %v2829_v4  ;;  %v2864_v6 = vmul.f32 -0.5, %v9478_v50  ;;  %v3433_v30 = vpop.permute.xlu0 %3432  ;;  %v3005_v40 = vsel %vm2493_vm12, %v9318_v59, %v2973_v51  ;;  %vm9570_vm13 = vcmp.lt.f32.partialorder %v2831_v17, 0.0004427343 }
 0x2e8   :  { %v2575_v46 = vand.u32 2147483647, %v9520_v58  ;;  %v2975_v61 = vadd.f32 %v2815_v18, %v2463_v32  ;;  %3516 = vst.msk [vmem:[#allocation5 + $0x60] sm:$0xff] %vm63_vm0, %v3433_v30  ;;  %v9582_v18 = vadd.f32 %v9212_v63, %v9163_v44  ;;  %v2465_v51 = vmax.f32 %v9340_v14, 0.0 }
 0x2e9   :  { %v2882_v17 = vmul.f32 -0.5, %v9487_v33  ;;  %v2865_v21 = vadd.f32 1.0, %v2864_v6  ;;  %vm2497_vm10 = vcmp.ne.f32.partialorder %v9340_v14, %v9340_v14  ;;  %v2900_v48 = vmul.f32 -0.5, %v9512_v39 }
 0x2ea   :  { %v2607_v7 = vsub.f32 0.0, %v2575_v46  ;;  %3082 = vrot.lane.b32.xlu1 %v3003_v55, %s6850_s17  ;;  %v6568_v46 = vpop.eup %6567  ;;  %v2849_v55 = vand.u32 2147483647, %v9457_v35  ;;  %vm2499_vm12 = vcmp.ne.f32.partialorder %v9362_v1, %v9362_v1 }
 0x2eb   :  { %3340 = vrot.lane.b32.xlu0 %v9549_v20, %s6850_s17  ;;  %v2845_v27 = vmul.f32 0.6931472, %v6568_v46  ;;  %v2883_v6 = vadd.f32 1.0, %v2882_v17 }
 0x2ec   :  { %v2670_v57 = vmul.f32 1.442695, %v2607_v7  ;;  %v2847_v7 = vadd.f32 1.0, %v2846_v5  ;;  %v2833_v5 = vsel %vm9570_vm13, %v2830_v37, %v2827_v34  ;;  %vm9591_vm15 = vcmp.lt.f32.partialorder %v2849_v55, 0.0004427343  ;;  %v3309_v55 = vpop.permute.xlu0 %3308 }
 0x2ed   :  { %v2977_v44 = vadd.f32 %v2833_v5, %v2465_v51  ;;  %3390 = vst.msk [vmem:[#allocation4 + $0x70] sm:$0xff] %vm63_vm0, %v3309_v55  ;;  %v2918_v51 = vmul.f32 -0.5, %v9538_v60  ;;  %v2921_v55 = vand.u32 2147483647, %v9538_v60 }
 0x2ee   :  { %6577 = vpow2.f32 %v2670_v57  ;;  %v9566_v10 = vpop.eup %6569  ;;  %3178 = vrot.lane.b32.xlu1 %v3035_v56, %s6850_s17  ;;  %v3037_v57 = vmul.f32 %v3005_v40, %v8693_v43  ;;  %v2848_v34 = vmul.f32 %v9457_v35, %v2847_v7  ;;  %v3311_v35 = vpop.permute.xlu1 %3310  ;;  %v2467_v7 = vmax.f32 %v9362_v1, 0.0 }
 0x2ef   :  { %3084 = vrot.lane.b32.xlu0 %v3005_v40, %s6850_s17  ;;  %6579 = vlog2.f32 %v2915_v11  ;;  %v2933_v4 = vadd.f32 1.0, %v9566_v10  ;;  %v6572_v59 = vpop.eup %6571  ;;  %v3007_v11 = vsel %vm2495_vm14, %v9328_v28, %v2975_v61  ;;  %v2546_v28 = vand.u32 2147483647, %v9582_v18  ;;  %3391 = vst.msk [vmem:[#allocation4 + $0x78] sm:$0xff] %vm63_vm0, %v3311_v35 }
 0x2f0   :  { %6581 = vpow2.f32 %v2608_v47  ;;  %v2867_v47 = vand.u32 2147483647, %v9478_v50  ;;  %v6574_v56 = vpop.eup %6573  ;;  %v2851_v32 = vsel %vm9591_vm15, %v2848_v34, %v2845_v27  ;;  %v2863_v37 = vmul.f32 0.6931472, %v6572_v59 }
 0x2f1   :  { %6583 = vlog2.f32 %v2933_v4  ;;  %v3039_v30 = vmul.f32 %v3007_v11, %v8766_v62  ;;  %v2885_v61 = vand.u32 2147483647, %v9487_v33  ;;  %v2866_v40 = vmul.f32 %v9478_v50, %v2865_v21 }
 0x2f2   :  { %3086 = vrot.lane.b32.xlu1 %v3007_v11, %s6850_s17  ;;  %v2979_v27 = vadd.f32 %v2851_v32, %v2467_v7  ;;  %v3009_v5 = vsel %vm2497_vm10, %v9340_v14, %v2977_v44  ;;  %v2881_v4 = vmul.f32 0.6931472, %v6574_v56  ;;  %vm9610_vm11 = vcmp.lt.f32.partialorder %v2867_v47, 0.0004427343  ;;  %v3439_v17 = vpop.permute.xlu1 %3438  ;;  %v3437_v56 = vpop.permute.xlu0 %3436 }
 0x2f3   :  { %3180 = vrot.lane.b32.xlu0 %v3037_v57, %s6850_s17  ;;  %v2869_v50 = vsel %vm9610_vm11, %v2866_v40, %v2863_v37  ;;  %v6576_v57 = vpop.eup %6575  ;;  %v2578_v34 = vsub.f32 0.0, %v2546_v28  ;;  %v9622_v14 = vadd.f32 %v9212_v63, %v9171_v23  ;;  %v2884_v21 = vmul.f32 %v9487_v33, %v2883_v6  ;;  %3519 = vst.msk [vmem:[#allocation5 + $0x78] sm:$0xff] %vm63_vm0, %v3439_v17 }
 0x2f4   :  { %v2469_v11 = vmax.f32 %v9376_v8, 0.0  ;;  %v3041_v46 = vmul.f32 %v3009_v5, %v8842_v42  ;;  %vm9630_vm13 = vcmp.lt.f32.partialorder %v2885_v61, 0.0004427343  ;;  %v2901_v47 = vadd.f32 1.0, %v2900_v48  ;;  %3518 = vst.msk [vmem:[#allocation5 + $0x70] sm:$0xff] %vm63_vm0, %v3437_v56 }
 0x2f5   :  { %v3011_v23 = vsel %vm2499_vm12, %v9362_v1, %v2979_v27  ;;  %v2887_v33 = vsel %vm9630_vm13, %v2884_v21, %v2881_v4  ;;  %v2903_v35 = vand.u32 2147483647, %v9512_v39  ;;  %v2919_v28 = vadd.f32 1.0, %v2918_v51 }
 0x2f6   :  { %3182 = vrot.lane.b32.xlu1 %v3039_v30, %s6850_s17  ;;  %v2981_v37 = vadd.f32 %v2869_v50, %v2469_v11  ;;  %v2899_v7 = vmul.f32 0.6931472, %v6576_v57  ;;  %v2936_v30 = vmul.f32 -0.5, %v9566_v10  ;;  %v2612_v1 = vmul.f32 1.442695, %v2578_v34 }
 0x2f7   :  { %3088 = vrot.lane.b32.xlu0 %v3009_v5, %s6850_s17  ;;  %v2471_v40 = vmax.f32 %v9384_v25, 0.0  ;;  %v3043_v27 = vmul.f32 %v3011_v23, %v8909_v24  ;;  %vm2501_vm14 = vcmp.ne.f32.partialorder %v9376_v8, %v9376_v8  ;;  %v2902_v5 = vmul.f32 %v9512_v39, %v2901_v47 }
 0x2f8   :  { %v2548_v4 = vand.u32 2147483647, %v9622_v14  ;;  %v3013_v50 = vsel %vm2501_vm14, %v9376_v8, %v2981_v37  ;;  %vm9655_vm15 = vcmp.lt.f32.partialorder %v2903_v35, 0.0004427343  ;;  %v2920_v57 = vmul.f32 %v9538_v60, %v2919_v28 }
 0x2f9   :  { %v2983_v59 = vadd.f32 %v2887_v33, %v2471_v40  ;;  %v2905_v39 = vsel %vm9655_vm15, %v2902_v5, %v2899_v7  ;;  %v2937_v34 = vadd.f32 1.0, %v2936_v30  ;;  %vm9664_vm10 = vcmp.lt.f32.partialorder %v2921_v55, 0.0004427343 }
 0x2fa   :  { %3090 = vrot.lane.b32.xlu1 %v3011_v23, %s6850_s17  ;;  %v2473_v8 = vmax.f32 %v9402_v0, 0.0  ;;  %v2939_v44 = vand.u32 2147483647, %v9566_v10  ;;  %vm2503_vm11 = vcmp.ne.f32.partialorder %v9384_v25, %v9384_v25  ;;  %v3045_v47 = vmul.f32 %v3013_v50, %v8990_v31 }
 0x2fb   :  { %v9634_v32 = vpop.eup %6577  ;;  %3184 = vrot.lane.b32.xlu0 %v3041_v46, %s6850_s17  ;;  %v3315_v46 = vpop.permute.xlu1 %3314  ;;  %v3015_v56 = vsel %vm2503_vm11, %v9384_v25, %v2983_v59  ;;  %v2580_v37 = vsub.f32 0.0, %v2548_v4  ;;  %v2938_v7 = vmul.f32 %v9566_v10, %v2937_v34  ;;  %vm2505_vm13 = vcmp.ne.f32.partialorder %v9402_v0, %v9402_v0 }
 0x2fc   :  { %v2951_v6 = vadd.f32 1.0, %v9634_v32  ;;  %v6580_v61 = vpop.eup %6579  ;;  %3393 = vst.msk [vmem:[#allocation4 + $0x88] sm:$0xff] %vm63_vm0, %v3315_v46  ;;  %v2954_v60 = vmul.f32 -0.5, %v9634_v32  ;;  %v2985_v23 = vadd.f32 %v2905_v39, %v2473_v8  ;;  %v3313_v33 = vpop.permute.xlu0 %3312  ;;  %vm9683_vm12 = vcmp.lt.f32.partialorder %v2939_v44, 0.0004427343 }
 0x2fd   :  { %v9647_v48 = vpop.eup %6581  ;;  %v2917_v17 = vmul.f32 0.6931472, %v6580_v61  ;;  %3392 = vst.msk [vmem:[#allocation4 + $0x80] sm:$0xff] %vm63_vm0, %v3313_v33  ;;  %v2616_v4 = vmul.f32 1.442695, %v2580_v37  ;;  %vm2507_vm14 = vcmp.ne.f32.partialorder %v9420_v9, %v9420_v9  ;;  %v2479_v11 = vmax.f32 %v9520_v58, 0.0 }
 0x2fe   :  { %6585 = vlog2.f32 %v2951_v6  ;;  %3186 = vrot.lane.b32.xlu1 %v3043_v27, %s6850_s17  ;;  %v6584_v21 = vpop.eup %6583  ;;  %v2475_v6 = vmax.f32 %v9420_v9, 0.0  ;;  %v2672_v61 = vadd.f32 1.0, %v9647_v48  ;;  %v2955_v40 = vadd.f32 1.0, %v2954_v60  ;;  %v9721_v60 = vld [vmem:[%s10938_s5] sm:$0xff] }
 0x2ff   :  { %3092 = vrot.lane.b32.xlu0 %v3013_v50, %s6850_s17  ;;  %6587 = vpow2.f32 %v2612_v1  ;;  %v2923_v35 = vsel %vm9664_vm10, %v2920_v57, %v2917_v17  ;;  %v2935_v28 = vmul.f32 0.6931472, %v6584_v21  ;;  %v3443_v30 = vpop.permute.xlu1 %3442  ;;  %v3047_v1 = vmul.f32 %v3015_v56, %v9059_v49 }
 0x300   :  { %3521 = vst.msk [vmem:[#allocation5 + $0x88] sm:$0xff] %vm63_vm0, %v3443_v30  ;;  %v2987_v55 = vadd.f32 %v2923_v35, %v2475_v6  ;;  %v3017_v10 = vsel %vm2505_vm13, %v9402_v0, %v2985_v23  ;;  %v2957_v27 = vand.u32 2147483647, %v9634_v32  ;;  %v3441_v5 = vpop.permute.xlu0 %3440  ;;  %v2477_v50 = vmax.f32 %v9461_v16, 0.0  ;;  %v9731_v23 = vld [vmem:[%s10938_s5 + $0x10] sm:$0xff] }
 0x301   :  { %v2941_v59 = vsel %vm9683_vm12, %v2938_v7, %v2935_v28  ;;  %3520 = vst.msk [vmem:[#allocation5 + $0x80] sm:$0xff] %vm63_vm0, %v3441_v5  ;;  %6589 = vlog2.f32 %v2672_v61  ;;  %v3049_v0 = vmul.f32 %v3017_v10, %v9120_v2  ;;  %v2956_v51 = vmul.f32 %v9634_v32, %v2955_v40 }
 0x302   :  { %3094 = vrot.lane.b32.xlu1 %v3015_v56, %s6850_s17  ;;  %v9706_v57 = vadd.f32 %v9212_v63, %v9179_v13  ;;  %v3019_v39 = vsel %vm2507_vm14, %v9420_v9, %v2987_v55  ;;  %vm2958_vm15 = vcmp.lt.f32.partialorder %v2957_v27, 0.0004427343  ;;  %v2989_v34 = vadd.f32 %v2941_v59, %v2477_v50  ;;  %v9726_v56 = vld [vmem:[%s10938_s5 + $0x8] sm:$0xff] }
 0x303   :  { %3188 = vrot.lane.b32.xlu0 %v3045_v47, %s6850_s17  ;;  %6591 = vpow2.f32 %v2616_v4  ;;  %v3051_v32 = vmul.f32 %v3019_v39, %v9132_v36  ;;  %vm2509_vm10 = vcmp.ne.f32.partialorder %v9461_v16, %v9461_v16  ;;  %vm2511_vm11 = vcmp.ne.f32.partialorder %v9520_v58, %v9520_v58 }
 0x304   :  { %v2550_v13 = vand.u32 2147483647, %v9706_v57  ;;  %v3021_v44 = vsel %vm2509_vm10, %v9461_v16, %v2989_v34  ;;  %v9741_v16 = vld [vmem:[%s10938_s5 + $0x18] sm:$0xff]  ;;  %v2675_v30 = vmul.f32 -0.5, %v9647_v48  ;;  %v9751_v25 = vadd.f32 %v9212_v63, %v9190_v12  ;;  %s10125_s5 = smov 0  }
 0x305   :  { %v3053_v35 = vmul.f32 %v3021_v44, %v9142_v26  ;;  %v2678_v12 = vand.u32 2147483647, %v9647_v48  ;;  %v2448_v34 = vmax.f32 %v9485_v38, 0.0  ;;  %vm2480_vm13 = vcmp.ne.f32.partialorder %v9485_v38, %v9485_v38 }
 0x306   :  { %3190 = vrot.lane.b32.xlu1 %v3047_v1, %s6850_s17  ;;  %v3319_v8 = vpop.permute.xlu1 %3318  ;;  %v2582_v28 = vsub.f32 0.0, %v2550_v13 }
 0x307   :  { %3096 = vrot.lane.b32.xlu0 %v3017_v10, %s6850_s17  ;;  %3395 = vst.msk [vmem:[#allocation4 + $0x98] sm:$0xff] %vm63_vm0, %v3319_v8  ;;  %v2552_v10 = vand.u32 2147483647, %v9751_v25  ;;  %vm2679_vm12 = vcmp.lt.f32.partialorder %v2678_v12, 0.0004427343 }
 0x308   :  { %v3317_v47 = vpop.permute.xlu0 %3316  ;;  %v2620_v55 = vmul.f32 1.442695, %v2582_v28 }
 0x309   :  { %3394 = vst.msk [vmem:[#allocation4 + $0x90] sm:$0xff] %vm63_vm0, %v3317_v47  ;;  %v2584_v50 = vsub.f32 0.0, %v2552_v10 }
 0x30a   :  { %3098 = vrot.lane.b32.xlu1 %v3019_v39, %s6850_s17  ;;  %v3447_v37 = vpop.permute.xlu1 %3446 }
 0x30b   :  { %v6586_v17 = vpop.eup %6585  ;;  %3192 = vrot.lane.b32.xlu0 %v3049_v0, %s6850_s17  ;;  %3523 = vst.msk [vmem:[#allocation5 + $0x98] sm:$0xff] %vm63_vm0, %v3447_v37  ;;  %v9790_v37 = vadd.f32 %v9212_v63, %v9239_v15 }
 0x30c   :  { %v2953_v21 = vmul.f32 0.6931472, %v6586_v17  ;;  %v9733_v33 = vpop.eup %6587  ;;  %v3445_v6 = vpop.permute.xlu0 %3444  ;;  %v9772_v17 = vadd.f32 %v9212_v63, %v9202_v22 }
 0x30d   :  { %3522 = vst.msk [vmem:[#allocation5 + $0x90] sm:$0xff] %vm63_vm0, %v3445_v6  ;;  %v2690_v61 = vadd.f32 1.0, %v9733_v33  ;;  %v2693_v22 = vmul.f32 -0.5, %v9733_v33  ;;  %v2696_v6 = vand.u32 2147483647, %v9733_v33 }
 0x30e   :  { %v2959_v46 = vsel %vm2958_vm15, %v2956_v51, %v2953_v21  ;;  %3194 = vrot.lane.b32.xlu1 %v3051_v32, %s6850_s17  ;;  %v6590_v1 = vpop.eup %6589  ;;  %v9780_v32 = vadd.f32 %v9212_v63, %v9224_v41  ;;  %v2558_v15 = vand.u32 2147483647, %v9790_v37  ;;  %vm2482_vm15 = vcmp.ne.f32.partialorder %v9582_v18, %v9582_v18 }
 0x30f   :  { %v2991_v9 = vadd.f32 %v2959_v46, %v2479_v11  ;;  %3100 = vrot.lane.b32.xlu0 %v3021_v44, %s6850_s17  ;;  %6593 = vlog2.f32 %v2690_v61  ;;  %v2674_v5 = vmul.f32 0.6931472, %v6590_v1  ;;  %v2694_v28 = vadd.f32 1.0, %v2693_v22 }
 0x310   :  { %v9763_v27 = vpop.eup %6591  ;;  %6595 = vpow2.f32 %v2620_v55  ;;  %v2556_v47 = vand.u32 2147483647, %v9780_v32  ;;  %vm9807_vm14 = vcmp.lt.f32.partialorder %v2696_v6, 0.0004427343 }
 0x311   :  { %v3023_v7 = vsel %vm2511_vm11, %v9520_v58, %v2991_v9  ;;  %v2676_v58 = vadd.f32 1.0, %v2675_v30  ;;  %v2708_v51 = vadd.f32 1.0, %v9763_v27  ;;  %v2695_v12 = vmul.f32 %v9733_v33, %v2694_v28 }
 0x312   :  { %3102 = vrot.lane.b32.xlu1 %v3023_v7, %s6850_s17  ;;  %v3055_v40 = vmul.f32 %v3023_v7, %v9150_v45  ;;  %v9816_v33 = vadd.f32 %v9212_v63, %v9274_v53  ;;  %vm2484_vm11 = vcmp.ne.f32.partialorder %v9622_v14, %v9622_v14 }
 0x313   :  { %3196 = vrot.lane.b32.xlu0 %v3053_v35, %s6850_s17  ;;  %v2677_v59 = vmul.f32 %v9647_v48, %v2676_v58  ;;  %v2624_v48 = vmul.f32 1.442695, %v2584_v50  ;;  %6597 = vlog2.f32 %v2708_v51  ;;  %v9802_v58 = vadd.f32 %v9212_v63, %v9256_v29 }
 0x314   :  { %v2562_v53 = vand.u32 2147483647, %v9816_v33 }
 0x315   :  { %v3323_v4 = vpop.permute.xlu1 %3322  ;;  %v2680_v39 = vsel %vm2679_vm12, %v2677_v59, %v2674_v5  ;;  %6599 = vpow2.f32 %v2624_v48  ;;  %v2711_v5 = vmul.f32 -0.5, %v9763_v27 }
 0x316   :  { %3198 = vrot.lane.b32.xlu1 %v3055_v40, %s6850_s17  ;;  %3397 = vst.msk [vmem:[#allocation4 + $0xa8] sm:$0xff] %vm63_vm0, %v3323_v4  ;;  %v2960_v8 = vadd.f32 %v2680_v39, %v2448_v34  ;;  %v2588_v40 = vsub.f32 0.0, %v2556_v47  ;;  %v2590_v39 = vsub.f32 0.0, %v2558_v15  ;;  %v2450_v34 = vmax.f32 %v9582_v18, 0.0 }
 0x317   :  { %3468 = vrot.lane.b32.xlu0 %v9549_v20, %s6851_s18  ;;  %v3321_v0 = vpop.permute.xlu0 %3320  ;;  %v2712_v48 = vadd.f32 1.0, %v2711_v5  ;;  %v2594_v6 = vsub.f32 0.0, %v2562_v53  ;;  %v11642_v5 = vld [vmem:[#allocation37_spill] sm:$0xff] }
 0x318   :  { %3396 = vst.msk [vmem:[#allocation4 + $0xa0] sm:$0xff] %vm63_vm0, %v3321_v0  ;;  %v2992_v13 = vsel %vm2480_vm13, %v9485_v38, %v2960_v8  ;;  %v2632_v51 = vmul.f32 1.442695, %v2588_v40  ;;  %vm2486_vm13 = vcmp.ne.f32.partialorder %v9706_v57, %v9706_v57 }
 0x319   :  { %v3451_v21 = vpop.permute.xlu1 %3450  ;;  %v3024_v7 = vmul.f32 %v2992_v13, %v8219_v19 }
 0x31a   :  { %3470 = vrot.lane.b32.xlu1 %v9515_v52, %s6851_s18  ;;  %3525 = vst.msk [vmem:[#allocation5 + $0xa8] sm:$0xff] %vm63_vm0, %v3451_v21  ;;  %v2554_v52 = vand.u32 2147483647, %v9772_v17  ;;  %v2560_v21 = vand.u32 2147483647, %v9802_v58 }
 0x31b   :  { %v3449_v11 = vpop.permute.xlu0 %3448 }
 0x31c   :  { %3524 = vst.msk [vmem:[#allocation5 + $0xa0] sm:$0xff] %vm63_vm0, %v3449_v11  ;;  %v6594_v9 = vpop.eup %6593  ;;  %v2586_v44 = vsub.f32 0.0, %v2554_v52  ;;  %v2714_v11 = vand.u32 2147483647, %v9763_v27 }
 0x31d   :  { %v9796_v38 = vpop.eup %6595  ;;  %v2692_v61 = vmul.f32 0.6931472, %v6594_v9  ;;  %v2592_v9 = vsub.f32 0.0, %v2560_v21 }
 0x31e   :  { %v2628_v1 = vmul.f32 1.442695, %v2586_v44  ;;  %v2726_v59 = vadd.f32 1.0, %v9796_v38  ;;  %v9828_v44 = vadd.f32 %v9212_v63, %v9298_v3  ;;  %vm2715_vm10 = vcmp.lt.f32.partialorder %v2714_v11, 0.0004427343 }
 0x31f   :  { %v3073_v46 = vpop.permute.xlu0 %3072  ;;  %v2698_v0 = vsel %vm9807_vm14, %v2695_v12, %v2692_v61  ;;  %v2640_v61 = vmul.f32 1.442695, %v2592_v9  ;;  %v2644_v12 = vmul.f32 1.442695, %v2594_v6 }
 0x320   :  { %v3120_v41 = vsel %vm2090_vm9, %v2992_v13, %v3073_v46  ;;  %v6598_v29 = vpop.eup %6597  ;;  %6601 = vpow2.f32 %v2628_v1  ;;  %v2962_v52 = vadd.f32 %v2698_v0, %v2450_v34  ;;  %v2636_v13 = vmul.f32 1.442695, %v2590_v39 }
 0x321   :  { %3136 = vst [vmem:[#allocation2] sm:$0xff] %v3120_v41  ;;  %6603 = vlog2.f32 %v2726_v59  ;;  %v2710_v22 = vmul.f32 0.6931472, %v6598_v29  ;;  %v2713_v41 = vmul.f32 %v9763_v27, %v2712_v48  ;;  %v2564_v1 = vand.u32 2147483647, %v9828_v44  ;;  %v11641_v27 = vld [vmem:[#allocation57_spill] sm:$0xff] }
 0x322   :  { %v9822_v46 = vpop.eup %6599  ;;  %6605 = vpow2.f32 %v2632_v51  ;;  %v9840_v40 = vadd.f32 %v9212_v63, %v11641_v27  ;;  %v2729_v59 = vmul.f32 -0.5, %v9796_v38  ;;  %v11643_v51 = vld [vmem:[#allocation58_spill] sm:$0xff] }
 0x323   :  { %v3327_v35 = vpop.permute.xlu1 %3326  ;;  %v3169_v30 = vpop.permute.xlu0 %3168  ;;  %6607 = vpow2.f32 %v2636_v13  ;;  %v2744_v3 = vadd.f32 1.0, %v9822_v46  ;;  %v2596_v0 = vsub.f32 0.0, %v2564_v1  ;;  %v9852_v39 = vadd.f32 %v9212_v63, %v11643_v51 }
 0x324   :  { %3399 = vst.msk [vmem:[#allocation4 + $0xb8] sm:$0xff] %vm63_vm0, %v3327_v35  ;;  %v3216_v55 = vsel %vm2090_vm9, %v3024_v7, %v3169_v30  ;;  %v2994_v35 = vsel %vm2482_vm15, %v9582_v18, %v2962_v52  ;;  %v2716_v7 = vsel %vm2715_vm10, %v2713_v41, %v2710_v22  ;;  %v2566_v29 = vand.u32 2147483647, %v9840_v40 }
 0x325   :  { %3232 = vst [vmem:[#allocation3] sm:$0xff] %v3216_v55  ;;  %v2452_v55 = vmax.f32 %v9622_v14, 0.0  ;;  %v3026_v4 = vmul.f32 %v2994_v35, %v11642_v5  ;;  %6609 = vlog2.f32 %v2744_v3  ;;  %v2730_v52 = vadd.f32 1.0, %v2729_v59 }
 0x326   :  { %6611 = vpow2.f32 %v2640_v61  ;;  %v2732_v22 = vand.u32 2147483647, %v9796_v38  ;;  %v2648_v9 = vmul.f32 1.442695, %v2596_v0  ;;  %v2568_v41 = vand.u32 2147483647, %v9852_v39 }
 0x327   :  { %v3455_v10 = vpop.permute.xlu1 %3454  ;;  %v3325_v50 = vpop.permute.xlu0 %3324  ;;  %v2964_v18 = vadd.f32 %v2716_v7, %v2452_v55  ;;  %6613 = vpow2.f32 %v2644_v12  ;;  %v2731_v27 = vmul.f32 %v9796_v38, %v2730_v52  ;;  %v2454_v0 = vmax.f32 %v9706_v57, 0.0 }
 0x328   :  { %3527 = vst.msk [vmem:[#allocation5 + $0xb8] sm:$0xff] %vm63_vm0, %v3455_v10  ;;  %3398 = vst.msk [vmem:[#allocation4 + $0xb0] sm:$0xff] %vm63_vm0, %v3325_v50  ;;  %vm2733_vm12 = vcmp.lt.f32.partialorder %v2732_v22, 0.0004427343  ;;  %v2747_v51 = vmul.f32 -0.5, %v9822_v46  ;;  %vm2488_vm15 = vcmp.ne.f32.partialorder %v9751_v25, %v9751_v25 }
 0x329   :  { %v2996_v11 = vsel %vm2484_vm11, %v9622_v14, %v2964_v18  ;;  %v11645_v14 = vld [vmem:[#allocation34_spill] sm:$0xff] }
 0x32a   :  { %v3028_v6 = vmul.f32 %v2996_v11, %v11645_v14 }
 0x32b   :  { %v3453_v8 = vpop.permute.xlu0 %3452 }
 0x32c   :  { %3526 = vst.msk [vmem:[#allocation5 + $0xb0] sm:$0xff] %vm63_vm0, %v3453_v8 }
 0x32d   :  { %v9847_v50 = vpop.eup %6601 }
 0x32e   :  { %v6604_v48 = vpop.eup %6603  ;;  %v2762_v13 = vadd.f32 1.0, %v9847_v50 }
 0x32f   :  { %v3331_v47 = vpop.permute.xlu1 %3330  ;;  %v3075_v28 = vpop.permute.xlu0 %3074  ;;  %v2728_v3 = vmul.f32 0.6931472, %v6604_v48 }
 0x330   :  { %3401 = vst.msk [vmem:[#allocation4 + $0xc8] sm:$0xff] %vm63_vm0, %v3331_v47  ;;  %v3121_v30 = vsel %vm2090_vm9, %v2994_v35, %v3075_v28  ;;  %v9861_v53 = vpop.eup %6605  ;;  %v2598_v47 = vsub.f32 0.0, %v2566_v29  ;;  %v11644_v28 = vld [vmem:[#allocation59_spill] sm:$0xff]  ;;  %6615 = vlog2.f32 %v2762_v13 }
 0x331   :  { %3137 = vst [vmem:[#allocation2 + $0x8] sm:$0xff] %v3121_v30  ;;  %v9866_v7 = vadd.f32 %v9212_v63, %v11644_v28  ;;  %v9873_v55 = vpop.eup %6607  ;;  %6617 = vpow2.f32 %v2648_v9  ;;  %v2734_v38 = vsel %vm2733_vm12, %v2731_v27, %v2728_v3  ;;  %v9890_v9 = vadd.f32 %v9212_v63, %v9549_v20 }
 0x332   :  { %v2652_v18 = vmul.f32 1.442695, %v2598_v47  ;;  %vm2490_vm12 = vcmp.ne.f32.partialorder %v9772_v17, %v9772_v17 }
 0x333   :  { %v3459_v15 = vpop.permute.xlu1 %3458  ;;  %v3329_v10 = vpop.permute.xlu0 %3328  ;;  %v2570_v5 = vand.u32 2147483647, %v9866_v7 }
 0x334   :  { %3529 = vst.msk [vmem:[#allocation5 + $0xc8] sm:$0xff] %vm63_vm0, %v3459_v15  ;;  %3400 = vst.msk [vmem:[#allocation4 + $0xc0] sm:$0xff] %vm63_vm0, %v3329_v10  ;;  %v2780_v15 = vadd.f32 1.0, %v9861_v53  ;;  %v2600_v10 = vsub.f32 0.0, %v2568_v41  ;;  %v2748_v41 = vadd.f32 1.0, %v2747_v51 }
 0x335   :  { %v2602_v22 = vsub.f32 0.0, %v2570_v5 }
 0x336   :  { %6619 = vlog2.f32 %v2780_v15  ;;  %v2656_v48 = vmul.f32 1.442695, %v2600_v10  ;;  %v2749_v27 = vmul.f32 %v9822_v46, %v2748_v41  ;;  %v2765_v15 = vmul.f32 -0.5, %v9847_v50 }
 0x337   :  { %v3171_v34 = vpop.permute.xlu1 %3170  ;;  %v3457_v8 = vpop.permute.xlu0 %3456  ;;  %6621 = vpow2.f32 %v2652_v18 }
 0x338   :  { %v3217_v21 = vsel %vm2090_vm9, %v3026_v4, %v3171_v34  ;;  %3528 = vst.msk [vmem:[#allocation5 + $0xc0] sm:$0xff] %vm63_vm0, %v3457_v8  ;;  %v11646_v4 = vld [vmem:[#allocation60_spill] sm:$0xff]  ;;  %v2798_v34 = vadd.f32 1.0, %v9873_v55  ;;  %v2966_v8 = vadd.f32 %v2734_v38, %v2454_v0  ;;  %v2766_v51 = vadd.f32 1.0, %v2765_v15 }
 0x339   :  { %3233 = vst [vmem:[#allocation3 + $0x8] sm:$0xff] %v3217_v21  ;;  %v9878_v59 = vadd.f32 %v9212_v63, %v11646_v4  ;;  %v6610_v21 = vpop.eup %6609 }
 0x33a   :  { %v9885_v52 = vpop.eup %6611  ;;  %6623 = vlog2.f32 %v2798_v34  ;;  %v2998_v14 = vsel %vm2486_vm13, %v9706_v57, %v2966_v8  ;;  %v2746_v63 = vmul.f32 0.6931472, %v6610_v21  ;;  %v2783_v34 = vmul.f32 -0.5, %v9861_v53 }
 0x33b   :  { %v3077_v35 = vpop.permute.xlu1 %3076  ;;  %v3173_v61 = vpop.permute.xlu0 %3172  ;;  %v2572_v13 = vand.u32 2147483647, %v9878_v59  ;;  %6625 = vpow2.f32 %v2656_v48  ;;  %v2816_v20 = vadd.f32 1.0, %v9885_v52  ;;  %v2768_v48 = vand.u32 2147483647, %v9847_v50 }
 0x33c   :  { %v3122_v30 = vsel %vm2090_vm9, %v2996_v11, %v3077_v35  ;;  %v3218_v1 = vsel %vm2090_vm9, %v3028_v6, %v3173_v61  ;;  %v2750_v35 = vand.u32 2147483647, %v9822_v46  ;;  %v9897_v28 = vpop.eup %6613  ;;  %v2574_v61 = vand.u32 2147483647, %v9890_v9 }
 0x33d   :  { %3138 = vst [vmem:[#allocation2 + $0x10] sm:$0xff] %v3122_v30  ;;  %3234 = vst [vmem:[#allocation3 + $0x10] sm:$0xff] %v3218_v1  ;;  %v2660_v30 = vmul.f32 1.442695, %v2602_v22  ;;  %v2604_v3 = vsub.f32 0.0, %v2572_v13  ;;  %v2834_v57 = vadd.f32 1.0, %v9897_v28  ;;  %v6616_v10 = vpop.eup %6615  ;;  %6627 = vlog2.f32 %v2816_v20 }
 0x33e   :  { %vm9905_vm14 = vcmp.lt.f32.partialorder %v2750_v35, 0.0004427343  ;;  %v9912_v38 = vpop.eup %6617  ;;  %v2606_v46 = vsub.f32 0.0, %v2574_v61  ;;  %v2764_v13 = vmul.f32 0.6931472, %v6616_v10  ;;  %v2784_v20 = vadd.f32 1.0, %v2783_v34 }
 0x33f   :  { %v3335_v12 = vpop.permute.xlu1 %3334  ;;  %v2752_v4 = vsel %vm9905_vm14, %v2749_v27, %v2746_v63  ;;  %6629 = vpow2.f32 %v2660_v30  ;;  %v2664_v0 = vmul.f32 1.442695, %v2604_v3  ;;  %v2801_v63 = vmul.f32 -0.5, %v9873_v55  ;;  %v11649_v30 = vld [vmem:[#allocation25_spill] sm:$0xff] }
 0x340   :  { %3403 = vst.msk [vmem:[#allocation4 + $0xd8] sm:$0xff] %vm63_vm0, %v3335_v12  ;;  %v3333_v29 = vpop.permute.xlu0 %3332  ;;  %6631 = vlog2.f32 %v2834_v57  ;;  %v2668_v35 = vmul.f32 1.442695, %v2606_v46  ;;  %v3030_v3 = vmul.f32 %v2998_v14, %v11649_v30  ;;  %vm9930_vm10 = vcmp.lt.f32.partialorder %v2768_v48, 0.0004427343 }
 0x341   :  { %3402 = vst.msk [vmem:[#allocation4 + $0xd0] sm:$0xff] %vm63_vm0, %v3333_v29  ;;  %v2456_v29 = vmax.f32 %v9751_v25, 0.0  ;;  %6633 = vpow2.f32 %v2664_v0  ;;  %v2786_v27 = vand.u32 2147483647, %v9861_v53  ;;  %v2802_v0 = vadd.f32 1.0, %v2801_v63 }
 0x342   :  { %v2785_v46 = vmul.f32 %v9861_v53, %v2784_v20  ;;  %v2804_v48 = vand.u32 2147483647, %v9873_v55  ;;  %v2460_v63 = vmax.f32 %v9780_v32, 0.0  ;;  %vm2492_vm14 = vcmp.ne.f32.partialorder %v9780_v32, %v9780_v32 }
 0x343   :  { %v3463_v11 = vpop.permute.xlu1 %3462  ;;  %v2968_v21 = vadd.f32 %v2752_v4, %v2456_v29  ;;  %v2458_v4 = vmax.f32 %v9772_v17, 0.0  ;;  %v2819_v29 = vmul.f32 -0.5, %v9885_v52  ;;  %vm9947_vm11 = vcmp.lt.f32.partialorder %v2786_v27, 0.0004427343 }
 0x344   :  { %3531 = vst.msk [vmem:[#allocation5 + $0xd8] sm:$0xff] %vm63_vm0, %v3463_v11  ;;  %v3461_v47 = vpop.permute.xlu0 %3460  ;;  %v6620_v11 = vpop.eup %6619  ;;  %vm9964_vm13 = vcmp.lt.f32.partialorder %v2804_v48, 0.0004427343 }
 0x345   :  { %3530 = vst.msk [vmem:[#allocation5 + $0xd0] sm:$0xff] %vm63_vm0, %v3461_v47  ;;  %v2852_v47 = vadd.f32 1.0, %v9912_v38  ;;  %v9920_v41 = vpop.eup %6621  ;;  %v3000_v61 = vsel %vm2488_vm15, %v9751_v25, %v2968_v21 }
 0x346   :  { %v2873_v27 = vmul.f32 -0.5, %v9920_v41 }
 0x347   :  { %v3079_v6 = vpop.permute.xlu1 %3078  ;;  %v6624_v15 = vpop.eup %6623  ;;  %6635 = vlog2.f32 %v2852_v47 }
 0x348   :  { %v3123_v1 = vsel %vm2090_vm9, %v2998_v14, %v3079_v6  ;;  %v2767_v6 = vmul.f32 %v9847_v50, %v2766_v51  ;;  %v2782_v50 = vmul.f32 0.6931472, %v6620_v11  ;;  %6637 = vpow2.f32 %v2668_v35  ;;  %v11652_v51 = vld [vmem:[#allocation27_spill] sm:$0xff] }
 0x349   :  { %3139 = vst [vmem:[#allocation2 + $0x18] sm:$0xff] %v3123_v1  ;;  %v3032_v34 = vmul.f32 %v3000_v61, %v11652_v51  ;;  %v2837_v35 = vmul.f32 -0.5, %v9897_v28  ;;  %v2840_v51 = vand.u32 2147483647, %v9897_v28 }
 0x34a   :  { %v2770_v10 = vsel %vm9930_vm10, %v2767_v6, %v2764_v13  ;;  %v2800_v13 = vmul.f32 0.6931472, %v6624_v15  ;;  %v2788_v47 = vsel %vm9947_vm11, %v2785_v46, %v2782_v50  ;;  %v11657_v46 = vld [vmem:[#allocation30_spill] sm:$0xff]  ;;  %vm2494_vm10 = vcmp.ne.f32.partialorder %v9790_v37, %v9790_v37 }
 0x34b   :  { %v3339_v12 = vpop.permute.xlu1 %3338  ;;  %v2970_v21 = vadd.f32 %v2770_v10, %v2458_v4  ;;  %v2972_v15 = vadd.f32 %v2788_v47, %v2460_v63  ;;  %vm10000_vm11 = vcmp.lt.f32.partialorder %v2840_v51, 0.0004427343 }
 0x34c   :  { %3405 = vst.msk [vmem:[#allocation4 + $0xe8] sm:$0xff] %vm63_vm0, %v3339_v12  ;;  %v2870_v12 = vadd.f32 1.0, %v9920_v41 }
 0x34d   :  { %v3337_v5 = vpop.permute.xlu0 %3336  ;;  %v3002_v1 = vsel %vm2490_vm12, %v9772_v17, %v2970_v21  ;;  %v2855_v21 = vmul.f32 -0.5, %v9912_v38  ;;  %v3004_v11 = vsel %vm2492_vm14, %v9780_v32, %v2972_v15  ;;  %vm2496_vm12 = vcmp.ne.f32.partialorder %v9802_v58, %v9802_v58 }
 0x34e   :  { %3404 = vst.msk [vmem:[#allocation4 + $0xe0] sm:$0xff] %vm63_vm0, %v3337_v5  ;;  %v9938_v5 = vpop.eup %6625  ;;  %6639 = vlog2.f32 %v2870_v12  ;;  %vm2498_vm14 = vcmp.ne.f32.partialorder %v9816_v33, %v9816_v33 }
 0x34f   :  { %v3467_v8 = vpop.permute.xlu1 %3466  ;;  %v6628_v53 = vpop.eup %6627  ;;  %v2888_v20 = vadd.f32 1.0, %v9938_v5  ;;  %v2856_v15 = vadd.f32 1.0, %v2855_v21  ;;  %v2874_v21 = vadd.f32 1.0, %v2873_v27 }
 0x350   :  { %3533 = vst.msk [vmem:[#allocation5 + $0xe8] sm:$0xff] %vm63_vm0, %v3467_v8  ;;  %v9958_v30 = vpop.eup %6629 }
 0x351   :  { %v3465_v22 = vpop.permute.xlu0 %3464  ;;  %v2906_v4 = vadd.f32 1.0, %v9958_v30  ;;  %6641 = vlog2.f32 %v2888_v20 }
 0x352   :  { %3532 = vst.msk [vmem:[#allocation5 + $0xe0] sm:$0xff] %vm63_vm0, %v3465_v22 }
 0x353   :  { %v3175_v18 = vpop.permute.xlu1 %3174  ;;  %6643 = vlog2.f32 %v2906_v4 }
 0x354   :  { %v3219_v25 = vsel %vm2090_vm9, %v3030_v3, %v3175_v18  ;;  %v2803_v3 = vmul.f32 %v9873_v55, %v2802_v0  ;;  %v2822_v18 = vand.u32 2147483647, %v9885_v52  ;;  %v2838_v55 = vadd.f32 1.0, %v2837_v35 }
 0x355   :  { %v3081_v57 = vpop.permute.xlu0 %3080  ;;  %3235 = vst [vmem:[#allocation3 + $0x18] sm:$0xff] %v3219_v25  ;;  %v2818_v25 = vmul.f32 0.6931472, %v6628_v53  ;;  %v2464_v53 = vmax.f32 %v9802_v58, 0.0 }
 0x356   :  { %v3124_v14 = vsel %vm2090_vm9, %v3000_v61, %v3081_v57  ;;  %v2820_v61 = vadd.f32 1.0, %v2819_v29  ;;  %v6632_v57 = vpop.eup %6631  ;;  %v2806_v12 = vsel %vm9964_vm13, %v2803_v3, %v2800_v13  ;;  %v3034_v29 = vmul.f32 %v3002_v1, %v11657_v46 }
 0x357   :  { %3140 = vst [vmem:[#allocation2 + $0x20] sm:$0xff] %v3124_v14  ;;  %v2462_v14 = vmax.f32 %v9790_v37, 0.0  ;;  %v9977_v0 = vpop.eup %6633  ;;  %vm9984_vm15 = vcmp.lt.f32.partialorder %v2822_v18, 0.0004427343  ;;  %v2839_v35 = vmul.f32 %v9897_v28, %v2838_v55 }
 0x358   :  { %v3343_v8 = vpop.permute.xlu1 %3342  ;;  %v2924_v20 = vadd.f32 1.0, %v9977_v0 }
 0x359   :  { %v3177_v22 = vpop.permute.xlu0 %3176  ;;  %3407 = vst.msk [vmem:[#allocation4 + $0xf8] sm:$0xff] %vm63_vm0, %v3343_v8  ;;  %v2974_v48 = vadd.f32 %v2806_v12, %v2462_v14  ;;  %v2836_v8 = vmul.f32 0.6931472, %v6632_v57 }
 0x35a   :  { %v3220_v6 = vsel %vm2090_vm9, %v3032_v34, %v3177_v22  ;;  %v2821_v34 = vmul.f32 %v9885_v52, %v2820_v61  ;;  %v11660_v61 = vld [vmem:[#allocation44_spill] sm:$0xff]  ;;  %6645 = vlog2.f32 %v2924_v20  ;;  %v11666_v20 = vld [vmem:[#allocation45_spill] sm:$0xff] }
 0x35b   :  { %3236 = vst [vmem:[#allocation3 + $0x20] sm:$0xff] %v3220_v6  ;;  %v6636_v6 = vpop.eup %6635  ;;  %v3006_v18 = vsel %vm2494_vm10, %v9790_v37, %v2974_v48  ;;  %v2842_v57 = vsel %vm10000_vm11, %v2839_v35, %v2836_v8  ;;  %v2857_v48 = vmul.f32 %v9912_v38, %v2856_v15  ;;  %v2876_v8 = vand.u32 2147483647, %v9920_v41 }
 0x35c   :  { %v3083_v10 = vpop.permute.xlu1 %3082  ;;  %v2824_v52 = vsel %vm9984_vm15, %v2821_v34, %v2818_v25  ;;  %v9997_v3 = vpop.eup %6637  ;;  %v2466_v25 = vmax.f32 %v9816_v33, 0.0  ;;  %v2909_v15 = vmul.f32 -0.5, %v9958_v30  ;;  %vm2500_vm10 = vcmp.ne.f32.partialorder %v9828_v44, %v9828_v44 }
 0x35d   :  { %v3341_v50 = vpop.permute.xlu0 %3340  ;;  %v3125_v17 = vsel %vm2090_vm9, %v3002_v1, %v3083_v10  ;;  %v3036_v1 = vmul.f32 %v3004_v11, %v11660_v61  ;;  %v2976_v10 = vadd.f32 %v2824_v52, %v2464_v53  ;;  %v6640_v14 = vpop.eup %6639  ;;  %v2942_v37 = vadd.f32 1.0, %v9997_v3 }
 0x35e   :  { %3406 = vst.msk [vmem:[#allocation4 + $0xf0] sm:$0xff] %vm63_vm0, %v3341_v50  ;;  %3141 = vst [vmem:[#allocation2 + $0x28] sm:$0xff] %v3125_v17  ;;  %v2858_v50 = vand.u32 2147483647, %v9912_v38  ;;  %v2854_v17 = vmul.f32 0.6931472, %v6636_v6  ;;  %v2978_v34 = vadd.f32 %v2842_v57, %v2466_v25 }
 0x35f   :  { %v2872_v53 = vmul.f32 0.6931472, %v6640_v14  ;;  %v2468_v6 = vmax.f32 %v9828_v44, 0.0  ;;  %6647 = vlog2.f32 %v2942_v37  ;;  %vm10037_vm15 = vcmp.lt.f32.partialorder %v2876_v8, 0.0004427343 }
 0x360   :  { %v3179_v13 = vpop.permute.xlu1 %3178  ;;  %vm10022_vm13 = vcmp.lt.f32.partialorder %v2858_v50, 0.0004427343  ;;  %v2470_v25 = vmax.f32 %v9840_v40, 0.0  ;;  %v2945_v22 = vmul.f32 -0.5, %v9997_v3 }
 0x361   :  { %v3085_v47 = vpop.permute.xlu0 %3084  ;;  %v3221_v32 = vsel %vm2090_vm9, %v3034_v29, %v3179_v13  ;;  %v11663_v29 = vld [vmem:[#allocation47_spill] sm:$0xff]  ;;  %v2891_v13 = vmul.f32 -0.5, %v9938_v5  ;;  %v2860_v52 = vsel %vm10022_vm13, %v2857_v48, %v2854_v17 }
 0x362   :  { %v3126_v63 = vsel %vm2090_vm9, %v3004_v11, %v3085_v47  ;;  %3237 = vst [vmem:[#allocation3 + $0x28] sm:$0xff] %v3221_v32  ;;  %v3038_v51 = vmul.f32 %v3006_v18, %v11663_v29  ;;  %v3008_v11 = vsel %vm2496_vm12, %v9802_v58, %v2976_v10  ;;  %v6642_v32 = vpop.eup %6641  ;;  %v2980_v27 = vadd.f32 %v2860_v52, %v2468_v6  ;;  %v11672_v6 = vld [vmem:[#allocation49_spill] sm:$0xff] }
 0x363   :  { %3142 = vst [vmem:[#allocation2 + $0x30] sm:$0xff] %v3126_v63  ;;  %v3010_v63 = vsel %vm2498_vm14, %v9816_v33, %v2978_v34  ;;  %v3040_v61 = vmul.f32 %v3008_v11, %v11666_v20  ;;  %v2894_v33 = vand.u32 2147483647, %v9938_v5  ;;  %v2890_v17 = vmul.f32 0.6931472, %v6642_v32  ;;  %v6644_v14 = vpop.eup %6643 }
 0x364   :  { %v3087_v12 = vpop.permute.xlu1 %3086  ;;  %v3012_v29 = vsel %vm2500_vm10, %v9828_v44, %v2980_v27  ;;  %vm2502_vm12 = vcmp.ne.f32.partialorder %v9840_v40, %v9840_v40  ;;  %v2472_v52 = vmax.f32 %v9852_v39, 0.0  ;;  %v2946_v27 = vadd.f32 1.0, %v2945_v22 }
 0x365   :  { %v3181_v55 = vpop.permute.xlu0 %3180  ;;  %v3127_v4 = vsel %vm2090_vm9, %v3006_v18, %v3087_v12  ;;  %v2892_v18 = vadd.f32 1.0, %v2891_v13  ;;  %v2927_v12 = vmul.f32 -0.5, %v9977_v0  ;;  %vm10055_vm11 = vcmp.lt.f32.partialorder %v2894_v33, 0.0004427343 }
 0x366   :  { %v3222_v46 = vsel %vm2090_vm9, %v3036_v1, %v3181_v55  ;;  %3143 = vst [vmem:[#allocation2 + $0x38] sm:$0xff] %v3127_v4  ;;  %v2875_v1 = vmul.f32 %v9920_v41, %v2874_v21  ;;  %v11669_v4 = vld [vmem:[#allocation48_spill] sm:$0xff]  ;;  %v3044_v32 = vmul.f32 %v3012_v29, %v11672_v6  ;;  %v2948_v33 = vand.u32 2147483647, %v9997_v3 }
 0x367   :  { %3238 = vst [vmem:[#allocation3 + $0x30] sm:$0xff] %v3222_v46  ;;  %v3042_v46 = vmul.f32 %v3010_v63, %v11669_v4  ;;  %v2893_v34 = vmul.f32 %v9938_v5, %v2892_v18  ;;  %v2928_v13 = vadd.f32 1.0, %v2927_v12  ;;  %v6646_v5 = vpop.eup %6645  ;;  %v2947_v4 = vmul.f32 %v9997_v3, %v2946_v27 }
 0x368   :  { %v3183_v47 = vpop.permute.xlu1 %3182  ;;  %v2878_v50 = vsel %vm10037_vm15, %v2875_v1, %v2872_v53  ;;  %v2908_v53 = vmul.f32 0.6931472, %v6644_v14  ;;  %vm2504_vm15 = vcmp.ne.f32.partialorder %v9852_v39, %v9852_v39  ;;  %vm10095_vm10 = vcmp.lt.f32.partialorder %v2948_v33, 0.0004427343 }
 0x369   :  { %v3089_v35 = vpop.permute.xlu0 %3088  ;;  %v3223_v38 = vsel %vm2090_vm9, %v3038_v51, %v3183_v47  ;;  %v2982_v37 = vadd.f32 %v2878_v50, %v2470_v25  ;;  %v2910_v51 = vadd.f32 1.0, %v2909_v15  ;;  %v2896_v44 = vsel %vm10055_vm11, %v2893_v34, %v2890_v17 }
 0x36a   :  { %v3128_v58 = vsel %vm2090_vm9, %v3008_v11, %v3089_v35  ;;  %3239 = vst [vmem:[#allocation3 + $0x38] sm:$0xff] %v3223_v38  ;;  %v2912_v11 = vand.u32 2147483647, %v9958_v30  ;;  %v2930_v38 = vand.u32 2147483647, %v9977_v0  ;;  %v2984_v28 = vadd.f32 %v2896_v44, %v2472_v52  ;;  %v11681_v44 = vld [vmem:[#allocation42_spill] sm:$0xff] }
 0x36b   :  { %3144 = vst [vmem:[#allocation2 + $0x40] sm:$0xff] %v3128_v58  ;;  %v3014_v58 = vsel %vm2502_vm12, %v9840_v40, %v2982_v37  ;;  %v2929_v15 = vmul.f32 %v9977_v0, %v2928_v13  ;;  %v11677_v0 = vld [vmem:[#allocation38_spill] sm:$0xff]  ;;  %vm2506_vm11 = vcmp.ne.f32.partialorder %v9866_v7, %v9866_v7  ;;  %vm2508_vm12 = vcmp.ne.f32.partialorder %v9878_v59, %v9878_v59 }
 0x36c   :  { %v3091_v57 = vpop.permute.xlu1 %3090  ;;  %vm10071_vm13 = vcmp.lt.f32.partialorder %v2912_v11, 0.0004427343  ;;  %v6648_v50 = vpop.eup %6647  ;;  %vm10082_vm14 = vcmp.lt.f32.partialorder %v2930_v38, 0.0004427343  ;;  %v3016_v17 = vsel %vm2504_vm15, %v9852_v39, %v2984_v28  ;;  %v11680_v39 = vld [vmem:[#allocation39_spill] sm:$0xff] }
 0x36d   :  { %v3185_v10 = vpop.permute.xlu0 %3184  ;;  %v3129_v55 = vsel %vm2090_vm9, %v3010_v63, %v3091_v57  ;;  %v2911_v63 = vmul.f32 %v9958_v30, %v2910_v51  ;;  %v2474_v30 = vmax.f32 %v9866_v7, 0.0  ;;  %v3048_v3 = vmul.f32 %v3016_v17, %v11680_v39 }
 0x36e   :  { %v3224_v41 = vsel %vm2090_vm9, %v3040_v61, %v3185_v10  ;;  %3145 = vst [vmem:[#allocation2 + $0x48] sm:$0xff] %v3129_v55  ;;  %v2926_v10 = vmul.f32 0.6931472, %v6646_v5  ;;  %v3046_v55 = vmul.f32 %v3014_v58, %v11677_v0 }
 0x36f   :  { %3240 = vst [vmem:[#allocation3 + $0x40] sm:$0xff] %v3224_v41  ;;  %v2914_v40 = vsel %vm10071_vm13, %v2911_v63, %v2908_v53  ;;  %v2478_v53 = vmax.f32 %v9890_v9, 0.0  ;;  %vm2510_vm13 = vcmp.ne.f32.partialorder %v9890_v9, %v9890_v9  ;;  %v11682_v63 = vld [vmem:[#allocation41_spill] sm:$0xff] }
 0x370   :  { %v3187_v21 = vpop.permute.xlu1 %3186  ;;  %v2986_v25 = vadd.f32 %v2914_v40, %v2474_v30  ;;  %v2932_v51 = vsel %vm10082_vm14, %v2929_v15, %v2926_v10  ;;  %v11683_v15 = vld [vmem:[#allocation43_spill] sm:$0xff] }
 0x371   :  { %v3093_v48 = vpop.permute.xlu0 %3092  ;;  %v3225_v47 = vsel %vm2090_vm9, %v3042_v46, %v3187_v21  ;;  %v2476_v21 = vmax.f32 %v9878_v59, 0.0 }
 0x372   :  { %v3130_v35 = vsel %vm2090_vm9, %v3012_v29, %v3093_v48  ;;  %3241 = vst [vmem:[#allocation3 + $0x48] sm:$0xff] %v3225_v47  ;;  %v2944_v29 = vmul.f32 0.6931472, %v6648_v50  ;;  %v3018_v48 = vsel %vm2506_vm11, %v9866_v7, %v2986_v25 }
 0x373   :  { %3146 = vst [vmem:[#allocation2 + $0x50] sm:$0xff] %v3130_v35  ;;  %v2988_v22 = vadd.f32 %v2932_v51, %v2476_v21  ;;  %v3050_v5 = vmul.f32 %v3018_v48, %v11681_v44 }
 0x374   :  { %v3095_v20 = vpop.permute.xlu1 %3094  ;;  %v2950_v35 = vsel %vm10095_vm10, %v2947_v4, %v2944_v29 }
 0x375   :  { %v3189_v61 = vpop.permute.xlu0 %3188  ;;  %v3131_v18 = vsel %vm2090_vm9, %v3014_v58, %v3095_v20  ;;  %v2990_v52 = vadd.f32 %v2950_v35, %v2478_v53  ;;  %v3020_v38 = vsel %vm2508_vm12, %v9878_v59, %v2988_v22 }
 0x376   :  { %v3226_v57 = vsel %vm2090_vm9, %v3044_v32, %v3189_v61  ;;  %3147 = vst [vmem:[#allocation2 + $0x58] sm:$0xff] %v3131_v18  ;;  %v3052_v20 = vmul.f32 %v3020_v38, %v11682_v63 }
 0x377   :  { %3242 = vst [vmem:[#allocation3 + $0x50] sm:$0xff] %v3226_v57  ;;  %v3022_v1 = vsel %vm2510_vm13, %v9890_v9, %v2990_v52 }
 0x378   :  { %v3191_v41 = vpop.permute.xlu1 %3190  ;;  %v3054_v18 = vmul.f32 %v3022_v1, %v11683_v15 }
 0x379   :  { %v3097_v14 = vpop.permute.xlu0 %3096  ;;  %v3227_v46 = vsel %vm2090_vm9, %v3046_v55, %v3191_v41 }
 0x37a   :  { %v3132_v37 = vsel %vm2090_vm9, %v3016_v17, %v3097_v14  ;;  %3243 = vst [vmem:[#allocation3 + $0x58] sm:$0xff] %v3227_v46 }
 0x37b   :  { %3148 = vst [vmem:[#allocation2 + $0x60] sm:$0xff] %v3132_v37 }
 0x37c   :  { %v3099_v11 = vpop.permute.xlu1 %3098 }
 0x37d   :  { %v3193_v8 = vpop.permute.xlu0 %3192  ;;  %v3133_v13 = vsel %vm2090_vm9, %v3018_v48, %v3099_v11 }
 0x37e   :  { %v3228_v47 = vsel %vm2090_vm9, %v3048_v3, %v3193_v8  ;;  %3149 = vst [vmem:[#allocation2 + $0x68] sm:$0xff] %v3133_v13 }
 0x37f   :  { %3244 = vst [vmem:[#allocation3 + $0x60] sm:$0xff] %v3228_v47 }
 0x380   :  { %v3195_v7 = vpop.permute.xlu1 %3194 }
 0x381   :  { %v3101_v58 = vpop.permute.xlu0 %3100  ;;  %v3229_v6 = vsel %vm2090_vm9, %v3050_v5, %v3195_v7 }
 0x382   :  { %v3134_v32 = vsel %vm2090_vm9, %v3020_v38, %v3101_v58  ;;  %3245 = vst [vmem:[#allocation3 + $0x68] sm:$0xff] %v3229_v6 }
 0x383   :  { %3150 = vst [vmem:[#allocation2 + $0x70] sm:$0xff] %v3134_v32 }
 0x384   :  { %v3103_v61 = vpop.permute.xlu1 %3102 }
 0x385   :  { %v3197_v28 = vpop.permute.xlu0 %3196  ;;  %v3135_v27 = vsel %vm2090_vm9, %v3022_v1, %v3103_v61 }
 0x386   :  { %v3230_v59 = vsel %vm2090_vm9, %v3052_v20, %v3197_v28  ;;  %3151 = vst [vmem:[#allocation2 + $0x78] sm:$0xff] %v3135_v27 }
 0x387   :  { %3246 = vst [vmem:[#allocation3 + $0x70] sm:$0xff] %v3230_v59 }
 0x388   :  { %v3199_v57 = vpop.permute.xlu1 %3198 }
 0x389   :  { %v3469_v40 = vpop.permute.xlu0 %3468  ;;  %v3231_v10 = vsel %vm2090_vm9, %v3054_v18, %v3199_v57 }
 0x38a   :  { %3534 = vst.msk [vmem:[#allocation5 + $0xf0] sm:$0xff] %vm63_vm0, %v3469_v40  ;;  %3247 = vst [vmem:[#allocation3 + $0x78] sm:$0xff] %v3231_v10 }
 0x38c   :  { %v3471_v50 = vpop.permute.xlu1 %3470 }
 0x38d   :  { %3535 = vst.msk [vmem:[#allocation5 + $0xf8] sm:$0xff] %vm63_vm0, %v3471_v50 }
 0x38e LB: > { %s5848_s28 = sshll.u32 %s6848_s5, 4  ;;  %v6852_v9 = vmov 0.0   ;;  %v11684_v12 = vld [vmem:[#allocation11_spill] sm:$0xff]  ;;  %v11685_v41 = vld [vmem:[#allocation13_spill] sm:$0xff]  ;;  %vm6853_vm14 = vmmov 0   ;;  %v11686_v14 = vld [vmem:[#allocation12_spill] sm:$0xff]  ;;  %s6848_s5 = sphi %s10125_s5, %s3548_s5  }
 0x38f   : > { %6197 = vmatprep.subr.mxu0 %v6852_v9  ;;  %6208 = vmatprep.subr.mxu1 %v6852_v9  ;;  %s3555_s29 = scalar_lea.vmem [#allocation4], %s5848_s28  ;;  %v11687_v37 = vld [vmem:[#allocation10_spill] sm:$0xff]  ;;  %v11688_v34 = vld [vmem:[#allocation9_spill] sm:$0xff]  ;;  %v11689_v3 = vld [vmem:[#allocation8_spill] sm:$0xff]  ;;  %s10168_s30 = sshll.u32 %s6848_s5, 3 }
 0x390   : > { %v10135_v30 = vld [vmem:[%s3555_s29] sm:$0xff]  ;;  %v10137_v33 = vld [vmem:[%s3555_s29 + $0x8] sm:$0xff]  ;;  %6205 = vmatprep.mubr.msk.f32.mxu0 %vm6853_vm14, %v6852_v9  ;;  %6216 = vmatprep.mubr.msk.f32.mxu1 %vm6853_vm14, %v6852_v9  ;;  %s3550_s0 = scalar_lea.vmem [#allocation2], %s10168_s30  ;;  %v11691_v7 = vld [vmem:[#allocation14_spill] sm:$0xff]  ;;  %s3552_s8 = scalar_lea.vmem [#allocation3], %s10168_s30 }
 0x391   : > { %v3564_v0 = vrot.slane %v10135_v30, %v11684_v12  ;;  %v3716_v55 = vrot.slane %v10137_v33, %v11684_v12  ;;  %v3583_v25 = vrot.slane %v10135_v30, %v11685_v41  ;;  %v3735_v17 = vrot.slane %v10137_v33, %v11685_v41  ;;  %v11690_v8 = vld [vmem:[#allocation7_spill] sm:$0xff]  ;;  %s3558_s9 = scalar_lea.vmem [#allocation5], %s5848_s28  ;;  %s4837_s10 = scalar_lea.vmem [#allocation6], %s10168_s30 }
 0x392   : > { %v3602_v4 = vrot.slane %v10135_v30, %v11686_v14  ;;  %v3754_v46 = vrot.slane %v10137_v33, %v11686_v14  ;;  %v3621_v29 = vrot.slane %v10135_v30, %v11687_v37  ;;  %v3773_v51 = vrot.slane %v10137_v33, %v11687_v37  ;;  %v10173_v13 = vld [vmem:[%s3550_s0] sm:$0xff]  ;;  %s3548_s5 = sadd.s32 1, %s6848_s5  }
 0x393   : > { %3574 = vbcast.lane.b32.xlu1 %v3564_v0, 272  ;;  %3578 = vbcast.lane.b32.xlu0 %v3564_v0, 280  ;;  %v3640_v21 = vrot.slane %v10135_v30, %v11688_v34  ;;  %v3792_v39 = vrot.slane %v10137_v33, %v11688_v34  ;;  %v3659_v48 = vrot.slane %v10135_v30, %v11689_v3  ;;  %v10196_v27 = vld [vmem:[%s3552_s8] sm:$0xff]  ;;  %p3545_p0 = scmp.ge.s32.totalorder %s3548_s5, 16  }
 0x394   : > { %v3811_v11 = vrot.slane %v10137_v33, %v11689_v3  ;;  %v3678_v22 = vrot.slane %v10135_v30, %v11690_v8  ;;  %v3830_v47 = vrot.slane %v10137_v33, %v11690_v8  ;;  %v3868_v35 = vrot.slane %v10173_v13, %v11684_v12 }
 0x395   : > { %v3697_v52 = vrot.slane %v10135_v30, %v11691_v7  ;;  %v10185_v38 = vrot.slane %v10173_v13, %v11685_v41  ;;  %v3849_v32 = vrot.slane %v10137_v33, %v11691_v7  ;;  %v10200_v40 = vrot.slane %v10173_v13, %v11686_v14 }
 0x396   : > { %v3872_v53 = vmul.f32 %v3868_v35, %v9741_v16  ;;  %v3871_v44 = vmul.f32 %v3868_v35, %v9731_v23  ;;  %v3870_v6 = vmul.f32 %v3868_v35, %v9726_v56  ;;  %v3869_v1 = vmul.f32 %v3868_v35, %v9721_v60 }
 0x397   : > { %3726 = vbcast.lane.b32.xlu1 %v3716_v55, 272  ;;  %3730 = vbcast.lane.b32.xlu0 %v3716_v55, 280  ;;  %v3991_v63 = vmul.f32 %v10185_v38, %v9741_v16  ;;  %v3990_v28 = vmul.f32 %v10185_v38, %v9731_v23  ;;  %v10204_v10 = vrot.slane %v10196_v27, %v11684_v12  ;;  %v5378_v12 = vld [vmem:[%s10932_s6 + $0x38] sm:$0xff] (%p3545_p0) }
 0x398   : > { %v3879_v5 = vmul.f32 1.442695, %v3872_v53  ;;  %v3877_v58 = vmul.f32 1.442695, %v3871_v44  ;;  %v3875_v20 = vmul.f32 1.442695, %v3870_v6  ;;  %v10218_v53 = vrot.slane %v10196_v27, %v11685_v41 }
 0x399   : > { %v3998_v61 = vmul.f32 1.442695, %v3991_v63  ;;  %v3873_v18 = vmul.f32 1.442695, %v3869_v1  ;;  %v3996_v50 = vmul.f32 1.442695, %v3990_v28  ;;  %v3988_v41 = vmul.f32 %v10185_v38, %v9721_v60 }
 0x39a   : > { %6650 = vpow2.f32 %v3879_v5 }
 0x39b   : > { %3597 = vbcast.lane.b32.xlu1 %v3583_v25, 280  ;;  %3570 = vbcast.lane.b32.xlu0 %v3564_v0, 264  ;;  %6652 = vpow2.f32 %v3877_v58 }
 0x39c   : > { %6654 = vpow2.f32 %v3875_v20 }
 0x39d   : > { %6656 = vpow2.f32 %v3998_v61  ;;  %v4107_v61 = vmul.f32 %v10200_v40, %v9731_v23 }
 0x39e   : > { %6658 = vpow2.f32 %v3873_v18 }
 0x39f   : > { %3749 = vbcast.lane.b32.xlu1 %v3735_v17, 280  ;;  %3722 = vbcast.lane.b32.xlu0 %v3716_v55, 264  ;;  %6660 = vpow2.f32 %v3996_v50 }
 0x3a3   : > { %3593 = vbcast.lane.b32.xlu1 %v3583_v25, 272  ;;  %3566 = vbcast.lane.b32.xlu0 %v3564_v0, 256 }
 0x3a7   : > { %3745 = vbcast.lane.b32.xlu1 %v3735_v17, 272  ;;  %3718 = vbcast.lane.b32.xlu0 %v3716_v55, 256  ;;  %v6651_v57 = vpop.eup %6650 }
 0x3a8   : > { %v6653_v30 = vpop.eup %6652  ;;  %v3890_v55 = vmul.f32 0.0, %v6651_v57 }
 0x3ab   : > { %3616 = vbcast.lane.b32.xlu1 %v3602_v4, 280  ;;  %3589 = vbcast.lane.b32.xlu0 %v3583_v25, 264 }
 0x3af   : > { %3768 = vbcast.lane.b32.xlu1 %v3754_v46, 280  ;;  %3741 = vbcast.lane.b32.xlu0 %v3735_v17, 264 }
 0x3b3   : > { %3612 = vbcast.lane.b32.xlu1 %v3602_v4, 272  ;;  %3585 = vbcast.lane.b32.xlu0 %v3583_v25, 256  ;;  %v11699_v25 = vld [vmem:[#allocation81_spill] sm:$0xff] (%p3545_p0) }
 0x3b7   : > { %3764 = vbcast.lane.b32.xlu1 %v3754_v46, 272  ;;  %3737 = vbcast.lane.b32.xlu0 %v3735_v17, 256 }
 0x3bb   : > { %3635 = vbcast.lane.b32.xlu1 %v3621_v29, 280  ;;  %3608 = vbcast.lane.b32.xlu0 %v3602_v4, 264 }
 0x3bf   : > { %3787 = vbcast.lane.b32.xlu1 %v3773_v51, 280  ;;  %3760 = vbcast.lane.b32.xlu0 %v3754_v46, 264 }
 0x3c3   : > { %3631 = vbcast.lane.b32.xlu1 %v3621_v29, 272  ;;  %3604 = vbcast.lane.b32.xlu0 %v3602_v4, 256 }
 0x3c7   : > { %3783 = vbcast.lane.b32.xlu1 %v3773_v51, 272  ;;  %3756 = vbcast.lane.b32.xlu0 %v3754_v46, 256  ;;  %v4108_v46 = vmul.f32 %v10200_v40, %v9741_v16 }
 0x3c9   : > { %v4115_v35 = vmul.f32 1.442695, %v4108_v46 }
 0x3cb   : > { %3654 = vbcast.lane.b32.xlu1 %v3640_v21, 280  ;;  %3627 = vbcast.lane.b32.xlu0 %v3621_v29, 264  ;;  %6662 = vpow2.f32 %v4115_v35 }
 0x3cf   : > { %3806 = vbcast.lane.b32.xlu1 %v3792_v39, 280  ;;  %3779 = vbcast.lane.b32.xlu0 %v3773_v51, 264 }
 0x3d3   : > { %3650 = vbcast.lane.b32.xlu1 %v3640_v21, 272  ;;  %3623 = vbcast.lane.b32.xlu0 %v3621_v29, 256 }
 0x3d7   : > { %3802 = vbcast.lane.b32.xlu1 %v3792_v39, 272  ;;  %3775 = vbcast.lane.b32.xlu0 %v3773_v51, 256  ;;  %v3989_v51 = vmul.f32 %v10185_v38, %v9726_v56  ;;  %v10238_v38 = vld [vmem:[%s3558_s9 + $0x8] sm:$0xff] }
 0x3d9   : > { %v3994_v44 = vmul.f32 1.442695, %v3989_v51 }
 0x3db   : > { %3673 = vbcast.lane.b32.xlu1 %v3659_v48, 280  ;;  %3646 = vbcast.lane.b32.xlu0 %v3640_v21, 264  ;;  %6664 = vpow2.f32 %v3994_v44  ;;  %v10253_v44 = vld [vmem:[%s3558_s9] sm:$0xff] }
 0x3df   : > { %3825 = vbcast.lane.b32.xlu1 %v3811_v11, 280  ;;  %3798 = vbcast.lane.b32.xlu0 %v3792_v39, 264 }
 0x3e3   : > { %3669 = vbcast.lane.b32.xlu1 %v3659_v48, 272  ;;  %3642 = vbcast.lane.b32.xlu0 %v3640_v21, 256  ;;  %v3889_v21 = vmul.f32 0.0, %v6653_v30  ;;  %v10234_v30 = vrot.slane %v10173_v13, %v11687_v37 }
 0x3e5   : > { %v4226_v51 = vmul.f32 %v10234_v30, %v9741_v16 }
 0x3e7   : > { %3821 = vbcast.lane.b32.xlu1 %v3811_v11, 272  ;;  %3794 = vbcast.lane.b32.xlu0 %v3792_v39, 256 }
 0x3eb   : > { %3692 = vbcast.lane.b32.xlu1 %v3678_v22, 280  ;;  %3665 = vbcast.lane.b32.xlu0 %v3659_v48, 264 }
 0x3ef   : > { %3844 = vbcast.lane.b32.xlu1 %v3830_v47, 280  ;;  %3817 = vbcast.lane.b32.xlu0 %v3811_v11, 264 }
 0x3f3   : > { %3688 = vbcast.lane.b32.xlu1 %v3678_v22, 272  ;;  %3661 = vbcast.lane.b32.xlu0 %v3659_v48, 256 }
 0x3f7   : > { %3840 = vbcast.lane.b32.xlu1 %v3830_v47, 272  ;;  %3813 = vbcast.lane.b32.xlu0 %v3811_v11, 256 }
 0x3fb   : > { %3711 = vbcast.lane.b32.xlu1 %v3697_v52, 280  ;;  %3684 = vbcast.lane.b32.xlu0 %v3678_v22, 264 }
 0x3ff   : > { %3863 = vbcast.lane.b32.xlu1 %v3849_v32, 280  ;;  %3836 = vbcast.lane.b32.xlu0 %v3830_v47, 264 }
 0x403   : > { %3707 = vbcast.lane.b32.xlu1 %v3697_v52, 272  ;;  %3680 = vbcast.lane.b32.xlu0 %v3678_v22, 256 }
 0x405   : > { %v3575_v59 = vpop.permute.xlu1 %3574  ;;  %v3579_v15 = vpop.permute.xlu0 %3578 }
 0x407   : > { %3859 = vbcast.lane.b32.xlu1 %v3849_v32, 272  ;;  %3832 = vbcast.lane.b32.xlu0 %v3830_v47, 256  ;;  %v6655_v47 = vpop.eup %6654 }
 0x408   : > { %v6657_v5 = vpop.eup %6656  ;;  %v3888_v20 = vmul.f32 0.0, %v6655_v47 }
 0x409   : > { %v3727_v33 = vpop.permute.xlu1 %3726  ;;  %v3731_v0 = vpop.permute.xlu0 %3730 }
 0x40a   : > { %v3885_v17 = vsel %vm3542_vm1, %v3575_v59, %v3727_v33  ;;  %v3886_v4 = vsel %vm3542_vm1, %v3579_v15, %v3731_v0  ;;  %v6659_v33 = vpop.eup %6658  ;;  %v4113_v0 = vmul.f32 1.442695, %v4107_v61  ;;  %v4233_v61 = vmul.f32 1.442695, %v4226_v51 }
 0x40b   : > { %v3898_v29 = vmul.f32 %v10204_v10, %v3886_v4  ;;  %3855 = vbcast.lane.b32.xlu1 %v3849_v32, 264  ;;  %3703 = vbcast.lane.b32.xlu0 %v3697_v52, 264  ;;  %v3897_v39 = vmul.f32 %v10204_v10, %v3885_v17  ;;  %v6661_v17 = vpop.eup %6660 }
 0x40c   : > { %6666 = vpow2.f32 %v4113_v0 }
 0x40d   : > { %v3598_v48 = vpop.permute.xlu1 %3597  ;;  %v3571_v11 = vpop.permute.xlu0 %3570  ;;  %v3902_v22 = vadd.f32 %v3898_v29, %v3890_v55  ;;  %v3901_v58 = vadd.f32 %v3897_v39, %v3889_v21  ;;  %v3992_v55 = vmul.f32 1.442695, %v3988_v41  ;;  %v3887_v29 = vmul.f32 0.0, %v6659_v33 }
 0x40e   : > { %v4106_v21 = vmul.f32 %v10200_v40, %v9726_v56  ;;  %v6663_v41 = vpop.eup %6662 }
 0x40f   : > { %3851 = vbcast.lane.b32.xlu1 %v3849_v32, 256  ;;  %3699 = vbcast.lane.b32.xlu0 %v3697_v52, 256  ;;  %v4007_v59 = vmul.f32 %v6657_v5, %v3902_v22  ;;  %6668 = vpow2.f32 %v3992_v55 }
 0x410   : > { %6198 = vmatpush3.msra.mxu0 %v3902_v22  ;;  %v4006_v22 = vmul.f32 %v6661_v17, %v3901_v58  ;;  %6670 = vpow2.f32 %v4233_v61 }
 0x411   : > { %6199 = vmatprep.subr.mxu0 %v6852_v9  ;;  %v3750_v6 = vpop.permute.xlu1 %3749  ;;  %v3723_v63 = vpop.permute.xlu0 %3722 }
 0x412   : > { %v4003_v32 = vsel %vm3542_vm1, %v3598_v48, %v3750_v6  ;;  %v3884_v52 = vsel %vm3542_vm1, %v3571_v11, %v3723_v63  ;;  %6200 = vmatpush3.msra.mxu0 %v3901_v58  ;;  %v3904_v11 = vrot.slane %v10238_v38, 7  ;;  %v10259_v58 = vrot.slane %v10196_v27, %v11686_v14 }
 0x413   : > { %v4015_v1 = vmul.f32 %v10218_v53, %v4003_v32  ;;  %v3896_v28 = vmul.f32 %v10204_v10, %v3884_v52  ;;  %6201 = vmatprep.subr.mxu0 %v6852_v9  ;;  %v4111_v52 = vmul.f32 1.442695, %v4106_v21 }
 0x414   : > { %v3906_v32 = vsel %vm528_vm2, %v10253_v44, %v3904_v11 }
 0x415   : > { %v3900_v15 = vadd.f32 %v3896_v28, %v3888_v20  ;;  %v3594_v18 = vpop.permute.xlu1 %3593  ;;  %v3567_v57 = vpop.permute.xlu0 %3566  ;;  %v4019_v50 = vadd.f32 %v4015_v1, %v4007_v59  ;;  %v4225_v59 = vmul.f32 %v10234_v30, %v9731_v23  ;;  %6672 = vpow2.f32 %v4111_v52 }
 0x417   : > { %6202 = vmatpush3.msra.mxu0 %v3900_v15  ;;  %6209 = vmatpush3.msra.mxu1 %v4019_v50  ;;  %v4124_v33 = vmul.f32 %v6663_v41, %v4019_v50  ;;  %v4231_v21 = vmul.f32 1.442695, %v4225_v59 }
 0x418   : > { %6203 = vmatprep.subr.mxu0 %v6852_v9  ;;  %6210 = vmatprep.subr.mxu1 %v6852_v9 }
 0x419   : > { %v3746_v4 = vpop.permute.xlu1 %3745  ;;  %v3719_v46 = vpop.permute.xlu0 %3718  ;;  %6674 = vpow2.f32 %v4231_v21 }
 0x41a   : > { %v4002_v39 = vsel %vm3542_vm1, %v3594_v18, %v3746_v4  ;;  %v3883_v48 = vsel %vm3542_vm1, %v3567_v57, %v3719_v46  ;;  %v4105_v57 = vmul.f32 %v10200_v40, %v9721_v60 }
 0x41b   : > { %v4014_v47 = vmul.f32 %v10218_v53, %v4002_v39  ;;  %v3895_v35 = vmul.f32 %v10204_v10, %v3883_v48  ;;  %v6665_v10 = vpop.eup %6664  ;;  %v10278_v39 = vrot.slane %v10173_v13, %v11688_v34 }
 0x41c   : > { %v4005_v55 = vmul.f32 %v6665_v10, %v3900_v15  ;;  %v4109_v48 = vmul.f32 1.442695, %v4105_v57  ;;  %v6667_v40 = vpop.eup %6666 }
 0x41d   : > { %v4018_v5 = vadd.f32 %v4014_v47, %v4006_v22  ;;  %v3899_v6 = vadd.f32 %v3895_v35, %v3887_v29  ;;  %v3617_v63 = vpop.permute.xlu1 %3616  ;;  %v3590_v20 = vpop.permute.xlu0 %3589  ;;  %v4344_v22 = vmul.f32 %v10278_v39, %v9741_v16  ;;  %v4224_v47 = vmul.f32 %v10234_v30, %v9726_v56 }
 0x41e   : > { %v6669_v11 = vpop.eup %6668  ;;  %6676 = vpow2.f32 %v4109_v48 }
 0x41f   : > { %6204 = vmatpush3.msra.mxu0 %v3899_v6  ;;  %6211 = vmatpush3.msra.mxu1 %v4018_v5  ;;  %v4123_v61 = vmul.f32 %v6667_v40, %v4018_v5  ;;  %v4004_v52 = vmul.f32 %v6669_v11, %v3899_v6  ;;  %v10297_v5 = vrot.slane %v10196_v27, %v11687_v37  ;;  %v5377_v37 = vld [vmem:[%s10932_s6 + $0x30] sm:$0xff] (%p3545_p0) }
 0x420   : > { %6212 = vmatprep.subr.mxu1 %v6852_v9  ;;  %6219 = vmatprep.subr.mxu0 %v6852_v9 }
 0x421   : > { %v3769_v1 = vpop.permute.xlu1 %3768  ;;  %v3742_v28 = vpop.permute.xlu0 %3741  ;;  %6206 = vmatmul.mubr.msk.f32.vlgmr.msra.gmra.mxu0 %vm63_vm0, %v3906_v32 }
 0x422   : > { %v4120_v18 = vsel %vm3542_vm1, %v3617_v63, %v3769_v1  ;;  %v4001_v14 = vsel %vm3542_vm1, %v3590_v20, %v3742_v28  ;;  %6227 = vmatprep.mubr.msk.f32.mxu0 %vm6853_vm14, %v6852_v9  ;;  %v4021_v20 = vrot.slane %v10253_v44, 1 }
 0x423   : > { %v4132_v0 = vmul.f32 %v10259_v58, %v4120_v18  ;;  %v4013_v17 = vmul.f32 %v10218_v53, %v4001_v14  ;;  %v4351_v18 = vmul.f32 1.442695, %v4344_v22  ;;  %v6671_v14 = vpop.eup %6670 }
 0x424   : > { %v4023_v57 = vsel %vm528_vm2, %v4021_v20, %v10238_v38 }
 0x425   : > { %v4136_v4 = vadd.f32 %v4132_v0, %v4124_v33  ;;  %v4017_v46 = vadd.f32 %v4013_v17, %v4005_v55  ;;  %v3613_v29 = vpop.permute.xlu1 %3612  ;;  %v3586_v51 = vpop.permute.xlu0 %3585  ;;  %v4229_v33 = vmul.f32 1.442695, %v4224_v47  ;;  %6678 = vpow2.f32 %v4351_v18 }
 0x426   : > { %v6673_v0 = vpop.eup %6672  ;;  %v4223_v17 = vmul.f32 %v10234_v30, %v9721_v60  ;;  %v4139_v18 = vrot.slane %v10238_v38, 1 }
 0x427   : > { %6213 = vmatpush3.msra.mxu1 %v4017_v46  ;;  %6220 = vmatpush3.msra.mxu0 %v4136_v4  ;;  %6680 = vpow2.f32 %v4229_v33  ;;  %v4242_v21 = vmul.f32 %v6671_v14, %v4136_v4  ;;  %v4122_v40 = vmul.f32 %v6673_v0, %v4017_v46  ;;  %v6675_v20 = vpop.eup %6674 }
 0x428   : > { %6214 = vmatprep.subr.mxu1 %v6852_v9  ;;  %6221 = vmatprep.subr.mxu0 %v6852_v9 }
 0x429   : > { %v3765_v15 = vpop.permute.xlu1 %3764  ;;  %v3738_v50 = vpop.permute.xlu0 %3737 }
 0x42a   : > { %v4119_v35 = vsel %vm3542_vm1, %v3613_v29, %v3765_v15  ;;  %v4000_v63 = vsel %vm3542_vm1, %v3586_v51, %v3738_v50 }
 0x42b   : > { %v4131_v32 = vmul.f32 %v10259_v58, %v4119_v35  ;;  %v4012_v41 = vmul.f32 %v10218_v53, %v4000_v63  ;;  %v4343_v53 = vmul.f32 %v10278_v39, %v9731_v23  ;;  %v4227_v35 = vmul.f32 1.442695, %v4223_v17 }
 0x42c   : > { %v10316_v63 = vrot.slane %v10173_v13, %v11689_v3 }
 0x42d   : > { %v4135_v10 = vadd.f32 %v4131_v32, %v4123_v61  ;;  %v4016_v1 = vadd.f32 %v4012_v41, %v4004_v52  ;;  %v3636_v28 = vpop.permute.xlu1 %3635  ;;  %v3609_v59 = vpop.permute.xlu0 %3608  ;;  %v4349_v15 = vmul.f32 1.442695, %v4343_v53  ;;  %v4342_v52 = vmul.f32 %v10278_v39, %v9726_v56 }
 0x42e   : > { %v6677_v61 = vpop.eup %6676  ;;  %v4462_v32 = vmul.f32 %v10316_v63, %v9741_v16 }
 0x42f   : > { %6215 = vmatpush3.msra.mxu1 %v4016_v1  ;;  %6222 = vmatpush3.msra.mxu0 %v4135_v10  ;;  %6682 = vpow2.f32 %v4349_v15  ;;  %v4241_v14 = vmul.f32 %v6675_v20, %v4135_v10  ;;  %v4121_v33 = vmul.f32 %v6677_v61, %v4016_v1  ;;  %v10335_v10 = vrot.slane %v10196_v27, %v11688_v34  ;;  %v11697_v34 = vld [vmem:[#allocation66_spill] sm:$0xff] (%p3545_p0) }
 0x430   : > { %6223 = vmatprep.subr.mxu0 %v6852_v9  ;;  %6230 = vmatprep.subr.mxu1 %v6852_v9  ;;  %6684 = vpow2.f32 %v4227_v35  ;;  %v4341_v15 = vmul.f32 %v10278_v39, %v9721_v60 }
 0x431   : > { %v3788_v6 = vpop.permute.xlu1 %3787  ;;  %v3761_v55 = vpop.permute.xlu0 %3760  ;;  %6217 = vmatmul.mubr.msk.f32.vlgmr.msra.gmra.mxu1 %vm63_vm0, %v4023_v57 }
 0x432   : > { %v4238_v29 = vsel %vm3542_vm1, %v3636_v28, %v3788_v6  ;;  %v4118_v51 = vsel %vm3542_vm1, %v3609_v59, %v3761_v55  ;;  %6238 = vmatprep.mubr.msk.f32.mxu1 %vm6853_vm14, %v6852_v9  ;;  %v4137_v59 = vrot.slane %v10253_v44, 2 }
 0x433   : > { %v4250_v48 = vmul.f32 %v10297_v5, %v4238_v29  ;;  %v4130_v11 = vmul.f32 %v10259_v58, %v4118_v51  ;;  %v4469_v29 = vmul.f32 1.442695, %v4462_v32  ;;  %v6679_v51 = vpop.eup %6678 }
 0x435   : > { %v4254_v50 = vadd.f32 %v4250_v48, %v4242_v21  ;;  %v4134_v22 = vadd.f32 %v4130_v11, %v4122_v40  ;;  %v3632_v30 = vpop.permute.xlu1 %3631  ;;  %v3605_v47 = vpop.permute.xlu0 %3604  ;;  %v4141_v21 = vsel %vm528_vm2, %v4137_v59, %v4139_v18  ;;  %v4347_v48 = vmul.f32 1.442695, %v4342_v52 }
 0x436   : > { %v6681_v40 = vpop.eup %6680  ;;  %6686 = vpow2.f32 %v4469_v29  ;;  %v4345_v59 = vmul.f32 1.442695, %v4341_v15  ;;  %v10354_v18 = vrot.slane %v10173_v13, %v11690_v8  ;;  %v4257_v29 = vrot.slane %v10238_v38, 2 }
 0x437   : > { %6224 = vmatpush3.msra.mxu0 %v4134_v22  ;;  %6231 = vmatpush3.msra.mxu1 %v4254_v50  ;;  %6688 = vpow2.f32 %v4347_v48  ;;  %v4360_v35 = vmul.f32 %v6679_v51, %v4254_v50  ;;  %v4240_v61 = vmul.f32 %v6681_v40, %v4134_v22 }
 0x438   : > { %6225 = vmatprep.subr.mxu0 %v6852_v9  ;;  %6232 = vmatprep.subr.mxu1 %v6852_v9 }
 0x439   : > { %v3784_v4 = vpop.permute.xlu1 %3783  ;;  %v3757_v46 = vpop.permute.xlu0 %3756 }
 0x43a   : > { %v4237_v41 = vsel %vm3542_vm1, %v3632_v30, %v3784_v4  ;;  %v4117_v28 = vsel %vm3542_vm1, %v3605_v47, %v3757_v46 }
 0x43b   : > { %v4249_v57 = vmul.f32 %v10297_v5, %v4237_v41  ;;  %v4129_v0 = vmul.f32 %v10259_v58, %v4117_v28  ;;  %v4461_v58 = vmul.f32 %v10316_v63, %v9731_v23 }
 0x43c   : > { %v6683_v32 = vpop.eup %6682 }
 0x43d   : > { %v4253_v53 = vadd.f32 %v4249_v57, %v4241_v14  ;;  %v4133_v6 = vadd.f32 %v4129_v0, %v4121_v33  ;;  %v3655_v55 = vpop.permute.xlu1 %3654  ;;  %v3628_v17 = vpop.permute.xlu0 %3627  ;;  %v4467_v46 = vmul.f32 1.442695, %v4461_v58  ;;  %v4580_v57 = vmul.f32 %v10354_v18, %v9741_v16 }
 0x43e   : > { %v6685_v14 = vpop.eup %6684  ;;  %v4460_v33 = vmul.f32 %v10316_v63, %v9726_v56 }
 0x43f   : > { %6226 = vmatpush3.msra.mxu0 %v4133_v6  ;;  %6233 = vmatpush3.msra.mxu1 %v4253_v53  ;;  %6690 = vpow2.f32 %v4467_v46  ;;  %v4359_v51 = vmul.f32 %v6683_v32, %v4253_v53  ;;  %v4239_v48 = vmul.f32 %v6685_v14, %v4133_v6  ;;  %v10373_v53 = vrot.slane %v10196_v27, %v11689_v3 }
 0x440   : > { %6234 = vmatprep.subr.mxu1 %v6852_v9  ;;  %6241 = vmatprep.subr.mxu0 %v6852_v9  ;;  %6692 = vpow2.f32 %v4345_v59  ;;  %v4459_v46 = vmul.f32 %v10316_v63, %v9721_v60  ;;  %v5874_v3 = vmul.f32 (%p3545_p0), -1.442695, %v11697_v34 }
 0x441   : > { %v3807_v1 = vpop.permute.xlu1 %3806  ;;  %v3780_v11 = vpop.permute.xlu0 %3779  ;;  %6228 = vmatmul.mubr.msk.f32.vlgmr.msra.gmra.mxu0 %vm63_vm0, %v4141_v21 }
 0x442   : > { %v4356_v30 = vsel %vm3542_vm1, %v3655_v55, %v3807_v1  ;;  %v4236_v47 = vsel %vm3542_vm1, %v3628_v17, %v3780_v11  ;;  %6249 = vmatprep.mubr.msk.f32.mxu0 %vm6853_vm14, %v6852_v9  ;;  %v4255_v17 = vrot.slane %v10253_v44, 3 }
 0x443   : > { %v4368_v20 = vmul.f32 %v10335_v10, %v4356_v30  ;;  %v4248_v4 = vmul.f32 %v10297_v5, %v4236_v47  ;;  %v4587_v30 = vmul.f32 1.442695, %v4580_v57  ;;  %v6687_v47 = vpop.eup %6686 }
 0x445   : > { %v4372_v52 = vadd.f32 %v4368_v20, %v4360_v35  ;;  %v4252_v39 = vadd.f32 %v4248_v4, %v4240_v61  ;;  %v3651_v41 = vpop.permute.xlu1 %3650  ;;  %v3624_v28 = vpop.permute.xlu0 %3623  ;;  %v4259_v35 = vsel %vm528_vm2, %v4255_v17, %v4257_v29  ;;  %v4465_v20 = vmul.f32 1.442695, %v4460_v33 }
 0x446   : > { %v6689_v61 = vpop.eup %6688  ;;  %6694 = vpow2.f32 %v4587_v30  ;;  %v4463_v17 = vmul.f32 1.442695, %v4459_v46  ;;  %v10392_v29 = vrot.slane %v10173_v13, %v11691_v7 }
 0x447   : > { %6235 = vmatpush3.msra.mxu1 %v4252_v39  ;;  %6242 = vmatpush3.msra.mxu0 %v4372_v52  ;;  %6696 = vpow2.f32 %v4465_v20  ;;  %v4358_v14 = vmul.f32 %v6689_v61, %v4252_v39 }
 0x448   : > { %6236 = vmatprep.subr.mxu1 %v6852_v9  ;;  %6243 = vmatprep.subr.mxu0 %v6852_v9 }
 0x449   : > { %v3803_v50 = vpop.permute.xlu1 %3802  ;;  %v3776_v22 = vpop.permute.xlu0 %3775 }
 0x44a   : > { %v4355_v0 = vsel %vm3542_vm1, %v3651_v41, %v3803_v50  ;;  %v4235_v55 = vsel %vm3542_vm1, %v3624_v28, %v3776_v22  ;;  %v4478_v28 = vmul.f32 %v6687_v47, %v4372_v52 }
 0x44b   : > { %v4367_v21 = vmul.f32 %v10335_v10, %v4355_v0  ;;  %v4247_v40 = vmul.f32 %v10297_v5, %v4235_v55  ;;  %v4579_v5 = vmul.f32 %v10354_v18, %v9731_v23 }
 0x44c   : > { %v6691_v57 = vpop.eup %6690 }
 0x44d   : > { %v4371_v58 = vadd.f32 %v4367_v21, %v4359_v51  ;;  %v4251_v1 = vadd.f32 %v4247_v40, %v4239_v48  ;;  %v3674_v11 = vpop.permute.xlu1 %3673  ;;  %v3647_v15 = vpop.permute.xlu0 %3646  ;;  %v4585_v22 = vmul.f32 1.442695, %v4579_v5  ;;  %v4698_v21 = vmul.f32 %v10392_v29, %v9741_v16 }
 0x44e   : > { %v6693_v51 = vpop.eup %6692  ;;  %v4578_v48 = vmul.f32 %v10354_v18, %v9726_v56 }
 0x44f   : > { %6237 = vmatpush3.msra.mxu1 %v4251_v1  ;;  %6244 = vmatpush3.msra.mxu0 %v4371_v58  ;;  %6698 = vpow2.f32 %v4585_v22  ;;  %v4477_v30 = vmul.f32 %v6691_v57, %v4371_v58  ;;  %v4705_v46 = vmul.f32 1.442695, %v4698_v21  ;;  %v10411_v58 = vrot.slane %v10196_v27, %v11690_v8  ;;  %v11698_v8 = vld [vmem:[#allocation19_spill] sm:$0xff] (%p3545_p0) }
 0x450   : > { %6245 = vmatprep.subr.mxu0 %v6852_v9  ;;  %6252 = vmatprep.subr.mxu1 %v6852_v9  ;;  %6700 = vpow2.f32 %v4463_v17 }
 0x451   : > { %v3826_v6 = vpop.permute.xlu1 %3825  ;;  %v3799_v4 = vpop.permute.xlu0 %3798  ;;  %6239 = vmatmul.mubr.msk.f32.vlgmr.msra.gmra.mxu1 %vm63_vm0, %v4259_v35  ;;  %v4357_v35 = vmul.f32 %v6693_v51, %v4251_v1  ;;  %6702 = vpow2.f32 %v4705_v46 }
 0x452   : > { %v4474_v32 = vsel %vm3542_vm1, %v3674_v11, %v3826_v6  ;;  %v4354_v41 = vsel %vm3542_vm1, %v3647_v15, %v3799_v4  ;;  %6260 = vmatprep.mubr.msk.f32.mxu1 %vm6853_vm14, %v6852_v9  ;;  %v4373_v11 = vrot.slane %v10253_v44, 4  ;;  %v4375_v15 = vrot.slane %v10238_v38, 3 }
 0x453   : > { %v4486_v59 = vmul.f32 %v10373_v53, %v4474_v32  ;;  %v4366_v50 = vmul.f32 %v10335_v10, %v4354_v41  ;;  %v6695_v32 = vpop.eup %6694 }
 0x454   : > { %v4377_v41 = vsel %vm528_vm2, %v4373_v11, %v4375_v15  ;;  %v4696_v15 = vmul.f32 %v10392_v29, %v9726_v56 }
 0x455   : > { %v4490_v33 = vadd.f32 %v4486_v59, %v4478_v28  ;;  %v4370_v63 = vadd.f32 %v4366_v50, %v4358_v14  ;;  %v3670_v0 = vpop.permute.xlu1 %3669  ;;  %v3643_v55 = vpop.permute.xlu0 %3642  ;;  %v4583_v28 = vmul.f32 1.442695, %v4578_v48  ;;  %v4577_v50 = vmul.f32 %v10354_v18, %v9721_v60 }
 0x456   : > { %v6697_v59 = vpop.eup %6696 }
 0x457   : > { %6246 = vmatpush3.msra.mxu0 %v4370_v63  ;;  %6253 = vmatpush3.msra.mxu1 %v4490_v33  ;;  %6704 = vpow2.f32 %v4583_v28  ;;  %v4476_v17 = vmul.f32 %v6697_v59, %v4370_v63 }
 0x458   : > { %6247 = vmatprep.subr.mxu0 %v6852_v9  ;;  %6254 = vmatprep.subr.mxu1 %v6852_v9 }
 0x459   : > { %v3822_v52 = vpop.permute.xlu1 %3821  ;;  %v3795_v39 = vpop.permute.xlu0 %3794 }
 0x45a   : > { %v4473_v13 = vsel %vm3542_vm1, %v3670_v0, %v3822_v52  ;;  %v4353_v40 = vsel %vm3542_vm1, %v3643_v55, %v3795_v39  ;;  %v4596_v0 = vmul.f32 %v6695_v32, %v4490_v33 }
 0x45b   : > { %v4485_v47 = vmul.f32 %v10373_v53, %v4473_v13  ;;  %v4365_v20 = vmul.f32 %v10335_v10, %v4353_v40  ;;  %v4697_v10 = vmul.f32 %v10392_v29, %v9731_v23  ;;  %v4581_v40 = vmul.f32 1.442695, %v4577_v50  ;;  %v11696_v23 = vld [vmem:[#allocation20_spill] sm:$0xff] (%p3545_p0) }
 0x45c   : > { %v6699_v39 = vpop.eup %6698  ;;  %v5859_v16 = vmul.f32 (%p3545_p0), -1.442695, %v11696_v23 }
 0x45d   : > { %v4489_v61 = vadd.f32 %v4485_v47, %v4477_v30  ;;  %v4369_v5 = vadd.f32 %v4365_v20, %v4357_v35  ;;  %v3693_v6 = vpop.permute.xlu1 %3692  ;;  %v3666_v4 = vpop.permute.xlu0 %3665  ;;  %v4703_v52 = vmul.f32 1.442695, %v4697_v10  ;;  %v4491_v30 = vrot.slane %v10253_v44, 5 }
 0x45e   : > { %v6701_v11 = vpop.eup %6700  ;;  %v4493_v47 = vrot.slane %v10238_v38, 4 }
 0x45f   : > { %6248 = vmatpush3.msra.mxu0 %v4369_v5  ;;  %6255 = vmatpush3.msra.mxu1 %v4489_v61  ;;  %6706 = vpow2.f32 %v4703_v52  ;;  %v4595_v46 = vmul.f32 %v6699_v39, %v4489_v61 }
 0x460   : > { %6256 = vmatprep.subr.mxu1 %v6852_v9  ;;  %6263 = vmatprep.subr.mxu0 %v6852_v9  ;;  %6708 = vpow2.f32 %v4581_v40  ;;  %v4495_v50 = vsel %vm528_vm2, %v4491_v30, %v4493_v47 }
 0x461   : > { %v3845_v1 = vpop.permute.xlu1 %3844  ;;  %v3818_v14 = vpop.permute.xlu0 %3817  ;;  %6250 = vmatmul.mubr.msk.f32.vlgmr.msra.gmra.mxu0 %vm63_vm0, %v4377_v41  ;;  %v4475_v41 = vmul.f32 %v6701_v11, %v4369_v5 }
 0x462   : > { %v4592_v22 = vsel %vm3542_vm1, %v3693_v6, %v3845_v1  ;;  %v4472_v57 = vsel %vm3542_vm1, %v3666_v4, %v3818_v14  ;;  %6271 = vmatprep.mubr.msk.f32.mxu0 %vm6853_vm14, %v6852_v9  ;;  %v4701_v6 = vmul.f32 1.442695, %v4696_v15  ;;  %v4695_v4 = vmul.f32 %v10392_v29, %v9721_v60 }
 0x463   : > { %v4604_v55 = vmul.f32 %v10411_v58, %v4592_v22  ;;  %v4484_v51 = vmul.f32 %v10373_v53, %v4472_v57  ;;  %v6703_v22 = vpop.eup %6702  ;;  %v4718_v29 = vrot.slane %v10196_v27, %v11691_v7  ;;  %v5860_v7 = vmul.f32 (%p3545_p0), -1.442695, %v11698_v8 }
 0x464   : > { %v4699_v57 = vmul.f32 1.442695, %v4695_v4  ;;  %6710 = vpow2.f32 %v4701_v6 }
 0x465   : > { %v4608_v21 = vadd.f32 %v4604_v55, %v4596_v0  ;;  %v4488_v18 = vadd.f32 %v4484_v51, %v4476_v17  ;;  %v3689_v48 = vpop.permute.xlu1 %3688  ;;  %v3662_v13 = vpop.permute.xlu0 %3661 }
 0x466   : > { %v6705_v0 = vpop.eup %6704  ;;  %6712 = vpow2.f32 %v4699_v57 }
 0x467   : > { %6257 = vmatpush3.msra.mxu1 %v4488_v18  ;;  %6264 = vmatpush3.msra.mxu0 %v4608_v21  ;;  %v4714_v27 = vmul.f32 %v6703_v22, %v4608_v21  ;;  %v4594_v51 = vmul.f32 %v6705_v0, %v4488_v18  ;;  %v4609_v21 = vrot.slane %v10253_v44, 6  ;;  %v4611_v18 = vrot.slane %v10238_v38, 5 }
 0x468   : > { %6258 = vmatprep.subr.mxu1 %v6852_v9  ;;  %6265 = vmatprep.subr.mxu0 %v6852_v9 }
 0x469   : > { %v3841_v33 = vpop.permute.xlu1 %3840  ;;  %v3814_v63 = vpop.permute.xlu0 %3813 }
 0x46a   : > { %v4591_v35 = vsel %vm3542_vm1, %v3689_v48, %v3841_v33  ;;  %v4471_v20 = vsel %vm3542_vm1, %v3662_v13, %v3814_v63 }
 0x46b   : > { %v4603_v32 = vmul.f32 %v10411_v58, %v4591_v35  ;;  %v4483_v28 = vmul.f32 %v10373_v53, %v4471_v20 }
 0x46c   : > { %v6707_v39 = vpop.eup %6706 }
 0x46d   : > { %v4607_v59 = vadd.f32 %v4603_v32, %v4595_v46  ;;  %v4487_v10 = vadd.f32 %v4483_v28, %v4475_v41  ;;  %v3712_v1 = vpop.permute.xlu1 %3711  ;;  %v3685_v14 = vpop.permute.xlu0 %3684 }
 0x46e   : > { %v6709_v15 = vpop.eup %6708 }
 0x46f   : > { %6259 = vmatpush3.msra.mxu1 %v4487_v10  ;;  %6266 = vmatpush3.msra.mxu0 %v4607_v59  ;;  %v4713_v35 = vmul.f32 %v6707_v39, %v4607_v59  ;;  %v4593_v6 = vmul.f32 %v6709_v15, %v4487_v10 }
 0x470   : > { %6261 = vmatmul.mubr.msk.f32.vlgmr.msra.gmra.mxu1 %vm63_vm0, %v4495_v50  ;;  %6267 = vmatprep.subr.mxu0 %v6852_v9 }
 0x471   : > { %v3864_v53 = vpop.permute.xlu1 %3863  ;;  %v3837_v61 = vpop.permute.xlu0 %3836  ;;  %6274 = vmatprep.subr.mxu1 %v6852_v9  ;;  %6282 = vmatprep.mubr.msk.f32.mxu1 %vm6853_vm14, %v6852_v9 }
 0x472   : > { %v4710_v5 = vsel %vm3542_vm1, %v3712_v1, %v3864_v53  ;;  %v4590_v55 = vsel %vm3542_vm1, %v3685_v14, %v3837_v61  ;;  %v6711_v46 = vpop.eup %6710  ;;  %v4613_v14 = vsel %vm528_vm2, %v4609_v21, %v4611_v18  ;;  %v4727_v53 = vrot.slane %v10253_v44, 7 }
 0x473   : > { %v4722_v17 = vmul.f32 %v4718_v29, %v4710_v5  ;;  %v4602_v52 = vmul.f32 %v10411_v58, %v4590_v55  ;;  %v6713_v22 = vpop.eup %6712  ;;  %v4729_v61 = vrot.slane %v10238_v38, 6 }
 0x475   : > { %v4726_v48 = vadd.f32 %v4722_v17, %v4714_v27  ;;  %v4606_v13 = vadd.f32 %v4602_v52, %v4594_v51  ;;  %v3708_v40 = vpop.permute.xlu1 %3707  ;;  %v3681_v11 = vpop.permute.xlu0 %3680  ;;  %v4731_v51 = vsel %vm528_vm2, %v4727_v53, %v4729_v61 }
 0x477   : > { %6268 = vmatpush3.msra.mxu0 %v4606_v13  ;;  %6275 = vmatpush3.msra.mxu1 %v4726_v48  ;;  %v4712_v57 = vmul.f32 %v6711_v46, %v4606_v13 }
 0x478   : > { %6269 = vmatprep.subr.mxu0 %v6852_v9  ;;  %6276 = vmatprep.subr.mxu1 %v6852_v9 }
 0x479   : > { %v3860_v33 = vpop.permute.xlu1 %3859  ;;  %v3833_v63 = vpop.permute.xlu0 %3832 }
 0x47a   : > { %v4709_v30 = vsel %vm3542_vm1, %v3708_v40, %v3860_v33  ;;  %v4589_v47 = vsel %vm3542_vm1, %v3681_v11, %v3833_v63 }
 0x47b   : > { %v4721_v20 = vmul.f32 %v4718_v29, %v4709_v30  ;;  %v4601_v4 = vmul.f32 %v10411_v58, %v4589_v47 }
 0x47d   : > { %v4725_v32 = vadd.f32 %v4721_v20, %v4713_v35  ;;  %v4605_v41 = vadd.f32 %v4601_v4, %v4593_v6  ;;  %v3856_v28 = vpop.permute.xlu1 %3855  ;;  %v3704_v1 = vpop.permute.xlu0 %3703 }
 0x47e   : > { %v4708_v50 = vsel %vm3542_vm1, %v3704_v1, %v3856_v28 }
 0x47f   : > { %v4720_v0 = vmul.f32 %v4718_v29, %v4708_v50  ;;  %6270 = vmatpush3.msra.mxu0 %v4605_v41  ;;  %6277 = vmatpush3.msra.mxu1 %v4725_v32  ;;  %v4711_v55 = vmul.f32 %v6713_v22, %v4605_v41 }
 0x480   : > { %6272 = vmatmul.mubr.msk.f32.vlgmr.msra.gmra.mxu0 %vm63_vm0, %v4613_v14  ;;  %6278 = vmatprep.subr.mxu1 %v6852_v9 }
 0x481   : > { %v4724_v58 = vadd.f32 %v4720_v0, %v4712_v57  ;;  %v3852_v59 = vpop.permute.xlu1 %3851  ;;  %v3700_v10 = vpop.permute.xlu0 %3699  ;;  %6285 = vmatprep.subr.mxu0 (%p3545_p0), %v5378_v12 }
 0x482   : > { %v4707_v5 = vsel %vm3542_vm1, %v3700_v10, %v3852_v59  ;;  %6286 = vmatpush3.msra.mxu0 (%p3545_p0), %v5378_v12 }
 0x483   : > { %v4719_v27 = vmul.f32 %v4718_v29, %v4707_v5  ;;  %6279 = vmatpush3.msra.mxu1 %v4724_v58  ;;  %6287 = vmatprep.subr.mxu0 (%p3545_p0), %v5377_v37 }
 0x484   : > { %6280 = vmatprep.subr.mxu1 %v6852_v9  ;;  %6288 = vmatpush3.msra.mxu0 (%p3545_p0), %v5377_v37 }
 0x485   : > { %v4723_v17 = vadd.f32 %v4719_v27, %v4711_v55 }
 0x487   : > { %6281 = vmatpush3.msra.mxu1 %v4723_v17 }
 0x488   : > { %6283 = vmatmul.mubr.msk.f32.vlgmr.msra.gmra.mxu1 %vm63_vm0, %v4731_v51  ;;  %6365 = vmatprep.subr.mxu1 (%p3545_p0), %v5378_v12 }
 0x489   :  { %6373 = vmatpush3.msra.mxu1 (%p3545_p0), %v5378_v12 }
 0x48a   :  { %6366 = vmatprep.subr.mxu1 (%p3545_p0), %v5377_v37 }
 0x48b   :  { %6374 = vmatpush3.msra.mxu1 (%p3545_p0), %v5377_v37 }
 0x4e1   : > { %v3976_v52 = vpop.f32.mrf.mxu0 }
 0x4e2   : > { %v3981_v48 = vrot.slane %v3976_v52, 1 }
 0x4e3   : > { %v6207_v39 = vpop.f32.mrf.mxu0 }
 0x4e4   : > { %v3983_v40 = vsel %vm3542_vm1, %v3976_v52, %v3981_v48 }
 0x4f1   : > { %v4093_v44 = vpop.f32.mrf.mxu1 }
 0x4f2   : > { %v4098_v13 = vrot.slane %v4093_v44, 1 }
 0x4f3   : > { %v6218_v38 = vpop.f32.mrf.mxu1 }
 0x4f4   : > { %v4100_v29 = vsel %vm3542_vm1, %v4093_v44, %v4098_v13 }
 0x4f5   : > { %v4810_v11 = vrot.slane %v4100_v29, 7  ;;  %v11693_v29 = vld [vmem:[#allocation18_spill] sm:$0xff] (%p3545_p0) }
 0x4f7   : > { %v4830_v9 = vsel %vm528_vm2, %v3983_v40, %v4810_v11  ;;  %v5857_v11 = vmul.f32 (%p3545_p0), -1.442695, %v11693_v29 }
 0x4f9   :  { %6714 = vpow2.f32 (%p3545_p0), %v5857_v11  ;;  %v11707_v11 = vld [vmem:[#allocation105_spill] sm:$0xff] (%p3545_p0) }
 0x501   : > { %v4211_v15 = vpop.f32.mrf.mxu0 }
 0x502   : > { %v4216_v33 = vrot.slane %v4211_v15, 1 }
 0x503   : > { %v6229_v63 = vpop.f32.mrf.mxu0 }
 0x504   : > { %v4218_v21 = vsel %vm3542_vm1, %v4211_v15, %v4216_v33 }
 0x505   : > { %v4813_v18 = vrot.slane %v4218_v21, 6  ;;  %v11695_v21 = vld [vmem:[#allocation70_spill] sm:$0xff] (%p3545_p0) }
 0x506   :  { %v5873_v60 = vmul.f32 (%p3545_p0), -1.442695, %v11695_v21 }
 0x507   : > { %v4831_v30 = vsel %vm728_vm3, %v4830_v9, %v4813_v18  ;;  %v11694_v9 = vld [vmem:[#allocation17_spill] sm:$0xff] (%p3545_p0)  ;;  %v5875_v18 = vmul.f32 (%p3545_p0), -1.442695, %v11699_v25 }
 0x508   :  { %v5858_v15 = vmul.f32 (%p3545_p0), -1.442695, %v11694_v9 }
 0x50a   :  { %6716 = vpow2.f32 (%p3545_p0), %v5858_v15  ;;  %v5879_v15 = vmul.f32 (%p3545_p0), -1.442695, %v11707_v11 }
 0x50b   :  { %6718 = vpow2.f32 (%p3545_p0), %v5873_v60 }
 0x50c   :  { %6720 = vpow2.f32 (%p3545_p0), %v5859_v16 }
 0x50d   :  { %6722 = vpow2.f32 (%p3545_p0), %v5874_v3  ;;  %v5371_v3 = vld [vmem:[%s10932_s6] sm:$0xff] (%p3545_p0) }
 0x50e   :  { %6724 = vpow2.f32 (%p3545_p0), %v5860_v7 }
 0x50f   :  { %6726 = vpow2.f32 (%p3545_p0), %v5875_v18 }
 0x511   : > { %v4329_v47 = vpop.f32.mrf.mxu1 }
 0x512   : > { %v4334_v32 = vrot.slane %v4329_v47, 1 }
 0x513   : > { %v6240_v35 = vpop.f32.mrf.mxu1 }
 0x514   : > { %v4336_v28 = vsel %vm3542_vm1, %v4329_v47, %v4334_v32  ;;  %v11701_v35 = vld [vmem:[#allocation76_spill] sm:$0xff] (%p3545_p0)  ;;  %v5375_v32 = vld [vmem:[%s10932_s6 + $0x20] sm:$0xff] (%p3545_p0) }
 0x515   : > { %v4816_v50 = vrot.slane %v4336_v28, 5  ;;  %v11703_v28 = vld [vmem:[#allocation90_spill] sm:$0xff] (%p3545_p0) }
 0x517   : > { %v4832_v10 = vsel %vm928_vm4, %v4831_v30, %v4816_v50  ;;  %v11700_v30 = vld [vmem:[#allocation22_spill] sm:$0xff] (%p3545_p0) }
 0x518   :  { %v5861_v47 = vmul.f32 (%p3545_p0), -1.442695, %v11700_v30  ;;  %v11704_v50 = vld [vmem:[#allocation86_spill] sm:$0xff] (%p3545_p0) }
 0x51a   :  { %6728 = vpow2.f32 (%p3545_p0), %v5861_v47 }
 0x521   : > { %v4447_v20 = vpop.f32.mrf.mxu0 }
 0x522   : > { %v4452_v41 = vrot.slane %v4447_v20, 1 }
 0x523   : > { %v6251_v6 = vpop.f32.mrf.mxu0 }
 0x524   : > { %v4454_v22 = vsel %vm3542_vm1, %v4447_v20, %v4452_v41  ;;  %v5876_v20 = vmul.f32 (%p3545_p0), -1.442695, %v11701_v35  ;;  %v5376_v6 = vld [vmem:[%s10932_s6 + $0x28] sm:$0xff] (%p3545_p0) }
 0x525   : > { %v4819_v58 = vrot.slane %v4454_v22, 4  ;;  %6289 = vmatprep.subr.mxu0 (%p3545_p0), %v5376_v6  ;;  %6367 = vmatprep.subr.mxu1 (%p3545_p0), %v5376_v6  ;;  %v5878_v22 = vmul.f32 (%p3545_p0), -1.442695, %v11704_v50 }
 0x526   :  { %6290 = vmatpush3.msra.mxu0 (%p3545_p0), %v5376_v6  ;;  %6730 = vpow2.f32 (%p3545_p0), %v5876_v20  ;;  %6375 = vmatpush3.msra.mxu1 (%p3545_p0), %v5376_v6  ;;  %v11708_v20 = vld [vmem:[#allocation98_spill] sm:$0xff] (%p3545_p0) }
 0x527   : > { %v4833_v55 = vsel %vm1128_vm5, %v4832_v10, %v4819_v58  ;;  %6291 = vmatprep.subr.mxu0 (%p3545_p0), %v5375_v32  ;;  %6368 = vmatprep.subr.mxu1 (%p3545_p0), %v5375_v32  ;;  %v6715_v10 = vpop.eup (%p3545_p0), %6714  ;;  %v5880_v6 = vmul.f32 (%p3545_p0), -1.442695, %v11708_v20 }
 0x528   :  { %6292 = vmatpush3.msra.mxu0 (%p3545_p0), %v5375_v32  ;;  %6376 = vmatpush3.msra.mxu1 (%p3545_p0), %v5375_v32 }
 0x530   : > { %v4565_v4 = vpop.f32.mrf.mxu1 }
 0x531   : > { %v4570_v14 = vrot.slane %v4565_v4, 1 }
 0x532   : > { %v6262_v46 = vpop.f32.mrf.mxu1 }
 0x533   : > { %v4572_v59 = vsel %vm3542_vm1, %v4565_v4, %v4570_v14  ;;  %v11702_v4 = vld [vmem:[#allocation21_spill] sm:$0xff] (%p3545_p0)  ;;  %v5374_v14 = vld [vmem:[%s10932_s6 + $0x18] sm:$0xff] (%p3545_p0) }
 0x534   : > { %v4822_v61 = vrot.slane %v4572_v59, 3  ;;  %v5862_v46 = vmul.f32 (%p3545_p0), -1.442695, %v11702_v4  ;;  %6293 = vmatprep.subr.mxu0 (%p3545_p0), %v5374_v14  ;;  %v5372_v59 = vld [vmem:[%s10932_s6 + $0x8] sm:$0xff] (%p3545_p0)  ;;  %6369 = vmatprep.subr.mxu1 (%p3545_p0), %v5374_v14 }
 0x535   :  { %6294 = vmatpush3.msra.mxu0 (%p3545_p0), %v5374_v14  ;;  %6377 = vmatpush3.msra.mxu1 (%p3545_p0), %v5374_v14 }
 0x536   : > { %v4834_v39 = vsel %vm1328_vm6, %v4833_v55, %v4822_v61  ;;  %6732 = vpow2.f32 (%p3545_p0), %v5862_v46  ;;  %v6717_v55 = vpop.eup (%p3545_p0), %6716 }
 0x540   : > { %v4683_v1 = vpop.f32.mrf.mxu0 }
 0x541   : > { %v4688_v57 = vrot.slane %v4683_v1, 1 }
 0x542   : > { %v6273_v0 = vpop.f32.mrf.mxu0 }
 0x543   : > { %v4690_v53 = vsel %vm3542_vm1, %v4683_v1, %v4688_v57  ;;  %v5877_v1 = vmul.f32 (%p3545_p0), -1.442695, %v11703_v28  ;;  %v5373_v57 = vld [vmem:[%s10932_s6 + $0x10] sm:$0xff] (%p3545_p0)  ;;  %v11705_v0 = vld [vmem:[#allocation24_spill] sm:$0xff] (%p3545_p0) }
 0x544   : > { %v4825_v27 = vrot.slane %v4690_v53, 2  ;;  %v5863_v58 = vmul.f32 (%p3545_p0), -1.442695, %v11705_v0  ;;  %v11706_v53 = vld [vmem:[#allocation23_spill] sm:$0xff] (%p3545_p0)  ;;  %6295 = vmatprep.subr.mxu0 (%p3545_p0), %v5373_v57  ;;  %6370 = vmatprep.subr.mxu1 (%p3545_p0), %v5373_v57 }
 0x545   :  { %6734 = vpow2.f32 (%p3545_p0), %v5877_v1  ;;  %v5864_v61 = vmul.f32 (%p3545_p0), -1.442695, %v11706_v53  ;;  %6296 = vmatpush3.msra.mxu0 (%p3545_p0), %v5373_v57  ;;  %6378 = vmatpush3.msra.mxu1 (%p3545_p0), %v5373_v57 }
 0x546   : > { %v4835_v44 = vsel %vm1528_vm7, %v4834_v39, %v4825_v27  ;;  %6736 = vpow2.f32 (%p3545_p0), %v5878_v22  ;;  %6297 = vmatprep.subr.mxu0 (%p3545_p0), %v5372_v59  ;;  %v6719_v27 = vpop.eup (%p3545_p0), %6718  ;;  %6371 = vmatprep.subr.mxu1 (%p3545_p0), %v5372_v59 }
 0x547   :  { %6738 = vpow2.f32 (%p3545_p0), %v5863_v58  ;;  %6298 = vmatpush3.msra.mxu0 (%p3545_p0), %v5372_v59  ;;  %6379 = vmatpush3.msra.mxu1 (%p3545_p0), %v5372_v59  ;;  %v11709_v58 = vld [vmem:[#allocation31_spill] sm:$0xff] (%p3545_p0) }
 0x548   : > { %v4801_v5 = vpop.f32.mrf.mxu1  ;;  %6299 = vmatprep.subr.mxu0 (%p3545_p0), %v5371_v3  ;;  %6372 = vmatprep.subr.mxu1 (%p3545_p0), %v5371_v3  ;;  %v5865_v59 = vmul.f32 (%p3545_p0), -1.442695, %v11709_v58 }
 0x549   : > { %v4806_v17 = vrot.slane %v4801_v5, 1  ;;  %6300 = vmatpush3.msra.mxu0 (%p3545_p0), %v5371_v3  ;;  %6380 = vmatpush3.msra.mxu1 (%p3545_p0), %v5371_v3  ;;  %v11712_v3 = vld [vmem:[#allocation114_spill] sm:$0xff] (%p3545_p0) }
 0x54a   : > { %v6284_v51 = vpop.f32.mrf.mxu1 }
 0x54b   : > { %v4808_v52 = vsel %vm3542_vm1, %v4801_v5, %v4806_v17  ;;  %3547 = sbr.rel (!%p3545_p0) target bundleno = 910 (0x38e), region = 60  ;;  %v5083_v5 = vadd.f32 (%p3545_p0), 1.0, %v6715_v10  ;;  %v5084_v17 = vadd.f32 (%p3545_p0), 1.0, %v6717_v55  ;;  %v6721_v51 = vpop.eup (%p3545_p0), %6720  ;;  %v11710_v55 = vld [vmem:[#allocation26_spill] sm:$0xff] (%p3545_p0) }
 0x54c   : > { %v4828_v48 = vrot.slane %v4808_v52, 1  ;;  %v5099_v52 = vadd.f32 (%p3545_p0), 1.0, %v6719_v27  ;;  %v6723_v39 = vpop.eup (%p3545_p0), %6722  ;;  %v5866_v27 = vmul.f32 (%p3545_p0), -1.442695, %v11710_v55 }
 0x54d   :  { %6740 = vrcp.f32 (%p3545_p0), %v5083_v5 }
 0x54e   : > { %v4836_v13 = vsel %vm1728_vm8, %v4835_v44, %v4828_v48  ;;  %6742 = vpow2.f32 (%p3545_p0), %v5864_v61  ;;  %v5085_v48 = vadd.f32 (%p3545_p0), 1.0, %v6721_v51  ;;  %v6725_v44 = vpop.eup (%p3545_p0), %6724 }
 0x54f   : > { %4838 = vst [vmem:[%s4837_s10] sm:$0xff] %v4836_v13  ;;  %6744 = vrcp.f32 (%p3545_p0), %v5084_v17  ;;  %v5100_v13 = vadd.f32 (%p3545_p0), 1.0, %v6723_v39  ;;  %v6727_v60 = vpop.eup (%p3545_p0), %6726  ;;  %v5086_v16 = vadd.f32 (%p3545_p0), 1.0, %v6725_v44 }
 0x550   :  { %6746 = vrcp.f32 %v5099_v52  ;;  %v6729_v12 = vpop.eup %6728  ;;  %v5101_v37 = vadd.f32 1.0, %v6727_v60 }
 0x551   :  { %6748 = vrcp.f32 %v5085_v48  ;;  %v6731_v7 = vpop.eup %6730  ;;  %v5087_v18 = vadd.f32 1.0, %v6729_v12  ;;  %v11711_v48 = vld [vmem:[#allocation121_spill] sm:$0xff] }
 0x552   :  { %6750 = vrcp.f32 %v5100_v13  ;;  %v6733_v47 = vpop.eup %6732  ;;  %v5102_v32 = vadd.f32 1.0, %v6731_v7  ;;  %v5881_v44 = vmul.f32 -1.442695, %v11711_v48  ;;  %v5882_v7 = vmul.f32 -1.442695, %v11712_v3 }
 0x553   :  { %6752 = vrcp.f32 %v5086_v16  ;;  %v6735_v46 = vpop.eup %6734  ;;  %v5088_v1 = vadd.f32 1.0, %v6733_v47 }
 0x554   :  { %6754 = vpow2.f32 %v5879_v15  ;;  %v6737_v14 = vpop.eup %6736  ;;  %v5103_v22 = vadd.f32 1.0, %v6735_v46 }
 0x555   :  { %6756 = vrcp.f32 %v5101_v37  ;;  %v6739_v57 = vpop.eup %6738  ;;  %v5104_v51 = vadd.f32 1.0, %v6737_v14 }
 0x556   :  { %v10503_v38 = vld [vmem:[#allocation6] sm:$0xff]  ;;  %v10505_v40 = vld [vmem:[#allocation6 + $0x48] sm:$0xff]  ;;  %v10515_v63 = vld [vmem:[#allocation6 + $0x50] sm:$0xff]  ;;  %6758 = vrcp.f32 %v5087_v18  ;;  %v5089_v16 = vadd.f32 1.0, %v6739_v57 }
 0x557   :  { %4871 = vrot.lane.b32.xlu0 %v10503_v38, %s6850_s17  ;;  %4889 = vrot.lane.b32.xlu1 %v10505_v40, %s6850_s17  ;;  %v10513_v33 = vld [vmem:[#allocation6 + $0x40] sm:$0xff]  ;;  %v10520_v56 = vld [vmem:[#allocation6 + $0x8] sm:$0xff]  ;;  %v10545_v41 = vld [vmem:[#allocation6 + $0x10] sm:$0xff]  ;;  %6760 = vpow2.f32 %v5880_v6 }
 0x558   :  { %6762 = vrcp.f32 %v5102_v32  ;;  %v11714_v57 = vld [vmem:[#allocation36_spill] sm:$0xff] }
 0x559   :  { %6764 = vrcp.f32 %v5088_v1 }
 0x55a   :  { %v6741_v10 = vpop.eup %6740  ;;  %6766 = vrcp.f32 %v5103_v22 }
 0x55b   :  { %4887 = vrot.lane.b32.xlu0 %v10513_v33, %s6850_s17  ;;  %4891 = vrot.lane.b32.xlu1 %v10515_v63, %s6850_s17  ;;  %v6743_v61 = vpop.eup %6742  ;;  %v5179_v5 = vmul.f32 %v6741_v10, %v11693_v29  ;;  %6768 = vpow2.f32 %v5865_v59 }
 0x55c   :  { %v6745_v17 = vpop.eup %6744  ;;  %6770 = vpow2.f32 %v5866_v27  ;;  %v5090_v47 = vadd.f32 1.0, %v6743_v61 }
 0x55d   :  { %v6747_v52 = vpop.eup %6746  ;;  %v5180_v39 = vmul.f32 %v6745_v17, %v11694_v9  ;;  %6772 = vrcp.f32 %v5104_v51 }
 0x55e   :  { %v6749_v13 = vpop.eup %6748  ;;  %v5195_v15 = vmul.f32 %v6747_v52, %v11695_v21  ;;  %6774 = vpow2.f32 %v5881_v44 }
 0x55f   :  { %4873 = vrot.lane.b32.xlu0 %v10520_v56, %s6850_s17  ;;  %5243 = vrot.lane.b32.xlu1 %v5179_v5, %s6850_s17  ;;  %v6751_v60 = vpop.eup %6750  ;;  %v5181_v29 = vmul.f32 %v6749_v13, %v11696_v23  ;;  %6776 = vrcp.f32 %v5089_v16  ;;  %v11713_v23 = vld [vmem:[#allocation40_spill] sm:$0xff]  ;;  %v11716_v13 = vld [vmem:[#allocation130_spill] sm:$0xff] }
 0x560   :  { %v6753_v12 = vpop.eup %6752  ;;  %v5196_v9 = vmul.f32 %v6751_v60, %v11697_v34  ;;  %v5867_v6 = vmul.f32 -1.442695, %v11713_v23  ;;  %6778 = vpow2.f32 %v5882_v7  ;;  %v11717_v60 = vld [vmem:[#allocation50_spill] sm:$0xff] }
 0x561   :  { %v6755_v37 = vpop.eup %6754  ;;  %v5182_v21 = vmul.f32 %v6753_v12, %v11698_v8  ;;  %6780 = vrcp.f32 %v5090_v47  ;;  %v5868_v8 = vmul.f32 -1.442695, %v11714_v57  ;;  %v10597_v12 = vld [vmem:[#allocation6 + $0x18] sm:$0xff] }
 0x562   :  { %v6757_v18 = vpop.eup %6756  ;;  %v5105_v14 = vadd.f32 1.0, %v6755_v37  ;;  %6782 = vpow2.f32 %v5867_v6  ;;  %v11718_v47 = vld [vmem:[#allocation46_spill] sm:$0xff] }
 0x563   :  { %4875 = vrot.lane.b32.xlu0 %v10545_v41, %s6850_s17  ;;  %5275 = vrot.lane.b32.xlu1 %v5195_v15, %s6850_s17  ;;  %v6759_v46 = vpop.eup %6758  ;;  %v5197_v1 = vmul.f32 %v6757_v18, %v11699_v25  ;;  %v11715_v25 = vld [vmem:[#allocation140_spill] sm:$0xff] }
 0x564   :  { %v6761_v32 = vpop.eup %6760  ;;  %v5183_v22 = vmul.f32 %v6759_v46, %v11700_v30  ;;  %6784 = vrcp.f32 %v5105_v14  ;;  %v5883_v27 = vmul.f32 -1.442695, %v11715_v25  ;;  %v11719_v46 = vld [vmem:[#allocation156_spill] sm:$0xff]  ;;  %v10607_v14 = vld [vmem:[#allocation6 + $0x58] sm:$0xff] }
 0x565   :  { %v6763_v34 = vpop.eup %6762  ;;  %v5106_v10 = vadd.f32 1.0, %v6761_v32  ;;  %6786 = vpow2.f32 %v5868_v8  ;;  %v5885_v32 = vmul.f32 -1.442695, %v11719_v46 }
 0x566   :  { %v6765_v59 = vpop.eup %6764  ;;  %v5198_v5 = vmul.f32 %v6763_v34, %v11701_v35  ;;  %v5884_v35 = vmul.f32 -1.442695, %v11716_v13 }
 0x567   :  { %5245 = vrot.lane.b32.xlu0 %v5180_v39, %s6850_s17  ;;  %5277 = vrot.lane.b32.xlu1 %v5196_v9, %s6850_s17  ;;  %v6767_v61 = vpop.eup %6766  ;;  %v5184_v51 = vmul.f32 %v6765_v59, %v11702_v4  ;;  %6788 = vrcp.f32 %v5106_v10  ;;  %v11720_v10 = vld [vmem:[#allocation150_spill] sm:$0xff] }
 0x568   :  { %v6769_v17 = vpop.eup %6768  ;;  %v5199_v44 = vmul.f32 %v6767_v61, %v11703_v28  ;;  %6790 = vpow2.f32 %v5883_v27  ;;  %v5886_v61 = vmul.f32 -1.442695, %v11720_v10  ;;  %v11721_v27 = vld [vmem:[#allocation61_spill] sm:$0xff] }
 0x569   :  { %v5091_v52 = vadd.f32 1.0, %v6769_v17  ;;  %v6771_v30 = vpop.eup %6770  ;;  %v5871_v17 = vmul.f32 -1.442695, %v11721_v27 }
 0x56a   :  { %v6773_v39 = vpop.eup %6772  ;;  %v5092_v16 = vadd.f32 1.0, %v6771_v30 }
 0x56b   :  { %5247 = vrot.lane.b32.xlu0 %v5181_v29, %s6850_s17  ;;  %5279 = vrot.lane.b32.xlu1 %v5197_v1, %s6850_s17  ;;  %v6775_v15 = vpop.eup %6774  ;;  %v5869_v29 = vmul.f32 -1.442695, %v11717_v60  ;;  %6792 = vrcp.f32 %v5091_v52  ;;  %v5200_v37 = vmul.f32 %v6773_v39, %v11704_v50  ;;  %v10617_v52 = vld [vmem:[#allocation6 + $0x20] sm:$0xff] }
 0x56c   :  { %v6777_v4 = vpop.eup %6776  ;;  %v5107_v9 = vadd.f32 1.0, %v6775_v15  ;;  %6794 = vpow2.f32 %v5884_v35  ;;  %v11722_v15 = vld [vmem:[#allocation56_spill] sm:$0xff] }
 0x56d   :  { %v6779_v28 = vpop.eup %6778  ;;  %6796 = vpow2.f32 %v5869_v29  ;;  %v5185_v18 = vmul.f32 %v6777_v4, %v11705_v0  ;;  %v5872_v29 = vmul.f32 -1.442695, %v11722_v15  ;;  %v11723_v4 = vld [vmem:[#allocation164_spill] sm:$0xff] }
 0x56e   :  { %v6781_v7 = vpop.eup %6780  ;;  %6798 = vrcp.f32 %v5092_v16  ;;  %v5108_v50 = vadd.f32 1.0, %v6779_v28  ;;  %v10627_v28 = vld [vmem:[#allocation6 + $0x60] sm:$0xff] }
 0x56f   :  { %5249 = vrot.lane.b32.xlu0 %v5182_v21, %s6850_s17  ;;  %5281 = vrot.lane.b32.xlu1 %v5198_v5, %s6850_s17  ;;  %v5870_v21 = vmul.f32 -1.442695, %v11718_v47  ;;  %v6783_v6 = vpop.eup %6782  ;;  %6800 = vrcp.f32 %v5107_v9  ;;  %v5186_v34 = vmul.f32 %v6781_v7, %v11706_v53 }
 0x571   :  { %v6785_v1 = vpop.eup %6784  ;;  %6802 = vpow2.f32 %v5870_v21 }
 0x572   :  { %v6787_v0 = vpop.eup %6786  ;;  %6804 = vpow2.f32 %v5885_v32  ;;  %v5201_v59 = vmul.f32 %v6785_v1, %v11707_v11  ;;  %v11724_v32 = vld [vmem:[#allocation157_spill] sm:$0xff] }
 0x573   :  { %5251 = vrot.lane.b32.xlu0 %v5183_v22, %s6850_s17  ;;  %5283 = vrot.lane.b32.xlu1 %v5199_v44, %s6850_s17  ;;  %v5093_v22 = vadd.f32 1.0, %v6783_v6  ;;  %6806 = vrcp.f32 %v5108_v50  ;;  %v5094_v53 = vadd.f32 1.0, %v6787_v0  ;;  %v5888_v50 = vmul.f32 -1.442695, %v11724_v32 }
 0x574   :  { %v6789_v8 = vpop.eup %6788 }
 0x575   :  { %v6791_v5 = vpop.eup %6790  ;;  %6808 = vrcp.f32 %v5093_v22  ;;  %v5202_v30 = vmul.f32 %v6789_v8, %v11708_v20 }
 0x576   :  { %v5109_v39 = vadd.f32 1.0, %v6791_v5  ;;  %6810 = vpow2.f32 %v5886_v61 }
 0x577   :  { %5253 = vrot.lane.b32.xlu0 %v5184_v51, %s6850_s17  ;;  %5285 = vrot.lane.b32.xlu1 %v5200_v37, %s6850_s17  ;;  %6812 = vpow2.f32 %v5871_v17  ;;  %v5887_v37 = vmul.f32 -1.442695, %v11723_v4 }
 0x578   :  { %v6793_v51 = vpop.eup %6792  ;;  %6814 = vrcp.f32 %v5094_v53 }
 0x579   :  { %v6795_v11 = vpop.eup %6794  ;;  %v5187_v35 = vmul.f32 %v6793_v51, %v11709_v58  ;;  %6816 = vrcp.f32 %v5109_v39  ;;  %v10644_v51 = vld [vmem:[#allocation6 + $0x68] sm:$0xff] }
 0x57a   :  { %v6797_v44 = vpop.eup %6796  ;;  %v5110_v20 = vadd.f32 1.0, %v6795_v11  ;;  %6818 = vpow2.f32 %v5872_v29 }
 0x57b   :  { %4877 = vrot.lane.b32.xlu0 %v10597_v12, %s6850_s17  ;;  %4893 = vrot.lane.b32.xlu1 %v10607_v14, %s6850_s17  ;;  %v6799_v16 = vpop.eup %6798  ;;  %6820 = vpow2.f32 %v5887_v37 }
 0x57c   :  { %v6801_v9 = vpop.eup %6800  ;;  %v5188_v7 = vmul.f32 %v6799_v16, %v11710_v55  ;;  %6822 = vrcp.f32 %v5110_v20  ;;  %v10636_v55 = vld [vmem:[#allocation6 + $0x28] sm:$0xff]  ;;  %v10652_v16 = vld [vmem:[#allocation6 + $0x30] sm:$0xff] }
 0x57d   :  { %v5203_v6 = vmul.f32 %v6801_v9, %v11711_v48 }
 0x57e   :  { %v6803_v58 = vpop.eup %6802 }
 0x57f   :  { %5255 = vrot.lane.b32.xlu0 %v5185_v18, %s6850_s17  ;;  %5287 = vrot.lane.b32.xlu1 %v5201_v59, %s6850_s17  ;;  %v5095_v18 = vadd.f32 1.0, %v6797_v44  ;;  %v6805_v21 = vpop.eup %6804 }
 0x580   :  { %v6807_v1 = vpop.eup %6806  ;;  %v5111_v8 = vadd.f32 1.0, %v6805_v21 }
 0x581   :  { %6824 = vrcp.f32 %v5095_v18  ;;  %v5204_v0 = vmul.f32 %v6807_v1, %v11712_v3 }
 0x582   :  { %v6809_v22 = vpop.eup %6808  ;;  %6826 = vpow2.f32 %v5888_v50  ;;  %v10668_v50 = vld [vmem:[#allocation6 + $0x38] sm:$0xff] }
 0x583   :  { %5257 = vrot.lane.b32.xlu0 %v5186_v34, %s6850_s17  ;;  %5289 = vrot.lane.b32.xlu1 %v5202_v30, %s6850_s17  ;;  %v5096_v34 = vadd.f32 1.0, %v6803_v58  ;;  %v6811_v59 = vpop.eup %6810  ;;  %v5189_v48 = vmul.f32 %v6809_v22, %v11713_v23  ;;  %v10660_v58 = vld [vmem:[#allocation6 + $0x70] sm:$0xff]  ;;  %v10676_v22 = vld [vmem:[#allocation6 + $0x78] sm:$0xff] }
 0x584   :  { %v6813_v61 = vpop.eup %6812  ;;  %v5112_v17 = vadd.f32 1.0, %v6811_v59 }
 0x585   :  { %6828 = vrcp.f32 %v5096_v34  ;;  %v6815_v5 = vpop.eup %6814  ;;  %v5097_v30 = vadd.f32 1.0, %v6813_v61 }
 0x586   :  { %6830 = vrcp.f32 %v5111_v8  ;;  %v6817_v53 = vpop.eup %6816  ;;  %v5190_v3 = vmul.f32 %v6815_v5, %v11714_v57 }
 0x587   :  { %4879 = vrot.lane.b32.xlu0 %v10617_v52, %s6850_s17  ;;  %4895 = vrot.lane.b32.xlu1 %v10627_v28, %s6850_s17  ;;  %v6819_v39 = vpop.eup %6818  ;;  %v5205_v23 = vmul.f32 %v6817_v53, %v11715_v25  ;;  %6832 = vrcp.f32 %v5112_v17  ;;  %v11725_v17 = vld [vmem:[#allocation12_spill] sm:$0xff] }
 0x588   :  { %v6821_v11 = vpop.eup %6820  ;;  %6834 = vrcp.f32 %v5097_v30 }
 0x589   :  { %v6823_v44 = vpop.eup %6822  ;;  %v5113_v37 = vadd.f32 1.0, %v6821_v11  ;;  %v11727_v11 = vld [vmem:[#allocation45_spill] sm:$0xff] }
 0x58a   :  { %v5206_v57 = vmul.f32 %v6823_v44, %v11716_v13 }
 0x58b   :  { %5259 = vrot.lane.b32.xlu0 %v5187_v35, %s6850_s17  ;;  %5291 = vrot.lane.b32.xlu1 %v5203_v6, %s6850_s17  ;;  %v5098_v35 = vadd.f32 1.0, %v6819_v39 }
 0x58d   :  { %6836 = vrcp.f32 %v5098_v35  ;;  %v11729_v35 = vld [vmem:[#allocation37_spill] sm:$0xff] }
 0x58e   :  { %v6825_v29 = vpop.eup %6824  ;;  %6838 = vrcp.f32 %v5113_v37 }
 0x58f   :  { %5261 = vrot.lane.b32.xlu0 %v5188_v7, %s6850_s17  ;;  %5293 = vrot.lane.b32.xlu1 %v5204_v0, %s6850_s17  ;;  %v6827_v20 = vpop.eup %6826  ;;  %v5191_v25 = vmul.f32 %v6825_v29, %v11717_v60 }
 0x590   :  { %v5114_v7 = vadd.f32 1.0, %v6827_v20 }
 0x592   :  { %v6829_v9 = vpop.eup %6828  ;;  %6840 = vrcp.f32 %v5114_v7 }
 0x593   :  { %4881 = vrot.lane.b32.xlu0 %v10636_v55, %s6850_s17  ;;  %4897 = vrot.lane.b32.xlu1 %v10644_v51, %s6850_s17  ;;  %v6831_v18 = vpop.eup %6830  ;;  %v5192_v13 = vmul.f32 %v6829_v9, %v11718_v47 }
 0x594   :  { %v5207_v21 = vmul.f32 %v6831_v18, %v11719_v46  ;;  %v6833_v60 = vpop.eup %6832 }
 0x595   :  { %v6835_v6 = vpop.eup %6834  ;;  %v5208_v1 = vmul.f32 %v6833_v60, %v11720_v10  ;;  %v11731_v60 = vld [vmem:[#allocation33_spill] sm:$0xff] }
 0x596   :  { %v5193_v47 = vmul.f32 %v6835_v6, %v11721_v27 }
 0x597   :  { %5263 = vrot.lane.b32.xlu0 %v5189_v48, %s6850_s17  ;;  %5295 = vrot.lane.b32.xlu1 %v5205_v23, %s6850_s17  ;;  %v11728_v23 = vld [vmem:[#allocation32_spill] sm:$0xff] }
 0x59a   :  { %v6837_v34 = vpop.eup %6836 }
 0x59b   :  { %5265 = vrot.lane.b32.xlu0 %v5190_v3, %s6850_s17  ;;  %5297 = vrot.lane.b32.xlu1 %v5206_v57, %s6850_s17  ;;  %v6839_v46 = vpop.eup %6838  ;;  %v5194_v0 = vmul.f32 %v6837_v34, %v11722_v15  ;;  %v11726_v15 = vld [vmem:[#allocation15_spill] sm:$0xff] }
 0x59c   :  { %v5209_v10 = vmul.f32 %v6839_v46, %v11723_v4  ;;  %v10689_v53 = vrot.slane %v11726_v15, %v11725_v17 }
 0x59e   :  { %v4923_v4 = vmul.f32 %v10689_v53, %v8219_v19  ;;  %v4924_v44 = vmul.f32 %v10689_v53, %v11728_v23  ;;  %v4925_v29 = vmul.f32 %v10689_v53, %v11729_v35  ;;  %v4926_v6 = vmul.f32 %v10689_v53, %v11731_v60 }
 0x59f   :  { %4883 = vrot.lane.b32.xlu0 %v10652_v16, %s6850_s17  ;;  %4899 = vrot.lane.b32.xlu1 %v10660_v58, %s6850_s17  ;;  %v6841_v8 = vpop.eup %6840  ;;  %v4942_v17 = vmul.f32 %v10689_v53, %v8909_v24 }
 0x5a0   :  { %v5210_v27 = vmul.f32 %v6841_v8, %v11724_v32  ;;  %v4955_v39 = vadd.f32 %v4923_v4, %v10503_v38  ;;  %v4939_v32 = vmul.f32 %v10689_v53, %v11727_v11  ;;  %v4957_v19 = vadd.f32 %v4925_v29, %v10520_v56  ;;  %v11733_v4 = vld [vmem:[#allocation49_spill] sm:$0xff]  ;;  %v11734_v11 = vld [vmem:[#allocation35_spill] sm:$0xff] }
 0x5a1   :  { %v4940_v38 = vmul.f32 %v10689_v53, %v8842_v42 }
 0x5a2   :  { %v4971_v37 = vadd.f32 %v4939_v32, %v10513_v33 }
 0x5a3   :  { %5267 = vrot.lane.b32.xlu0 %v5191_v25, %s6850_s17  ;;  %5299 = vrot.lane.b32.xlu1 %v5207_v21, %s6850_s17 }
 0x5a7   :  { %5269 = vrot.lane.b32.xlu0 %v5192_v13, %s6850_s17  ;;  %5301 = vrot.lane.b32.xlu1 %v5208_v1, %s6850_s17  ;;  %v11730_v13 = vld [vmem:[#allocation48_spill] sm:$0xff] }
 0x5a8   :  { %v4941_v21 = vmul.f32 %v10689_v53, %v11730_v13 }
 0x5ab   :  { %4885 = vrot.lane.b32.xlu0 %v10668_v50, %s6850_s17  ;;  %4901 = vrot.lane.b32.xlu1 %v10676_v22, %s6850_s17 }
 0x5af   :  { %5271 = vrot.lane.b32.xlu0 %v5193_v47, %s6850_s17  ;;  %5303 = vrot.lane.b32.xlu1 %v5209_v10, %s6850_s17  ;;  %v11732_v47 = vld [vmem:[#allocation34_spill] sm:$0xff] }
 0x5b0   :  { %v4927_v56 = vmul.f32 %v10689_v53, %v11732_v47 }
 0x5b3   :  { %5273 = vrot.lane.b32.xlu0 %v5194_v0, %s6850_s17  ;;  %5305 = vrot.lane.b32.xlu1 %v5210_v27, %s6850_s17  ;;  %v4973_v0 = vadd.f32 %v4941_v21, %v10505_v40  ;;  %v4928_v40 = vmul.f32 %v10689_v53, %v11734_v11  ;;  %v11737_v21 = vld [vmem:[#allocation38_spill] sm:$0xff] }
 0x5c9   :  { %v4872_v59 = vpop.permute.xlu0 %4871  ;;  %v4890_v48 = vpop.permute.xlu1 %4889 }
 0x5ca   :  { %v4956_v20 = vadd.f32 %v4924_v44, %v4872_v59  ;;  %v4959_v59 = vadd.f32 %v4927_v56, %v10545_v41  ;;  %v4974_v23 = vadd.f32 %v4942_v17, %v4890_v48  ;;  %v11739_v17 = vld [vmem:[#allocation29_spill] sm:$0xff] }
 0x5cd   :  { %v4888_v61 = vpop.permute.xlu0 %4887  ;;  %v4892_v3 = vpop.permute.xlu1 %4891 }
 0x5ce   :  { %v4972_v34 = vadd.f32 %v4940_v38, %v4888_v61 }
 0x5d1   :  { %v4874_v5 = vpop.permute.xlu0 %4873  ;;  %v5244_v57 = vpop.permute.xlu1 %5243 }
 0x5d2   :  { %v5339_v25 = vmul.f32 %v5244_v57, %v4955_v39  ;;  %v4958_v10 = vadd.f32 %v4926_v6, %v4874_v5  ;;  %v4943_v39 = vmul.f32 %v10689_v53, %v11733_v4 }
 0x5d4   :  { %6301 = vmatprep.mubr.msk.f32.mxu0 %vm2090_vm9, %v5339_v25  ;;  %v4975_v24 = vadd.f32 %v4943_v39, %v10515_v63  ;;  %v4944_v25 = vmul.f32 %v10689_v53, %v8990_v31  ;;  %v4945_v31 = vmul.f32 %v10689_v53, %v11737_v21 }
 0x5d5   :  { %v4876_v30 = vpop.permute.xlu0 %4875  ;;  %v5276_v18 = vpop.permute.xlu1 %5275 }
 0x5d6   :  { %v5355_v33 = vmul.f32 %v5276_v18, %v4971_v37  ;;  %v4960_v35 = vadd.f32 %v4928_v40, %v4876_v30  ;;  %v11735_v37 = vld [vmem:[#allocation25_spill] sm:$0xff]  ;;  %v4976_v30 = vadd.f32 %v4944_v25, %v4892_v3  ;;  %v4977_v56 = vadd.f32 %v4945_v31, %v10607_v14  ;;  %v11738_v3 = vld [vmem:[#allocation27_spill] sm:$0xff] }
 0x5d7   :  { %v4932_v14 = vmul.f32 %v10689_v53, %v11739_v17 }
 0x5d8   :  { %6325 = vmatprep.mubr.msk.f32.mxu1 %vm2090_vm9, %v5355_v33 }
 0x5d9   :  { %v5246_v9 = vpop.permute.xlu0 %5245  ;;  %v5278_v42 = vpop.permute.xlu1 %5277 }
 0x5da   :  { %v5340_v7 = vmul.f32 %v5246_v9, %v4956_v20  ;;  %v5356_v8 = vmul.f32 %v5278_v42, %v4972_v34  ;;  %v4929_v20 = vmul.f32 %v10689_v53, %v11735_v37  ;;  %v4931_v34 = vmul.f32 %v10689_v53, %v11738_v3 }
 0x5dc   :  { %6302 = vmatmul.mubr.msk.f32.vlgmr.msra.gmra.mxu0 %vm2090_vm9, %v5340_v7  ;;  %6326 = vmatmul.mubr.msk.f32.vlgmr.msra.gmra.mxu1 %vm2090_vm9, %v5356_v8  ;;  %v4961_v63 = vadd.f32 %v4929_v20, %v10597_v12  ;;  %v11736_v7 = vld [vmem:[#allocation28_spill] sm:$0xff] }
 0x5dd   :  { %v5248_v1 = vpop.permute.xlu0 %5247  ;;  %v5280_v61 = vpop.permute.xlu1 %5279  ;;  %v4930_v18 = vmul.f32 %v10689_v53, %v11736_v7 }
 0x5de   :  { %v5341_v46 = vmul.f32 %v5248_v1, %v4957_v19  ;;  %v5357_v5 = vmul.f32 %v5280_v61, %v4973_v0  ;;  %v11740_v61 = vld [vmem:[#allocation39_spill] sm:$0xff] }
 0x5df   :  { %v4947_v4 = vmul.f32 %v10689_v53, %v11740_v61 }
 0x5e0   :  { %6304 = vmatprep.mubr.msk.f32.mxu0 %vm2090_vm9, %v5341_v46  ;;  %6328 = vmatprep.mubr.msk.f32.mxu1 %vm2090_vm9, %v5357_v5  ;;  %v4946_v46 = vmul.f32 %v10689_v53, %v9059_v49 }
 0x5e1   :  { %v5250_v27 = vpop.permute.xlu0 %5249  ;;  %v5282_v41 = vpop.permute.xlu1 %5281 }
 0x5e2   :  { %v5342_v15 = vmul.f32 %v5250_v27, %v4958_v10  ;;  %v5358_v29 = vmul.f32 %v5282_v41, %v4974_v23  ;;  %v4963_v27 = vadd.f32 %v4931_v34, %v10617_v52  ;;  %v11741_v23 = vld [vmem:[#allocation30_spill] sm:$0xff]  ;;  %v4948_v41 = vmul.f32 %v10689_v53, %v9120_v2 }
 0x5e4   :  { %6305 = vmatmul.mubr.msk.f32.gmra.mxu0 %vm2090_vm9, %v5342_v15  ;;  %6329 = vmatmul.mubr.msk.f32.gmra.mxu1 %vm2090_vm9, %v5358_v29 }
 0x5e5   :  { %v5252_v32 = vpop.permute.xlu0 %5251  ;;  %v5284_v48 = vpop.permute.xlu1 %5283 }
 0x5e6   :  { %v5343_v44 = vmul.f32 %v5252_v32, %v4959_v59  ;;  %v5359_v19 = vmul.f32 %v5284_v48, %v4975_v24  ;;  %v4979_v32 = vadd.f32 %v4947_v4, %v10627_v28  ;;  %v4934_v28 = vmul.f32 %v10689_v53, %v8620_v54 }
 0x5e8   :  { %6307 = vmatprep.mubr.msk.f32.mxu0 %vm2090_vm9, %v5343_v44  ;;  %6331 = vmatprep.mubr.msk.f32.mxu1 %vm2090_vm9, %v5359_v19  ;;  %v4933_v44 = vmul.f32 %v10689_v53, %v11741_v23 }
 0x5e9   :  { %v5254_v57 = vpop.permute.xlu0 %5253  ;;  %v5286_v13 = vpop.permute.xlu1 %5285 }
 0x5ea   :  { %v5344_v9 = vmul.f32 %v5254_v57, %v4960_v35  ;;  %v5360_v60 = vmul.f32 %v5286_v13, %v4976_v30  ;;  %v4965_v37 = vadd.f32 %v4933_v44, %v10636_v55  ;;  %v4950_v13 = vmul.f32 %v10689_v53, %v9132_v36 }
 0x5ec   :  { %6308 = vmatmul.mubr.msk.f32.gmra.mxu0 %vm2090_vm9, %v5344_v9  ;;  %6332 = vmatmul.mubr.msk.f32.gmra.mxu1 %vm2090_vm9, %v5360_v60  ;;  %v11742_v9 = vld [vmem:[#allocation42_spill] sm:$0xff] }
 0x5ed   :  { %v4878_v38 = vpop.permute.xlu0 %4877  ;;  %v4894_v47 = vpop.permute.xlu1 %4893  ;;  %v4949_v48 = vmul.f32 %v10689_v53, %v11742_v9 }
 0x5ee   :  { %v4962_v33 = vadd.f32 %v4930_v18, %v4878_v38  ;;  %v4978_v59 = vadd.f32 %v4946_v46, %v4894_v47  ;;  %v11743_v18 = vld [vmem:[#allocation44_spill] sm:$0xff] }
 0x5ef   :  { %v4981_v7 = vadd.f32 %v4949_v48, %v10644_v51  ;;  %v4935_v54 = vmul.f32 %v10689_v53, %v11743_v18  ;;  %v4936_v51 = vmul.f32 %v10689_v53, %v8693_v43 }
 0x5f1   :  { %v5256_v6 = vpop.permute.xlu0 %5255  ;;  %v5288_v0 = vpop.permute.xlu1 %5287 }
 0x5f2   :  { %v5345_v1 = vmul.f32 %v5256_v6, %v4961_v63  ;;  %v5361_v10 = vmul.f32 %v5288_v0, %v4977_v56  ;;  %v11744_v56 = vld [vmem:[#allocation41_spill] sm:$0xff] }
 0x5f4   :  { %6310 = vmatprep.mubr.msk.f32.mxu0 %vm2090_vm9, %v5345_v1  ;;  %6334 = vmatprep.mubr.msk.f32.mxu1 %vm2090_vm9, %v5361_v10  ;;  %v11745_v10 = vld [vmem:[#allocation47_spill] sm:$0xff] }
 0x5f5   :  { %v5258_v12 = vpop.permute.xlu0 %5257  ;;  %v5290_v15 = vpop.permute.xlu1 %5289  ;;  %v4937_v43 = vmul.f32 %v10689_v53, %v11745_v10 }
 0x5f6   :  { %v5346_v42 = vmul.f32 %v5258_v12, %v4962_v33  ;;  %v5362_v39 = vmul.f32 %v5290_v15, %v4978_v59  ;;  %v4967_v33 = vadd.f32 %v4935_v54, %v10652_v16  ;;  %v4951_v12 = vmul.f32 %v10689_v53, %v11744_v56 }
 0x5f7   :  { %v4969_v15 = vadd.f32 %v4937_v43, %v10668_v50 }
 0x5f8   :  { %6311 = vmatmul.mubr.msk.f32.gmra.mxu0 %vm2090_vm9, %v5346_v42  ;;  %6335 = vmatmul.mubr.msk.f32.gmra.mxu1 %vm2090_vm9, %v5362_v39  ;;  %v4983_v0 = vadd.f32 %v4951_v12, %v10660_v58  ;;  %v4938_v58 = vmul.f32 %v10689_v53, %v8766_v62  ;;  %v11746_v39 = vld [vmem:[#allocation43_spill] sm:$0xff]  ;;  %v4954_v62 = vmul.f32 %v10689_v53, %v9150_v45 }
 0x5f9   :  { %v4880_v8 = vpop.permute.xlu0 %4879  ;;  %v4896_v5 = vpop.permute.xlu1 %4895 }
 0x5fa   :  { %v4964_v11 = vadd.f32 %v4932_v14, %v4880_v8  ;;  %v4980_v20 = vadd.f32 %v4948_v41, %v4896_v5  ;;  %v4952_v8 = vmul.f32 %v10689_v53, %v9142_v26 }
 0x5fd   :  { %v5260_v49 = vpop.permute.xlu0 %5259  ;;  %v5292_v35 = vpop.permute.xlu1 %5291 }
 0x5fe   :  { %v5347_v40 = vmul.f32 %v5260_v49, %v4963_v27  ;;  %v5363_v29 = vmul.f32 %v5292_v35, %v4979_v32  ;;  %v4953_v49 = vmul.f32 %v10689_v53, %v11746_v39 }
 0x600   :  { %6313 = vmatprep.mubr.msk.f32.mxu0 %vm2090_vm9, %v5347_v40  ;;  %6337 = vmatprep.mubr.msk.f32.mxu1 %vm2090_vm9, %v5363_v29 }
 0x601   :  { %v5262_v52 = vpop.permute.xlu0 %5261  ;;  %v5294_v25 = vpop.permute.xlu1 %5293 }
 0x602   :  { %v5348_v24 = vmul.f32 %v5262_v52, %v4964_v11  ;;  %v5364_v19 = vmul.f32 %v5294_v25, %v4980_v20  ;;  %v4985_v52 = vadd.f32 %v4953_v49, %v10676_v22 }
 0x604   :  { %6314 = vmatmul.mubr.msk.f32.gmra.mxu0 %vm2090_vm9, %v5348_v24  ;;  %6338 = vmatmul.mubr.msk.f32.gmra.mxu1 %vm2090_vm9, %v5364_v19 }
 0x605   :  { %v4882_v57 = vpop.permute.xlu0 %4881  ;;  %v4898_v30 = vpop.permute.xlu1 %4897 }
 0x606   :  { %v4966_v38 = vadd.f32 %v4934_v28, %v4882_v57  ;;  %v4982_v1 = vadd.f32 %v4950_v13, %v4898_v30 }
 0x609   :  { %v5264_v2 = vpop.permute.xlu0 %5263  ;;  %v5296_v31 = vpop.permute.xlu1 %5295 }
 0x60a   :  { %v5349_v63 = vmul.f32 %v5264_v2, %v4965_v37  ;;  %v5365_v60 = vmul.f32 %v5296_v31, %v4981_v7 }
 0x60c   :  { %6316 = vmatprep.mubr.msk.f32.mxu0 %vm2090_vm9, %v5349_v63  ;;  %6340 = vmatprep.mubr.msk.f32.mxu1 %vm2090_vm9, %v5365_v60 }
 0x60d   :  { %v5266_v55 = vpop.permute.xlu0 %5265  ;;  %v5298_v47 = vpop.permute.xlu1 %5297 }
 0x60e   :  { %v5350_v21 = vmul.f32 %v5266_v55, %v4966_v38  ;;  %v5366_v3 = vmul.f32 %v5298_v47, %v4982_v1 }
 0x610   :  { %6317 = vmatmul.mubr.msk.f32.gmra.mxu0 %vm2090_vm9, %v5350_v21  ;;  %6341 = vmatmul.mubr.msk.f32.gmra.mxu1 %vm2090_vm9, %v5366_v3 }
 0x611   :  { %v4884_v6 = vpop.permute.xlu0 %4883  ;;  %v4900_v42 = vpop.permute.xlu1 %4899 }
 0x612   :  { %v4968_v34 = vadd.f32 %v4936_v51, %v4884_v6  ;;  %v4984_v61 = vadd.f32 %v4952_v8, %v4900_v42 }
 0x615   :  { %v5268_v36 = vpop.permute.xlu0 %5267  ;;  %v5300_v59 = vpop.permute.xlu1 %5299 }
 0x616   :  { %v5351_v46 = vmul.f32 %v5268_v36, %v4967_v33  ;;  %v5367_v17 = vmul.f32 %v5300_v59, %v4983_v0 }
 0x618   :  { %6319 = vmatprep.mubr.msk.f32.mxu0 %vm2090_vm9, %v5351_v46  ;;  %6343 = vmatprep.mubr.msk.f32.mxu1 %vm2090_vm9, %v5367_v17 }
 0x619   :  { %v5270_v16 = vpop.permute.xlu0 %5269  ;;  %v5302_v4 = vpop.permute.xlu1 %5301 }
 0x61a   :  { %v5352_v27 = vmul.f32 %v5270_v16, %v4968_v34  ;;  %v5368_v11 = vmul.f32 %v5302_v4, %v4984_v61 }
 0x61c   :  { %6320 = vmatmul.mubr.msk.f32.gmra.mxu0 %vm2090_vm9, %v5352_v27  ;;  %6344 = vmatmul.mubr.msk.f32.gmra.mxu1 %vm2090_vm9, %v5368_v11 }
 0x61d   :  { %v4886_v14 = vpop.permute.xlu0 %4885  ;;  %v4902_v32 = vpop.permute.xlu1 %4901 }
 0x61e   :  { %v4970_v40 = vadd.f32 %v4938_v58, %v4886_v14  ;;  %v4986_v24 = vadd.f32 %v4954_v62, %v4902_v32 }
 0x621   :  { %v5272_v26 = vpop.permute.xlu0 %5271  ;;  %v5304_v44 = vpop.permute.xlu1 %5303 }
 0x622   :  { %v5353_v5 = vmul.f32 %v5272_v26, %v4969_v15  ;;  %v5369_v41 = vmul.f32 %v5304_v44, %v4985_v52 }
 0x624   :  { %6322 = vmatprep.mubr.msk.f32.mxu0 %vm2090_vm9, %v5353_v5  ;;  %6346 = vmatprep.mubr.msk.f32.mxu1 %vm2090_vm9, %v5369_v41 }
 0x625   :  { %v5274_v50 = vpop.permute.xlu0 %5273  ;;  %v5306_v35 = vpop.permute.xlu1 %5305 }
 0x626   :  { %v5354_v23 = vmul.f32 %v5274_v50, %v4970_v40  ;;  %v5370_v29 = vmul.f32 %v5306_v35, %v4986_v24 }
 0x628   :  { %6323 = vmatmul.mubr.msk.f32.gmra.mxu0 %vm2090_vm9, %v5354_v23  ;;  %6347 = vmatmul.mubr.msk.f32.gmra.mxu1 %vm2090_vm9, %v5370_v29 }
 0x69c   :  { %v6303_v57 = vpop.f32.mrf.mxu0  ;;  %v6327_v45 = vpop.f32.mrf.mxu1 }
 0x69d   :  { %5701 = vst.msk [vmem:[%s10933_s7 + $0x8] sm:$0xff] %vm63_vm0, %v6303_v57  ;;  %5717 = vst.msk [vmem:[%s10933_s7 + $0x88] sm:$0xff] %vm63_vm0, %v6327_v45 }
 0x69e   :  { %v5541_v22 = vpop.f32.mrf.mxu0  ;;  %v5621_v37 = vpop.f32.mrf.mxu1 }
 0x69f   :  { %5700 = vst.msk [vmem:[%s10933_s7] sm:$0xff] %vm63_vm0, %v5541_v22  ;;  %5716 = vst.msk [vmem:[%s10933_s7 + $0x80] sm:$0xff] %vm63_vm0, %v5621_v37 }
 0x6a4   :  { %v6306_v53 = vpop.f32.mrf.mxu0  ;;  %v6330_v28 = vpop.f32.mrf.mxu1 }
 0x6a5   :  { %5703 = vst.msk [vmem:[%s10933_s7 + $0x18] sm:$0xff] %vm63_vm0, %v6306_v53  ;;  %5719 = vst.msk [vmem:[%s10933_s7 + $0x98] sm:$0xff] %vm63_vm0, %v6330_v28 }
 0x6a6   :  { %v5551_v20 = vpop.f32.mrf.mxu0  ;;  %v5631_v9 = vpop.f32.mrf.mxu1 }
 0x6a7   :  { %5702 = vst.msk [vmem:[%s10933_s7 + $0x10] sm:$0xff] %vm63_vm0, %v5551_v20  ;;  %5718 = vst.msk [vmem:[%s10933_s7 + $0x90] sm:$0xff] %vm63_vm0, %v5631_v9 }
 0x6ac   :  { %v6309_v25 = vpop.f32.mrf.mxu0  ;;  %v6333_v19 = vpop.f32.mrf.mxu1 }
 0x6ad   :  { %5705 = vst.msk [vmem:[%s10933_s7 + $0x28] sm:$0xff] %vm63_vm0, %v6309_v25  ;;  %5721 = vst.msk [vmem:[%s10933_s7 + $0xa8] sm:$0xff] %vm63_vm0, %v6333_v19 }
 0x6ae   :  { %v5561_v48 = vpop.f32.mrf.mxu0  ;;  %v5641_v2 = vpop.f32.mrf.mxu1 }
 0x6af   :  { %5704 = vst.msk [vmem:[%s10933_s7 + $0x20] sm:$0xff] %vm63_vm0, %v5561_v48  ;;  %5720 = vst.msk [vmem:[%s10933_s7 + $0xa0] sm:$0xff] %vm63_vm0, %v5641_v2 }
 0x6b8   :  { %v6312_v38 = vpop.f32.mrf.mxu0  ;;  %v6336_v30 = vpop.f32.mrf.mxu1 }
 0x6b9   :  { %5707 = vst.msk [vmem:[%s10933_s7 + $0x38] sm:$0xff] %vm63_vm0, %v6312_v38  ;;  %5723 = vst.msk [vmem:[%s10933_s7 + $0xb8] sm:$0xff] %vm63_vm0, %v6336_v30 }
 0x6ba   :  { %v5571_v63 = vpop.f32.mrf.mxu0  ;;  %v5651_v7 = vpop.f32.mrf.mxu1 }
 0x6bb   :  { %5706 = vst.msk [vmem:[%s10933_s7 + $0x30] sm:$0xff] %vm63_vm0, %v5571_v63  ;;  %5722 = vst.msk [vmem:[%s10933_s7 + $0xb0] sm:$0xff] %vm63_vm0, %v5651_v7 }
 0x6c4   :  { %v6315_v55 = vpop.f32.mrf.mxu0  ;;  %v6339_v54 = vpop.f32.mrf.mxu1 }
 0x6c5   :  { %5709 = vst.msk [vmem:[%s10933_s7 + $0x48] sm:$0xff] %vm63_vm0, %v6315_v55  ;;  %5725 = vst.msk [vmem:[%s10933_s7 + $0xc8] sm:$0xff] %vm63_vm0, %v6339_v54 }
 0x6c6   :  { %v5581_v18 = vpop.f32.mrf.mxu0  ;;  %v5661_v13 = vpop.f32.mrf.mxu1 }
 0x6c7   :  { %5708 = vst.msk [vmem:[%s10933_s7 + $0x40] sm:$0xff] %vm63_vm0, %v5581_v18  ;;  %5724 = vst.msk [vmem:[%s10933_s7 + $0xc0] sm:$0xff] %vm63_vm0, %v5661_v13 }
 0x6d0   :  { %v6318_v21 = vpop.f32.mrf.mxu0  ;;  %v6342_v60 = vpop.f32.mrf.mxu1 }
 0x6d1   :  { %5711 = vst.msk [vmem:[%s10933_s7 + $0x58] sm:$0xff] %vm63_vm0, %v6318_v21  ;;  %5727 = vst.msk [vmem:[%s10933_s7 + $0xd8] sm:$0xff] %vm63_vm0, %v6342_v60 }
 0x6d2   :  { %v5591_v31 = vpop.f32.mrf.mxu0  ;;  %v5671_v6 = vpop.f32.mrf.mxu1 }
 0x6d3   :  { %5710 = vst.msk [vmem:[%s10933_s7 + $0x50] sm:$0xff] %vm63_vm0, %v5591_v31  ;;  %5726 = vst.msk [vmem:[%s10933_s7 + $0xd0] sm:$0xff] %vm63_vm0, %v5671_v6 }
 0x6dc   :  { %v6321_v33 = vpop.f32.mrf.mxu0  ;;  %v6345_v51 = vpop.f32.mrf.mxu1 }
 0x6dd   :  { %5713 = vst.msk [vmem:[%s10933_s7 + $0x68] sm:$0xff] %vm63_vm0, %v6321_v33  ;;  %5729 = vst.msk [vmem:[%s10933_s7 + $0xe8] sm:$0xff] %vm63_vm0, %v6345_v51 }
 0x6de   :  { %v5601_v1 = vpop.f32.mrf.mxu0  ;;  %v5681_v47 = vpop.f32.mrf.mxu1 }
 0x6df   :  { %5712 = vst.msk [vmem:[%s10933_s7 + $0x60] sm:$0xff] %vm63_vm0, %v5601_v1  ;;  %5728 = vst.msk [vmem:[%s10933_s7 + $0xe0] sm:$0xff] %vm63_vm0, %v5681_v47 }
 0x6e8   :  { %v6324_v56 = vpop.f32.mrf.mxu0  ;;  %v6348_v3 = vpop.f32.mrf.mxu1 }
 0x6e9   :  { %5715 = vst.msk [vmem:[%s10933_s7 + $0x78] sm:$0xff] %vm63_vm0, %v6324_v56  ;;  %5731 = vst.msk [vmem:[%s10933_s7 + $0xf8] sm:$0xff] %vm63_vm0, %v6348_v3 }
 0x6ea   :  { %v5611_v12 = vpop.f32.mrf.mxu0  ;;  %v5691_v36 = vpop.f32.mrf.mxu1 }
 0x6eb   :  { %5714 = vst.msk [vmem:[%s10933_s7 + $0x70] sm:$0xff] %vm63_vm0, %v5611_v12  ;;  %5730 = vst.msk [vmem:[%s10933_s7 + $0xf0] sm:$0xff] %vm63_vm0, %v5691_v36 }

</bundles_post_ra>
